<compile_context>
chip_gen: v5e
topology: v5e:2x2
jax: 0.10.0
libtpu: 0.0.40
codegen_flags: <defaults>
</compile_context>

<pallas_src>
import functools

import jax
import jax.numpy as jnp
from jax.experimental import pallas as pl
from jax.experimental.pallas import tpu as pltpu

CPAD = 128                    # conv Cout padded to a full 128-lane vreg width
FC1_IN = 64 * 7 * 7           # 3136 (PyTorch NCHW flatten size)
P2, P2_PAD = 7 * 7, 56        # conv2 pooled positions, padded to sublane mult
FC1_K = P2_PAD * 64           # 3584 = 14*256 -> MXU-depth aligned fc1 K axis
FC3_PAD = 256                 # fc3 N padded: lane-dense stores + 2 N tiles

_VMEM_LIMIT = 32 * 1024 * 1024   # actual usage < 8 MiB; safe on v7x's 64 MiB


# --------------------- fused conv3x3 + ReLU + maxpool2x2 ---------------------

def _conv_relu_pool_kernel(x_ref, w_ref, b_ref, o_ref, *, p_pad):
    """One grid step = one whole image.

    x_ref: (1, 4*p_pad, K) bf16 im2col rows, grouped into the 4 maxpool phases
           (each phase in pooled (ho, wo) order, zero-padded to p_pad rows).
    w_ref: (K, CPAD) bf16;  b_ref: (1, CPAD) f32;  o_ref: (1, p_pad, CPAD).
    """
    # single MXU push for the whole image
    y = jnp.dot(x_ref[0], w_ref[...], preferred_element_type=jnp.float32)
    # 2x2 window max = elementwise max of the 4 phase blocks (sublane-aligned)
    v = jnp.maximum(jnp.maximum(y[0:p_pad], y[p_pad:2 * p_pad]),
                    jnp.maximum(y[2 * p_pad:3 * p_pad], y[3 * p_pad:4 * p_pad]))
    # per-channel bias and ReLU commute with the window max
    o_ref[0] = jnp.maximum(v + b_ref[...], 0.0).astype(o_ref.dtype)


def _im2col_pooled(x_nhwc, p_pad):
    """3x3 / pad=1 / stride=1 patches in (kh, kw, cin) column order, with rows
    grouped into the 4 maxpool phases so the kernel pools with static slices.
    Returns (B, 4*p_pad, 9*Cin) bf16."""
    # TODO(synk): move this patch gather in-kernel (manual DMA + pltpu.roll) if
    # the conv path ever dominates at large batch; today it writes ~9x the
    # input volume to HBM as XLA glue.
    B, H, W, C = x_nhwc.shape
    Ho, Wo = H // 2, W // 2
    K = 9 * C
    xp = jnp.pad(x_nhwc, ((0, 0), (1, 1), (1, 1), (0, 0)))
    cols = [xp[:, dy:dy + H, dx:dx + W, :] for dy in range(3) for dx in range(3)]
    p = jnp.concatenate(cols, axis=-1)                      # (B, H, W, 9C)
    p = p.reshape(B, Ho, 2, Wo, 2, K)
    p = jnp.transpose(p, (0, 2, 4, 1, 3, 5))                # (B, dy, dx, Ho, Wo, K)
    p = p.reshape(B, 4, Ho * Wo, K)
    p = jnp.pad(p, ((0, 0), (0, 0), (0, p_pad - Ho * Wo), (0, 0)))
    return p.reshape(B, 4 * p_pad, K).astype(jnp.bfloat16)


def conv3x3_relu_pool(x_nhwc, w_mat, bias):
    """Conv2d(k=3, s=1, p=1) + ReLU + MaxPool2x2, one fused kernel step/image.

    Returns (B, p_pad, CPAD) bf16 where rows >= Ho*Wo and lanes >= Cout are
    junk (discarded or multiplied by zero weights downstream), plus (Ho, Wo).
    """
    B, H, W, Cin = x_nhwc.shape
    Ho, Wo = H // 2, W // 2
    p_pad = ((Ho * Wo + 7) // 8) * 8
    K = 9 * Cin
    patches = _im2col_pooled(x_nhwc, p_pad)                 # (B, 4*p_pad, K)
    out = pl.pallas_call(
        functools.partial(_conv_relu_pool_kernel, p_pad=p_pad),
        out_shape=jax.ShapeDtypeStruct((B, p_pad, CPAD), jnp.bfloat16),
        grid=(B,),
        in_specs=[
            pl.BlockSpec((1, 4 * p_pad, K), lambda i: (i, 0, 0)),
            pl.BlockSpec((K, CPAD), lambda i: (0, 0)),
            pl.BlockSpec((1, CPAD), lambda i: (0, 0)),
        ],
        out_specs=pl.BlockSpec((1, p_pad, CPAD), lambda i: (i, 0, 0)),
        compiler_params=pltpu.CompilerParams(
            dimension_semantics=("parallel",),
            vmem_limit_bytes=_VMEM_LIMIT),
    )(patches, w_mat, bias)
    return out, Ho, Wo


# ------------------------ tiled linear (+bias, +ReLU) ------------------------

def _linear_kernel(x_ref, w_ref, b_ref, o_ref, acc_ref, *, apply_relu):
    @pl.when(pl.program_id(2) == 0)
    def _():
        acc_ref[...] = jnp.zeros_like(acc_ref)

    acc_ref[...] += jnp.dot(x_ref[...], w_ref[...],
                            preferred_element_type=jnp.float32)

    @pl.when(pl.program_id(2) == pl.num_programs(2) - 1)
    def _():
        y = acc_ref[...] + b_ref[...]
        if apply_relu:
            y = jnp.maximum(y, 0.0)
        o_ref[...] = y.astype(o_ref.dtype)


def linear(x, w, b, *, nt, kt, apply_relu, out_dtype):
    """y = x @ w + b (ReLU optional). x: (M, K) bf16 with M % 8 == 0,
    w: (K, N) bf16 pre-transposed to (in, out), b: (N,) f32."""
    M, K = x.shape
    N = w.shape[1]
    assert K % kt == 0 and N % nt == 0, (K, kt, N, nt)
    return pl.pallas_call(
        functools.partial(_linear_kernel, apply_relu=apply_relu),
        out_shape=jax.ShapeDtypeStruct((M, N), out_dtype),
        grid=(1, N // nt, K // kt),
        in_specs=[
            pl.BlockSpec((M, kt), lambda i, j, k: (i, k)),
            pl.BlockSpec((kt, nt), lambda i, j, k: (k, j)),
            pl.BlockSpec((1, nt), lambda i, j, k: (0, j)),
        ],
        out_specs=pl.BlockSpec((M, nt), lambda i, j, k: (i, j)),
        scratch_shapes=[pltpu.VMEM((M, nt), jnp.float32)],
        compiler_params=pltpu.CompilerParams(
            dimension_semantics=("parallel", "parallel", "arbitrary"),
            vmem_limit_bytes=_VMEM_LIMIT),
    )(x, w, b.reshape(1, N))


# --------------------------------- params -----------------------------------

def init_torch_params(key):
    """Synthetic params in PyTorch layouts (Conv: OIHW, Linear: (out, in))."""
    ks = jax.random.split(key, 10)
    s = 0.05
    return {
        "conv1_w": s * jax.random.normal(ks[0], (32, 1, 3, 3), jnp.float32),
        "conv1_b": s * jax.random.normal(ks[1], (32,), jnp.float32),
        "conv2_w": s * jax.random.normal(ks[2], (64, 32, 3, 3), jnp.float32),
        "conv2_b": s * jax.random.normal(ks[3], (64,), jnp.float32),
        "fc1_w": s * jax.random.normal(ks[4], (1024, FC1_IN), jnp.float32),
        "fc1_b": s * jax.random.normal(ks[5], (1024,), jnp.float32),
        "fc2_w": s * jax.random.normal(ks[6], (512, 1024), jnp.float32),
        "fc2_b": s * jax.random.normal(ks[7], (512,), jnp.float32),
        "fc3_w": s * jax.random.normal(ks[8], (10, 512), jnp.float32),
        "fc3_b": s * jax.random.normal(ks[9], (10,), jnp.float32),
    }


def _prep_conv(w_oihw, b):
    cout, cin = w_oihw.shape[0], w_oihw.shape[1]
    # (Cout, Cin, kh, kw) -> (kh, kw, Cin, Cout) -> (9*Cin, Cout): im2col order
    wm = jnp.transpose(w_oihw, (2, 3, 1, 0)).reshape(9 * cin, cout)
    wm = jnp.pad(wm, ((0, 0), (0, CPAD - cout))).astype(jnp.bfloat16)
    bias = jnp.pad(b, (0, CPAD - cout)).astype(jnp.float32).reshape(1, CPAD)
    return wm, bias


def prepare_params(p):
    """One-time conversion to kernel-ready layouts (outside the hot path)."""
    c1w, c1b = _prep_conv(p["conv1_w"], p["conv1_b"])
    c2w, c2b = _prep_conv(p["conv2_w"], p["conv2_b"])
    # fc1: bake the PyTorch NCHW flatten (feature = c*49 + q) into the weight,
    # reordered to conv2's kernel-output layout (feature = q*64 + c) and
    # zero-padded to the 56 padded pooled rows -> K = 3584 (junk conv rows
    # multiply zero weight rows, so no runtime slice/transpose is needed).
    w1 = p["fc1_w"].reshape(1024, 64, P2)                    # (out, c, q)
    w1 = jnp.transpose(w1, (2, 1, 0))                        # (q, c, out)
    w1 = jnp.pad(w1, ((0, P2_PAD - P2), (0, 0), (0, 0)))
    fc1w = w1.reshape(FC1_K, 1024)
    # fc3: zero-pad the 10 logits to 256 lanes (lane-dense stores, 2 N tiles).
    fc3w = jnp.pad(p["fc3_w"].T, ((0, 0), (0, FC3_PAD - 10)))
    fc3b = jnp.pad(p["fc3_b"], (0, FC3_PAD - 10))
    return {
        "conv1_w": c1w, "conv1_b": c1b,
        "conv2_w": c2w, "conv2_b": c2b,
        "fc1_w": fc1w.astype(jnp.bfloat16),
        "fc1_b": p["fc1_b"].astype(jnp.float32),
        "fc2_w": p["fc2_w"].T.astype(jnp.bfloat16),
        "fc2_b": p["fc2_b"].astype(jnp.float32),
        "fc3_w": fc3w.astype(jnp.bfloat16),
        "fc3_b": fc3b.astype(jnp.float32),
    }


# --------------------------------- forward ----------------------------------

@jax.jit
def cnn_forward(x_nchw, params):
    B = x_nchw.shape[0]
    # NCHW (PyTorch) -> NHWC (channels on the lane axis)
    x = jnp.transpose(x_nchw, (0, 2, 3, 1)).astype(jnp.float32)           # (B,28,28,1)
    o1, Ho1, Wo1 = conv3x3_relu_pool(x, params["conv1_w"], params["conv1_b"])
    x = o1[:, :Ho1 * Wo1, :32].reshape(B, Ho1, Wo1, 32)                   # (B,14,14,32)
    o2, _, _ = conv3x3_relu_pool(x, params["conv2_w"], params["conv2_b"])
    # conv2's kernel-layout output feeds fc1 directly: its junk pad rows hit
    # the zero weight rows baked into fc1_w (no transpose / row slice).
    x = o2[:, :, :64].reshape(B, FC1_K)                                   # (B,3584)
    mp = max(8, ((B + 7) // 8) * 8)                 # pad batch to 8 sublanes
    x = jnp.pad(x, ((0, mp - B), (0, 0)))
    x = linear(x, params["fc1_w"], params["fc1_b"], nt=512, kt=1792,
               apply_relu=True, out_dtype=jnp.bfloat16)                   # (mp,1024)
    x = linear(x, params["fc2_w"], params["fc2_b"], nt=256, kt=1024,
               apply_relu=True, out_dtype=jnp.bfloat16)                   # (mp,512)
    x = linear(x, params["fc3_w"], params["fc3_b"], nt=128, kt=512,
               apply_relu=False, out_dtype=jnp.float32)                   # (mp,256)
    return x[:B, :10]


if __name__ == "__main__":
    key = jax.random.PRNGKey(0)
    k_x, k_p = jax.random.split(key)
    # fc1 (64*7*7) hard-requires 28x28 spatial input; keep batch small.
    x = jax.random.normal(k_x, (2, 1, 28, 28), jnp.float32)
    params = prepare_params(init_torch_params(k_p))
    out = jax.block_until_ready(cnn_forward(x, params))
    assert out.shape == (2, 10) and out.dtype == jnp.float32
    print("KERNEL_OK")
</pallas_src>

<mosaic_0001>
module attributes {stable_mosaic.version = 11 : i64} {
  func.func @_conv_relu_pool_kernel(%arg0: i32, %arg1: memref<1x800x9xbf16, #tpu.memory_space<vmem>>, %arg2: memref<9x128xbf16, #tpu.memory_space<vmem>>, %arg3: memref<1x128xf32, #tpu.memory_space<vmem>>, %arg4: memref<1x200x128xbf16, #tpu.memory_space<vmem>>) attributes {dimension_semantics = [#tpu.dimension_semantics<parallel>], iteration_bounds = array<i64: 2>, scalar_prefetch = 0 : i64, scratch_operands = 0 : i64, tpu.core_type = #tpu.core_type<tc>, window_params = [{transform_indices = @transform_0, window_bounds = array<i64: 1, 800, 9>}, {pipeline_mode = #tpu.pipeline_mode<synchronous>, transform_indices = @transform_1, window_bounds = array<i64: 9, 128>}, {pipeline_mode = #tpu.pipeline_mode<synchronous>, transform_indices = @transform_2, window_bounds = array<i64: 1, 128>}, {transform_indices = @transform_3, window_bounds = array<i64: 1, 200, 128>}]} {
    %c0 = arith.constant 0 : index
    %c0_0 = arith.constant 0 : index
    %c0_1 = arith.constant 0 : index
    %0 = vector.load %arg1[%c0, %c0_0, %c0_1] : memref<1x800x9xbf16, #tpu.memory_space<vmem>>, vector<1x800x9xbf16>
    %1 = vector.shape_cast %0 : vector<1x800x9xbf16> to vector<800x9xbf16>
    %c0_2 = arith.constant 0 : index
    %c0_3 = arith.constant 0 : index
    %2 = vector.load %arg2[%c0_2, %c0_3] : memref<9x128xbf16, #tpu.memory_space<vmem>>, vector<9x128xbf16>
    %cst = arith.constant dense<0.000000e+00> : vector<800x128xf32>
    %3 = tpu.matmul %1, %2, %cst {dimension_numbers = #tpu.dot_dimension_numbers<[1], [0], [0], [1], [0, 0, 1, 1], [], []>} : vector<800x9xbf16>, vector<9x128xbf16>, vector<800x128xf32> -> vector<800x128xf32>
    %4 = vector.extract_strided_slice %3 {offsets = [0, 0], sizes = [200, 128], strides = [1, 1]} : vector<800x128xf32> to vector<200x128xf32>
    %5 = vector.extract_strided_slice %3 {offsets = [200, 0], sizes = [200, 128], strides = [1, 1]} : vector<800x128xf32> to vector<200x128xf32>
    %6 = arith.maximumf %4, %5 : vector<200x128xf32>
    %7 = vector.extract_strided_slice %3 {offsets = [400, 0], sizes = [200, 128], strides = [1, 1]} : vector<800x128xf32> to vector<200x128xf32>
    %8 = vector.extract_strided_slice %3 {offsets = [600, 0], sizes = [200, 128], strides = [1, 1]} : vector<800x128xf32> to vector<200x128xf32>
    %9 = arith.maximumf %7, %8 : vector<200x128xf32>
    %10 = arith.maximumf %6, %9 : vector<200x128xf32>
    %c0_4 = arith.constant 0 : index
    %c0_5 = arith.constant 0 : index
    %11 = vector.load %arg3[%c0_4, %c0_5] : memref<1x128xf32, #tpu.memory_space<vmem>>, vector<1x128xf32>
    %12 = vector.broadcast %11 : vector<1x128xf32> to vector<200x128xf32>
    %13 = arith.addf %10, %12 : vector<200x128xf32>
    %cst_6 = arith.constant 0.000000e+00 : f32
    %14 = vector.broadcast %cst_6 : f32 to vector<200x128xf32>
    %15 = arith.maximumf %13, %14 : vector<200x128xf32>
    %16 = arith.truncf %15 : vector<200x128xf32> to vector<200x128xbf16>
    %c0_7 = arith.constant 0 : index
    %c0_8 = arith.constant 0 : index
    %c0_9 = arith.constant 0 : index
    %17 = vector.load %arg4[%c0_7, %c0_8, %c0_9] : memref<1x200x128xbf16, #tpu.memory_space<vmem>>, vector<1x200x128xbf16>
    %18 = vector.shape_cast %17 : vector<1x200x128xbf16> to vector<200x128xbf16>
    %19 = vector.shape_cast %16 : vector<200x128xbf16> to vector<1x200x128xbf16>
    tpu.vector_store %arg4[%c0_7, %c0_8, %c0_9], %19 {strides = array<i32>} : memref<1x200x128xbf16, #tpu.memory_space<vmem>>, vector<1x200x128xbf16>,
    return
  }
  func.func @transform_0(%arg0: i32) -> (i32, i32, i32) {
    %c0_i32 = arith.constant 0 : i32
    %c0_i32_0 = arith.constant 0 : i32
    %c0_i32_1 = arith.constant 0 : i32
    return %arg0, %c0_i32, %c0_i32_0 : i32, i32, i32
  }
  func.func @transform_1(%arg0: i32) -> (i32, i32) {
    %c0_i32 = arith.constant 0 : i32
    %c0_i32_0 = arith.constant 0 : i32
    %c0_i32_1 = arith.constant 0 : i32
    return %c0_i32, %c0_i32_0 : i32, i32
  }
  func.func @transform_2(%arg0: i32) -> (i32, i32) {
    %c0_i32 = arith.constant 0 : i32
    %c0_i32_0 = arith.constant 0 : i32
    %c0_i32_1 = arith.constant 0 : i32
    return %c0_i32, %c0_i32_0 : i32, i32
  }
  func.func @transform_3(%arg0: i32) -> (i32, i32, i32) {
    %c0_i32 = arith.constant 0 : i32
    %c0_i32_0 = arith.constant 0 : i32
    %c0_i32_1 = arith.constant 0 : i32
    return %arg0, %c0_i32, %c0_i32_0 : i32, i32, i32
  }
}

module attributes {stable_mosaic.version = 11 : i64} {
  func.func @_conv_relu_pool_kernel(%arg0: i32, %arg1: memref<1x224x288xbf16, #tpu.memory_space<vmem>>, %arg2: memref<288x128xbf16, #tpu.memory_space<vmem>>, %arg3: memref<1x128xf32, #tpu.memory_space<vmem>>, %arg4: memref<1x56x128xbf16, #tpu.memory_space<vmem>>) attributes {dimension_semantics = [#tpu.dimension_semantics<parallel>], iteration_bounds = array<i64: 2>, scalar_prefetch = 0 : i64, scratch_operands = 0 : i64, tpu.core_type = #tpu.core_type<tc>, window_params = [{transform_indices = @transform_0, window_bounds = array<i64: 1, 224, 288>}, {pipeline_mode = #tpu.pipeline_mode<synchronous>, transform_indices = @transform_1, window_bounds = array<i64: 288, 128>}, {pipeline_mode = #tpu.pipeline_mode<synchronous>, transform_indices = @transform_2, window_bounds = array<i64: 1, 128>}, {transform_indices = @transform_3, window_bounds = array<i64: 1, 56, 128>}]} {
    %c0 = arith.constant 0 : index
    %c0_0 = arith.constant 0 : index
    %c0_1 = arith.constant 0 : index
    %0 = vector.load %arg1[%c0, %c0_0, %c0_1] : memref<1x224x288xbf16, #tpu.memory_space<vmem>>, vector<1x224x288xbf16>
    %1 = vector.shape_cast %0 : vector<1x224x288xbf16> to vector<224x288xbf16>
    %c0_2 = arith.constant 0 : index
    %c0_3 = arith.constant 0 : index
    %2 = vector.load %arg2[%c0_2, %c0_3] : memref<288x128xbf16, #tpu.memory_space<vmem>>, vector<288x128xbf16>
    %cst = arith.constant dense<0.000000e+00> : vector<224x128xf32>
    %3 = tpu.matmul %1, %2, %cst {dimension_numbers = #tpu.dot_dimension_numbers<[1], [0], [0], [1], [0, 0, 1, 1], [], []>} : vector<224x288xbf16>, vector<288x128xbf16>, vector<224x128xf32> -> vector<224x128xf32>
    %4 = vector.extract_strided_slice %3 {offsets = [0, 0], sizes = [56, 128], strides = [1, 1]} : vector<224x128xf32> to vector<56x128xf32>
    %5 = vector.extract_strided_slice %3 {offsets = [56, 0], sizes = [56, 128], strides = [1, 1]} : vector<224x128xf32> to vector<56x128xf32>
    %6 = arith.maximumf %4, %5 : vector<56x128xf32>
    %7 = vector.extract_strided_slice %3 {offsets = [112, 0], sizes = [56, 128], strides = [1, 1]} : vector<224x128xf32> to vector<56x128xf32>
    %8 = vector.extract_strided_slice %3 {offsets = [168, 0], sizes = [56, 128], strides = [1, 1]} : vector<224x128xf32> to vector<56x128xf32>
    %9 = arith.maximumf %7, %8 : vector<56x128xf32>
    %10 = arith.maximumf %6, %9 : vector<56x128xf32>
    %c0_4 = arith.constant 0 : index
    %c0_5 = arith.constant 0 : index
    %11 = vector.load %arg3[%c0_4, %c0_5] : memref<1x128xf32, #tpu.memory_space<vmem>>, vector<1x128xf32>
    %12 = vector.broadcast %11 : vector<1x128xf32> to vector<56x128xf32>
    %13 = arith.addf %10, %12 : vector<56x128xf32>
    %cst_6 = arith.constant 0.000000e+00 : f32
    %14 = vector.broadcast %cst_6 : f32 to vector<56x128xf32>
    %15 = arith.maximumf %13, %14 : vector<56x128xf32>
    %16 = arith.truncf %15 : vector<56x128xf32> to vector<56x128xbf16>
    %c0_7 = arith.constant 0 : index
    %c0_8 = arith.constant 0 : index
    %c0_9 = arith.constant 0 : index
    %17 = vector.load %arg4[%c0_7, %c0_8, %c0_9] : memref<1x56x128xbf16, #tpu.memory_space<vmem>>, vector<1x56x128xbf16>
    %18 = vector.shape_cast %17 : vector<1x56x128xbf16> to vector<56x128xbf16>
    %19 = vector.shape_cast %16 : vector<56x128xbf16> to vector<1x56x128xbf16>
    tpu.vector_store %arg4[%c0_7, %c0_8, %c0_9], %19 {strides = array<i32>} : memref<1x56x128xbf16, #tpu.memory_space<vmem>>, vector<1x56x128xbf16>,
    return
  }
  func.func @transform_0(%arg0: i32) -> (i32, i32, i32) {
    %c0_i32 = arith.constant 0 : i32
    %c0_i32_0 = arith.constant 0 : i32
    %c0_i32_1 = arith.constant 0 : i32
    return %arg0, %c0_i32, %c0_i32_0 : i32, i32, i32
  }
  func.func @transform_1(%arg0: i32) -> (i32, i32) {
    %c0_i32 = arith.constant 0 : i32
    %c0_i32_0 = arith.constant 0 : i32
    %c0_i32_1 = arith.constant 0 : i32
    return %c0_i32, %c0_i32_0 : i32, i32
  }
  func.func @transform_2(%arg0: i32) -> (i32, i32) {
    %c0_i32 = arith.constant 0 : i32
    %c0_i32_0 = arith.constant 0 : i32
    %c0_i32_1 = arith.constant 0 : i32
    return %c0_i32, %c0_i32_0 : i32, i32
  }
  func.func @transform_3(%arg0: i32) -> (i32, i32, i32) {
    %c0_i32 = arith.constant 0 : i32
    %c0_i32_0 = arith.constant 0 : i32
    %c0_i32_1 = arith.constant 0 : i32
    return %arg0, %c0_i32, %c0_i32_0 : i32, i32, i32
  }
}

module attributes {stable_mosaic.version = 11 : i64} {
  func.func @_linear_kernel(%arg0: i32, %arg1: i32, %arg2: i32, %arg3: memref<8x1024xbf16, #tpu.memory_space<vmem>>, %arg4: memref<1024x256xbf16, #tpu.memory_space<vmem>>, %arg5: memref<1x256xf32, #tpu.memory_space<vmem>>, %arg6: memref<8x256xbf16, #tpu.memory_space<vmem>>, %arg7: memref<8x256xf32, #tpu.memory_space<vmem>>) attributes {dimension_semantics = [#tpu.dimension_semantics<parallel>, #tpu.dimension_semantics<parallel>, #tpu.dimension_semantics<arbitrary>], iteration_bounds = array<i64: 1, 2, 1>, scalar_prefetch = 0 : i64, scratch_operands = 1 : i64, tpu.core_type = #tpu.core_type<tc>, window_params = [{transform_indices = @transform_0, window_bounds = array<i64: 8, 1024>}, {transform_indices = @transform_1, window_bounds = array<i64: 1024, 256>}, {transform_indices = @transform_2, window_bounds = array<i64: 1, 256>}, {transform_indices = @transform_3, window_bounds = array<i64: 8, 256>}]} {
    %c0_i32 = arith.constant 0 : i32
    %0 = arith.cmpi eq, %arg2, %c0_i32 : i32
    %1 = arith.extui %0 : i1 to i32
    %c0_i32_0 = arith.constant 0 : i32
    %2 = arith.cmpi ne, %1, %c0_i32_0 : i32
    scf.if %2 {
      %cst_10 = arith.constant 0.000000e+00 : f32
      %12 = vector.broadcast %cst_10 : f32 to vector<8x256xf32>
      %c0_11 = arith.constant 0 : index
      %c0_12 = arith.constant 0 : index
      %13 = vector.load %arg7[%c0_11, %c0_12] : memref<8x256xf32, #tpu.memory_space<vmem>>, vector<8x256xf32>
      tpu.vector_store %arg7[%c0_11, %c0_12], %12 {strides = array<i32>} : memref<8x256xf32, #tpu.memory_space<vmem>>, vector<8x256xf32>,
    } else {
    }
    %c0 = arith.constant 0 : index
    %c0_1 = arith.constant 0 : index
    %3 = vector.load %arg7[%c0, %c0_1] : memref<8x256xf32, #tpu.memory_space<vmem>>, vector<8x256xf32>
    %c0_2 = arith.constant 0 : index
    %c0_3 = arith.constant 0 : index
    %4 = vector.load %arg3[%c0_2, %c0_3] : memref<8x1024xbf16, #tpu.memory_space<vmem>>, vector<8x1024xbf16>
    %c0_4 = arith.constant 0 : index
    %c0_5 = arith.constant 0 : index
    %5 = vector.load %arg4[%c0_4, %c0_5] : memref<1024x256xbf16, #tpu.memory_space<vmem>>, vector<1024x256xbf16>
    %cst = arith.constant dense<0.000000e+00> : vector<8x256xf32>
    %6 = tpu.matmul %4, %5, %cst {dimension_numbers = #tpu.dot_dimension_numbers<[1], [0], [0], [1], [0, 0, 1, 1], [], []>} : vector<8x1024xbf16>, vector<1024x256xbf16>, vector<8x256xf32> -> vector<8x256xf32>
    %7 = arith.addf %3, %6 : vector<8x256xf32>
    %c0_6 = arith.constant 0 : index
    %c0_7 = arith.constant 0 : index
    %8 = vector.load %arg7[%c0_6, %c0_7] : memref<8x256xf32, #tpu.memory_space<vmem>>, vector<8x256xf32>
    tpu.vector_store %arg7[%c0_6, %c0_7], %7 {strides = array<i32>} : memref<8x256xf32, #tpu.memory_space<vmem>>, vector<8x256xf32>,
    %c0_i32_8 = arith.constant 0 : i32
    %9 = arith.cmpi eq, %arg2, %c0_i32_8 : i32
    %10 = arith.extui %9 : i1 to i32
    %c0_i32_9 = arith.constant 0 : i32
    %11 = arith.cmpi ne, %10, %c0_i32_9 : i32
    scf.if %11 {
      %c0_10 = arith.constant 0 : index
      %c0_11 = arith.constant 0 : index
      %12 = vector.load %arg7[%c0_10, %c0_11] : memref<8x256xf32, #tpu.memory_space<vmem>>, vector<8x256xf32>
      %c0_12 = arith.constant 0 : index
      %c0_13 = arith.constant 0 : index
      %13 = vector.load %arg5[%c0_12, %c0_13] : memref<1x256xf32, #tpu.memory_space<vmem>>, vector<1x256xf32>
      %14 = vector.broadcast %13 : vector<1x256xf32> to vector<8x256xf32>
      %15 = arith.addf %12, %14 : vector<8x256xf32>
      %cst_14 = arith.constant 0.000000e+00 : f32
      %16 = vector.broadcast %cst_14 : f32 to vector<8x256xf32>
      %17 = arith.maximumf %15, %16 : vector<8x256xf32>
      %18 = arith.truncf %17 : vector<8x256xf32> to vector<8x256xbf16>
      %c0_15 = arith.constant 0 : index
      %c0_16 = arith.constant 0 : index
      %19 = vector.load %arg6[%c0_15, %c0_16] : memref<8x256xbf16, #tpu.memory_space<vmem>>, vector<8x256xbf16>
      tpu.vector_store %arg6[%c0_15, %c0_16], %18 {strides = array<i32>} : memref<8x256xbf16, #tpu.memory_space<vmem>>, vector<8x256xbf16>,
    } else {
    }
    return
  }
  func.func @transform_0(%arg0: i32, %arg1: i32, %arg2: i32) -> (i32, i32) {
    %c0_i32 = arith.constant 0 : i32
    return %arg0, %arg2 : i32, i32
  }
  func.func @transform_1(%arg0: i32, %arg1: i32, %arg2: i32) -> (i32, i32) {
    %c0_i32 = arith.constant 0 : i32
    return %arg2, %arg1 : i32, i32
  }
  func.func @transform_2(%arg0: i32, %arg1: i32, %arg2: i32) -> (i32, i32) {
    %c0_i32 = arith.constant 0 : i32
    %c0_i32_0 = arith.constant 0 : i32
    return %c0_i32, %arg1 : i32, i32
  }
  func.func @transform_3(%arg0: i32, %arg1: i32, %arg2: i32) -> (i32, i32) {
    %c0_i32 = arith.constant 0 : i32
    return %arg0, %arg1 : i32, i32
  }
}

module attributes {stable_mosaic.version = 11 : i64} {
  func.func @_linear_kernel(%arg0: i32, %arg1: i32, %arg2: i32, %arg3: memref<8x1792xbf16, #tpu.memory_space<vmem>>, %arg4: memref<1792x512xbf16, #tpu.memory_space<vmem>>, %arg5: memref<1x512xf32, #tpu.memory_space<vmem>>, %arg6: memref<8x512xbf16, #tpu.memory_space<vmem>>, %arg7: memref<8x512xf32, #tpu.memory_space<vmem>>) attributes {dimension_semantics = [#tpu.dimension_semantics<parallel>, #tpu.dimension_semantics<parallel>, #tpu.dimension_semantics<arbitrary>], iteration_bounds = array<i64: 1, 2, 2>, scalar_prefetch = 0 : i64, scratch_operands = 1 : i64, tpu.core_type = #tpu.core_type<tc>, window_params = [{transform_indices = @transform_0, window_bounds = array<i64: 8, 1792>}, {transform_indices = @transform_1, window_bounds = array<i64: 1792, 512>}, {transform_indices = @transform_2, window_bounds = array<i64: 1, 512>}, {transform_indices = @transform_3, window_bounds = array<i64: 8, 512>}]} {
    %c0_i32 = arith.constant 0 : i32
    %0 = arith.cmpi eq, %arg2, %c0_i32 : i32
    %1 = arith.extui %0 : i1 to i32
    %c0_i32_0 = arith.constant 0 : i32
    %2 = arith.cmpi ne, %1, %c0_i32_0 : i32
    scf.if %2 {
      %cst_9 = arith.constant 0.000000e+00 : f32
      %12 = vector.broadcast %cst_9 : f32 to vector<8x512xf32>
      %c0_10 = arith.constant 0 : index
      %c0_11 = arith.constant 0 : index
      %13 = vector.load %arg7[%c0_10, %c0_11] : memref<8x512xf32, #tpu.memory_space<vmem>>, vector<8x512xf32>
      tpu.vector_store %arg7[%c0_10, %c0_11], %12 {strides = array<i32>} : memref<8x512xf32, #tpu.memory_space<vmem>>, vector<8x512xf32>,
    } else {
    }
    %c0 = arith.constant 0 : index
    %c0_1 = arith.constant 0 : index
    %3 = vector.load %arg7[%c0, %c0_1] : memref<8x512xf32, #tpu.memory_space<vmem>>, vector<8x512xf32>
    %c0_2 = arith.constant 0 : index
    %c0_3 = arith.constant 0 : index
    %4 = vector.load %arg3[%c0_2, %c0_3] : memref<8x1792xbf16, #tpu.memory_space<vmem>>, vector<8x1792xbf16>
    %c0_4 = arith.constant 0 : index
    %c0_5 = arith.constant 0 : index
    %5 = vector.load %arg4[%c0_4, %c0_5] : memref<1792x512xbf16, #tpu.memory_space<vmem>>, vector<1792x512xbf16>
    %cst = arith.constant dense<0.000000e+00> : vector<8x512xf32>
    %6 = tpu.matmul %4, %5, %cst {dimension_numbers = #tpu.dot_dimension_numbers<[1], [0], [0], [1], [0, 0, 1, 1], [], []>} : vector<8x1792xbf16>, vector<1792x512xbf16>, vector<8x512xf32> -> vector<8x512xf32>
    %7 = arith.addf %3, %6 : vector<8x512xf32>
    %c0_6 = arith.constant 0 : index
    %c0_7 = arith.constant 0 : index
    %8 = vector.load %arg7[%c0_6, %c0_7] : memref<8x512xf32, #tpu.memory_space<vmem>>, vector<8x512xf32>
    tpu.vector_store %arg7[%c0_6, %c0_7], %7 {strides = array<i32>} : memref<8x512xf32, #tpu.memory_space<vmem>>, vector<8x512xf32>,
    %c1_i32 = arith.constant 1 : i32
    %9 = arith.cmpi eq, %arg2, %c1_i32 : i32
    %10 = arith.extui %9 : i1 to i32
    %c0_i32_8 = arith.constant 0 : i32
    %11 = arith.cmpi ne, %10, %c0_i32_8 : i32
    scf.if %11 {
      %c0_9 = arith.constant 0 : index
      %c0_10 = arith.constant 0 : index
      %12 = vector.load %arg7[%c0_9, %c0_10] : memref<8x512xf32, #tpu.memory_space<vmem>>, vector<8x512xf32>
      %c0_11 = arith.constant 0 : index
      %c0_12 = arith.constant 0 : index
      %13 = vector.load %arg5[%c0_11, %c0_12] : memref<1x512xf32, #tpu.memory_space<vmem>>, vector<1x512xf32>
      %14 = vector.broadcast %13 : vector<1x512xf32> to vector<8x512xf32>
      %15 = arith.addf %12, %14 : vector<8x512xf32>
      %cst_13 = arith.constant 0.000000e+00 : f32
      %16 = vector.broadcast %cst_13 : f32 to vector<8x512xf32>
      %17 = arith.maximumf %15, %16 : vector<8x512xf32>
      %18 = arith.truncf %17 : vector<8x512xf32> to vector<8x512xbf16>
      %c0_14 = arith.constant 0 : index
      %c0_15 = arith.constant 0 : index
      %19 = vector.load %arg6[%c0_14, %c0_15] : memref<8x512xbf16, #tpu.memory_space<vmem>>, vector<8x512xbf16>
      tpu.vector_store %arg6[%c0_14, %c0_15], %18 {strides = array<i32>} : memref<8x512xbf16, #tpu.memory_space<vmem>>, vector<8x512xbf16>,
    } else {
    }
    return
  }
  func.func @transform_0(%arg0: i32, %arg1: i32, %arg2: i32) -> (i32, i32) {
    %c0_i32 = arith.constant 0 : i32
    return %arg0, %arg2 : i32, i32
  }
  func.func @transform_1(%arg0: i32, %arg1: i32, %arg2: i32) -> (i32, i32) {
    %c0_i32 = arith.constant 0 : i32
    return %arg2, %arg1 : i32, i32
  }
  func.func @transform_2(%arg0: i32, %arg1: i32, %arg2: i32) -> (i32, i32) {
    %c0_i32 = arith.constant 0 : i32
    %c0_i32_0 = arith.constant 0 : i32
    return %c0_i32, %arg1 : i32, i32
  }
  func.func @transform_3(%arg0: i32, %arg1: i32, %arg2: i32) -> (i32, i32) {
    %c0_i32 = arith.constant 0 : i32
    return %arg0, %arg1 : i32, i32
  }
}

module attributes {stable_mosaic.version = 11 : i64} {
  func.func @_linear_kernel(%arg0: i32, %arg1: i32, %arg2: i32, %arg3: memref<8x512xbf16, #tpu.memory_space<vmem>>, %arg4: memref<512x128xbf16, #tpu.memory_space<vmem>>, %arg5: memref<1x128xf32, #tpu.memory_space<vmem>>, %arg6: memref<8x128xf32, #tpu.memory_space<vmem>>, %arg7: memref<8x128xf32, #tpu.memory_space<vmem>>) attributes {dimension_semantics = [#tpu.dimension_semantics<parallel>, #tpu.dimension_semantics<parallel>, #tpu.dimension_semantics<arbitrary>], iteration_bounds = array<i64: 1, 2, 1>, scalar_prefetch = 0 : i64, scratch_operands = 1 : i64, tpu.core_type = #tpu.core_type<tc>, window_params = [{transform_indices = @transform_0, window_bounds = array<i64: 8, 512>}, {transform_indices = @transform_1, window_bounds = array<i64: 512, 128>}, {transform_indices = @transform_2, window_bounds = array<i64: 1, 128>}, {transform_indices = @transform_3, window_bounds = array<i64: 8, 128>}]} {
    %c0_i32 = arith.constant 0 : i32
    %0 = arith.cmpi eq, %arg2, %c0_i32 : i32
    %1 = arith.extui %0 : i1 to i32
    %c0_i32_0 = arith.constant 0 : i32
    %2 = arith.cmpi ne, %1, %c0_i32_0 : i32
    scf.if %2 {
      %cst_10 = arith.constant 0.000000e+00 : f32
      %12 = vector.broadcast %cst_10 : f32 to vector<8x128xf32>
      %c0_11 = arith.constant 0 : index
      %c0_12 = arith.constant 0 : index
      %13 = vector.load %arg7[%c0_11, %c0_12] : memref<8x128xf32, #tpu.memory_space<vmem>>, vector<8x128xf32>
      tpu.vector_store %arg7[%c0_11, %c0_12], %12 {strides = array<i32>} : memref<8x128xf32, #tpu.memory_space<vmem>>, vector<8x128xf32>,
    } else {
    }
    %c0 = arith.constant 0 : index
    %c0_1 = arith.constant 0 : index
    %3 = vector.load %arg7[%c0, %c0_1] : memref<8x128xf32, #tpu.memory_space<vmem>>, vector<8x128xf32>
    %c0_2 = arith.constant 0 : index
    %c0_3 = arith.constant 0 : index
    %4 = vector.load %arg3[%c0_2, %c0_3] : memref<8x512xbf16, #tpu.memory_space<vmem>>, vector<8x512xbf16>
    %c0_4 = arith.constant 0 : index
    %c0_5 = arith.constant 0 : index
    %5 = vector.load %arg4[%c0_4, %c0_5] : memref<512x128xbf16, #tpu.memory_space<vmem>>, vector<512x128xbf16>
    %cst = arith.constant dense<0.000000e+00> : vector<8x128xf32>
    %6 = tpu.matmul %4, %5, %cst {dimension_numbers = #tpu.dot_dimension_numbers<[1], [0], [0], [1], [0, 0, 1, 1], [], []>} : vector<8x512xbf16>, vector<512x128xbf16>, vector<8x128xf32> -> vector<8x128xf32>
    %7 = arith.addf %3, %6 : vector<8x128xf32>
    %c0_6 = arith.constant 0 : index
    %c0_7 = arith.constant 0 : index
    %8 = vector.load %arg7[%c0_6, %c0_7] : memref<8x128xf32, #tpu.memory_space<vmem>>, vector<8x128xf32>
    tpu.vector_store %arg7[%c0_6, %c0_7], %7 {strides = array<i32>} : memref<8x128xf32, #tpu.memory_space<vmem>>, vector<8x128xf32>,
    %c0_i32_8 = arith.constant 0 : i32
    %9 = arith.cmpi eq, %arg2, %c0_i32_8 : i32
    %10 = arith.extui %9 : i1 to i32
    %c0_i32_9 = arith.constant 0 : i32
    %11 = arith.cmpi ne, %10, %c0_i32_9 : i32
    scf.if %11 {
      %c0_10 = arith.constant 0 : index
      %c0_11 = arith.constant 0 : index
      %12 = vector.load %arg7[%c0_10, %c0_11] : memref<8x128xf32, #tpu.memory_space<vmem>>, vector<8x128xf32>
      %c0_12 = arith.constant 0 : index
      %c0_13 = arith.constant 0 : index
      %13 = vector.load %arg5[%c0_12, %c0_13] : memref<1x128xf32, #tpu.memory_space<vmem>>, vector<1x128xf32>
      %14 = vector.broadcast %13 : vector<1x128xf32> to vector<8x128xf32>
      %15 = arith.addf %12, %14 : vector<8x128xf32>
      %c0_14 = arith.constant 0 : index
      %c0_15 = arith.constant 0 : index
      %16 = vector.load %arg6[%c0_14, %c0_15] : memref<8x128xf32, #tpu.memory_space<vmem>>, vector<8x128xf32>
      tpu.vector_store %arg6[%c0_14, %c0_15], %15 {strides = array<i32>} : memref<8x128xf32, #tpu.memory_space<vmem>>, vector<8x128xf32>,
    } else {
    }
    return
  }
  func.func @transform_0(%arg0: i32, %arg1: i32, %arg2: i32) -> (i32, i32) {
    %c0_i32 = arith.constant 0 : i32
    return %arg0, %arg2 : i32, i32
  }
  func.func @transform_1(%arg0: i32, %arg1: i32, %arg2: i32) -> (i32, i32) {
    %c0_i32 = arith.constant 0 : i32
    return %arg2, %arg1 : i32, i32
  }
  func.func @transform_2(%arg0: i32, %arg1: i32, %arg2: i32) -> (i32, i32) {
    %c0_i32 = arith.constant 0 : i32
    %c0_i32_0 = arith.constant 0 : i32
    return %c0_i32, %arg1 : i32, i32
  }
  func.func @transform_3(%arg0: i32, %arg1: i32, %arg2: i32) -> (i32, i32) {
    %c0_i32 = arith.constant 0 : i32
    return %arg0, %arg1 : i32, i32
  }
}

</mosaic_0001>

<bundles_post_ra>
// kernel: cnn_forward.5
= control target key start
LH: loop header
LB: loop body
LE: loop exit
PB: predicated region body
PF: predicated region fallthrough
CT: control target
= control target key end

     0   :  { %8 = vsyncpa [#allocation3], 0  ;;  %s1973_s0 = inlined_call_operand.vmem [shape: bf16[2,800,9], index: 0, kind: input, shape index: {}]   ;;  %s1974_s1 = inlined_call_operand.hbm [shape: bf16[9,128], index: 1, kind: input, shape index: {}]   ;;  %s1975_s2 = inlined_call_operand.hbm [shape: f32[1,128], index: 2, kind: input, shape index: {}]   ;;  %s1976_s3 = inlined_call_operand.vmem [shape: bf16[2,200,128], index: 3, kind: output, shape index: {}]  }
   0x1   :  { %9 = vsyncpa [#allocation5], 0  ;;  %s1762_s12 = smov 0  }
   0x2 LB: > { %s125_s15 = sshll.u32 %s1974_s1, 4  ;;  %s1234_s16 = sadd.s32 4294967295, %s1735_s12   ;;  %s1735_s12 = sphi %s1762_s12, %s15_s12   ;;  %s126_s15 = int_to_ptr.hbm [resolvable:$true] %s125_s15 }
   0x3   : > { %p1236_p0 = scmp.ge.s32.totalorder %s1735_s12, 1  ;;  %p114_p1 = scmp.lt.s32.totalorder %s1735_s12, 3 }
   0x4   : > { %p1643_p2 = scmp.eq.s32.totalorder %s1234_s16, 0  ;;  %s1737_s18 = smov [#allocation2]  }
   0x5   : > { %p1773_p3 = pnand %p1236_p0, %p114_p1  ;;  %s127_s19 = sshll.u32 %s1737_s18, 4  ;;  %s128_s19 = int_to_ptr.vmem [resolvable:$true] %s127_s19 }
   0x6   : > { %s140_s22 = sshll.u32 %s1975_s2, 4  ;;  %s1738_s23 = smov [#allocation4]   ;;  %s141_s22 = int_to_ptr.hbm [resolvable:$true] %s140_s22 }
   0x7   : > { %p1636_p4 = pneg %p1773_p3  ;;  %s142_s24 = sshll.u32 %s1738_s23, 4  ;;  %s143_s24 = int_to_ptr.vmem [resolvable:$true] %s142_s24 }
   0x8   : > { %s1739_s25 = smov 64   ;;  %s1740_s26 = smov 4  }
   0x9   : > { %p1637_p5 = pnand %p1643_p2, %p1636_p4  ;;  %163 = sbr.rel (%p1773_p3) target bundleno = 370 (0x172), region = 32 }
   0xb   : > { %1639 = dma.hbm_to_vmem [thread:$0]  (!%p1637_p5), %s126_s15, 128, %s128_s19, [#allocation3], %s1739_s25, %s1739_s25, %s1740_s26  }
   0xc   : > { %1642 = dma.hbm_to_vmem [thread:$0]  (!%p1637_p5), %s141_s22, 16, %s143_s24, [#allocation5]  }
   0xe   : > { %1726 = dma.done.wait (%p1643_p2), [#allocation3], 128  }
   0xf   : > { %1728 = vsyncadd (%p1643_p2), [#allocation3], 4294967168 }
  0x10   : > { %1730 = dma.done.wait (%p1643_p2), [#allocation5], 16  }
  0x11   : > { %1732 = vsyncadd (%p1643_p2), [#allocation5], 4294967280  ;;  %p193_p6 = scmp.lt.s32.totalorder %s1234_s16, 1  ;;  %vm712_vm0 = vcmask 1043456   ;;  %vm713_vm1 = vcmask 1044480   ;;  %v1741_v0 = vmov 65535  }
  0x12   : > { %v714_v1 = vsel %vm712_vm0, 4294967295, %v1741_v0  ;;  %v1447_v2 = vld [vmem:[#allocation2] sm:$0xf]  ;;  %v1551_v3 = vld [vmem:[#allocation2] sm:$0x10]  ;;  %vm561_vm2 = vcmask 72704  }
  0x13   : > { %s1979_s16 = smov (!%p193_p6, %s1234_s16), 1  ;;  %v715_v4 = vsel %vm713_vm1, %v714_v1, 0  ;;  %v1448_v5 = vor.u32 %v1551_v3, %v1447_v2 }
  0x14   : > { %s1626_s27 = smul.u32 400, %s1979_s16 }
  0x15   : > { %v717_v6 = vand.u32 %v1448_v5, %v715_v4  ;;  %s1627_s4 = smul.u32 100, %s1979_s16 }
  0x16   : > { %s1795_s30 = scalar_lea.vmem %s1973_s0, %s1626_s27 }
  0x17   : > { %v1501_v7 = vld [vmem:[%s1795_s30] sm:$0xff]  ;;  %v1514_v8 = vld [vmem:[%s1795_s30 + $0x68] sm:$0xff]  ;;  %726 = vmatpush.bf16.msra.mxu0 %v717_v6  ;;  %1623 = vmatpush.bf16.msra.mxu1 %v717_v6  ;;  %v1527_v9 = vld [vmem:[%s1795_s30 + $0xd0] sm:$0xff]  ;;  %s1913_s7 = scalar_lea.vmem %s1976_s3, %s1627_s4 }
  0x18   : > { %v1540_v10 = vld [vmem:[%s1795_s30 + $0x138] sm:$0xff]  ;;  %1624 = vmatpush.bf16.msra.mxu2 %v717_v6  ;;  %1625 = vmatpush.bf16.msra.mxu3 %v717_v6  ;;  %v1502_v11 = vld [vmem:[%s1795_s30 + $0x8] sm:$0xff]  ;;  %v1515_v12 = vld [vmem:[%s1795_s30 + $0x70] sm:$0xff] }
  0x19   : > { %v1528_v13 = vld [vmem:[%s1795_s30 + $0xd8] sm:$0xff]  ;;  %v1541_v14 = vld [vmem:[%s1795_s30 + $0x140] sm:$0xff]  ;;  %v1503_v15 = vld [vmem:[%s1795_s30 + $0x10] sm:$0xff] }
  0x1a   : > { %1449 = vmatmul.msk.bf16.vlgmr.msra.gmra.mxu0 %vm561_vm2, %v1501_v7  ;;  %1462 = vmatmul.msk.bf16.vlgmr.msra.gmra.mxu1 %vm561_vm2, %v1514_v8  ;;  %v1516_v16 = vld [vmem:[%s1795_s30 + $0x78] sm:$0xff]  ;;  %v1529_v17 = vld [vmem:[%s1795_s30 + $0xe0] sm:$0xff]  ;;  %v1542_v18 = vld [vmem:[%s1795_s30 + $0x148] sm:$0xff] }
  0x1b   : > { %1475 = vmatmul.msk.bf16.vlgmr.msra.gmra.mxu2 %vm561_vm2, %v1527_v9  ;;  %1488 = vmatmul.msk.bf16.vlgmr.msra.gmra.mxu3 %vm561_vm2, %v1540_v10  ;;  %v1504_v19 = vld [vmem:[%s1795_s30 + $0x18] sm:$0xff]  ;;  %v1517_v20 = vld [vmem:[%s1795_s30 + $0x80] sm:$0xff]  ;;  %v1530_v21 = vld [vmem:[%s1795_s30 + $0xe8] sm:$0xff] }
  0x1c   : > { %v1543_v22 = vld [vmem:[%s1795_s30 + $0x150] sm:$0xff]  ;;  %v1505_v23 = vld [vmem:[%s1795_s30 + $0x20] sm:$0xff]  ;;  %v1518_v24 = vld [vmem:[%s1795_s30 + $0x88] sm:$0xff] }
  0x1d   : > { %v1531_v25 = vld [vmem:[%s1795_s30 + $0xf0] sm:$0xff]  ;;  %v1544_v26 = vld [vmem:[%s1795_s30 + $0x158] sm:$0xff]  ;;  %v1506_v27 = vld [vmem:[%s1795_s30 + $0x28] sm:$0xff] }
  0x1e   : > { %v1519_v28 = vld [vmem:[%s1795_s30 + $0x90] sm:$0xff]  ;;  %v1532_v29 = vld [vmem:[%s1795_s30 + $0xf8] sm:$0xff]  ;;  %v1545_v30 = vld [vmem:[%s1795_s30 + $0x160] sm:$0xff] }
  0x1f   : > { %v1507_v31 = vld [vmem:[%s1795_s30 + $0x30] sm:$0xff]  ;;  %v1520_v32 = vld [vmem:[%s1795_s30 + $0x98] sm:$0xff]  ;;  %v1533_v33 = vld [vmem:[%s1795_s30 + $0x100] sm:$0xff] }
  0x20   : > { %v1546_v34 = vld [vmem:[%s1795_s30 + $0x168] sm:$0xff]  ;;  %v1508_v35 = vld [vmem:[%s1795_s30 + $0x38] sm:$0xff]  ;;  %v1521_v36 = vld [vmem:[%s1795_s30 + $0xa0] sm:$0xff] }
  0x21   : > { %v1534_v37 = vld [vmem:[%s1795_s30 + $0x108] sm:$0xff]  ;;  %v1547_v38 = vld [vmem:[%s1795_s30 + $0x170] sm:$0xff]  ;;  %v1509_v39 = vld [vmem:[%s1795_s30 + $0x40] sm:$0xff] }
  0x22   : > { %v1522_v40 = vld [vmem:[%s1795_s30 + $0xa8] sm:$0xff]  ;;  %v1535_v43 = vld [vmem:[%s1795_s30 + $0x110] sm:$0xff]  ;;  %v1548_v44 = vld [vmem:[%s1795_s30 + $0x178] sm:$0xff] }
  0x23   : > { %v1510_v51 = vld [vmem:[%s1795_s30 + $0x48] sm:$0xff]  ;;  %v1523_v52 = vld [vmem:[%s1795_s30 + $0xb0] sm:$0xff]  ;;  %v1536_v57 = vld [vmem:[%s1795_s30 + $0x118] sm:$0xff] }
  0x24   : > { %v1549_v58 = vld [vmem:[%s1795_s30 + $0x180] sm:$0xff]  ;;  %v1511_v3 = vld [vmem:[%s1795_s30 + $0x50] sm:$0xff]  ;;  %v1524_v4 = vld [vmem:[%s1795_s30 + $0xb8] sm:$0xff] }
  0x25   : > { %v1537_v8 = vld [vmem:[%s1795_s30 + $0x120] sm:$0xff]  ;;  %v1550_v9 = vld [vmem:[%s1795_s30 + $0x188] sm:$0xff] }
  0x2a   : > { %1450 = vmatmul.msk.bf16.gmra.mxu0 %vm561_vm2, %v1502_v11  ;;  %1463 = vmatmul.msk.bf16.gmra.mxu1 %vm561_vm2, %v1515_v12 }
  0x2b   : > { %1476 = vmatmul.msk.bf16.gmra.mxu2 %vm561_vm2, %v1528_v13  ;;  %1489 = vmatmul.msk.bf16.gmra.mxu3 %vm561_vm2, %v1541_v14 }
  0x3a   : > { %1451 = vmatmul.msk.bf16.gmra.mxu0 %vm561_vm2, %v1503_v15  ;;  %1464 = vmatmul.msk.bf16.gmra.mxu1 %vm561_vm2, %v1516_v16 }
  0x3b   : > { %1477 = vmatmul.msk.bf16.gmra.mxu2 %vm561_vm2, %v1529_v17  ;;  %1490 = vmatmul.msk.bf16.gmra.mxu3 %vm561_vm2, %v1542_v18  ;;  %v1903_v17 = vld [vmem:[#allocation4] ss:$0 sm:$0xff] }
  0x4a   : > { %1452 = vmatmul.msk.bf16.gmra.mxu0 %vm561_vm2, %v1504_v19  ;;  %1465 = vmatmul.msk.bf16.gmra.mxu1 %vm561_vm2, %v1517_v20 }
  0x4b   : > { %1478 = vmatmul.msk.bf16.gmra.mxu2 %vm561_vm2, %v1530_v21  ;;  %1491 = vmatmul.msk.bf16.gmra.mxu3 %vm561_vm2, %v1543_v22 }
  0x5a   : > { %1453 = vmatmul.msk.bf16.gmra.mxu0 %vm561_vm2, %v1505_v23  ;;  %1466 = vmatmul.msk.bf16.gmra.mxu1 %vm561_vm2, %v1518_v24 }
  0x5b   : > { %1479 = vmatmul.msk.bf16.gmra.mxu2 %vm561_vm2, %v1531_v25  ;;  %1492 = vmatmul.msk.bf16.gmra.mxu3 %vm561_vm2, %v1544_v26  ;;  %v1512_v26 = vld [vmem:[%s1795_s30 + $0x58] sm:$0xff] }
  0x6a   : > { %1454 = vmatmul.msk.bf16.gmra.mxu0 %vm561_vm2, %v1506_v27  ;;  %1467 = vmatmul.msk.bf16.gmra.mxu1 %vm561_vm2, %v1519_v28  ;;  %v1525_v27 = vld [vmem:[%s1795_s30 + $0xc0] sm:$0xff] }
  0x6b   : > { %1480 = vmatmul.msk.bf16.gmra.mxu2 %vm561_vm2, %v1532_v29  ;;  %1493 = vmatmul.msk.bf16.gmra.mxu3 %vm561_vm2, %v1545_v30 }
  0x7a   : > { %1455 = vmatmul.msk.bf16.gmra.mxu0 %vm561_vm2, %v1507_v31  ;;  %1468 = vmatmul.msk.bf16.gmra.mxu1 %vm561_vm2, %v1520_v32  ;;  %v1538_v31 = vld [vmem:[%s1795_s30 + $0x128] sm:$0xff] }
  0x7b   : > { %1481 = vmatmul.msk.bf16.gmra.mxu2 %vm561_vm2, %v1533_v33  ;;  %1494 = vmatmul.msk.bf16.gmra.mxu3 %vm561_vm2, %v1546_v34 }
  0x8a   : > { %1456 = vmatmul.msk.bf16.gmra.mxu0 %vm561_vm2, %v1508_v35  ;;  %1469 = vmatmul.msk.bf16.gmra.mxu1 %vm561_vm2, %v1521_v36 }
  0x8b   : > { %1482 = vmatmul.msk.bf16.gmra.mxu2 %vm561_vm2, %v1534_v37  ;;  %1495 = vmatmul.msk.bf16.gmra.mxu3 %vm561_vm2, %v1547_v38 }
  0x97   : > { %v1863_v41 = vpop.f32.mrf.mxu0  ;;  %v1865_v42 = vpop.f32.mrf.mxu1 }
  0x9a   : > { %1457 = vmatmul.msk.bf16.gmra.mxu0 %vm561_vm2, %v1509_v39  ;;  %1470 = vmatmul.msk.bf16.gmra.mxu1 %vm561_vm2, %v1522_v40 }
  0x9b   : > { %1483 = vmatmul.msk.bf16.gmra.mxu2 %vm561_vm2, %v1535_v43  ;;  %1496 = vmatmul.msk.bf16.gmra.mxu3 %vm561_vm2, %v1548_v44 }
  0x9e   : > { %v1873_v45 = vpop.f32.mrf.mxu2  ;;  %v923_v46 = vpop.f32.mrf.mxu3 }
  0x9f   : > { %v1875_v47 = vpop.f32.mrf.mxu0  ;;  %v1877_v48 = vpop.f32.mrf.mxu1 }
  0xa0   : > { %v979_v49 = vmax.f32 %v1875_v47, %v1865_v42 }
  0xa6   : > { %v860_v50 = vpop.f32.mrf.mxu2  ;;  %v925_v53 = vpop.f32.mrf.mxu3 }
  0xa7   : > { %v1006_v54 = vmax.f32 %v860_v50, %v923_v46  ;;  %v1883_v55 = vpop.f32.mrf.mxu0  ;;  %v798_v56 = vpop.f32.mrf.mxu1 }
  0xa8   : > { %v980_v59 = vmax.f32 %v1883_v55, %v1877_v48 }
  0xaa   : > { %1458 = vmatmul.msk.bf16.gmra.mxu0 %vm561_vm2, %v1510_v51  ;;  %1471 = vmatmul.msk.bf16.gmra.mxu1 %vm561_vm2, %v1523_v52 }
  0xab   : > { %1484 = vmatmul.msk.bf16.gmra.mxu2 %vm561_vm2, %v1536_v57  ;;  %1497 = vmatmul.msk.bf16.gmra.mxu3 %vm561_vm2, %v1549_v58 }
  0xae   : > { %v863_v60 = vpop.f32.mrf.mxu2  ;;  %v928_v61 = vpop.f32.mrf.mxu3 }
  0xaf   : > { %v735_v62 = vpop.f32.mrf.mxu0  ;;  %v800_v63 = vpop.f32.mrf.mxu1  ;;  %v1007_v11 = vmax.f32 %v863_v60, %v925_v53 }
  0xb0   : > { %v981_v0 = vmax.f32 %v735_v62, %v798_v56  ;;  %v1526_v56 = vld [vmem:[%s1795_s30 + $0xc8] sm:$0xff] }
  0xb2   : > { %v1893_v1 = vmax.f32 %v981_v0, %v1006_v54  ;;  %v1513_v54 = vld [vmem:[%s1795_s30 + $0x60] sm:$0xff] }
  0xb6   : > { %v865_v2 = vpop.f32.mrf.mxu2  ;;  %v930_v5 = vpop.f32.mrf.mxu3 }
  0xb7   : > { %v738_v6 = vpop.f32.mrf.mxu0  ;;  %v803_v7 = vpop.f32.mrf.mxu1  ;;  %v1008_v18 = vmax.f32 %v865_v2, %v928_v61  ;;  %v1539_v61 = vld [vmem:[%s1795_s30 + $0x130] sm:$0xff] }
  0xb8   : > { %v982_v10 = vmax.f32 %v738_v6, %v800_v63 }
  0xba   : > { %1459 = vmatmul.msk.bf16.gmra.mxu0 %vm561_vm2, %v1511_v3  ;;  %1472 = vmatmul.msk.bf16.gmra.mxu1 %vm561_vm2, %v1524_v4  ;;  %v1032_v12 = vmax.f32 %v982_v10, %v1007_v11 }
  0xbb   : > { %1485 = vmatmul.msk.bf16.gmra.mxu2 %vm561_vm2, %v1537_v8  ;;  %1498 = vmatmul.msk.bf16.gmra.mxu3 %vm561_vm2, %v1550_v9 }
  0xbc   : > { %v1061_v20 = vadd.f32 %v1903_v17, %v1032_v12 }
  0xbe   : > { %v868_v13 = vpop.f32.mrf.mxu2  ;;  %v933_v14 = vpop.f32.mrf.mxu3  ;;  %v1086_v23 = vmax.f32 %v1061_v20, 0.0 }
  0xbf   : > { %v740_v15 = vpop.f32.mrf.mxu0  ;;  %v805_v16 = vpop.f32.mrf.mxu1  ;;  %v1009_v34 = vmax.f32 %v868_v13, %v930_v5 }
  0xc0   : > { %v983_v19 = vmax.f32 %v740_v15, %v803_v7 }
  0xc2   : > { %v1033_v21 = vmax.f32 %v983_v19, %v1008_v18 }
  0xc4   : > { %v1062_v22 = vadd.f32 %v1903_v17, %v1033_v21 }
  0xc6   : > { %v1087_v24 = vmax.f32 %v1062_v22, 0.0  ;;  %v870_v25 = vpop.f32.mrf.mxu2  ;;  %v935_v28 = vpop.f32.mrf.mxu3 }
  0xc7   : > { %v743_v29 = vpop.f32.mrf.mxu0  ;;  %v808_v30 = vpop.f32.mrf.mxu1  ;;  %v1010_v40 = vmax.f32 %v870_v25, %v933_v14 }
  0xc8   : > { %v1565_v32 = vpack.c.bf16 %v1087_v24, %v1086_v23  ;;  %v984_v33 = vmax.f32 %v743_v29, %v805_v16 }
  0xca   : > { %1613 = vst [vmem:[%s1913_s7 + $0x10] sm:$0xff] %v1565_v32   ;;  %1460 = vmatmul.msk.bf16.gmra.mxu0 %vm561_vm2, %v1512_v26  ;;  %1473 = vmatmul.msk.bf16.gmra.mxu1 %vm561_vm2, %v1525_v27  ;;  %v1034_v35 = vmax.f32 %v984_v33, %v1009_v34 }
  0xcb   : > { %1486 = vmatmul.msk.bf16.gmra.mxu2 %vm561_vm2, %v1538_v31 }
  0xcc   : > { %v1063_v44 = vadd.f32 %v1903_v17, %v1034_v35 }
  0xce   : > { %v873_v36 = vpop.f32.mrf.mxu2  ;;  %v938_v37 = vpop.f32.mrf.mxu3  ;;  %v1088_v51 = vmax.f32 %v1063_v44, 0.0 }
  0xcf   : > { %v745_v38 = vpop.f32.mrf.mxu0  ;;  %v810_v39 = vpop.f32.mrf.mxu1  ;;  %v1011_v0 = vmax.f32 %v873_v36, %v935_v28 }
  0xd0   : > { %v985_v43 = vmax.f32 %v745_v38, %v808_v30 }
  0xd2   : > { %v1035_v46 = vmax.f32 %v985_v43, %v1010_v40 }
  0xd4   : > { %v1064_v50 = vadd.f32 %v1903_v17, %v1035_v46 }
  0xd6   : > { %v1089_v52 = vmax.f32 %v1064_v50, 0.0  ;;  %v875_v53 = vpop.f32.mrf.mxu2  ;;  %v940_v57 = vpop.f32.mrf.mxu3 }
  0xd7   : > { %v748_v58 = vpop.f32.mrf.mxu0  ;;  %v813_v60 = vpop.f32.mrf.mxu1  ;;  %v1012_v7 = vmax.f32 %v875_v53, %v938_v37 }
  0xd8   : > { %v1570_v62 = vpack.c.bf16 %v1089_v52, %v1088_v51  ;;  %v986_v63 = vmax.f32 %v748_v58, %v810_v39 }
  0xda   : > { %1614 = vst [vmem:[%s1913_s7 + $0x18] sm:$0xff] %v1570_v62   ;;  %1461 = vmatmul.msk.bf16.gmra.mxu0 %vm561_vm2, %v1513_v54  ;;  %1474 = vmatmul.msk.bf16.gmra.mxu1 %vm561_vm2, %v1526_v56  ;;  %v1036_v2 = vmax.f32 %v986_v63, %v1011_v0 }
  0xdb   : > { %1487 = vmatmul.msk.bf16.gmra.mxu2 %vm561_vm2, %v1539_v61 }
  0xdc   : > { %v1065_v9 = vadd.f32 %v1903_v17, %v1036_v2 }
  0xde   : > { %v878_v3 = vpop.f32.mrf.mxu2  ;;  %v943_v4 = vpop.f32.mrf.mxu3  ;;  %v1090_v12 = vmax.f32 %v1065_v9, 0.0 }
  0xdf   : > { %v750_v5 = vpop.f32.mrf.mxu0  ;;  %v815_v6 = vpop.f32.mrf.mxu1  ;;  %v1013_v21 = vmax.f32 %v878_v3, %v940_v57 }
  0xe0   : > { %v987_v8 = vmax.f32 %v750_v5, %v813_v60 }
  0xe2   : > { %v1037_v10 = vmax.f32 %v987_v8, %v1012_v7 }
  0xe4   : > { %v1066_v11 = vadd.f32 %v1903_v17, %v1037_v10 }
  0xe6   : > { %v1091_v13 = vmax.f32 %v1066_v11, 0.0  ;;  %v880_v14 = vpop.f32.mrf.mxu2  ;;  %v945_v15 = vpop.f32.mrf.mxu3 }
  0xe7   : > { %v753_v16 = vpop.f32.mrf.mxu0  ;;  %v818_v18 = vpop.f32.mrf.mxu1  ;;  %v1014_v27 = vmax.f32 %v880_v14, %v943_v4 }
  0xe8   : > { %v1575_v19 = vpack.c.bf16 %v1091_v13, %v1090_v12  ;;  %v988_v20 = vmax.f32 %v753_v16, %v815_v6 }
  0xea   : > { %1615 = vst [vmem:[%s1913_s7 + $0x20] sm:$0xff] %v1575_v19   ;;  %v1038_v22 = vmax.f32 %v988_v20, %v1013_v21 }
  0xec   : > { %v1067_v29 = vadd.f32 %v1903_v17, %v1038_v22 }
  0xee   : > { %v883_v23 = vpop.f32.mrf.mxu2  ;;  %v948_v24 = vpop.f32.mrf.mxu3  ;;  %v1092_v32 = vmax.f32 %v1067_v29, 0.0 }
  0xef   : > { %v755_v25 = vpop.f32.mrf.mxu0  ;;  %v820_v26 = vpop.f32.mrf.mxu1  ;;  %v1015_v40 = vmax.f32 %v883_v23, %v945_v15 }
  0xf0   : > { %v989_v28 = vmax.f32 %v755_v25, %v818_v18 }
  0xf2   : > { %v1039_v30 = vmax.f32 %v989_v28, %v1014_v27 }
  0xf4   : > { %v1068_v31 = vadd.f32 %v1903_v17, %v1039_v30 }
  0xf6   : > { %v1093_v33 = vmax.f32 %v1068_v31, 0.0  ;;  %v885_v34 = vpop.f32.mrf.mxu2  ;;  %v950_v35 = vpop.f32.mrf.mxu3 }
  0xf7   : > { %v758_v36 = vpop.f32.mrf.mxu0  ;;  %v823_v37 = vpop.f32.mrf.mxu1  ;;  %v1016_v52 = vmax.f32 %v885_v34, %v948_v24 }
  0xf8   : > { %v1580_v38 = vpack.c.bf16 %v1093_v33, %v1092_v32  ;;  %v990_v39 = vmax.f32 %v758_v36, %v820_v26 }
  0xfa   : > { %1616 = vst [vmem:[%s1913_s7 + $0x28] sm:$0xff] %v1580_v38   ;;  %v1040_v43 = vmax.f32 %v990_v39, %v1015_v40 }
  0xfc   : > { %v1069_v54 = vadd.f32 %v1903_v17, %v1040_v43 }
  0xfe   : > { %v888_v44 = vpop.f32.mrf.mxu2  ;;  %v953_v46 = vpop.f32.mrf.mxu3  ;;  %v1094_v58 = vmax.f32 %v1069_v54, 0.0 }
  0xff   : > { %v760_v50 = vpop.f32.mrf.mxu0  ;;  %v825_v51 = vpop.f32.mrf.mxu1  ;;  %v1017_v4 = vmax.f32 %v888_v44, %v950_v35 }
 0x100   : > { %v991_v53 = vmax.f32 %v760_v50, %v823_v37 }
 0x102   : > { %v1041_v56 = vmax.f32 %v991_v53, %v1016_v52 }
 0x104   : > { %v1070_v57 = vadd.f32 %v1903_v17, %v1041_v56 }
 0x106   : > { %v1095_v60 = vmax.f32 %v1070_v57, 0.0  ;;  %v890_v61 = vpop.f32.mrf.mxu2  ;;  %v955_v62 = vpop.f32.mrf.mxu3 }
 0x107   : > { %v763_v63 = vpop.f32.mrf.mxu0  ;;  %v828_v0 = vpop.f32.mrf.mxu1  ;;  %v1018_v10 = vmax.f32 %v890_v61, %v953_v46 }
 0x108   : > { %v1585_v2 = vpack.c.bf16 %v1095_v60, %v1094_v58  ;;  %v992_v3 = vmax.f32 %v763_v63, %v825_v51 }
 0x10a   : > { %1617 = vst [vmem:[%s1913_s7 + $0x30] sm:$0xff] %v1585_v2   ;;  %v1042_v5 = vmax.f32 %v992_v3, %v1017_v4 }
 0x10c   : > { %v1071_v12 = vadd.f32 %v1903_v17, %v1042_v5 }
 0x10e   : > { %v893_v6 = vpop.f32.mrf.mxu2  ;;  %v958_v7 = vpop.f32.mrf.mxu3  ;;  %v1096_v15 = vmax.f32 %v1071_v12, 0.0 }
 0x10f   : > { %v765_v8 = vpop.f32.mrf.mxu0  ;;  %v830_v9 = vpop.f32.mrf.mxu1  ;;  %v1019_v24 = vmax.f32 %v893_v6, %v955_v62 }
 0x110   : > { %v993_v11 = vmax.f32 %v765_v8, %v828_v0 }
 0x112   : > { %v1043_v13 = vmax.f32 %v993_v11, %v1018_v10 }
 0x114   : > { %v1072_v14 = vadd.f32 %v1903_v17, %v1043_v13 }
 0x116   : > { %v1097_v16 = vmax.f32 %v1072_v14, 0.0  ;;  %v895_v18 = vpop.f32.mrf.mxu2  ;;  %v960_v22 = vpop.f32.mrf.mxu3 }
 0x117   : > { %v768_v19 = vpop.f32.mrf.mxu0  ;;  %v833_v20 = vpop.f32.mrf.mxu1  ;;  %v1020_v29 = vmax.f32 %v895_v18, %v958_v7 }
 0x118   : > { %v1590_v21 = vpack.c.bf16 %v1097_v16, %v1096_v15  ;;  %v994_v23 = vmax.f32 %v768_v19, %v830_v9 }
 0x11a   : > { %1618 = vst [vmem:[%s1913_s7 + $0x38] sm:$0xff] %v1590_v21   ;;  %v1044_v25 = vmax.f32 %v994_v23, %v1019_v24 }
 0x11c   : > { %v1073_v31 = vadd.f32 %v1903_v17, %v1044_v25 }
 0x11e   : > { %v898_v26 = vpop.f32.mrf.mxu2  ;;  %v963_v33 = vpop.f32.mrf.mxu3  ;;  %v1098_v35 = vmax.f32 %v1073_v31, 0.0 }
 0x11f   : > { %v770_v27 = vpop.f32.mrf.mxu0  ;;  %v835_v28 = vpop.f32.mrf.mxu1  ;;  %v1021_v44 = vmax.f32 %v898_v26, %v960_v22 }
 0x120   : > { %v995_v30 = vmax.f32 %v770_v27, %v833_v20 }
 0x122   : > { %v1045_v32 = vmax.f32 %v995_v30, %v1020_v29 }
 0x124   : > { %v1074_v34 = vadd.f32 %v1903_v17, %v1045_v32 }
 0x126   : > { %v1099_v36 = vmax.f32 %v1074_v34, 0.0  ;;  %v900_v37 = vpop.f32.mrf.mxu2  ;;  %v965_v46 = vpop.f32.mrf.mxu3 }
 0x127   : > { %v773_v38 = vpop.f32.mrf.mxu0  ;;  %v838_v39 = vpop.f32.mrf.mxu1  ;;  %v1022_v54 = vmax.f32 %v900_v37, %v963_v33 }
 0x128   : > { %v1595_v40 = vpack.c.bf16 %v1099_v36, %v1098_v35  ;;  %v996_v43 = vmax.f32 %v773_v38, %v835_v28 }
 0x12a   : > { %1619 = vst [vmem:[%s1913_s7 + $0x40] sm:$0xff] %v1595_v40   ;;  %v1046_v50 = vmax.f32 %v996_v43, %v1021_v44 }
 0x12c   : > { %v1075_v57 = vadd.f32 %v1903_v17, %v1046_v50 }
 0x12e   : > { %v903_v51 = vpop.f32.mrf.mxu2  ;;  %v1100_v61 = vmax.f32 %v1075_v57, 0.0  ;;  %v968_v0 = vpop.f32.mrf.mxu3 }
 0x12f   : > { %v775_v52 = vpop.f32.mrf.mxu0  ;;  %v840_v53 = vpop.f32.mrf.mxu1  ;;  %v1023_v6 = vmax.f32 %v903_v51, %v965_v46 }
 0x130   : > { %v997_v56 = vmax.f32 %v775_v52, %v838_v39 }
 0x132   : > { %v1047_v58 = vmax.f32 %v997_v56, %v1022_v54 }
 0x134   : > { %v1076_v60 = vadd.f32 %v1903_v17, %v1047_v58 }
 0x136   : > { %v1101_v62 = vmax.f32 %v1076_v60, 0.0  ;;  %v905_v63 = vpop.f32.mrf.mxu2  ;;  %v970_v13 = vpop.f32.mrf.mxu3 }
 0x137   : > { %v778_v2 = vpop.f32.mrf.mxu0  ;;  %v843_v3 = vpop.f32.mrf.mxu1  ;;  %v1024_v11 = vmax.f32 %v905_v63, %v968_v0 }
 0x138   : > { %v1600_v4 = vpack.c.bf16 %v1101_v62, %v1100_v61  ;;  %v998_v5 = vmax.f32 %v778_v2, %v840_v53 }
 0x13a   : > { %1620 = vst [vmem:[%s1913_s7 + $0x48] sm:$0xff] %v1600_v4   ;;  %v1048_v7 = vmax.f32 %v998_v5, %v1023_v6 }
 0x13c   : > { %v1077_v14 = vadd.f32 %v1903_v17, %v1048_v7 }
 0x13e   : > { %v908_v8 = vpop.f32.mrf.mxu2  ;;  %v1102_v18 = vmax.f32 %v1077_v14, 0.0  ;;  %v973_v25 = vpop.f32.mrf.mxu3 }
 0x13f   : > { %v780_v9 = vpop.f32.mrf.mxu0  ;;  %v845_v10 = vpop.f32.mrf.mxu1  ;;  %v1025_v26 = vmax.f32 %v908_v8, %v970_v13 }
 0x140   : > { %v999_v12 = vmax.f32 %v780_v9, %v843_v3 }
 0x142   : > { %v1049_v15 = vmax.f32 %v999_v12, %v1024_v11 }
 0x144   : > { %v1078_v16 = vadd.f32 %v1903_v17, %v1049_v15 }
 0x146   : > { %v1103_v19 = vmax.f32 %v1078_v16, 0.0  ;;  %v910_v20 = vpop.f32.mrf.mxu2  ;;  %v975_v36 = vpop.f32.mrf.mxu3 }
 0x147   : > { %v783_v21 = vpop.f32.mrf.mxu0  ;;  %v848_v22 = vpop.f32.mrf.mxu1  ;;  %v1026_v31 = vmax.f32 %v910_v20, %v973_v25 }
 0x148   : > { %v1605_v23 = vpack.c.bf16 %v1103_v19, %v1102_v18  ;;  %v1000_v24 = vmax.f32 %v783_v21, %v845_v10 }
 0x14a   : > { %1621 = vst [vmem:[%s1913_s7 + $0x50] sm:$0xff] %v1605_v23   ;;  %v1050_v27 = vmax.f32 %v1000_v24, %v1025_v26 }
 0x14c   : > { %v1079_v33 = vadd.f32 %v1903_v17, %v1050_v27 }
 0x14e   : > { %v913_v28 = vpop.f32.mrf.mxu2  ;;  %v1104_v37 = vmax.f32 %v1079_v33, 0.0 }
 0x14f   : > { %v785_v29 = vpop.f32.mrf.mxu0  ;;  %v850_v30 = vpop.f32.mrf.mxu1  ;;  %v1027_v44 = vmax.f32 %v913_v28, %v975_v36 }
 0x150   : > { %v1001_v32 = vmax.f32 %v785_v29, %v848_v22 }
 0x152   : > { %v1051_v34 = vmax.f32 %v1001_v32, %v1026_v31 }
 0x154   : > { %v1080_v35 = vadd.f32 %v1903_v17, %v1051_v34 }
 0x156   : > { %v1105_v38 = vmax.f32 %v1080_v35, 0.0  ;;  %v915_v39 = vpop.f32.mrf.mxu2 }
 0x157   : > { %v788_v40 = vpop.f32.mrf.mxu0  ;;  %v853_v43 = vpop.f32.mrf.mxu1 }
 0x158   : > { %v1610_v46 = vpack.c.bf16 %v1105_v38, %v1104_v37  ;;  %v1002_v50 = vmax.f32 %v788_v40, %v850_v30  ;;  %v1003_v60 = vmax.f32 %v853_v43, %v915_v39 }
 0x15a   : > { %1622 = vst [vmem:[%s1913_s7 + $0x58] sm:$0xff] %v1610_v46   ;;  %v1052_v51 = vmax.f32 %v1002_v50, %v1027_v44 }
 0x15c   : > { %v1081_v52 = vadd.f32 %v1903_v17, %v1052_v51 }
 0x15e   : > { %v1106_v53 = vmax.f32 %v1081_v52, 0.0  ;;  %v918_v54 = vpop.f32.mrf.mxu2 }
 0x15f   : > { %v790_v56 = vpop.f32.mrf.mxu0  ;;  %v855_v57 = vpop.f32.mrf.mxu1 }
 0x160   : > { %v1131_v58 = vpack.c.bf16 %v1106_v53, %v1106_v53  ;;  %v978_v61 = vmax.f32 %v1863_v41, %v790_v56  ;;  %v1004_v62 = vmax.f32 %v855_v57, %v918_v54  ;;  %v1060_v41 = vadd.f32 %v1903_v17, %v1893_v1 }
 0x162   : > { %1156 = vst [vmem:[%s1913_s7 + $0x60] sm:$0xf] %v1131_v58  ;;  %v1028_v63 = vmax.f32 %v978_v61, %v1003_v60  ;;  %v1029_v0 = vmax.f32 %v979_v49, %v1004_v62  ;;  %v1085_v47 = vmax.f32 %v1060_v41, 0.0 }
 0x164   : > { %v1057_v2 = vadd.f32 %v1903_v17, %v1028_v63  ;;  %v1058_v3 = vadd.f32 %v1903_v17, %v1029_v0 }
 0x166   : > { %v1082_v4 = vmax.f32 %v1057_v2, 0.0  ;;  %v1083_v5 = vmax.f32 %v1058_v3, 0.0  ;;  %v920_v6 = vpop.f32.mrf.mxu2 }
 0x167   : > { %v1005_v7 = vmax.f32 %v1873_v45, %v920_v6 }
 0x168   : > { %v1555_v8 = vpack.c.bf16 %v1083_v5, %v1082_v4 }
 0x169   : > { %v1030_v9 = vmax.f32 %v980_v59, %v1005_v7 }
 0x16a   : > { %1556 = vst [vmem:[%s1913_s7] sm:$0xff] %v1555_v8  }
 0x16b   : > { %v1059_v42 = vadd.f32 %v1903_v17, %v1030_v9 }
 0x16d   : > { %v1084_v49 = vmax.f32 %v1059_v42, 0.0 }
 0x16f   : > { %v1560_v10 = vpack.c.bf16 %v1085_v47, %v1084_v49 }
 0x171   : > { %1612 = vst [vmem:[%s1913_s7 + $0x8] sm:$0xff] %v1560_v10  }
 0x172 PF: > { %s15_s12 = sadd.s32 1, %s1735_s12  }
 0x173   : > { %p12_p7 = scmp.ge.s32.totalorder %s15_s12, 4  }
 0x175   :  { %14 = sbr.rel (!%p12_p7) target bundleno = 2 (0x2), region = 71 }
 0x17a   :  { %1178 = vsyncpa [#allocation3], 1 }
 0x17b   :  { %1180 = vsyncpa [#allocation3 + $0x1], 1 }
 0x17c   :  { %1181 = vsyncpa [#allocation5], 1 }

// kernel: cnn_forward.6
= control target key start
LH: loop header
LB: loop body
LE: loop exit
PB: predicated region body
PF: predicated region fallthrough
CT: control target
= control target key end

     0   :  { %s1367_s12 = smov 0   ;;  %s1632_s0 = inlined_call_operand.vmem [shape: bf16[2,224,288], index: 0, kind: input, shape index: {}]   ;;  %s1633_s1 = inlined_call_operand.vmem [shape: bf16[288,128], index: 1, kind: input, shape index: {}]   ;;  %s1634_s2 = inlined_call_operand.vmem [shape: f32[1,128], index: 2, kind: input, shape index: {}]   ;;  %s1635_s3 = inlined_call_operand.vmem [shape: bf16[2,56,128], index: 3, kind: output, shape index: {}]  }
   0x1 LB: > { %s970_s13 = sadd.s32 4294967295, %s1345_s12   ;;  %p974_p0 = scmp.ge.s32.totalorder %s1345_s12, 1  ;;  %s1345_s12 = sphi %s1367_s12, %s13_s12  }
   0x2   : > { %p137_p1 = scmp.lt.s32.totalorder %s1345_s12, 3 }
   0x4   : > { %p138_p2 = pnand %p974_p0, %p137_p1 }
   0x5   : > { %p161_p3 = scmp.lt.s32.totalorder (!%p138_p2), %s970_s13, 1 }
   0x6   : > { %141 = sbr.rel (%p138_p2) target bundleno = 353 (0x161), region = 32 }
   0xb   : > { %v1282_v0 = vld [vmem:[%s1633_s1 + $0x38] sm:$0xff]  ;;  %v1386_v2 = vld [vmem:[%s1633_s1 + $0x88] sm:$0xff]  ;;  %v1281_v3 = vld [vmem:[%s1633_s1 + $0x30] sm:$0xff]  ;;  %s1637_s13 = smov (!%p161_p3, %s970_s13), 1  ;;  %vm582_vm0 = vcmask 261120  }
   0xc   : > { %v1381_v1 = vld [vmem:[%s1633_s1 + $0x78] sm:$0xff]  ;;  %625 = vmatpush.bf16.msra.mxu0 %v1282_v0  ;;  %1310 = vmatpush.bf16.msra.mxu3 %v1282_v0  ;;  %v1289_v4 = vld [vmem:[%s1633_s1 + $0x70] sm:$0xff]  ;;  %v1401_v5 = vld [vmem:[%s1633_s1 + $0x80] sm:$0xff]  ;;  %s1328_s26 = smul.u32 336, %s1637_s13 }
   0xd   : > { %704 = vmatpush.bf16.msra.mxu1 %v1381_v1  ;;  %789 = vmatpush.bf16.msra.mxu2 %v1386_v2  ;;  %v1280_v6 = vld [vmem:[%s1633_s1 + $0x28] sm:$0xff]  ;;  %v1279_v11 = vld [vmem:[%s1633_s1 + $0x20] sm:$0xff]  ;;  %v1278_v13 = vld [vmem:[%s1633_s1 + $0x18] sm:$0xff]  ;;  %s1329_s4 = smul.u32 28, %s1637_s13 }
   0xe   : > { %s1407_s29 = scalar_lea.vmem %s1632_s0, %s1328_s26  ;;  %v1288_v9 = vld [vmem:[%s1633_s1 + $0x68] sm:$0xff]  ;;  %v1287_v12 = vld [vmem:[%s1633_s1 + $0x60] sm:$0xff]  ;;  %v1286_v14 = vld [vmem:[%s1633_s1 + $0x58] sm:$0xff] }
   0xf   : > { %v987_v7 = vld [vmem:[%s1407_s29 + $0x8] sm:$0xf]  ;;  %v1235_v8 = vld [vmem:[%s1407_s29 + $0x10] sm:$0xf0]  ;;  %v999_v17 = vld [vmem:[%s1407_s29 + $0x20] sm:$0xf]  ;;  %s1611_s7 = scalar_lea.vmem %s1635_s3, %s1329_s4 }
  0x10   : > { %626 = vmatpush.bf16.msra.mxu0 %v1281_v3  ;;  %1311 = vmatpush.bf16.msra.mxu3 %v1281_v3  ;;  %v988_v10 = vor.u32 %v1235_v8, %v987_v7  ;;  %v1277_v15 = vld [vmem:[%s1633_s1 + $0x10] sm:$0xff]  ;;  %v1238_v18 = vld [vmem:[%s1407_s29 + $0x28] sm:$0xf0]  ;;  %v1275_v22 = vld [vmem:[%s1633_s1] sm:$0xff] }
  0x11   : > { %705 = vmatpush.bf16.msra.mxu1 %v1289_v4  ;;  %790 = vmatpush.bf16.msra.mxu2 %v1401_v5  ;;  %v1285_v16 = vld [vmem:[%s1633_s1 + $0x50] sm:$0xff]  ;;  %v1000_v19 = vor.u32 %v1238_v18, %v999_v17  ;;  %v1276_v20 = vld [vmem:[%s1633_s1 + $0x8] sm:$0xff]  ;;  %v1283_v23 = vld [vmem:[%s1633_s1 + $0x40] sm:$0xff] }
  0x12   : > { %v1284_v21 = vld [vmem:[%s1633_s1 + $0x48] sm:$0xff]  ;;  %v979_v24 = vld [vmem:[%s1407_s29] sm:$0xf]  ;;  %v1267_v27 = vld [vmem:[%s1407_s29 + $0x110] sm:$0xf0] }
  0x13   : > { %v1234_v25 = vld [vmem:[%s1407_s29 + $0x8] sm:$0xf0]  ;;  %v1111_v26 = vld [vmem:[%s1407_s29 + $0x108] sm:$0xf]  ;;  %v1233_v28 = vld [vmem:[%s1407_s29 + $0x4] sm:$0xf] }
  0x14   : > { %1217 = vmatmul.msk.bf16.vlgmr.msra.gmra.mxu2 %vm582_vm0, %v988_v10  ;;  %627 = vmatpush.bf16.msra.mxu0 %v1280_v6  ;;  %v981_v29 = vld [vmem:[%s1407_s29 + $0xc] sm:$0xf0]  ;;  %v980_v30 = vor.u32 %v1234_v25, %v979_v24  ;;  %v1112_v31 = vor.u32 %v1267_v27, %v1111_v26  ;;  %v1011_v33 = vld [vmem:[%s1407_s29 + $0x38] sm:$0xf]  ;;  %v1241_v34 = vld [vmem:[%s1407_s29 + $0x40] sm:$0xf0] }
  0x15   : > { %1312 = vmatpush.bf16.msra.mxu3 %v1280_v6  ;;  %706 = vmatpush.bf16.msra.mxu1 %v1288_v9  ;;  %v984_v32 = vor.u32 %v1233_v28, %v981_v29  ;;  %v1012_v35 = vor.u32 %v1241_v34, %v1011_v33  ;;  %v991_v36 = vld [vmem:[%s1407_s29 + $0x18] sm:$0xf]  ;;  %v1237_v37 = vld [vmem:[%s1407_s29 + $0x20] sm:$0xf0]  ;;  %v1123_v38 = vld [vmem:[%s1407_s29 + $0x120] sm:$0xf] }
  0x16   : > { %v1270_v39 = vld [vmem:[%s1407_s29 + $0x128] sm:$0xf0]  ;;  %v1236_v40 = vld [vmem:[%s1407_s29 + $0x1c] sm:$0xf]  ;;  %v993_v41 = vld [vmem:[%s1407_s29 + $0x24] sm:$0xf0]  ;;  %v992_v42 = vor.u32 %v1237_v37, %v991_v36 }
  0x17   : > { %v1124_v43 = vor.u32 %v1270_v39, %v1123_v38  ;;  %v996_v44 = vor.u32 %v1236_v40, %v993_v41  ;;  %v1023_v45 = vld [vmem:[%s1407_s29 + $0x50] sm:$0xf]  ;;  %v1244_v46 = vld [vmem:[%s1407_s29 + $0x58] sm:$0xf0]  ;;  %v1135_v50 = vld [vmem:[%s1407_s29 + $0x138] sm:$0xf] }
  0x18   : > { %628 = vmatpush.bf16.msra.mxu0 %v1279_v11  ;;  %v1024_v47 = vor.u32 %v1244_v46, %v1023_v45  ;;  %v1003_v48 = vld [vmem:[%s1407_s29 + $0x30] sm:$0xf]  ;;  %v1240_v49 = vld [vmem:[%s1407_s29 + $0x38] sm:$0xf0]  ;;  %v1273_v51 = vld [vmem:[%s1407_s29 + $0x140] sm:$0xf0] }
  0x19   : > { %1313 = vmatpush.bf16.msra.mxu3 %v1279_v11  ;;  %707 = vmatpush.bf16.msra.mxu1 %v1287_v12  ;;  %v1239_v52 = vld [vmem:[%s1407_s29 + $0x34] sm:$0xf]  ;;  %v1005_v53 = vld [vmem:[%s1407_s29 + $0x3c] sm:$0xf0]  ;;  %v1004_v54 = vor.u32 %v1240_v49, %v1003_v48  ;;  %v1136_v55 = vor.u32 %v1273_v51, %v1135_v50  ;;  %v1035_v57 = vld [vmem:[%s1407_s29 + $0x68] sm:$0xf] }
  0x1a   : > { %v1008_v56 = vor.u32 %v1239_v52, %v1005_v53  ;;  %v1247_v58 = vld [vmem:[%s1407_s29 + $0x70] sm:$0xf0]  ;;  %v1015_v60 = vld [vmem:[%s1407_s29 + $0x48] sm:$0xf]  ;;  %v1242_v62 = vld [vmem:[%s1407_s29 + $0x4c] sm:$0xf] }
  0x1b   : > { %v1036_v59 = vor.u32 %v1247_v58, %v1035_v57  ;;  %v1243_v61 = vld [vmem:[%s1407_s29 + $0x50] sm:$0xf0]  ;;  %v1017_v63 = vld [vmem:[%s1407_s29 + $0x54] sm:$0xf0]  ;;  %v1266_v0 = vld [vmem:[%s1407_s29 + $0x10c] sm:$0xf] }
  0x1c   : > { %629 = vmatpush.bf16.msra.mxu0 %v1278_v13  ;;  %v1020_v3 = vor.u32 %v1242_v62, %v1017_v63  ;;  %v1250_v6 = vld [vmem:[%s1407_s29 + $0x88] sm:$0xf0]  ;;  %v1027_v8 = vld [vmem:[%s1407_s29 + $0x60] sm:$0xf]  ;;  %v1245_v10 = vld [vmem:[%s1407_s29 + $0x64] sm:$0xf] }
  0x1d   : > { %1314 = vmatpush.bf16.msra.mxu3 %v1278_v13  ;;  %708 = vmatpush.bf16.msra.mxu1 %v1286_v14  ;;  %v1029_v11 = vld [vmem:[%s1407_s29 + $0x6c] sm:$0xf0]  ;;  %v1059_v17 = vld [vmem:[%s1407_s29 + $0x98] sm:$0xf]  ;;  %v1253_v18 = vld [vmem:[%s1407_s29 + $0xa0] sm:$0xf0] }
  0x1e   : > { %v1125_v13 = vld [vmem:[%s1407_s29 + $0x12c] sm:$0xf0]  ;;  %v1272_v24 = vld [vmem:[%s1407_s29 + $0x13c] sm:$0xf]  ;;  %v1137_v25 = vld [vmem:[%s1407_s29 + $0x144] sm:$0xf0] }
  0x1f   : > { %v1140_v28 = vor.u32 %v1272_v24, %v1137_v25  ;;  %v1071_v29 = vld [vmem:[%s1407_s29 + $0xb0] sm:$0xf]  ;;  %v1252_v33 = vld [vmem:[%s1407_s29 + $0x98] sm:$0xf0]  ;;  %v1251_v34 = vld [vmem:[%s1407_s29 + $0x94] sm:$0xf] }
  0x20   : > { %630 = vmatpush.bf16.msra.mxu0 %v1277_v15  ;;  %v1131_v36 = vld [vmem:[%s1407_s29 + $0x128] sm:$0xf]  ;;  %v1271_v37 = vld [vmem:[%s1407_s29 + $0x130] sm:$0xf0]  ;;  %v1254_v46 = vld [vmem:[%s1407_s29 + $0xac] sm:$0xf] }
  0x21   : > { %1315 = vmatpush.bf16.msra.mxu3 %v1277_v15  ;;  %709 = vmatpush.bf16.msra.mxu1 %v1285_v16  ;;  %v1032_v15 = vor.u32 %v1245_v10, %v1029_v11  ;;  %v1132_v40 = vor.u32 %v1271_v37, %v1131_v36  ;;  %v1083_v41 = vld [vmem:[%s1407_s29 + $0xc8] sm:$0xf]  ;;  %v1255_v45 = vld [vmem:[%s1407_s29 + $0xb0] sm:$0xf0]  ;;  %v1143_v48 = vld [vmem:[%s1407_s29 + $0x140] sm:$0xf] }
  0x22   : > { %v1274_v49 = vld [vmem:[%s1407_s29 + $0x148] sm:$0xf0]  ;;  %v1075_v58 = vld [vmem:[%s1407_s29 + $0xc0] sm:$0xf]  ;;  %v1264_v36 = vld [vmem:[%s1407_s29 + $0xf8] sm:$0xf0] }
  0x23   : > { %v1144_v53 = vor.u32 %v1274_v49, %v1143_v48  ;;  %v1263_v37 = vld [vmem:[%s1407_s29 + $0xf4] sm:$0xf] }
  0x24   : > { %1218 = vmatmul.msk.bf16.gmra.mxu2 %vm582_vm0, %v1000_v19  ;;  %631 = vmatpush.bf16.msra.mxu0 %v1276_v20  ;;  %v1060_v19 = vor.u32 %v1253_v18, %v1059_v17  ;;  %v1089_v17 = vld [vmem:[%s1407_s29 + $0xe4] sm:$0xf0] }
  0x25   : > { %1316 = vmatpush.bf16.msra.mxu3 %v1276_v20  ;;  %710 = vmatpush.bf16.msra.mxu1 %v1284_v21  ;;  %v1039_v20 = vld [vmem:[%s1407_s29 + $0x78] sm:$0xf] }
  0x28   : > { %632 = vmatpush.bf16.msra.mxu0 %v1275_v22 }
  0x29   : > { %1317 = vmatpush.bf16.msra.mxu3 %v1275_v22  ;;  %711 = vmatpush.bf16.msra.mxu1 %v1283_v23  ;;  %v1248_v22 = vld [vmem:[%s1407_s29 + $0x7c] sm:$0xf] }
  0x2b   : > { %633 = vmatmul.bf16.vlgmr.msra.gmra.mxu0 %v980_v30  ;;  %v1256_v30 = vld [vmem:[%s1407_s29 + $0xb8] sm:$0xf0] }
  0x2c   : > { %688 = vmatmul.bf16.vlgmr.msra.gmra.mxu3 %v1112_v31  ;;  %712 = vmatmul.bf16.vlgmr.msra.gmra.mxu1 %v984_v32  ;;  %v1072_v31 = vor.u32 %v1256_v30, %v1071_v29  ;;  %v1051_v32 = vld [vmem:[%s1407_s29 + $0x90] sm:$0xf] }
  0x2d   : > { %1318 = vmatpush.bf16.msrb.mxu3 %v1381_v1  ;;  %v1113_v1 = vld [vmem:[%s1407_s29 + $0x114] sm:$0xf0]  ;;  %v1052_v38 = vor.u32 %v1252_v33, %v1051_v32 }
  0x31   : > { %1319 = vmatpush.bf16.msrb.mxu3 %v1289_v4  ;;  %v1116_v4 = vor.u32 %v1266_v0, %v1113_v1 }
  0x34   : > { %1219 = vmatmul.msk.bf16.gmra.mxu2 %vm582_vm0, %v1012_v35  ;;  %v1053_v35 = vld [vmem:[%s1407_s29 + $0x9c] sm:$0xf0] }
  0x35   : > { %1320 = vmatpush.bf16.msrb.mxu3 %v1288_v9  ;;  %v1246_v9 = vld [vmem:[%s1407_s29 + $0x68] sm:$0xf0]  ;;  %v1056_v39 = vor.u32 %v1251_v34, %v1053_v35  ;;  %v1099_v35 = vld [vmem:[%s1407_s29 + $0xf0] sm:$0xf] }
  0x39   : > { %1321 = vmatpush.bf16.msrb.mxu3 %v1287_v12  ;;  %v1269_v12 = vld [vmem:[%s1407_s29 + $0x124] sm:$0xf] }
  0x3b   : > { %638 = vmatmul.bf16.gmra.mxu0 %v992_v42  ;;  %v1259_v42 = vld [vmem:[%s1407_s29 + $0xd0] sm:$0xf0] }
  0x3c   : > { %693 = vmatmul.bf16.gmra.mxu3 %v1124_v43  ;;  %717 = vmatmul.bf16.gmra.mxu1 %v996_v44  ;;  %v1084_v43 = vor.u32 %v1259_v42, %v1083_v41  ;;  %v1063_v44 = vld [vmem:[%s1407_s29 + $0xa8] sm:$0xf]  ;;  %v1100_v41 = vor.u32 %v1264_v36, %v1099_v35 }
  0x3d   : > { %1322 = vmatpush.bf16.msrb.mxu3 %v1286_v14  ;;  %v1028_v14 = vor.u32 %v1246_v9, %v1027_v8  ;;  %v1064_v51 = vor.u32 %v1255_v45, %v1063_v44 }
  0x41   : > { %1323 = vmatpush.bf16.msrb.mxu3 %v1285_v16  ;;  %v1128_v16 = vor.u32 %v1269_v12, %v1125_v13 }
  0x44   : > { %1220 = vmatmul.msk.bf16.gmra.mxu2 %vm582_vm0, %v1024_v47  ;;  %v1065_v47 = vld [vmem:[%s1407_s29 + $0xb4] sm:$0xf0] }
  0x45   : > { %1324 = vmatpush.bf16.msrb.mxu3 %v1284_v21  ;;  %v1249_v21 = vld [vmem:[%s1407_s29 + $0x80] sm:$0xf0]  ;;  %v1068_v52 = vor.u32 %v1254_v46, %v1065_v47 }
  0x46   : > { %v1040_v26 = vor.u32 %v1249_v21, %v1039_v20 }
  0x49   : > { %1325 = vmatpush.bf16.msrb.mxu3 %v1283_v23  ;;  %v1041_v23 = vld [vmem:[%s1407_s29 + $0x84] sm:$0xf0] }
  0x4a   : > { %v1044_v27 = vor.u32 %v1248_v22, %v1041_v23 }
  0x4b   : > { %643 = vmatmul.bf16.gmra.mxu0 %v1004_v54  ;;  %v1095_v54 = vld [vmem:[%s1407_s29 + $0xe0] sm:$0xf] }
  0x4c   : > { %698 = vmatmul.bf16.gmra.mxu3 %v1136_v55  ;;  %722 = vmatmul.bf16.gmra.mxu1 %v1008_v56  ;;  %v1262_v55 = vld [vmem:[%s1407_s29 + $0xe8] sm:$0xf0] }
  0x4d   : > { %1326 = vmatpush.bf16.msra.mxu3 %v1386_v2  ;;  %v1016_v2 = vor.u32 %v1243_v61, %v1015_v60  ;;  %v1096_v57 = vor.u32 %v1262_v55, %v1095_v54  ;;  %v1257_v60 = vld [vmem:[%s1407_s29 + $0xc4] sm:$0xf]  ;;  %v1077_v61 = vld [vmem:[%s1407_s29 + $0xcc] sm:$0xf0] }
  0x4e   : > { %v1080_v1 = vor.u32 %v1257_v60, %v1077_v61 }
  0x51   : > { %1327 = vmatpush.bf16.msra.mxu3 %v1401_v5  ;;  %v1047_v5 = vld [vmem:[%s1407_s29 + $0x80] sm:$0xf] }
  0x52   : > { %v1048_v7 = vor.u32 %v1250_v6, %v1047_v5  ;;  %v1107_v5 = vld [vmem:[%s1407_s29 + $0xf8] sm:$0xf]  ;;  %v1265_v6 = vld [vmem:[%s1407_s29 + $0x100] sm:$0xf0] }
  0x53   : > { %v1108_v10 = vor.u32 %v1265_v6, %v1107_v5 }
  0x54   : > { %1221 = vmatmul.msk.bf16.gmra.mxu2 %vm582_vm0, %v1036_v59  ;;  %v1258_v59 = vld [vmem:[%s1407_s29 + $0xc8] sm:$0xf0] }
  0x55   : > { %v1076_v63 = vor.u32 %v1258_v59, %v1075_v58 }
  0x5b   : > { %648 = vmatmul.bf16.gmra.mxu0 %v1016_v2 }
  0x5c   : > { %727 = vmatmul.bf16.gmra.mxu1 %v1020_v3  ;;  %767 = vmatmul.bf16.vlgmr.msrb.gmra.mxu3 %v1116_v4 }
  0x64   : > { %1222 = vmatmul.msk.bf16.gmra.mxu2 %vm582_vm0, %v1048_v7 }
  0x6b   : > { %653 = vmatmul.bf16.gmra.mxu0 %v1028_v14  ;;  %v1087_v14 = vld [vmem:[%s1407_s29 + $0xd8] sm:$0xf] }
  0x6c   : > { %732 = vmatmul.bf16.gmra.mxu1 %v1032_v15  ;;  %772 = vmatmul.bf16.gmra.mxu3 %v1128_v16  ;;  %v1261_v15 = vld [vmem:[%s1407_s29 + $0xe0] sm:$0xf0]  ;;  %v1260_v16 = vld [vmem:[%s1407_s29 + $0xdc] sm:$0xf] }
  0x6d   : > { %v1088_v20 = vor.u32 %v1261_v15, %v1087_v14  ;;  %v1092_v22 = vor.u32 %v1260_v16, %v1089_v17 }
  0x74   : > { %1223 = vmatmul.msk.bf16.gmra.mxu2 %vm582_vm0, %v1060_v19 }
  0x7b   : > { %658 = vmatmul.bf16.gmra.mxu0 %v1040_v26  ;;  %v1119_v26 = vld [vmem:[%s1407_s29 + $0x110] sm:$0xf] }
  0x7c   : > { %737 = vmatmul.bf16.gmra.mxu1 %v1044_v27  ;;  %777 = vmatmul.bf16.gmra.mxu3 %v1140_v28  ;;  %v1268_v27 = vld [vmem:[%s1407_s29 + $0x118] sm:$0xf0] }
  0x84   : > { %1224 = vmatmul.msk.bf16.gmra.mxu2 %vm582_vm0, %v1072_v31  ;;  %v1120_v31 = vor.u32 %v1268_v27, %v1119_v26 }
  0x8b   : > { %663 = vmatmul.bf16.gmra.mxu0 %v1052_v38  ;;  %v1101_v38 = vld [vmem:[%s1407_s29 + $0xfc] sm:$0xf0] }
  0x8c   : > { %742 = vmatmul.bf16.gmra.mxu1 %v1056_v39  ;;  %1229 = vmatmul.msk.bf16.vlgmr.msra.gmra.mxu3 %vm582_vm0, %v1132_v40 }
  0x94   : > { %1225 = vmatmul.msk.bf16.gmra.mxu2 %vm582_vm0, %v1084_v43  ;;  %v1104_v43 = vor.u32 %v1263_v37, %v1101_v38 }
  0x97   : > { %v792_v50 = vpop.f32.mrf.mxu2 }
  0x9b   : > { %668 = vmatmul.bf16.gmra.mxu0 %v1064_v51 }
  0x9c   : > { %747 = vmatmul.bf16.gmra.mxu1 %v1068_v52  ;;  %1230 = vmatmul.msk.bf16.gmra.mxu3 %vm582_vm0, %v1144_v53 }
  0x9f   : > { %v794_v56 = vpop.f32.mrf.mxu2 }
  0xa4   : > { %1226 = vmatmul.msk.bf16.gmra.mxu2 %vm582_vm0, %v1096_v57 }
  0xa7   : > { %v797_v62 = vpop.f32.mrf.mxu2 }
  0xa8   : > { %v634_v0 = vpop.f32.mrf.mxu0 }
  0xa9   : > { %v713_v2 = vpop.f32.mrf.mxu1 }
  0xaa   : > { %v714_v3 = vadd.f32 %v713_v2, %v634_v0 }
  0xab   : > { %673 = vmatmul.bf16.gmra.mxu0 %v1076_v63 }
  0xac   : > { %v1533_v4 = vadd.f32 %v792_v50, %v714_v3  ;;  %752 = vmatmul.bf16.gmra.mxu1 %v1080_v1 }
  0xaf   : > { %v689_v7 = vpop.f32.mrf.mxu3  ;;  %v799_v8 = vpop.f32.mrf.mxu2 }
  0xb0   : > { %v636_v9 = vpop.f32.mrf.mxu0 }
  0xb1   : > { %v715_v11 = vpop.f32.mrf.mxu1 }
  0xb2   : > { %v716_v12 = vadd.f32 %v715_v11, %v636_v9 }
  0xb4   : > { %v1537_v13 = vadd.f32 %v794_v56, %v716_v12  ;;  %1227 = vmatmul.msk.bf16.gmra.mxu2 %vm582_vm0, %v1108_v10 }
  0xb7   : > { %v691_v18 = vpop.f32.mrf.mxu3  ;;  %v802_v19 = vpop.f32.mrf.mxu2 }
  0xb8   : > { %v639_v21 = vpop.f32.mrf.mxu0 }
  0xb9   : > { %v718_v23 = vpop.f32.mrf.mxu1 }
  0xba   : > { %v719_v24 = vadd.f32 %v718_v23, %v639_v21 }
  0xbb   : > { %678 = vmatmul.bf16.gmra.mxu0 %v1088_v20 }
  0xbc   : > { %v1544_v25 = vadd.f32 %v797_v62, %v719_v24  ;;  %757 = vmatmul.bf16.gmra.mxu1 %v1092_v22 }
  0xbf   : > { %v1548_v28 = vpop.f32.mrf.mxu3  ;;  %v804_v29 = vpop.f32.mrf.mxu2 }
  0xc0   : > { %v641_v30 = vpop.f32.mrf.mxu0 }
  0xc1   : > { %v720_v32 = vpop.f32.mrf.mxu1 }
  0xc2   : > { %v721_v33 = vadd.f32 %v720_v32, %v641_v30 }
  0xc4   : > { %v1550_v34 = vadd.f32 %v799_v8, %v721_v33  ;;  %1228 = vmatmul.msk.bf16.gmra.mxu2 %vm582_vm0, %v1120_v31 }
  0xc7   : > { %v1557_v39 = vpop.f32.mrf.mxu3  ;;  %v807_v40 = vpop.f32.mrf.mxu2 }
  0xc8   : > { %v644_v42 = vpop.f32.mrf.mxu0 }
  0xc9   : > { %v723_v44 = vpop.f32.mrf.mxu1 }
  0xca   : > { %v724_v45 = vadd.f32 %v723_v44, %v644_v42 }
  0xcb   : > { %683 = vmatmul.bf16.gmra.mxu0 %v1100_v41 }
  0xcc   : > { %v1559_v46 = vadd.f32 %v802_v19, %v724_v45  ;;  %762 = vmatmul.bf16.gmra.mxu1 %v1104_v43 }
  0xcf   : > { %v1561_v47 = vpop.f32.mrf.mxu3  ;;  %v809_v48 = vpop.f32.mrf.mxu2 }
  0xd0   : > { %v646_v49 = vpop.f32.mrf.mxu0 }
  0xd1   : > { %v725_v50 = vpop.f32.mrf.mxu1 }
  0xd2   : > { %v726_v51 = vadd.f32 %v725_v50, %v646_v49 }
  0xd4   : > { %v1563_v52 = vadd.f32 %v804_v29, %v726_v51 }
  0xd7   : > { %v1565_v53 = vpop.f32.mrf.mxu3  ;;  %v812_v54 = vpop.f32.mrf.mxu2 }
  0xd8   : > { %v649_v55 = vpop.f32.mrf.mxu0 }
  0xd9   : > { %v728_v56 = vpop.f32.mrf.mxu1 }
  0xda   : > { %v729_v57 = vadd.f32 %v728_v56, %v649_v55 }
  0xdc   : > { %v1567_v58 = vadd.f32 %v807_v40, %v729_v57 }
  0xdf   : > { %v768_v59 = vpop.f32.mrf.mxu3  ;;  %v814_v60 = vpop.f32.mrf.mxu2 }
  0xe0   : > { %v1569_v61 = vadd.f32 %v768_v59, %v689_v7  ;;  %v651_v62 = vpop.f32.mrf.mxu0 }
  0xe1   : > { %v730_v63 = vpop.f32.mrf.mxu1 }
  0xe2   : > { %v731_v0 = vadd.f32 %v730_v63, %v651_v62 }
  0xe4   : > { %v1571_v1 = vadd.f32 %v809_v48, %v731_v0 }
  0xe6   : > { %v862_v2 = vmax.f32 %v1533_v4, %v1571_v1 }
  0xe7   : > { %v770_v3 = vpop.f32.mrf.mxu3  ;;  %v817_v5 = vpop.f32.mrf.mxu2 }
  0xe8   : > { %v1575_v6 = vadd.f32 %v770_v3, %v691_v18  ;;  %v654_v8 = vpop.f32.mrf.mxu0 }
  0xe9   : > { %v733_v9 = vpop.f32.mrf.mxu1 }
  0xea   : > { %v734_v10 = vadd.f32 %v733_v9, %v654_v8 }
  0xec   : > { %v1577_v11 = vadd.f32 %v812_v54, %v734_v10 }
  0xee   : > { %v863_v7 = vmax.f32 %v1537_v13, %v1577_v11 }
  0xef   : > { %v819_v12 = vpop.f32.mrf.mxu2  ;;  %v773_v30 = vpop.f32.mrf.mxu3 }
  0xf0   : > { %v656_v14 = vpop.f32.mrf.mxu0  ;;  %v774_v8 = vadd.f32 %v773_v30, %v1548_v28 }
  0xf1   : > { %v735_v15 = vpop.f32.mrf.mxu1 }
  0xf2   : > { %v736_v16 = vadd.f32 %v735_v15, %v656_v14 }
  0xf4   : > { %v1581_v17 = vadd.f32 %v814_v60, %v736_v16 }
  0xf6   : > { %v864_v19 = vmax.f32 %v1544_v25, %v1581_v17 }
  0xf7   : > { %v822_v20 = vpop.f32.mrf.mxu2  ;;  %v775_v40 = vpop.f32.mrf.mxu3 }
  0xf8   : > { %v659_v18 = vpop.f32.mrf.mxu0 }
  0xf9   : > { %v738_v21 = vpop.f32.mrf.mxu1 }
  0xfa   : > { %v739_v22 = vadd.f32 %v738_v21, %v659_v18 }
  0xfc   : > { %v818_v23 = vadd.f32 %v817_v5, %v739_v22  ;;  %v776_v22 = vadd.f32 %v775_v40, %v1557_v39  ;;  %v1338_v39 = vld [vmem:[%s1634_s2] ss:$0 sm:$0xff] }
  0xfe   : > { %v865_v24 = vmax.f32 %v1550_v34, %v818_v23 }
  0xff   : > { %v824_v26 = vpop.f32.mrf.mxu2  ;;  %v778_v49 = vpop.f32.mrf.mxu3 }
 0x100   : > { %v661_v27 = vpop.f32.mrf.mxu0  ;;  %v779_v30 = vadd.f32 %v778_v49, %v1561_v47 }
 0x101   : > { %v740_v29 = vpop.f32.mrf.mxu1 }
 0x102   : > { %v741_v31 = vadd.f32 %v740_v29, %v661_v27 }
 0x104   : > { %v820_v32 = vadd.f32 %v819_v12, %v741_v31 }
 0x106   : > { %v866_v33 = vmax.f32 %v1559_v46, %v820_v32 }
 0x107   : > { %v1587_v35 = vpop.f32.mrf.mxu2  ;;  %v780_v56 = vpop.f32.mrf.mxu3 }
 0x108   : > { %v664_v36 = vpop.f32.mrf.mxu0 }
 0x109   : > { %v743_v37 = vpop.f32.mrf.mxu1 }
 0x10a   : > { %v744_v38 = vadd.f32 %v743_v37, %v664_v36 }
 0x10c   : > { %v823_v41 = vadd.f32 %v822_v20, %v744_v38 }
 0x10e   : > { %v867_v42 = vmax.f32 %v1563_v52, %v823_v41 }
 0x10f   : > { %v829_v43 = vpop.f32.mrf.mxu2  ;;  %v852_v63 = vpop.f32.mrf.mxu3 }
 0x110   : > { %v666_v44 = vpop.f32.mrf.mxu0  ;;  %v853_v10 = vadd.f32 %v852_v63, %v774_v8 }
 0x111   : > { %v745_v34 = vpop.f32.mrf.mxu1 }
 0x112   : > { %v746_v45 = vadd.f32 %v745_v34, %v666_v44 }
 0x114   : > { %v1590_v48 = vadd.f32 %v824_v26, %v746_v45 }
 0x116   : > { %v868_v50 = vmax.f32 %v1567_v58, %v1590_v48 }
 0x117   : > { %v1594_v46 = vpop.f32.mrf.mxu2  ;;  %v854_v12 = vpop.f32.mrf.mxu3 }
 0x118   : > { %v669_v51 = vpop.f32.mrf.mxu0  ;;  %v855_v26 = vadd.f32 %v854_v12, %v776_v22 }
 0x119   : > { %v748_v54 = vpop.f32.mrf.mxu1 }
 0x11f   : > { %v834_v55 = vpop.f32.mrf.mxu2  ;;  %v857_v29 = vpop.f32.mrf.mxu3 }
 0x120   : > { %v671_v57 = vpop.f32.mrf.mxu0  ;;  %v858_v41 = vadd.f32 %v857_v29, %v779_v30 }
 0x121   : > { %v750_v59 = vpop.f32.mrf.mxu1 }
 0x122   : > { %v751_v44 = vadd.f32 %v750_v59, %v671_v57 }
 0x124   : > { %v830_v45 = vadd.f32 %v829_v43, %v751_v44 }
 0x127   : > { %v837_v60 = vpop.f32.mrf.mxu2 }
 0x128   : > { %v674_v52 = vpop.f32.mrf.mxu0 }
 0x129   : > { %v753_v62 = vpop.f32.mrf.mxu1 }
 0x12a   : > { %v754_v8 = vadd.f32 %v753_v62, %v674_v52 }
 0x12f   : > { %v839_v0 = vpop.f32.mrf.mxu2 }
 0x130   : > { %v676_v3 = vpop.f32.mrf.mxu0 }
 0x131   : > { %v755_v5 = vpop.f32.mrf.mxu1 }
 0x132   : > { %v756_v9 = vadd.f32 %v755_v5, %v676_v3  ;;  %v781_v5 = vadd.f32 %v780_v56, %v1565_v53 }
 0x134   : > { %v835_v14 = vadd.f32 %v834_v55, %v756_v9  ;;  %v859_v55 = vpop.f32.mrf.mxu3 }
 0x136   : > { %v872_v15 = vmax.f32 %v835_v14, %v853_v10  ;;  %v833_v14 = vadd.f32 %v1594_v46, %v754_v8 }
 0x137   : > { %v842_v16 = vpop.f32.mrf.mxu2 }
 0x138   : > { %v879_v20 = vmax.f32 %v865_v24, %v872_v15  ;;  %v679_v18 = vpop.f32.mrf.mxu0 }
 0x139   : > { %v758_v21 = vpop.f32.mrf.mxu1 }
 0x13a   : > { %v759_v23 = vadd.f32 %v758_v21, %v679_v18 }
 0x13c   : > { %v838_v27 = vadd.f32 %v837_v60, %v759_v23 }
 0x13e   : > { %v873_v31 = vmax.f32 %v838_v27, %v855_v26 }
 0x13f   : > { %v844_v32 = vpop.f32.mrf.mxu2 }
 0x140   : > { %v880_v36 = vmax.f32 %v866_v33, %v873_v31  ;;  %v681_v37 = vpop.f32.mrf.mxu0 }
 0x141   : > { %v760_v28 = vpop.f32.mrf.mxu1 }
 0x142   : > { %v761_v38 = vadd.f32 %v760_v28, %v681_v37  ;;  %v891_v60 = vadd.f32 %v1338_v39, %v880_v36 }
 0x144   : > { %v840_v24 = vadd.f32 %v839_v0, %v761_v38  ;;  %v860_v0 = vadd.f32 %v859_v55, %v781_v5  ;;  %v898_v9 = vmax.f32 %v891_v60, 0.0 }
 0x146   : > { %v874_v40 = vmax.f32 %v840_v24, %v858_v41 }
 0x147   : > { %v847_v34 = vpop.f32.mrf.mxu2 }
 0x148   : > { %v881_v63 = vmax.f32 %v867_v42, %v874_v40  ;;  %v848_v33 = vadd.f32 %v847_v34, %v1569_v61  ;;  %v684_v3 = vpop.f32.mrf.mxu0  ;;  %v749_v42 = vadd.f32 %v748_v54, %v669_v51  ;;  %v890_v51 = vadd.f32 %v1338_v39, %v879_v20 }
 0x149   : > { %v763_v47 = vpop.f32.mrf.mxu1 }
 0x14a   : > { %v892_v49 = vadd.f32 %v1338_v39, %v881_v63  ;;  %v870_v57 = vmax.f32 %v830_v45, %v848_v33  ;;  %v764_v59 = vadd.f32 %v763_v47, %v684_v3  ;;  %v828_v18 = vadd.f32 %v1587_v35, %v749_v42 }
 0x14b   : > { %v897_v21 = vmax.f32 %v890_v51, 0.0 }
 0x14c   : > { %v899_v10 = vmax.f32 %v892_v49, 0.0  ;;  %v877_v43 = vmax.f32 %v863_v7, %v870_v57  ;;  %v843_v12 = vadd.f32 %v842_v16, %v764_v59 }
 0x14e   : > { %v1306_v53 = vpack.c.bf16 %v899_v10, %v898_v9  ;;  %v875_v61 = vmax.f32 %v843_v12, %v860_v0  ;;  %v888_v22 = vadd.f32 %v1338_v39, %v877_v43 }
 0x14f   : > { %v849_v56 = vpop.f32.mrf.mxu2 }
 0x150   : > { %1309 = vst [vmem:[%s1611_s7 + $0x10] sm:$0xff] %v1306_v53   ;;  %v882_v52 = vmax.f32 %v868_v50, %v875_v61  ;;  %v850_v13 = vadd.f32 %v849_v56, %v1575_v6  ;;  %v686_v11 = vpop.f32.mrf.mxu0  ;;  %v895_v27 = vmax.f32 %v888_v22, 0.0 }
 0x151   : > { %v765_v7 = vpop.f32.mrf.mxu1 }
 0x152   : > { %v893_v62 = vadd.f32 %v1338_v39, %v882_v52  ;;  %v871_v15 = vmax.f32 %v833_v14, %v850_v13  ;;  %v766_v16 = vadd.f32 %v765_v7, %v686_v11 }
 0x154   : > { %v900_v54 = vmax.f32 %v893_v62, 0.0  ;;  %v878_v46 = vmax.f32 %v864_v19, %v871_v15  ;;  %v845_v58 = vadd.f32 %v844_v32, %v766_v16 }
 0x156   : > { %v907_v48 = vpack.c.bf16 %v900_v54, %v900_v54  ;;  %v889_v50 = vadd.f32 %v1338_v39, %v878_v46  ;;  %v869_v6 = vmax.f32 %v828_v18, %v845_v58 }
 0x158   : > { %914 = vst [vmem:[%s1611_s7 + $0x18] sm:$0xf] %v907_v48  ;;  %v896_v23 = vmax.f32 %v889_v50, 0.0  ;;  %v876_v35 = vmax.f32 %v862_v2, %v869_v6 }
 0x15a   : > { %v1301_v26 = vpack.c.bf16 %v897_v21, %v896_v23  ;;  %v887_v20 = vadd.f32 %v1338_v39, %v876_v35 }
 0x15c   : > { %1308 = vst [vmem:[%s1611_s7 + $0x8] sm:$0xff] %v1301_v26   ;;  %v894_v29 = vmax.f32 %v887_v20, 0.0 }
 0x15e   : > { %v1296_v25 = vpack.c.bf16 %v895_v27, %v894_v29 }
 0x160   : > { %1297 = vst [vmem:[%s1611_s7] sm:$0xff] %v1296_v25  }
 0x161 PF: > { %s13_s12 = sadd.s32 1, %s1345_s12  }
 0x162   : > { %p10_p4 = scmp.ge.s32.totalorder %s13_s12, 4  }
 0x164   :  { %12 = sbr.rel (!%p10_p4) target bundleno = 1 (0x1), region = 62 }

// kernel: cnn_forward.8
= control target key start
LH: loop header
LB: loop body
LE: loop exit
PB: predicated region body
PF: predicated region fallthrough
CT: control target
= control target key end

     0   :  { %s2723_s12 = smov 0   ;;  %s2725_s13 = smov 0   ;;  %s3353_s0 = inlined_call_operand.vmem [shape: bf16[8,1024], index: 0, kind: input, shape index: {}]   ;;  %s3354_s1 = inlined_call_operand.vmem [shape: bf16[1024,512], index: 1, kind: input, shape index: {}]   ;;  %s3355_s2 = inlined_call_operand.vmem [shape: f32[1,512], index: 2, kind: input, shape index: {}]   ;;  %s3356_s3 = inlined_call_operand.vmem [shape: bf16[8,512], index: 3, kind: output, shape index: {}]  }
   0x1   :  { %s2727_s14 = smov 0   ;;  %s2729_s15 = smov 0  }
   0x2   :  { %s2731_s16 = smov 0  }
   0x3 LB: > { %s28_s17 = sadd.s32 1, %s2697_s15  ;;  %p76_p1 = scmp.ne.s32.totalorder %s2689_s13, %s2685_s12  ;;  %s2701_s16 = sphi %s2731_s16, %s13_s16   ;;  %s2697_s15 = sphi %s2729_s15, %s3360_s15   ;;  %s2693_s14 = sphi %s2727_s14, %s3359_s14   ;;  %s2689_s13 = sphi %s2725_s13, %s3358_s13   ;;  %s2685_s12 = sphi %s2723_s12, %s3357_s12  }
   0x4   : > { %p30_p0 = scmp.ge.s32.totalorder %s28_s17, 2  ;;  %p77_p2 = scmp.eq.s32.totalorder %s2701_s16, 0 }
   0x5   : > { %s69_s19 = sadd.s32 1, %s2689_s13  ;;  %p1971_p5 = scmp.ge.s32.totalorder %s2701_s16, 2 }
   0x6   : > { %s3362_s17 = smov (%p30_p0, %s28_s17), 0  ;;  %p78_p3 = por %p77_p2, %p76_p1 }
   0x7   : > { %s65_s18 = ssub.s32 %s2697_s15, %s3362_s17  ;;  %169 = sbr.rel (%p1971_p5) target bundleno = 144 (0x90), region = 20 }
   0x8   : > { %p67_p4 = scmp.eq.s32.totalorder %s65_s18, 0 }
   0xa   : > { %s2758_s20 = scalar_select %p67_p4, %s2689_s13, %s69_s19  }
   0xc   : > { %172 = sbr.rel (!%p78_p3) target bundleno = 144 (0x90), region = 24  ;;  %s174_s21 = sand.u32 (%p78_p3), 1, %s2689_s13  }
   0xd   : > { %s2494_s22 = sshll.u32 (%p78_p3), %s2697_s15, 3  ;;  %s1972_s23 = sshll.u32 (%p78_p3), %s174_s21, 10 }
   0xe   : > { %s2766_s26 = scalar_lea.vmem (%p78_p3), %s3354_s1, %s2494_s22  ;;  %s2771_s27 = scalar_lea.vmem (%p78_p3), [#allocation3], %s1972_s23 }
   0xf   : > { %v465_v0 = vld [vmem:[%s2766_s26] sm:$0xff] (%p78_p3)  ;;  %v467_v1 = vld [vmem:[%s2766_s26 + $0x10] sm:$0xff] (%p78_p3) }
  0x10   : > { %v469_v2 = vld [vmem:[%s2766_s26 + $0x20] sm:$0xff] (%p78_p3)  ;;  %466 = vst [vmem:[%s2771_s27] sm:$0xff] (%p78_p3), %v465_v0  ;;  %v471_v3 = vld [vmem:[%s2766_s26 + $0x30] sm:$0xff] (%p78_p3) }
  0x11   : > { %468 = vst [vmem:[%s2771_s27 + $0x8] sm:$0xff] %v467_v1  ;;  %v473_v4 = vld [vmem:[%s2766_s26 + $0x40] sm:$0xff]  ;;  %v475_v5 = vld [vmem:[%s2766_s26 + $0x50] sm:$0xff] }
  0x12   : > { %470 = vst [vmem:[%s2771_s27 + $0x10] sm:$0xff] %v469_v2  ;;  %v477_v6 = vld [vmem:[%s2766_s26 + $0x60] sm:$0xff]  ;;  %v479_v7 = vld [vmem:[%s2766_s26 + $0x70] sm:$0xff] }
  0x13   : > { %472 = vst [vmem:[%s2771_s27 + $0x18] sm:$0xff] %v471_v3  ;;  %v481_v8 = vld [vmem:[%s2766_s26 + $0x80] sm:$0xff]  ;;  %v483_v9 = vld [vmem:[%s2766_s26 + $0x90] sm:$0xff] }
  0x14   : > { %474 = vst [vmem:[%s2771_s27 + $0x20] sm:$0xff] %v473_v4  ;;  %v485_v10 = vld [vmem:[%s2766_s26 + $0xa0] sm:$0xff]  ;;  %v487_v11 = vld [vmem:[%s2766_s26 + $0xb0] sm:$0xff] }
  0x15   : > { %476 = vst [vmem:[%s2771_s27 + $0x28] sm:$0xff] %v475_v5  ;;  %v489_v12 = vld [vmem:[%s2766_s26 + $0xc0] sm:$0xff]  ;;  %v491_v13 = vld [vmem:[%s2766_s26 + $0xd0] sm:$0xff] }
  0x16   : > { %478 = vst [vmem:[%s2771_s27 + $0x30] sm:$0xff] %v477_v6  ;;  %v493_v14 = vld [vmem:[%s2766_s26 + $0xe0] sm:$0xff]  ;;  %v495_v15 = vld [vmem:[%s2766_s26 + $0xf0] sm:$0xff] }
  0x17   : > { %480 = vst [vmem:[%s2771_s27 + $0x38] sm:$0xff] %v479_v7  ;;  %v497_v16 = vld [vmem:[%s2766_s26 + $0x100] sm:$0xff]  ;;  %v499_v17 = vld [vmem:[%s2766_s26 + $0x110] sm:$0xff] }
  0x18   : > { %482 = vst [vmem:[%s2771_s27 + $0x40] sm:$0xff] %v481_v8  ;;  %v501_v18 = vld [vmem:[%s2766_s26 + $0x120] sm:$0xff]  ;;  %v503_v19 = vld [vmem:[%s2766_s26 + $0x130] sm:$0xff] }
  0x19   : > { %484 = vst [vmem:[%s2771_s27 + $0x48] sm:$0xff] %v483_v9  ;;  %v505_v20 = vld [vmem:[%s2766_s26 + $0x140] sm:$0xff]  ;;  %v507_v21 = vld [vmem:[%s2766_s26 + $0x150] sm:$0xff] }
  0x1a   : > { %486 = vst [vmem:[%s2771_s27 + $0x50] sm:$0xff] %v485_v10  ;;  %v509_v22 = vld [vmem:[%s2766_s26 + $0x160] sm:$0xff]  ;;  %v511_v23 = vld [vmem:[%s2766_s26 + $0x170] sm:$0xff] }
  0x1b   : > { %488 = vst [vmem:[%s2771_s27 + $0x58] sm:$0xff] %v487_v11  ;;  %v513_v24 = vld [vmem:[%s2766_s26 + $0x180] sm:$0xff]  ;;  %v515_v25 = vld [vmem:[%s2766_s26 + $0x190] sm:$0xff] }
  0x1c   : > { %490 = vst [vmem:[%s2771_s27 + $0x60] sm:$0xff] %v489_v12  ;;  %v517_v26 = vld [vmem:[%s2766_s26 + $0x1a0] sm:$0xff]  ;;  %v519_v27 = vld [vmem:[%s2766_s26 + $0x1b0] sm:$0xff] }
  0x1d   : > { %492 = vst [vmem:[%s2771_s27 + $0x68] sm:$0xff] %v491_v13  ;;  %v521_v28 = vld [vmem:[%s2766_s26 + $0x1c0] sm:$0xff]  ;;  %v523_v29 = vld [vmem:[%s2766_s26 + $0x1d0] sm:$0xff] }
  0x1e   : > { %494 = vst [vmem:[%s2771_s27 + $0x70] sm:$0xff] %v493_v14  ;;  %v525_v30 = vld [vmem:[%s2766_s26 + $0x1e0] sm:$0xff]  ;;  %v527_v31 = vld [vmem:[%s2766_s26 + $0x1f0] sm:$0xff] }
  0x1f   : > { %496 = vst [vmem:[%s2771_s27 + $0x78] sm:$0xff] %v495_v15  ;;  %v529_v32 = vld [vmem:[%s2766_s26 + $0x200] sm:$0xff]  ;;  %v531_v33 = vld [vmem:[%s2766_s26 + $0x210] sm:$0xff] }
  0x20   : > { %498 = vst [vmem:[%s2771_s27 + $0x80] sm:$0xff] %v497_v16  ;;  %v533_v34 = vld [vmem:[%s2766_s26 + $0x220] sm:$0xff]  ;;  %v535_v35 = vld [vmem:[%s2766_s26 + $0x230] sm:$0xff] }
  0x21   : > { %500 = vst [vmem:[%s2771_s27 + $0x88] sm:$0xff] %v499_v17  ;;  %v537_v36 = vld [vmem:[%s2766_s26 + $0x240] sm:$0xff]  ;;  %v539_v37 = vld [vmem:[%s2766_s26 + $0x250] sm:$0xff] }
  0x22   : > { %502 = vst [vmem:[%s2771_s27 + $0x90] sm:$0xff] %v501_v18  ;;  %v541_v38 = vld [vmem:[%s2766_s26 + $0x260] sm:$0xff]  ;;  %v543_v39 = vld [vmem:[%s2766_s26 + $0x270] sm:$0xff] }
  0x23   : > { %504 = vst [vmem:[%s2771_s27 + $0x98] sm:$0xff] %v503_v19  ;;  %v545_v40 = vld [vmem:[%s2766_s26 + $0x280] sm:$0xff]  ;;  %v547_v41 = vld [vmem:[%s2766_s26 + $0x290] sm:$0xff] }
  0x24   : > { %506 = vst [vmem:[%s2771_s27 + $0xa0] sm:$0xff] %v505_v20  ;;  %v549_v42 = vld [vmem:[%s2766_s26 + $0x2a0] sm:$0xff]  ;;  %v551_v43 = vld [vmem:[%s2766_s26 + $0x2b0] sm:$0xff] }
  0x25   : > { %508 = vst [vmem:[%s2771_s27 + $0xa8] sm:$0xff] %v507_v21  ;;  %v553_v44 = vld [vmem:[%s2766_s26 + $0x2c0] sm:$0xff]  ;;  %v555_v45 = vld [vmem:[%s2766_s26 + $0x2d0] sm:$0xff] }
  0x26   : > { %510 = vst [vmem:[%s2771_s27 + $0xb0] sm:$0xff] %v509_v22  ;;  %v557_v46 = vld [vmem:[%s2766_s26 + $0x2e0] sm:$0xff]  ;;  %v559_v47 = vld [vmem:[%s2766_s26 + $0x2f0] sm:$0xff] }
  0x27   : > { %512 = vst [vmem:[%s2771_s27 + $0xb8] sm:$0xff] %v511_v23  ;;  %v561_v48 = vld [vmem:[%s2766_s26 + $0x300] sm:$0xff]  ;;  %v563_v49 = vld [vmem:[%s2766_s26 + $0x310] sm:$0xff] }
  0x28   : > { %514 = vst [vmem:[%s2771_s27 + $0xc0] sm:$0xff] %v513_v24  ;;  %v565_v50 = vld [vmem:[%s2766_s26 + $0x320] sm:$0xff]  ;;  %v567_v51 = vld [vmem:[%s2766_s26 + $0x330] sm:$0xff] }
  0x29   : > { %516 = vst [vmem:[%s2771_s27 + $0xc8] sm:$0xff] %v515_v25  ;;  %v569_v52 = vld [vmem:[%s2766_s26 + $0x340] sm:$0xff]  ;;  %v571_v53 = vld [vmem:[%s2766_s26 + $0x350] sm:$0xff] }
  0x2a   : > { %518 = vst [vmem:[%s2771_s27 + $0xd0] sm:$0xff] %v517_v26  ;;  %v573_v54 = vld [vmem:[%s2766_s26 + $0x360] sm:$0xff]  ;;  %v575_v55 = vld [vmem:[%s2766_s26 + $0x370] sm:$0xff] }
  0x2b   : > { %520 = vst [vmem:[%s2771_s27 + $0xd8] sm:$0xff] %v519_v27  ;;  %v577_v56 = vld [vmem:[%s2766_s26 + $0x380] sm:$0xff]  ;;  %v579_v57 = vld [vmem:[%s2766_s26 + $0x390] sm:$0xff] }
  0x2c   : > { %522 = vst [vmem:[%s2771_s27 + $0xe0] sm:$0xff] %v521_v28  ;;  %v581_v58 = vld [vmem:[%s2766_s26 + $0x3a0] sm:$0xff]  ;;  %v583_v59 = vld [vmem:[%s2766_s26 + $0x3b0] sm:$0xff] }
  0x2d   : > { %524 = vst [vmem:[%s2771_s27 + $0xe8] sm:$0xff] %v523_v29  ;;  %v585_v60 = vld [vmem:[%s2766_s26 + $0x3c0] sm:$0xff]  ;;  %v587_v61 = vld [vmem:[%s2766_s26 + $0x3d0] sm:$0xff] }
  0x2e   : > { %526 = vst [vmem:[%s2771_s27 + $0xf0] sm:$0xff] %v525_v30  ;;  %v589_v62 = vld [vmem:[%s2766_s26 + $0x3e0] sm:$0xff]  ;;  %v591_v63 = vld [vmem:[%s2766_s26 + $0x3f0] sm:$0xff] }
  0x2f   : > { %528 = vst [vmem:[%s2771_s27 + $0xf8] sm:$0xff] %v527_v31  ;;  %v593_v0 = vld [vmem:[%s2766_s26 + $0x400] sm:$0xff]  ;;  %v595_v1 = vld [vmem:[%s2766_s26 + $0x410] sm:$0xff] }
  0x30   : > { %530 = vst [vmem:[%s2771_s27 + $0x100] sm:$0xff] %v529_v32  ;;  %v597_v2 = vld [vmem:[%s2766_s26 + $0x420] sm:$0xff]  ;;  %v599_v3 = vld [vmem:[%s2766_s26 + $0x430] sm:$0xff] }
  0x31   : > { %532 = vst [vmem:[%s2771_s27 + $0x108] sm:$0xff] %v531_v33  ;;  %v601_v4 = vld [vmem:[%s2766_s26 + $0x440] sm:$0xff]  ;;  %v603_v5 = vld [vmem:[%s2766_s26 + $0x450] sm:$0xff] }
  0x32   : > { %534 = vst [vmem:[%s2771_s27 + $0x110] sm:$0xff] %v533_v34  ;;  %v605_v6 = vld [vmem:[%s2766_s26 + $0x460] sm:$0xff]  ;;  %v607_v7 = vld [vmem:[%s2766_s26 + $0x470] sm:$0xff] }
  0x33   : > { %536 = vst [vmem:[%s2771_s27 + $0x118] sm:$0xff] %v535_v35  ;;  %v609_v8 = vld [vmem:[%s2766_s26 + $0x480] sm:$0xff]  ;;  %v611_v9 = vld [vmem:[%s2766_s26 + $0x490] sm:$0xff] }
  0x34   : > { %538 = vst [vmem:[%s2771_s27 + $0x120] sm:$0xff] %v537_v36  ;;  %v613_v10 = vld [vmem:[%s2766_s26 + $0x4a0] sm:$0xff]  ;;  %v615_v11 = vld [vmem:[%s2766_s26 + $0x4b0] sm:$0xff] }
  0x35   : > { %540 = vst [vmem:[%s2771_s27 + $0x128] sm:$0xff] %v539_v37  ;;  %v617_v12 = vld [vmem:[%s2766_s26 + $0x4c0] sm:$0xff]  ;;  %v619_v13 = vld [vmem:[%s2766_s26 + $0x4d0] sm:$0xff] }
  0x36   : > { %542 = vst [vmem:[%s2771_s27 + $0x130] sm:$0xff] %v541_v38  ;;  %v621_v14 = vld [vmem:[%s2766_s26 + $0x4e0] sm:$0xff]  ;;  %v623_v15 = vld [vmem:[%s2766_s26 + $0x4f0] sm:$0xff] }
  0x37   : > { %544 = vst [vmem:[%s2771_s27 + $0x138] sm:$0xff] %v543_v39  ;;  %v625_v16 = vld [vmem:[%s2766_s26 + $0x500] sm:$0xff]  ;;  %v627_v17 = vld [vmem:[%s2766_s26 + $0x510] sm:$0xff] }
  0x38   : > { %546 = vst [vmem:[%s2771_s27 + $0x140] sm:$0xff] %v545_v40  ;;  %v629_v18 = vld [vmem:[%s2766_s26 + $0x520] sm:$0xff]  ;;  %v631_v19 = vld [vmem:[%s2766_s26 + $0x530] sm:$0xff] }
  0x39   : > { %548 = vst [vmem:[%s2771_s27 + $0x148] sm:$0xff] %v547_v41  ;;  %v633_v20 = vld [vmem:[%s2766_s26 + $0x540] sm:$0xff]  ;;  %v635_v21 = vld [vmem:[%s2766_s26 + $0x550] sm:$0xff] }
  0x3a   : > { %550 = vst [vmem:[%s2771_s27 + $0x150] sm:$0xff] %v549_v42  ;;  %v637_v22 = vld [vmem:[%s2766_s26 + $0x560] sm:$0xff]  ;;  %v639_v23 = vld [vmem:[%s2766_s26 + $0x570] sm:$0xff] }
  0x3b   : > { %552 = vst [vmem:[%s2771_s27 + $0x158] sm:$0xff] %v551_v43  ;;  %v641_v24 = vld [vmem:[%s2766_s26 + $0x580] sm:$0xff]  ;;  %v643_v25 = vld [vmem:[%s2766_s26 + $0x590] sm:$0xff] }
  0x3c   : > { %554 = vst [vmem:[%s2771_s27 + $0x160] sm:$0xff] %v553_v44  ;;  %v645_v26 = vld [vmem:[%s2766_s26 + $0x5a0] sm:$0xff]  ;;  %v647_v27 = vld [vmem:[%s2766_s26 + $0x5b0] sm:$0xff] }
  0x3d   : > { %556 = vst [vmem:[%s2771_s27 + $0x168] sm:$0xff] %v555_v45  ;;  %v649_v28 = vld [vmem:[%s2766_s26 + $0x5c0] sm:$0xff]  ;;  %v651_v29 = vld [vmem:[%s2766_s26 + $0x5d0] sm:$0xff] }
  0x3e   : > { %558 = vst [vmem:[%s2771_s27 + $0x170] sm:$0xff] %v557_v46  ;;  %v653_v30 = vld [vmem:[%s2766_s26 + $0x5e0] sm:$0xff]  ;;  %v655_v31 = vld [vmem:[%s2766_s26 + $0x5f0] sm:$0xff] }
  0x3f   : > { %560 = vst [vmem:[%s2771_s27 + $0x178] sm:$0xff] %v559_v47  ;;  %v657_v32 = vld [vmem:[%s2766_s26 + $0x600] sm:$0xff]  ;;  %v659_v33 = vld [vmem:[%s2766_s26 + $0x610] sm:$0xff] }
  0x40   : > { %562 = vst [vmem:[%s2771_s27 + $0x180] sm:$0xff] %v561_v48  ;;  %v661_v34 = vld [vmem:[%s2766_s26 + $0x620] sm:$0xff]  ;;  %v663_v35 = vld [vmem:[%s2766_s26 + $0x630] sm:$0xff] }
  0x41   : > { %564 = vst [vmem:[%s2771_s27 + $0x188] sm:$0xff] %v563_v49  ;;  %v665_v36 = vld [vmem:[%s2766_s26 + $0x640] sm:$0xff]  ;;  %v667_v37 = vld [vmem:[%s2766_s26 + $0x650] sm:$0xff] }
  0x42   : > { %566 = vst [vmem:[%s2771_s27 + $0x190] sm:$0xff] %v565_v50  ;;  %v669_v38 = vld [vmem:[%s2766_s26 + $0x660] sm:$0xff]  ;;  %v671_v39 = vld [vmem:[%s2766_s26 + $0x670] sm:$0xff] }
  0x43   : > { %568 = vst [vmem:[%s2771_s27 + $0x198] sm:$0xff] %v567_v51  ;;  %v673_v40 = vld [vmem:[%s2766_s26 + $0x680] sm:$0xff]  ;;  %v675_v41 = vld [vmem:[%s2766_s26 + $0x690] sm:$0xff] }
  0x44   : > { %570 = vst [vmem:[%s2771_s27 + $0x1a0] sm:$0xff] %v569_v52  ;;  %v677_v42 = vld [vmem:[%s2766_s26 + $0x6a0] sm:$0xff]  ;;  %v679_v43 = vld [vmem:[%s2766_s26 + $0x6b0] sm:$0xff] }
  0x45   : > { %572 = vst [vmem:[%s2771_s27 + $0x1a8] sm:$0xff] %v571_v53  ;;  %v681_v44 = vld [vmem:[%s2766_s26 + $0x6c0] sm:$0xff]  ;;  %v683_v45 = vld [vmem:[%s2766_s26 + $0x6d0] sm:$0xff] }
  0x46   : > { %574 = vst [vmem:[%s2771_s27 + $0x1b0] sm:$0xff] %v573_v54  ;;  %v685_v46 = vld [vmem:[%s2766_s26 + $0x6e0] sm:$0xff]  ;;  %v687_v47 = vld [vmem:[%s2766_s26 + $0x6f0] sm:$0xff] }
  0x47   : > { %576 = vst [vmem:[%s2771_s27 + $0x1b8] sm:$0xff] %v575_v55  ;;  %v689_v48 = vld [vmem:[%s2766_s26 + $0x700] sm:$0xff]  ;;  %v691_v49 = vld [vmem:[%s2766_s26 + $0x710] sm:$0xff] }
  0x48   : > { %578 = vst [vmem:[%s2771_s27 + $0x1c0] sm:$0xff] %v577_v56  ;;  %v693_v50 = vld [vmem:[%s2766_s26 + $0x720] sm:$0xff]  ;;  %v695_v51 = vld [vmem:[%s2766_s26 + $0x730] sm:$0xff] }
  0x49   : > { %580 = vst [vmem:[%s2771_s27 + $0x1c8] sm:$0xff] %v579_v57  ;;  %v697_v52 = vld [vmem:[%s2766_s26 + $0x740] sm:$0xff]  ;;  %v699_v53 = vld [vmem:[%s2766_s26 + $0x750] sm:$0xff] }
  0x4a   : > { %582 = vst [vmem:[%s2771_s27 + $0x1d0] sm:$0xff] %v581_v58  ;;  %v701_v54 = vld [vmem:[%s2766_s26 + $0x760] sm:$0xff]  ;;  %v703_v55 = vld [vmem:[%s2766_s26 + $0x770] sm:$0xff] }
  0x4b   : > { %584 = vst [vmem:[%s2771_s27 + $0x1d8] sm:$0xff] %v583_v59  ;;  %v705_v56 = vld [vmem:[%s2766_s26 + $0x780] sm:$0xff]  ;;  %v707_v57 = vld [vmem:[%s2766_s26 + $0x790] sm:$0xff] }
  0x4c   : > { %586 = vst [vmem:[%s2771_s27 + $0x1e0] sm:$0xff] %v585_v60  ;;  %v709_v58 = vld [vmem:[%s2766_s26 + $0x7a0] sm:$0xff]  ;;  %v711_v59 = vld [vmem:[%s2766_s26 + $0x7b0] sm:$0xff] }
  0x4d   : > { %588 = vst [vmem:[%s2771_s27 + $0x1e8] sm:$0xff] %v587_v61  ;;  %v713_v60 = vld [vmem:[%s2766_s26 + $0x7c0] sm:$0xff]  ;;  %v715_v61 = vld [vmem:[%s2766_s26 + $0x7d0] sm:$0xff] }
  0x4e   : > { %590 = vst [vmem:[%s2771_s27 + $0x1f0] sm:$0xff] %v589_v62  ;;  %v717_v62 = vld [vmem:[%s2766_s26 + $0x7e0] sm:$0xff] }
  0x4f   : > { %592 = vst [vmem:[%s2771_s27 + $0x1f8] sm:$0xff] %v591_v63  ;;  %v719_v63 = vld [vmem:[%s2766_s26 + $0x7f0] sm:$0xff] }
  0x50   : > { %594 = vst [vmem:[%s2771_s27 + $0x200] sm:$0xff] %v593_v0 }
  0x51   : > { %596 = vst [vmem:[%s2771_s27 + $0x208] sm:$0xff] %v595_v1 }
  0x52   : > { %598 = vst [vmem:[%s2771_s27 + $0x210] sm:$0xff] %v597_v2 }
  0x53   : > { %600 = vst [vmem:[%s2771_s27 + $0x218] sm:$0xff] %v599_v3 }
  0x54   : > { %602 = vst [vmem:[%s2771_s27 + $0x220] sm:$0xff] %v601_v4 }
  0x55   : > { %604 = vst [vmem:[%s2771_s27 + $0x228] sm:$0xff] %v603_v5 }
  0x56   : > { %606 = vst [vmem:[%s2771_s27 + $0x230] sm:$0xff] %v605_v6 }
  0x57   : > { %608 = vst [vmem:[%s2771_s27 + $0x238] sm:$0xff] %v607_v7 }
  0x58   : > { %610 = vst [vmem:[%s2771_s27 + $0x240] sm:$0xff] %v609_v8 }
  0x59   : > { %612 = vst [vmem:[%s2771_s27 + $0x248] sm:$0xff] %v611_v9 }
  0x5a   : > { %614 = vst [vmem:[%s2771_s27 + $0x250] sm:$0xff] %v613_v10 }
  0x5b   : > { %616 = vst [vmem:[%s2771_s27 + $0x258] sm:$0xff] %v615_v11 }
  0x5c   : > { %618 = vst [vmem:[%s2771_s27 + $0x260] sm:$0xff] %v617_v12 }
  0x5d   : > { %620 = vst [vmem:[%s2771_s27 + $0x268] sm:$0xff] %v619_v13 }
  0x5e   : > { %622 = vst [vmem:[%s2771_s27 + $0x270] sm:$0xff] %v621_v14 }
  0x5f   : > { %624 = vst [vmem:[%s2771_s27 + $0x278] sm:$0xff] %v623_v15 }
  0x60   : > { %626 = vst [vmem:[%s2771_s27 + $0x280] sm:$0xff] %v625_v16 }
  0x61   : > { %628 = vst [vmem:[%s2771_s27 + $0x288] sm:$0xff] %v627_v17 }
  0x62   : > { %630 = vst [vmem:[%s2771_s27 + $0x290] sm:$0xff] %v629_v18 }
  0x63   : > { %632 = vst [vmem:[%s2771_s27 + $0x298] sm:$0xff] %v631_v19 }
  0x64   : > { %634 = vst [vmem:[%s2771_s27 + $0x2a0] sm:$0xff] %v633_v20 }
  0x65   : > { %636 = vst [vmem:[%s2771_s27 + $0x2a8] sm:$0xff] %v635_v21 }
  0x66   : > { %638 = vst [vmem:[%s2771_s27 + $0x2b0] sm:$0xff] %v637_v22 }
  0x67   : > { %640 = vst [vmem:[%s2771_s27 + $0x2b8] sm:$0xff] %v639_v23 }
  0x68   : > { %642 = vst [vmem:[%s2771_s27 + $0x2c0] sm:$0xff] %v641_v24 }
  0x69   : > { %644 = vst [vmem:[%s2771_s27 + $0x2c8] sm:$0xff] %v643_v25 }
  0x6a   : > { %646 = vst [vmem:[%s2771_s27 + $0x2d0] sm:$0xff] %v645_v26 }
  0x6b   : > { %648 = vst [vmem:[%s2771_s27 + $0x2d8] sm:$0xff] %v647_v27 }
  0x6c   : > { %650 = vst [vmem:[%s2771_s27 + $0x2e0] sm:$0xff] %v649_v28 }
  0x6d   : > { %652 = vst [vmem:[%s2771_s27 + $0x2e8] sm:$0xff] %v651_v29 }
  0x6e   : > { %654 = vst [vmem:[%s2771_s27 + $0x2f0] sm:$0xff] %v653_v30 }
  0x6f   : > { %656 = vst [vmem:[%s2771_s27 + $0x2f8] sm:$0xff] %v655_v31 }
  0x70   : > { %658 = vst [vmem:[%s2771_s27 + $0x300] sm:$0xff] %v657_v32 }
  0x71   : > { %660 = vst [vmem:[%s2771_s27 + $0x308] sm:$0xff] %v659_v33 }
  0x72   : > { %662 = vst [vmem:[%s2771_s27 + $0x310] sm:$0xff] %v661_v34 }
  0x73   : > { %664 = vst [vmem:[%s2771_s27 + $0x318] sm:$0xff] %v663_v35 }
  0x74   : > { %666 = vst [vmem:[%s2771_s27 + $0x320] sm:$0xff] %v665_v36 }
  0x75   : > { %668 = vst [vmem:[%s2771_s27 + $0x328] sm:$0xff] %v667_v37 }
  0x76   : > { %670 = vst [vmem:[%s2771_s27 + $0x330] sm:$0xff] %v669_v38 }
  0x77   : > { %672 = vst [vmem:[%s2771_s27 + $0x338] sm:$0xff] %v671_v39 }
  0x78   : > { %674 = vst [vmem:[%s2771_s27 + $0x340] sm:$0xff] %v673_v40 }
  0x79   : > { %676 = vst [vmem:[%s2771_s27 + $0x348] sm:$0xff] %v675_v41 }
  0x7a   : > { %678 = vst [vmem:[%s2771_s27 + $0x350] sm:$0xff] %v677_v42 }
  0x7b   : > { %680 = vst [vmem:[%s2771_s27 + $0x358] sm:$0xff] %v679_v43 }
  0x7c   : > { %682 = vst [vmem:[%s2771_s27 + $0x360] sm:$0xff] %v681_v44 }
  0x7d   : > { %684 = vst [vmem:[%s2771_s27 + $0x368] sm:$0xff] %v683_v45 }
  0x7e   : > { %686 = vst [vmem:[%s2771_s27 + $0x370] sm:$0xff] %v685_v46 }
  0x7f   : > { %688 = vst [vmem:[%s2771_s27 + $0x378] sm:$0xff] %v687_v47 }
  0x80   : > { %690 = vst [vmem:[%s2771_s27 + $0x380] sm:$0xff] %v689_v48 }
  0x81   : > { %692 = vst [vmem:[%s2771_s27 + $0x388] sm:$0xff] %v691_v49 }
  0x82   : > { %694 = vst [vmem:[%s2771_s27 + $0x390] sm:$0xff] %v693_v50 }
  0x83   : > { %696 = vst [vmem:[%s2771_s27 + $0x398] sm:$0xff] %v695_v51 }
  0x84   : > { %698 = vst [vmem:[%s2771_s27 + $0x3a0] sm:$0xff] %v697_v52 }
  0x85   : > { %700 = vst [vmem:[%s2771_s27 + $0x3a8] sm:$0xff] %v699_v53 }
  0x86   : > { %702 = vst [vmem:[%s2771_s27 + $0x3b0] sm:$0xff] %v701_v54 }
  0x87   : > { %704 = vst [vmem:[%s2771_s27 + $0x3b8] sm:$0xff] %v703_v55 }
  0x88   : > { %706 = vst [vmem:[%s2771_s27 + $0x3c0] sm:$0xff] %v705_v56 }
  0x89   : > { %708 = vst [vmem:[%s2771_s27 + $0x3c8] sm:$0xff] %v707_v57 }
  0x8a   : > { %710 = vst [vmem:[%s2771_s27 + $0x3d0] sm:$0xff] %v709_v58 }
  0x8b   : > { %712 = vst [vmem:[%s2771_s27 + $0x3d8] sm:$0xff] %v711_v59 }
  0x8c   : > { %714 = vst [vmem:[%s2771_s27 + $0x3e0] sm:$0xff] %v713_v60 }
  0x8d   : > { %716 = vst [vmem:[%s2771_s27 + $0x3e8] sm:$0xff] %v715_v61 }
  0x8e   : > { %718 = vst [vmem:[%s2771_s27 + $0x3f0] sm:$0xff] %v717_v62 }
  0x8f   : > { %720 = vst [vmem:[%s2771_s27 + $0x3f8] sm:$0xff] %v719_v63 }
  0x90 PF: > { %p1975_p6 = scmp.ge.s32.totalorder %s2701_s16, 1  ;;  %p733_p7 = scmp.lt.s32.totalorder %s2701_s16, 3 }
  0x92   : > { %p734_p8 = pnand %p1975_p6, %p733_p7 }
  0x93   : > { %s740_s28 = sand.u32 (!%p734_p8), 1, %s2685_s12   ;;  %s1977_s12 = sshll.u32 (!%p734_p8), %s2693_s14, 1 }
  0x94   : > { %737 = sbr.rel (%p734_p8) target bundleno = 428 (0x1ac), region = 66  ;;  %s1976_s29 = sshll.u32 (!%p734_p8), %s740_s28, 10 }
  0x95   : > { %s3029_s30 = scalar_lea.vmem (!%p734_p8), [#allocation3], %s1976_s29  ;;  %p793_p9 = scmp.lt.s32.totalorder (!%p734_p8), %s1977_s12, 3 }
  0x99   : > { %v2038_v0 = vld [vmem:[%s3029_s30 + $0x70] sm:$0xf]  ;;  %v2510_v1 = vld [vmem:[%s3029_s30 + $0x74] sm:$0xf0]  ;;  %v2030_v11 = vld [vmem:[%s3029_s30 + $0x60] sm:$0xf] }
  0x9a   : > { %v2102_v2 = vld [vmem:[%s3029_s30 + $0xf0] sm:$0xf]  ;;  %v2039_v3 = vor.u32 %v2510_v1, %v2038_v0  ;;  %v2526_v4 = vld [vmem:[%s3029_s30 + $0xf4] sm:$0xf0]  ;;  %v2508_v13 = vld [vmem:[%s3029_s30 + $0x64] sm:$0xf0] }
  0x9b   : > { %v2166_v5 = vld [vmem:[%s3029_s30 + $0x170] sm:$0xf]  ;;  %v2542_v6 = vld [vmem:[%s3029_s30 + $0x174] sm:$0xf0]  ;;  %v2103_v7 = vor.u32 %v2526_v4, %v2102_v2  ;;  %v2094_v14 = vld [vmem:[%s3029_s30 + $0xe0] sm:$0xf]  ;;  %v2031_v16 = vor.u32 %v2508_v13, %v2030_v11 }
  0x9c   : > { %v2167_v8 = vor.u32 %v2542_v6, %v2166_v5  ;;  %v2230_v9 = vld [vmem:[%s3029_s30 + $0x1f0] sm:$0xf]  ;;  %v2558_v10 = vld [vmem:[%s3029_s30 + $0x1f4] sm:$0xf0]  ;;  %1615 = vmatpush.bf16.msra.mxu0 %v2039_v3  ;;  %v2524_v15 = vld [vmem:[%s3029_s30 + $0xe4] sm:$0xf0] }
  0x9d   : > { %v2231_v12 = vor.u32 %v2558_v10, %v2230_v9  ;;  %1628 = vmatpush.bf16.msra.mxu1 %v2103_v7  ;;  %v2095_v17 = vor.u32 %v2524_v15, %v2094_v14  ;;  %v2158_v18 = vld [vmem:[%s3029_s30 + $0x160] sm:$0xf]  ;;  %v2540_v19 = vld [vmem:[%s3029_s30 + $0x164] sm:$0xf0]  ;;  %v2022_v23 = vld [vmem:[%s3029_s30 + $0x50] sm:$0xf] }
  0x9e   : > { %1641 = vmatpush.bf16.msra.mxu2 %v2167_v8  ;;  %v2222_v20 = vld [vmem:[%s3029_s30 + $0x1e0] sm:$0xf]  ;;  %v2159_v21 = vor.u32 %v2540_v19, %v2158_v18  ;;  %v2556_v22 = vld [vmem:[%s3029_s30 + $0x1e4] sm:$0xf0]  ;;  %v2506_v24 = vld [vmem:[%s3029_s30 + $0x54] sm:$0xf0] }
  0x9f   : > { %1654 = vmatpush.bf16.msra.mxu3 %v2231_v12  ;;  %v2223_v25 = vor.u32 %v2556_v22, %v2222_v20  ;;  %v2086_v26 = vld [vmem:[%s3029_s30 + $0xd0] sm:$0xf]  ;;  %v2522_v27 = vld [vmem:[%s3029_s30 + $0xd4] sm:$0xf0]  ;;  %v2023_v29 = vor.u32 %v2506_v24, %v2022_v23  ;;  %v2014_v35 = vld [vmem:[%s3029_s30 + $0x40] sm:$0xf] }
  0xa0   : > { %v2150_v28 = vld [vmem:[%s3029_s30 + $0x150] sm:$0xf]  ;;  %1616 = vmatpush.bf16.msra.mxu0 %v2031_v16  ;;  %v2538_v30 = vld [vmem:[%s3029_s30 + $0x154] sm:$0xf0]  ;;  %v2087_v33 = vor.u32 %v2522_v27, %v2086_v26  ;;  %v2504_v36 = vld [vmem:[%s3029_s30 + $0x44] sm:$0xf0] }
  0xa1   : > { %v2214_v31 = vld [vmem:[%s3029_s30 + $0x1d0] sm:$0xf]  ;;  %v2554_v32 = vld [vmem:[%s3029_s30 + $0x1d4] sm:$0xf0]  ;;  %1629 = vmatpush.bf16.msra.mxu1 %v2095_v17  ;;  %v2151_v34 = vor.u32 %v2538_v30, %v2150_v28  ;;  %v2078_v37 = vld [vmem:[%s3029_s30 + $0xc0] sm:$0xf]  ;;  %v2015_v44 = vor.u32 %v2504_v36, %v2014_v35 }
  0xa2   : > { %1642 = vmatpush.bf16.msra.mxu2 %v2159_v21  ;;  %v2215_v38 = vor.u32 %v2554_v32, %v2214_v31  ;;  %v2520_v39 = vld [vmem:[%s3029_s30 + $0xc4] sm:$0xf0]  ;;  %v2142_v40 = vld [vmem:[%s3029_s30 + $0x140] sm:$0xf]  ;;  %v2006_v47 = vld [vmem:[%s3029_s30 + $0x30] sm:$0xf] }
  0xa3   : > { %1655 = vmatpush.bf16.msra.mxu3 %v2223_v25  ;;  %v2536_v41 = vld [vmem:[%s3029_s30 + $0x144] sm:$0xf0]  ;;  %v2206_v42 = vld [vmem:[%s3029_s30 + $0x1c0] sm:$0xf]  ;;  %v2079_v45 = vor.u32 %v2520_v39, %v2078_v37  ;;  %v2502_v48 = vld [vmem:[%s3029_s30 + $0x34] sm:$0xf0] }
  0xa4   : > { %v2552_v43 = vld [vmem:[%s3029_s30 + $0x1c4] sm:$0xf0]  ;;  %1617 = vmatpush.bf16.msra.mxu0 %v2023_v29  ;;  %v2143_v46 = vor.u32 %v2536_v41, %v2142_v40  ;;  %v2070_v49 = vld [vmem:[%s3029_s30 + $0xb0] sm:$0xf]  ;;  %v2518_v51 = vld [vmem:[%s3029_s30 + $0xb4] sm:$0xf0]  ;;  %v2007_v56 = vor.u32 %v2502_v48, %v2006_v47 }
  0xa5   : > { %1630 = vmatpush.bf16.msra.mxu1 %v2087_v33  ;;  %v2207_v50 = vor.u32 %v2552_v43, %v2206_v42  ;;  %v2134_v52 = vld [vmem:[%s3029_s30 + $0x130] sm:$0xf]  ;;  %v2534_v53 = vld [vmem:[%s3029_s30 + $0x134] sm:$0xf0]  ;;  %v2071_v57 = vor.u32 %v2518_v51, %v2070_v49  ;;  %v1998_v59 = vld [vmem:[%s3029_s30 + $0x20] sm:$0xf] }
  0xa6   : > { %1643 = vmatpush.bf16.msra.mxu2 %v2151_v34  ;;  %v2198_v54 = vld [vmem:[%s3029_s30 + $0x1b0] sm:$0xf]  ;;  %v2550_v55 = vld [vmem:[%s3029_s30 + $0x1b4] sm:$0xf0]  ;;  %v2135_v58 = vor.u32 %v2534_v53, %v2134_v52  ;;  %v2500_v60 = vld [vmem:[%s3029_s30 + $0x24] sm:$0xf0] }
  0xa7   : > { %1656 = vmatpush.bf16.msra.mxu3 %v2215_v38  ;;  %v2062_v61 = vld [vmem:[%s3029_s30 + $0xa0] sm:$0xf]  ;;  %v2199_v62 = vor.u32 %v2550_v55, %v2198_v54  ;;  %v2516_v63 = vld [vmem:[%s3029_s30 + $0xa4] sm:$0xf0]  ;;  %v1999_v4 = vor.u32 %v2500_v60, %v1998_v59  ;;  %v1990_v7 = vld [vmem:[%s3029_s30 + $0x10] sm:$0xf] }
  0xa8   : > { %1618 = vmatpush.bf16.msra.mxu0 %v2015_v44  ;;  %v2126_v0 = vld [vmem:[%s3029_s30 + $0x120] sm:$0xf]  ;;  %v2532_v1 = vld [vmem:[%s3029_s30 + $0x124] sm:$0xf0]  ;;  %v2063_v5 = vor.u32 %v2516_v63, %v2062_v61  ;;  %v2498_v8 = vld [vmem:[%s3029_s30 + $0x14] sm:$0xf0] }
  0xa9   : > { %1631 = vmatpush.bf16.msra.mxu1 %v2079_v45  ;;  %v2190_v2 = vld [vmem:[%s3029_s30 + $0x1a0] sm:$0xf]  ;;  %v2548_v3 = vld [vmem:[%s3029_s30 + $0x1a4] sm:$0xf0]  ;;  %v2127_v6 = vor.u32 %v2532_v1, %v2126_v0  ;;  %v2054_v9 = vld [vmem:[%s3029_s30 + $0x90] sm:$0xf]  ;;  %v1991_v16 = vor.u32 %v2498_v8, %v1990_v7 }
  0xaa   : > { %1644 = vmatpush.bf16.msra.mxu2 %v2143_v46  ;;  %v2191_v10 = vor.u32 %v2548_v3, %v2190_v2  ;;  %v2514_v11 = vld [vmem:[%s3029_s30 + $0x94] sm:$0xf0]  ;;  %v2118_v12 = vld [vmem:[%s3029_s30 + $0x110] sm:$0xf]  ;;  %v1982_v17 = vld [vmem:[%s3029_s30] sm:$0xf] }
  0xab   : > { %1657 = vmatpush.bf16.msra.mxu3 %v2207_v50  ;;  %v2530_v13 = vld [vmem:[%s3029_s30 + $0x114] sm:$0xf0]  ;;  %v2182_v14 = vld [vmem:[%s3029_s30 + $0x190] sm:$0xf]  ;;  %v2496_v18 = vld [vmem:[%s3029_s30 + $0x4] sm:$0xf0]  ;;  %v2055_v19 = vor.u32 %v2514_v11, %v2054_v9 }
  0xac   : > { %1619 = vmatpush.bf16.msra.mxu0 %v2007_v56  ;;  %v2546_v15 = vld [vmem:[%s3029_s30 + $0x194] sm:$0xf0]  ;;  %v2119_v20 = vor.u32 %v2530_v13, %v2118_v12  ;;  %v2046_v21 = vld [vmem:[%s3029_s30 + $0x80] sm:$0xf]  ;;  %v2512_v22 = vld [vmem:[%s3029_s30 + $0x84] sm:$0xf0]  ;;  %v1983_v31 = vor.u32 %v2496_v18, %v1982_v17 }
  0xad   : > { %1632 = vmatpush.bf16.msra.mxu1 %v2071_v57  ;;  %v2110_v23 = vld [vmem:[%s3029_s30 + $0x100] sm:$0xf]  ;;  %v2183_v24 = vor.u32 %v2546_v15, %v2182_v14  ;;  %v2528_v25 = vld [vmem:[%s3029_s30 + $0x104] sm:$0xf0]  ;;  %v2294_v28 = vld [vmem:[%s3029_s30 + $0x270] sm:$0xf]  ;;  %v2047_v35 = vor.u32 %v2512_v22, %v2046_v21 }
  0xae   : > { %1645 = vmatpush.bf16.msra.mxu2 %v2135_v58  ;;  %v2174_v26 = vld [vmem:[%s3029_s30 + $0x180] sm:$0xf]  ;;  %v2544_v27 = vld [vmem:[%s3029_s30 + $0x184] sm:$0xf0]  ;;  %v2574_v29 = vld [vmem:[%s3029_s30 + $0x274] sm:$0xf0]  ;;  %v2111_v36 = vor.u32 %v2528_v25, %v2110_v23 }
  0xaf   : > { %1658 = vmatpush.bf16.msra.mxu3 %v2199_v62  ;;  %v2358_v30 = vld [vmem:[%s3029_s30 + $0x2f0] sm:$0xf]  ;;  %v2590_v32 = vld [vmem:[%s3029_s30 + $0x2f4] sm:$0xf0]  ;;  %v2175_v39 = vor.u32 %v2544_v27, %v2174_v26  ;;  %v2295_v40 = vor.u32 %v2574_v29, %v2294_v28  ;;  %v2286_v43 = vld [vmem:[%s3029_s30 + $0x260] sm:$0xf] }
  0xb0   : > { %1620 = vmatpush.bf16.msra.mxu0 %v1999_v4  ;;  %v2422_v33 = vld [vmem:[%s3029_s30 + $0x370] sm:$0xf]  ;;  %v2606_v34 = vld [vmem:[%s3029_s30 + $0x374] sm:$0xf0]  ;;  %v2359_v41 = vor.u32 %v2590_v32, %v2358_v30  ;;  %v2572_v44 = vld [vmem:[%s3029_s30 + $0x264] sm:$0xf0] }
  0xb1   : > { %1633 = vmatpush.bf16.msra.mxu1 %v2063_v5  ;;  %v2486_v37 = vld [vmem:[%s3029_s30 + $0x3f0] sm:$0xf]  ;;  %v2622_v38 = vld [vmem:[%s3029_s30 + $0x3f4] sm:$0xf0]  ;;  %v2423_v42 = vor.u32 %v2606_v34, %v2422_v33  ;;  %v2350_v45 = vld [vmem:[%s3029_s30 + $0x2e0] sm:$0xf]  ;;  %v2287_v52 = vor.u32 %v2572_v44, %v2286_v43 }
  0xb2   : > { %1646 = vmatpush.bf16.msra.mxu2 %v2127_v6  ;;  %v2487_v46 = vor.u32 %v2622_v38, %v2486_v37  ;;  %v2588_v47 = vld [vmem:[%s3029_s30 + $0x2e4] sm:$0xf0]  ;;  %v2414_v48 = vld [vmem:[%s3029_s30 + $0x360] sm:$0xf]  ;;  %v2278_v53 = vld [vmem:[%s3029_s30 + $0x250] sm:$0xf] }
  0xb3   : > { %1659 = vmatpush.bf16.msra.mxu3 %v2191_v10  ;;  %v2604_v49 = vld [vmem:[%s3029_s30 + $0x364] sm:$0xf0]  ;;  %v2478_v50 = vld [vmem:[%s3029_s30 + $0x3e0] sm:$0xf]  ;;  %v2351_v54 = vor.u32 %v2588_v47, %v2350_v45  ;;  %v2570_v56 = vld [vmem:[%s3029_s30 + $0x254] sm:$0xf0] }
  0xb4   : > { %1621 = vmatpush.bf16.msra.mxu0 %v1991_v16  ;;  %v2620_v51 = vld [vmem:[%s3029_s30 + $0x3e4] sm:$0xf0]  ;;  %v2415_v55 = vor.u32 %v2604_v49, %v2414_v48  ;;  %v2342_v57 = vld [vmem:[%s3029_s30 + $0x2d0] sm:$0xf]  ;;  %v2586_v60 = vld [vmem:[%s3029_s30 + $0x2d4] sm:$0xf0]  ;;  %v2279_v3 = vor.u32 %v2570_v56, %v2278_v53 }
  0xb5   : > { %1634 = vmatpush.bf16.msra.mxu1 %v2055_v19  ;;  %v816_v58 = vld [vmem:[%s3353_s0 + $0x8] sm:$0xff]  ;;  %v2479_v59 = vor.u32 %v2620_v51, %v2478_v50  ;;  %v2406_v61 = vld [vmem:[%s3029_s30 + $0x350] sm:$0xf]  ;;  %v2602_v62 = vld [vmem:[%s3029_s30 + $0x354] sm:$0xf0]  ;;  %v2343_v7 = vor.u32 %v2586_v60, %v2342_v57  ;;  %s3364_s12 = smov (!%p793_p9, %s1977_s12), 3 }
  0xb6   : > { %1647 = vmatpush.bf16.msra.mxu2 %v2119_v20  ;;  %v953_v63 = vunpack.c.l.b16 %v816_v58  ;;  %v954_v0 = vunpack.c.h.b16 %v816_v58  ;;  %v2470_v1 = vld [vmem:[%s3029_s30 + $0x3d0] sm:$0xf]  ;;  %v2618_v2 = vld [vmem:[%s3029_s30 + $0x3d4] sm:$0xf0]  ;;  %v815_v5 = vld [vmem:[%s3353_s0] sm:$0xff]  ;;  %v2407_v8 = vor.u32 %v2602_v62, %v2406_v61  ;;  %s795_s21 = scalar_lea.vmem %s3355_s2, %s3364_s12  ;;  %s1979_s14 = sshll.u32 %s3364_s12, 2 }
  0xb7   : > { %1660 = vmatpush.bf16.msra.mxu3 %v2183_v24  ;;  %v2270_v9 = vld [vmem:[%s3029_s30 + $0x240] sm:$0xf]  ;;  %v2568_v10 = vld [vmem:[%s3029_s30 + $0x244] sm:$0xf0]  ;;  %v951_v12 = vunpack.c.l.b16 %v815_v5  ;;  %v952_v13 = vunpack.c.h.b16 %v815_v5  ;;  %v2471_v14 = vor.u32 %v2618_v2, %v2470_v1  ;;  %v2262_v25 = vld [vmem:[%s3029_s30 + $0x230] sm:$0xf]  ;;  %s805_s24 = scalar_lea.vmem %s3356_s3, %s1979_s14 }
  0xb8   : > { %1622 = vmatpush.bf16.msra.mxu0 %v1983_v31  ;;  %v3122_v4 = vpack.c.b16 %v953_v63, %v953_v63  ;;  %v3127_v6 = vpack.c.b16 %v954_v0, %v954_v0  ;;  %v2334_v11 = vld [vmem:[%s3029_s30 + $0x2c0] sm:$0xf]  ;;  %v2584_v15 = vld [vmem:[%s3029_s30 + $0x2c4] sm:$0xf0]  ;;  %v2271_v22 = vor.u32 %v2568_v10, %v2270_v9  ;;  %v2566_v26 = vld [vmem:[%s3029_s30 + $0x234] sm:$0xf0] }
  0xb9   : > { %1635 = vmatpush.bf16.msra.mxu1 %v2047_v35  ;;  %v2398_v16 = vld [vmem:[%s3029_s30 + $0x340] sm:$0xf]  ;;  %v2600_v17 = vld [vmem:[%s3029_s30 + $0x344] sm:$0xf0]  ;;  %v3138_v20 = vpack.c.b16 %v951_v12, %v951_v12  ;;  %v3141_v21 = vpack.c.b16 %v952_v13, %v952_v13  ;;  %v2335_v23 = vor.u32 %v2584_v15, %v2334_v11  ;;  %v2326_v27 = vld [vmem:[%s3029_s30 + $0x2b0] sm:$0xf]  ;;  %v2263_v34 = vor.u32 %v2566_v26, %v2262_v25 }
  0xba   : > { %1648 = vmatpush.bf16.msra.mxu2 %v2111_v36  ;;  %v2462_v18 = vld [vmem:[%s3029_s30 + $0x3c0] sm:$0xf]  ;;  %v2616_v19 = vld [vmem:[%s3029_s30 + $0x3c4] sm:$0xf0]  ;;  %v2399_v24 = vor.u32 %v2600_v17, %v2398_v16  ;;  %v2582_v29 = vld [vmem:[%s3029_s30 + $0x2b4] sm:$0xf0] }
  0xbb   : > { %1661 = vmatpush.bf16.msra.mxu3 %v2175_v39  ;;  %v2463_v28 = vor.u32 %v2616_v19, %v2462_v18  ;;  %v2390_v30 = vld [vmem:[%s3029_s30 + $0x330] sm:$0xf]  ;;  %v2598_v31 = vld [vmem:[%s3029_s30 + $0x334] sm:$0xf0]  ;;  %1623 = vmatmul.bf16.vlgmr.msra.gmra.mxu0 %v3138_v20  ;;  %v2327_v35 = vor.u32 %v2582_v29, %v2326_v27  ;;  %v2254_v37 = vld [vmem:[%s3029_s30 + $0x220] sm:$0xf] }
  0xbc   : > { %1667 = vmatpush.bf16.msrb.mxu0 %v2295_v40  ;;  %v2454_v32 = vld [vmem:[%s3029_s30 + $0x3b0] sm:$0xf]  ;;  %v2614_v33 = vld [vmem:[%s3029_s30 + $0x3b4] sm:$0xf0]  ;;  %1636 = vmatmul.bf16.vlgmr.msra.gmra.mxu1 %v3141_v21  ;;  %v2391_v36 = vor.u32 %v2598_v31, %v2390_v30  ;;  %v2564_v38 = vld [vmem:[%s3029_s30 + $0x224] sm:$0xf0] }
  0xbd   : > { %1680 = vmatpush.bf16.msrb.mxu1 %v2359_v41  ;;  %1649 = vmatmul.bf16.vlgmr.msra.gmra.mxu2 %v3122_v4  ;;  %v2318_v39 = vld [vmem:[%s3029_s30 + $0x2a0] sm:$0xf]  ;;  %v2455_v40 = vor.u32 %v2614_v33, %v2454_v32  ;;  %v2580_v41 = vld [vmem:[%s3029_s30 + $0x2a4] sm:$0xf0]  ;;  %v2246_v49 = vld [vmem:[%s3029_s30 + $0x210] sm:$0xf] }
  0xbe   : > { %1693 = vmatpush.bf16.msrb.mxu2 %v2423_v42  ;;  %1662 = vmatmul.bf16.vlgmr.msra.gmra.mxu3 %v3127_v6  ;;  %v2382_v42 = vld [vmem:[%s3029_s30 + $0x320] sm:$0xf]  ;;  %v2596_v43 = vld [vmem:[%s3029_s30 + $0x324] sm:$0xf0]  ;;  %v2319_v47 = vor.u32 %v2580_v41, %v2318_v39  ;;  %v2562_v50 = vld [vmem:[%s3029_s30 + $0x214] sm:$0xf0] }
  0xbf   : > { %1706 = vmatpush.bf16.msrb.mxu3 %v2487_v46  ;;  %v2446_v44 = vld [vmem:[%s3029_s30 + $0x3a0] sm:$0xf]  ;;  %v2612_v45 = vld [vmem:[%s3029_s30 + $0x3a4] sm:$0xf0]  ;;  %v2255_v46 = vor.u32 %v2564_v38, %v2254_v37  ;;  %v2383_v48 = vor.u32 %v2596_v43, %v2382_v42  ;;  %v2310_v51 = vld [vmem:[%s3029_s30 + $0x290] sm:$0xf] }
  0xc0   : > { %1668 = vmatpush.bf16.msrb.mxu0 %v2287_v52  ;;  %v2447_v52 = vor.u32 %v2612_v45, %v2446_v44  ;;  %v2578_v53 = vld [vmem:[%s3029_s30 + $0x294] sm:$0xf0]  ;;  %v2438_v56 = vld [vmem:[%s3029_s30 + $0x390] sm:$0xf]  ;;  %v2238_v58 = vld [vmem:[%s3029_s30 + $0x200] sm:$0xf] }
  0xc1   : > { %1681 = vmatpush.bf16.msrb.mxu1 %v2351_v54  ;;  %v2374_v54 = vld [vmem:[%s3029_s30 + $0x310] sm:$0xf]  ;;  %v2610_v57 = vld [vmem:[%s3029_s30 + $0x394] sm:$0xf0]  ;;  %v2560_v60 = vld [vmem:[%s3029_s30 + $0x204] sm:$0xf0]  ;;  %v2311_v63 = vor.u32 %v2578_v53, %v2310_v51 }
  0xc2   : > { %1694 = vmatpush.bf16.msrb.mxu2 %v2415_v55  ;;  %v2594_v55 = vld [vmem:[%s3029_s30 + $0x314] sm:$0xf0]  ;;  %v2302_v61 = vld [vmem:[%s3029_s30 + $0x280] sm:$0xf]  ;;  %v2576_v62 = vld [vmem:[%s3029_s30 + $0x284] sm:$0xf0]  ;;  %v2439_v5 = vor.u32 %v2610_v57, %v2438_v56  ;;  %v2239_v13 = vor.u32 %v2560_v60, %v2238_v58 }
  0xc3   : > { %1707 = vmatpush.bf16.msrb.mxu3 %v2479_v59  ;;  %v2247_v59 = vor.u32 %v2562_v50, %v2246_v49  ;;  %v2375_v0 = vor.u32 %v2594_v55, %v2374_v54  ;;  %v2366_v1 = vld [vmem:[%s3029_s30 + $0x300] sm:$0xf]  ;;  %v2592_v2 = vld [vmem:[%s3029_s30 + $0x304] sm:$0xf0]  ;;  %v817_v9 = vld [vmem:[%s3353_s0 + $0x10] sm:$0xff]  ;;  %v2303_v18 = vor.u32 %v2576_v62, %v2302_v61 }
  0xc4   : > { %1669 = vmatpush.bf16.msrb.mxu0 %v2279_v3  ;;  %v818_v3 = vld [vmem:[%s3353_s0 + $0x18] sm:$0xff]  ;;  %v2509_v10 = vld [vmem:[%s3029_s30 + $0x74] sm:$0xf]  ;;  %v2367_v19 = vor.u32 %v2592_v2, %v2366_v1  ;;  %v2507_v31 = vld [vmem:[%s3029_s30 + $0x64] sm:$0xf] }
  0xc5   : > { %1682 = vmatpush.bf16.msrb.mxu1 %v2343_v7  ;;  %v2430_v7 = vld [vmem:[%s3029_s30 + $0x380] sm:$0xf]  ;;  %v2040_v11 = vld [vmem:[%s3029_s30 + $0x78] sm:$0xf0]  ;;  %v2525_v12 = vld [vmem:[%s3029_s30 + $0xf4] sm:$0xf]  ;;  %v957_v17 = vunpack.c.l.b16 %v818_v3  ;;  %v958_v25 = vunpack.c.h.b16 %v818_v3 }
  0xc6   : > { %1695 = vmatpush.bf16.msrb.mxu2 %v2407_v8  ;;  %v2608_v8 = vld [vmem:[%s3029_s30 + $0x384] sm:$0xf0]  ;;  %v2541_v15 = vld [vmem:[%s3029_s30 + $0x174] sm:$0xf]  ;;  %v2168_v16 = vld [vmem:[%s3029_s30 + $0x178] sm:$0xf0]  ;;  %v2043_v27 = vor.u32 %v2509_v10, %v2040_v11 }
  0xc7   : > { %1708 = vmatpush.bf16.msrb.mxu3 %v2471_v14  ;;  %v2104_v14 = vld [vmem:[%s3029_s30 + $0xf8] sm:$0xf0]  ;;  %v2431_v26 = vor.u32 %v2608_v8, %v2430_v7  ;;  %v2171_v30 = vor.u32 %v2541_v15, %v2168_v16  ;;  %v2032_v32 = vld [vmem:[%s3029_s30 + $0x68] sm:$0xf0]  ;;  %v2523_v33 = vld [vmem:[%s3029_s30 + $0xe4] sm:$0xf]  ;;  %v3197_v38 = vpack.c.b16 %v957_v17, %v957_v17  ;;  %v3203_v42 = vpack.c.b16 %v958_v25, %v958_v25 }
  0xc8   : > { %1670 = vmatpush.bf16.msrb.mxu0 %v2271_v22  ;;  %v2557_v22 = vld [vmem:[%s3029_s30 + $0x1f4] sm:$0xf]  ;;  %v2107_v29 = vor.u32 %v2525_v12, %v2104_v14  ;;  %v2160_v37 = vld [vmem:[%s3029_s30 + $0x168] sm:$0xf0]  ;;  %v2555_v39 = vld [vmem:[%s3029_s30 + $0x1e4] sm:$0xf]  ;;  %v2035_v43 = vor.u32 %v2507_v31, %v2032_v32 }
  0xc9   : > { %1683 = vmatpush.bf16.msrb.mxu1 %v2335_v23  ;;  %v2232_v23 = vld [vmem:[%s3029_s30 + $0x1f8] sm:$0xf0]  ;;  %v2521_v49 = vld [vmem:[%s3029_s30 + $0xd4] sm:$0xf]  ;;  %v2016_v60 = vld [vmem:[%s3029_s30 + $0x48] sm:$0xf0] }
  0xca   : > { %1696 = vmatpush.bf16.msrb.mxu2 %v2399_v24  ;;  %v955_v24 = vunpack.c.l.b16 %v817_v9  ;;  %v2088_v51 = vld [vmem:[%s3029_s30 + $0xd8] sm:$0xf0]  ;;  %v2553_v54 = vld [vmem:[%s3029_s30 + $0x1d4] sm:$0xf]  ;;  %v2519_v61 = vld [vmem:[%s3029_s30 + $0xc4] sm:$0xf] }
  0xcb   : > { %1709 = vmatpush.bf16.msrb.mxu3 %v2463_v28  ;;  %v956_v28 = vunpack.c.h.b16 %v817_v9  ;;  %v2152_v53 = vld [vmem:[%s3029_s30 + $0x158] sm:$0xf0]  ;;  %v2091_v57 = vor.u32 %v2521_v49, %v2088_v51  ;;  %v2144_v1 = vld [vmem:[%s3029_s30 + $0x148] sm:$0xf0]  ;;  %v2551_v2 = vld [vmem:[%s3029_s30 + $0x1c4] sm:$0xf] }
  0xcc   : > { %1671 = vmatpush.bf16.msrb.mxu0 %v2263_v34  ;;  %v2235_v34 = vor.u32 %v2557_v22, %v2232_v23  ;;  %v3201_v41 = vpack.c.b16 %v955_v24, %v955_v24  ;;  %v2216_v55 = vld [vmem:[%s3029_s30 + $0x1d8] sm:$0xf0]  ;;  %v2208_v3 = vld [vmem:[%s3029_s30 + $0x1c8] sm:$0xf0]  ;;  %v2501_v9 = vld [vmem:[%s3029_s30 + $0x34] sm:$0xf] }
  0xcd   : > { %1684 = vmatpush.bf16.msrb.mxu1 %v2327_v35  ;;  %v2096_v35 = vld [vmem:[%s3029_s30 + $0xe8] sm:$0xf0]  ;;  %v3205_v44 = vpack.c.b16 %v956_v28, %v956_v28  ;;  %v2219_v62 = vor.u32 %v2553_v54, %v2216_v55  ;;  %v2008_v10 = vld [vmem:[%s3029_s30 + $0x38] sm:$0xf0]  ;;  %v2517_v11 = vld [vmem:[%s3029_s30 + $0xb4] sm:$0xf]  ;;  %v2211_v12 = vor.u32 %v2551_v2, %v2208_v3 }
  0xce   : > { %1697 = vmatpush.bf16.msrb.mxu2 %v2391_v36  ;;  %v2539_v36 = vld [vmem:[%s3029_s30 + $0x164] sm:$0xf]  ;;  %v2099_v45 = vor.u32 %v2523_v33, %v2096_v35  ;;  %v2533_v14 = vld [vmem:[%s3029_s30 + $0x134] sm:$0xf]  ;;  %v2136_v15 = vld [vmem:[%s3029_s30 + $0x138] sm:$0xf0] }
  0xcf   : > { %1710 = vmatpush.bf16.msrb.mxu3 %v2455_v40  ;;  %v2224_v40 = vld [vmem:[%s3029_s30 + $0x1e8] sm:$0xf0]  ;;  %v2549_v16 = vld [vmem:[%s3029_s30 + $0x1b4] sm:$0xf]  ;;  %v2200_v17 = vld [vmem:[%s3029_s30 + $0x1b8] sm:$0xf0]  ;;  %v2139_v22 = vor.u32 %v2533_v14, %v2136_v15 }
  0xd0   : > { %1672 = vmatpush.bf16.msrb.mxu0 %v2255_v46  ;;  %v2163_v46 = vor.u32 %v2539_v36, %v2160_v37  ;;  %v2227_v50 = vor.u32 %v2555_v39, %v2224_v40  ;;  %v2499_v23 = vld [vmem:[%s3029_s30 + $0x24] sm:$0xf]  ;;  %v2000_v24 = vld [vmem:[%s3029_s30 + $0x28] sm:$0xf0]  ;;  %v2497_v35 = vld [vmem:[%s3029_s30 + $0x14] sm:$0xf] }
  0xd1   : > { %1685 = vmatpush.bf16.msrb.mxu1 %v2319_v47  ;;  %v2505_v47 = vld [vmem:[%s3029_s30 + $0x54] sm:$0xf]  ;;  %v2515_v25 = vld [vmem:[%s3029_s30 + $0xa4] sm:$0xf]  ;;  %v2192_v31 = vld [vmem:[%s3029_s30 + $0x1a8] sm:$0xf0]  ;;  %v2003_v32 = vor.u32 %v2499_v23, %v2000_v24 }
  0xd2   : > { %1698 = vmatpush.bf16.msrb.mxu2 %v2383_v48  ;;  %v2024_v48 = vld [vmem:[%s3029_s30 + $0x58] sm:$0xf0]  ;;  %v2531_v28 = vld [vmem:[%s3029_s30 + $0x124] sm:$0xf]  ;;  %v2513_v37 = vld [vmem:[%s3029_s30 + $0x94] sm:$0xf] }
  0xd3   : > { %1711 = vmatpush.bf16.msrb.mxu3 %v2447_v52  ;;  %v2537_v52 = vld [vmem:[%s3029_s30 + $0x154] sm:$0xf]  ;;  %v2027_v56 = vor.u32 %v2505_v47, %v2024_v48  ;;  %v1992_v36 = vld [vmem:[%s3029_s30 + $0x18] sm:$0xf0]  ;;  %v2495_v49 = vld [vmem:[%s3029_s30 + $0x4] sm:$0xf] }
  0xd4   : > { %1673 = vmatpush.bf16.msrb.mxu0 %v2247_v59  ;;  %v2155_v58 = vor.u32 %v2537_v52, %v2152_v53  ;;  %v2503_v59 = vld [vmem:[%s3029_s30 + $0x44] sm:$0xf]  ;;  %v2056_v40 = vld [vmem:[%s3029_s30 + $0x98] sm:$0xf0]  ;;  %v1995_v48 = vor.u32 %v2497_v35, %v1992_v36  ;;  %v2048_v54 = vld [vmem:[%s3029_s30 + $0x88] sm:$0xf0] }
  0xd5   : > { %1686 = vmatpush.bf16.msrb.mxu1 %v2311_v63  ;;  %v2080_v63 = vld [vmem:[%s3029_s30 + $0xc8] sm:$0xf0]  ;;  %v2184_v47 = vld [vmem:[%s3029_s30 + $0x198] sm:$0xf0]  ;;  %v2059_v51 = vor.u32 %v2513_v37, %v2056_v40  ;;  %v2511_v53 = vld [vmem:[%s3029_s30 + $0x84] sm:$0xf] }
  0xd6   : > { %1699 = vmatpush.bf16.msrb.mxu2 %v2375_v0  ;;  %v2535_v0 = vld [vmem:[%s3029_s30 + $0x144] sm:$0xf]  ;;  %v2083_v7 = vor.u32 %v2519_v61, %v2080_v63  ;;  %v2296_v61 = vld [vmem:[%s3029_s30 + $0x278] sm:$0xf0]  ;;  %v2051_v3 = vor.u32 %v2511_v53, %v2048_v54  ;;  %v2288_v14 = vld [vmem:[%s3029_s30 + $0x268] sm:$0xf0] }
  0xd7   : > { %1712 = vmatpush.bf16.msrb.mxu3 %v2439_v5  ;;  %v2019_v5 = vor.u32 %v2503_v59, %v2016_v60  ;;  %v2147_v8 = vor.u32 %v2535_v0, %v2144_v1  ;;  %v2527_v55 = vld [vmem:[%s3029_s30 + $0x104] sm:$0xf]  ;;  %v2176_v59 = vld [vmem:[%s3029_s30 + $0x188] sm:$0xf0]  ;;  %v2573_v60 = vld [vmem:[%s3029_s30 + $0x274] sm:$0xf] }
  0xd8   : > { %1674 = vmatpush.bf16.msrb.mxu0 %v2239_v13  ;;  %v2072_v13 = vld [vmem:[%s3029_s30 + $0xb8] sm:$0xf0]  ;;  %v2605_v1 = vld [vmem:[%s3029_s30 + $0x374] sm:$0xf]  ;;  %v2587_v15 = vld [vmem:[%s3029_s30 + $0x2e4] sm:$0xf] }
  0xd9   : > { %1687 = vmatpush.bf16.msrb.mxu1 %v2303_v18  ;;  %v2011_v18 = vor.u32 %v2501_v9, %v2008_v10  ;;  %v2360_v0 = vld [vmem:[%s3029_s30 + $0x2f8] sm:$0xf0]  ;;  %v2299_v10 = vor.u32 %v2573_v60, %v2296_v61  ;;  %v2480_v23 = vld [vmem:[%s3029_s30 + $0x3e8] sm:$0xf0]  ;;  %v2581_v53 = vld [vmem:[%s3029_s30 + $0x2b4] sm:$0xf] }
  0xda   : > { %1700 = vmatpush.bf16.msrb.mxu2 %v2367_v19  ;;  %v2075_v19 = vor.u32 %v2517_v11, %v2072_v13  ;;  %v2424_v2 = vld [vmem:[%s3029_s30 + $0x378] sm:$0xf0]  ;;  %v2571_v13 = vld [vmem:[%s3029_s30 + $0x264] sm:$0xf]  ;;  %v2272_v40 = vld [vmem:[%s3029_s30 + $0x248] sm:$0xf0] }
  0xdb   : > { %1713 = vmatpush.bf16.msrb.mxu3 %v2431_v26  ;;  %1675 = vmatmul.bf16.vlgmr.msrb.gmra.mxu0 %v3201_v41  ;;  %v2203_v26 = vor.u32 %v2549_v16, %v2200_v17  ;;  %v2352_v17 = vld [vmem:[%s3029_s30 + $0x2e8] sm:$0xf0]  ;;  %v2291_v24 = vor.u32 %v2571_v13, %v2288_v14  ;;  %v2472_v35 = vld [vmem:[%s3029_s30 + $0x3d8] sm:$0xf0]  ;;  %v2561_v13 = vld [vmem:[%s3029_s30 + $0x214] sm:$0xf] }
  0xdc   : > { %1719 = vmatpush.bf16.msra.mxu0 %v2043_v27  ;;  %1688 = vmatmul.bf16.vlgmr.msrb.gmra.mxu1 %v3205_v44  ;;  %v2064_v27 = vld [vmem:[%s3029_s30 + $0xa8] sm:$0xf0]  ;;  %v2248_v14 = vld [vmem:[%s3029_s30 + $0x218] sm:$0xf0] }
  0xdd   : > { %1732 = vmatpush.bf16.msra.mxu1 %v2107_v29  ;;  %1701 = vmatmul.bf16.vlgmr.msrb.gmra.mxu2 %v3197_v38  ;;  %v2128_v29 = vld [vmem:[%s3029_s30 + $0x128] sm:$0xf0]  ;;  %v2067_v33 = vor.u32 %v2515_v25, %v2064_v27  ;;  %v2355_v25 = vor.u32 %v2587_v15, %v2352_v17  ;;  %v2569_v27 = vld [vmem:[%s3029_s30 + $0x254] sm:$0xf]  ;;  %v2312_v17 = vld [vmem:[%s3029_s30 + $0x298] sm:$0xf0] }
  0xde   : > { %1745 = vmatpush.bf16.msra.mxu2 %v2171_v30  ;;  %1714 = vmatmul.bf16.vlgmr.msrb.gmra.mxu3 %v3203_v42  ;;  %v2547_v30 = vld [vmem:[%s3029_s30 + $0x1a4] sm:$0xf]  ;;  %v2577_v15 = vld [vmem:[%s3029_s30 + $0x294] sm:$0xf] }
  0xdf   : > { %1758 = vmatpush.bf16.msra.mxu3 %v2235_v34  ;;  %v2131_v34 = vor.u32 %v2531_v28, %v2128_v29  ;;  %v2195_v39 = vor.u32 %v2547_v30, %v2192_v31  ;;  %v2280_v28 = vld [vmem:[%s3029_s30 + $0x258] sm:$0xf0]  ;;  %v2585_v29 = vld [vmem:[%s3029_s30 + $0x2d4] sm:$0xf] }
  0xe0   : > { %1720 = vmatpush.bf16.msra.mxu0 %v2035_v43  ;;  %v2529_v43 = vld [vmem:[%s3029_s30 + $0x114] sm:$0xf]  ;;  %v2344_v31 = vld [vmem:[%s3029_s30 + $0x2d8] sm:$0xf0]  ;;  %v2283_v36 = vor.u32 %v2569_v27, %v2280_v28  ;;  %v2559_v27 = vld [vmem:[%s3029_s30 + $0x204] sm:$0xf] }
  0xe1   : > { %1733 = vmatpush.bf16.msra.mxu1 %v2099_v45  ;;  %v2120_v45 = vld [vmem:[%s3029_s30 + $0x118] sm:$0xf0]  ;;  %v2240_v28 = vld [vmem:[%s3029_s30 + $0x208] sm:$0xf0] }
  0xe2   : > { %1746 = vmatpush.bf16.msra.mxu2 %v2163_v46  ;;  %v2545_v46 = vld [vmem:[%s3029_s30 + $0x194] sm:$0xf]  ;;  %v2123_v52 = vor.u32 %v2529_v43, %v2120_v45  ;;  %v2583_v43 = vld [vmem:[%s3029_s30 + $0x2c4] sm:$0xf]  ;;  %v2336_v45 = vld [vmem:[%s3029_s30 + $0x2c8] sm:$0xf0] }
  0xe3   : > { %1759 = vmatpush.bf16.msra.mxu3 %v2227_v50  ;;  %v1984_v50 = vld [vmem:[%s3029_s30 + $0x8] sm:$0xf0] }
  0xe4   : > { %1721 = vmatpush.bf16.msra.mxu0 %v2027_v56  ;;  %v2187_v56 = vor.u32 %v2545_v46, %v2184_v47  ;;  %v1987_v63 = vor.u32 %v2495_v49, %v1984_v50  ;;  %v2400_v46 = vld [vmem:[%s3029_s30 + $0x348] sm:$0xf0]  ;;  %v2615_v47 = vld [vmem:[%s3029_s30 + $0x3c4] sm:$0xf]  ;;  %v2339_v49 = vor.u32 %v2583_v43, %v2336_v45 }
  0xe5   : > { %1734 = vmatpush.bf16.msra.mxu1 %v2091_v57  ;;  %v2112_v57 = vld [vmem:[%s3029_s30 + $0x108] sm:$0xf0] }
  0xe6   : > { %1747 = vmatpush.bf16.msra.mxu2 %v2155_v58  ;;  %v2543_v58 = vld [vmem:[%s3029_s30 + $0x184] sm:$0xf] }
  0xe7   : > { %1760 = vmatpush.bf16.msra.mxu3 %v2219_v62  ;;  %v2589_v62 = vld [vmem:[%s3029_s30 + $0x2f4] sm:$0xf]  ;;  %v2179_v9 = vor.u32 %v2543_v58, %v2176_v59  ;;  %v2456_v59 = vld [vmem:[%s3029_s30 + $0x3b8] sm:$0xf0] }
  0xe8   : > { %1722 = vmatpush.bf16.msra.mxu0 %v2019_v5  ;;  %v2115_v5 = vor.u32 %v2527_v55, %v2112_v57  ;;  %v2363_v11 = vor.u32 %v2589_v62, %v2360_v0  ;;  %v2328_v55 = vld [vmem:[%s3029_s30 + $0x2b8] sm:$0xf0]  ;;  %v2613_v58 = vld [vmem:[%s3029_s30 + $0x3b4] sm:$0xf]  ;;  %v2256_v0 = vld [vmem:[%s3029_s30 + $0x228] sm:$0xf0] }
  0xe9   : > { %1735 = vmatpush.bf16.msra.mxu1 %v2083_v7  ;;  %v2621_v7 = vld [vmem:[%s3029_s30 + $0x3f4] sm:$0xf]  ;;  %v2392_v57 = vld [vmem:[%s3029_s30 + $0x338] sm:$0xf0]  ;;  %v2331_v61 = vor.u32 %v2581_v53, %v2328_v55 }
  0xea   : > { %1748 = vmatpush.bf16.msra.mxu2 %v2147_v8  ;;  %v2488_v8 = vld [vmem:[%s3029_s30 + $0x3f8] sm:$0xf0] }
  0xeb   : > { %1761 = vmatpush.bf16.msra.mxu3 %v2211_v12  ;;  %v2427_v12 = vor.u32 %v2605_v1, %v2424_v2  ;;  %v2491_v16 = vor.u32 %v2621_v7, %v2488_v8  ;;  %v2579_v1 = vld [vmem:[%s3029_s30 + $0x2a4] sm:$0xf]  ;;  %v2459_v2 = vor.u32 %v2613_v58, %v2456_v59  ;;  %v2384_v7 = vld [vmem:[%s3029_s30 + $0x328] sm:$0xf0] }
  0xec   : > { %1723 = vmatpush.bf16.msra.mxu0 %v2011_v18  ;;  %v2603_v18 = vld [vmem:[%s3029_s30 + $0x364] sm:$0xf] }
  0xed   : > { %1736 = vmatpush.bf16.msra.mxu1 %v2075_v19  ;;  %v2416_v19 = vld [vmem:[%s3029_s30 + $0x368] sm:$0xf0]  ;;  %v2611_v8 = vld [vmem:[%s3029_s30 + $0x3a4] sm:$0xf] }
  0xee   : > { %1749 = vmatpush.bf16.msra.mxu2 %v2139_v22  ;;  %v2619_v22 = vld [vmem:[%s3029_s30 + $0x3e4] sm:$0xf] }
  0xef   : > { %1762 = vmatpush.bf16.msra.mxu3 %v2203_v26  ;;  %v2419_v26 = vor.u32 %v2603_v18, %v2416_v19  ;;  %v2483_v30 = vor.u32 %v2619_v22, %v2480_v23  ;;  %v2593_v18 = vld [vmem:[%s3029_s30 + $0x314] sm:$0xf]  ;;  %v2376_v19 = vld [vmem:[%s3029_s30 + $0x318] sm:$0xf0] }
  0xf0   : > { %1724 = vmatpush.bf16.msra.mxu0 %v2003_v32  ;;  %v2601_v32 = vld [vmem:[%s3029_s30 + $0x354] sm:$0xf]  ;;  %v2440_v23 = vld [vmem:[%s3029_s30 + $0x398] sm:$0xf0] }
  0xf1   : > { %1737 = vmatpush.bf16.msra.mxu1 %v2067_v33  ;;  %v2408_v33 = vld [vmem:[%s3029_s30 + $0x358] sm:$0xf0]  ;;  %v2609_v22 = vld [vmem:[%s3029_s30 + $0x394] sm:$0xf] }
  0xf2   : > { %1750 = vmatpush.bf16.msra.mxu2 %v2131_v34  ;;  %v2617_v34 = vld [vmem:[%s3029_s30 + $0x3d4] sm:$0xf]  ;;  %v2411_v37 = vor.u32 %v2601_v32, %v2408_v33  ;;  %v2591_v32 = vld [vmem:[%s3029_s30 + $0x304] sm:$0xf]  ;;  %v2368_v33 = vld [vmem:[%s3029_s30 + $0x308] sm:$0xf0] }
  0xf3   : > { %1763 = vmatpush.bf16.msra.mxu3 %v2195_v39  ;;  %v2567_v39 = vld [vmem:[%s3029_s30 + $0x244] sm:$0xf] }
  0xf4   : > { %1725 = vmatpush.bf16.msra.mxu0 %v1995_v48  ;;  %v2275_v48 = vor.u32 %v2567_v39, %v2272_v40 }
  0xf5   : > { %1738 = vmatpush.bf16.msra.mxu1 %v2059_v51  ;;  %v2565_v51 = vld [vmem:[%s3029_s30 + $0x234] sm:$0xf] }
  0xf6   : > { %1751 = vmatpush.bf16.msra.mxu2 %v2123_v52  ;;  %v2264_v52 = vld [vmem:[%s3029_s30 + $0x238] sm:$0xf0] }
  0xf7   : > { %1764 = vmatpush.bf16.msra.mxu3 %v2187_v56  ;;  %v2597_v56 = vld [vmem:[%s3029_s30 + $0x334] sm:$0xf]  ;;  %v2267_v60 = vor.u32 %v2565_v51, %v2264_v52 }
  0xf8   : > { %1726 = vmatpush.bf16.msra.mxu0 %v1987_v63  ;;  %v2395_v62 = vor.u32 %v2597_v56, %v2392_v57  ;;  %v2563_v63 = vld [vmem:[%s3029_s30 + $0x224] sm:$0xf] }
  0xf9   : > { %1739 = vmatpush.bf16.msra.mxu1 %v2051_v3  ;;  %v2320_v3 = vld [vmem:[%s3029_s30 + $0x2a8] sm:$0xf0] }
  0xfa   : > { %1752 = vmatpush.bf16.msra.mxu2 %v2115_v5  ;;  %v2595_v5 = vld [vmem:[%s3029_s30 + $0x324] sm:$0xf] }
  0xfb   : > { %1765 = vmatpush.bf16.msra.mxu3 %v2179_v9  ;;  %1727 = vmatmul.bf16.vlgmr.msra.gmra.mxu0 %v3138_v20  ;;  %v2475_v20 = vor.u32 %v2617_v34, %v2472_v35  ;;  %v2448_v9 = vld [vmem:[%s3029_s30 + $0x3a8] sm:$0xf0]  ;;  %v2607_v34 = vld [vmem:[%s3029_s30 + $0x384] sm:$0xf] }
  0xfc   : > { %1771 = vmatpush.bf16.msrb.mxu0 %v2299_v10  ;;  %1740 = vmatmul.bf16.vlgmr.msra.gmra.mxu1 %v3141_v21  ;;  %v2464_v21 = vld [vmem:[%s3029_s30 + $0x3c8] sm:$0xf0]  ;;  %v2259_v10 = vor.u32 %v2563_v63, %v2256_v0 }
  0xfd   : > { %1784 = vmatpush.bf16.msrb.mxu1 %v2363_v11  ;;  %1753 = vmatmul.bf16.vlgmr.msra.gmra.mxu2 %v3122_v4  ;;  %v2347_v4 = vor.u32 %v2585_v29, %v2344_v31  ;;  %v2467_v54 = vor.u32 %v2615_v47, %v2464_v21  ;;  %v2323_v11 = vor.u32 %v2579_v1, %v2320_v3  ;;  %v2575_v29 = vld [vmem:[%s3029_s30 + $0x284] sm:$0xf]  ;;  %v2304_v31 = vld [vmem:[%s3029_s30 + $0x288] sm:$0xf0] }
  0xfe   : > { %1797 = vmatpush.bf16.msrb.mxu2 %v2427_v12  ;;  %1766 = vmatmul.bf16.vlgmr.msra.gmra.mxu3 %v3127_v6  ;;  %v2599_v6 = vld [vmem:[%s3029_s30 + $0x344] sm:$0xf]  ;;  %v2387_v12 = vor.u32 %v2595_v5, %v2384_v7  ;;  %v2432_v35 = vld [vmem:[%s3029_s30 + $0x388] sm:$0xf0] }
  0xff   : > { %1810 = vmatpush.bf16.msrb.mxu3 %v2491_v16  ;;  %v2403_v50 = vor.u32 %v2599_v6, %v2400_v46  ;;  %v2451_v16 = vor.u32 %v2611_v8, %v2448_v9  ;;  %v2435_v39 = vor.u32 %v2607_v34, %v2432_v35 }
 0x100   : > { %1772 = vmatpush.bf16.msrb.mxu0 %v2291_v24  ;;  %v2251_v24 = vor.u32 %v2561_v13, %v2248_v14 }
 0x101   : > { %1785 = vmatpush.bf16.msrb.mxu1 %v2355_v25  ;;  %v2315_v25 = vor.u32 %v2577_v15, %v2312_v17 }
 0x102   : > { %1798 = vmatpush.bf16.msrb.mxu2 %v2419_v26  ;;  %v2379_v26 = vor.u32 %v2593_v18, %v2376_v19 }
 0x103   : > { %1811 = vmatpush.bf16.msrb.mxu3 %v2483_v30  ;;  %v2443_v30 = vor.u32 %v2609_v22, %v2440_v23 }
 0x104   : > { %1773 = vmatpush.bf16.msrb.mxu0 %v2283_v36  ;;  %v2243_v36 = vor.u32 %v2559_v27, %v2240_v28 }
 0x105   : > { %1786 = vmatpush.bf16.msrb.mxu1 %v2347_v4  ;;  %v2307_v4 = vor.u32 %v2575_v29, %v2304_v31 }
 0x106   : > { %1799 = vmatpush.bf16.msrb.mxu2 %v2411_v37  ;;  %v2371_v37 = vor.u32 %v2591_v32, %v2368_v33 }
 0x107   : > { %1812 = vmatpush.bf16.msrb.mxu3 %v2475_v20 }
 0x108   : > { %1774 = vmatpush.bf16.msrb.mxu0 %v2275_v48 }
 0x109   : > { %1787 = vmatpush.bf16.msrb.mxu1 %v2339_v49 }
 0x10a   : > { %1800 = vmatpush.bf16.msrb.mxu2 %v2403_v50 }
 0x10b   : > { %1813 = vmatpush.bf16.msrb.mxu3 %v2467_v54 }
 0x10c   : > { %1775 = vmatpush.bf16.msrb.mxu0 %v2267_v60 }
 0x10d   : > { %1788 = vmatpush.bf16.msrb.mxu1 %v2331_v61 }
 0x10e   : > { %1801 = vmatpush.bf16.msrb.mxu2 %v2395_v62 }
 0x10f   : > { %1814 = vmatpush.bf16.msrb.mxu3 %v2459_v2 }
 0x110   : > { %1776 = vmatpush.bf16.msrb.mxu0 %v2259_v10  ;;  %v1832_v10 = vld [vmem:[%s795_s21] sm:$0x3] }
 0x111   : > { %1789 = vmatpush.bf16.msrb.mxu1 %v2323_v11  ;;  %v1835_v17 = vperm.slane %v1832_v10, 1 }
 0x112   : > { %1802 = vmatpush.bf16.msrb.mxu2 %v2387_v12  ;;  %v1834_v12 = vperm.slane %v1832_v10, 0 }
 0x113   : > { %1815 = vmatpush.bf16.msrb.mxu3 %v2451_v16 }
 0x114   : > { %1777 = vmatpush.bf16.msrb.mxu0 %v2251_v24 }
 0x115   : > { %1790 = vmatpush.bf16.msrb.mxu1 %v2315_v25 }
 0x116   : > { %1803 = vmatpush.bf16.msrb.mxu2 %v2379_v26 }
 0x117   : > { %1816 = vmatpush.bf16.msrb.mxu3 %v2443_v30 }
 0x118   : > { %1778 = vmatpush.bf16.msrb.mxu0 %v2243_v36 }
 0x119   : > { %1791 = vmatpush.bf16.msrb.mxu1 %v2307_v4 }
 0x11a   : > { %1804 = vmatpush.bf16.msrb.mxu2 %v2371_v37 }
 0x11b   : > { %1817 = vmatpush.bf16.msrb.mxu3 %v2435_v39  ;;  %1779 = vmatmul.bf16.vlgmr.msrb.gmra.mxu0 %v3201_v41 }
 0x11c   : > { %1792 = vmatmul.bf16.vlgmr.msrb.gmra.mxu1 %v3205_v44 }
 0x11d   : > { %1805 = vmatmul.bf16.vlgmr.msrb.gmra.mxu2 %v3197_v38 }
 0x11e   : > { %1818 = vmatmul.bf16.vlgmr.msrb.gmra.mxu3 %v3203_v42 }
 0x138   : > { %v1624_v40 = vpop.f32.mrf.mxu0 }
 0x139   : > { %v1637_v43 = vpop.f32.mrf.mxu1 }
 0x13a   : > { %v1638_v20 = vadd.f32 %v1637_v43, %v1624_v40 }
 0x140   : > { %v1650_v45 = vpop.f32.mrf.mxu2  ;;  %v1626_v21 = vpop.f32.mrf.mxu0 }
 0x141   : > { %v1663_v6 = vpop.f32.mrf.mxu3  ;;  %v1651_v46 = vadd.f32 %v1650_v45, %v1638_v20  ;;  %v1639_v48 = vpop.f32.mrf.mxu1 }
 0x143   : > { %v1664_v47 = vadd.f32 %v1663_v6, %v1651_v46 }
 0x148   : > { %v1652_v49 = vpop.f32.mrf.mxu2 }
 0x149   : > { %v1665_v50 = vpop.f32.mrf.mxu3 }
 0x158   : > { %v1676_v51 = vpop.f32.mrf.mxu0 }
 0x159   : > { %v1689_v41 = vpop.f32.mrf.mxu1  ;;  %v1677_v0 = vadd.f32 %v1676_v51, %v1664_v47 }
 0x15b   : > { %v1690_v2 = vadd.f32 %v1689_v41, %v1677_v0 }
 0x160   : > { %v1702_v52 = vpop.f32.mrf.mxu2  ;;  %v1678_v53 = vpop.f32.mrf.mxu0 }
 0x161   : > { %v1715_v44 = vpop.f32.mrf.mxu3  ;;  %v1691_v38 = vpop.f32.mrf.mxu1  ;;  %v1703_v8 = vadd.f32 %v1702_v52, %v1690_v2 }
 0x163   : > { %v1716_v11 = vadd.f32 %v1715_v44, %v1703_v8 }
 0x165   : > { %v1838_v22 = vadd.f32 %v1834_v12, %v1716_v11 }
 0x167   : > { %v1840_v25 = vmax.f32 %v1838_v22, 0.0 }
 0x168   : > { %v1704_v54 = vpop.f32.mrf.mxu2 }
 0x169   : > { %v1717_v42 = vpop.f32.mrf.mxu3 }
 0x178   : > { %v1728_v55 = vpop.f32.mrf.mxu0 }
 0x179   : > { %v1741_v56 = vpop.f32.mrf.mxu1 }
 0x17a   : > { %v1742_v63 = vadd.f32 %v1741_v56, %v1728_v55 }
 0x180   : > { %v1754_v57 = vpop.f32.mrf.mxu2  ;;  %v1730_v59 = vpop.f32.mrf.mxu0 }
 0x181   : > { %v1767_v58 = vpop.f32.mrf.mxu3  ;;  %v1743_v60 = vpop.f32.mrf.mxu1  ;;  %v1755_v1 = vadd.f32 %v1754_v57, %v1742_v63 }
 0x183   : > { %v1768_v3 = vadd.f32 %v1767_v58, %v1755_v1 }
 0x188   : > { %v1756_v61 = vpop.f32.mrf.mxu2 }
 0x189   : > { %v1769_v62 = vpop.f32.mrf.mxu3 }
 0x198   : > { %v1780_v5 = vpop.f32.mrf.mxu0 }
 0x199   : > { %v1793_v7 = vpop.f32.mrf.mxu1  ;;  %v1781_v9 = vadd.f32 %v1780_v5, %v1768_v3 }
 0x19b   : > { %v1794_v13 = vadd.f32 %v1793_v7, %v1781_v9 }
 0x1a0   : > { %v1806_v14 = vpop.f32.mrf.mxu2  ;;  %v1782_v18 = vpop.f32.mrf.mxu0 }
 0x1a1   : > { %v1807_v15 = vadd.f32 %v1806_v14, %v1794_v13  ;;  %v1819_v16 = vpop.f32.mrf.mxu3  ;;  %v1795_v19 = vpop.f32.mrf.mxu1 }
 0x1a3   : > { %v1820_v23 = vadd.f32 %v1819_v16, %v1807_v15 }
 0x1a5   : > { %v1839_v24 = vadd.f32 %v1835_v17, %v1820_v23 }
 0x1a7   : > { %v1841_v26 = vmax.f32 %v1839_v24, 0.0 }
 0x1a8   : > { %v1808_v27 = vpop.f32.mrf.mxu2 }
 0x1a9   : > { %v1842_v28 = vpack.c.bf16 %v1841_v26, %v1840_v25  ;;  %v1821_v29 = vpop.f32.mrf.mxu3 }
 0x1ab   : > { %1843 = vst [vmem:[%s805_s24] sm:$0xff] %v1842_v28 }
 0x1ac PF: > { %s13_s16 = sadd.s32 1, %s2701_s16   ;;  %s3357_s12 = smov %s2689_s13 }
 0x1ad   : > { %p10_p10 = scmp.ge.s32.totalorder %s13_s16, 4   ;;  %s3358_s13 = smov %s2758_s20 }
 0x1ae   : > { %s3359_s14 = smov %s2697_s15  ;;  %s3360_s15 = smov %s3362_s17 }
 0x1af   :  { %12 = sbr.rel (!%p10_p10) target bundleno = 3 (0x3), region = 119 }

// kernel: cnn_forward.9
= control target key start
LH: loop header
LB: loop body
LE: loop exit
PB: predicated region body
PF: predicated region fallthrough
CT: control target
= control target key end

     0   :  { %s1283_s12 = smov 0   ;;  %s1285_s13 = smov 0   ;;  %s1524_s0 = inlined_call_operand.vmem [shape: bf16[8,512], index: 0, kind: input, shape index: {}]   ;;  %s1525_s1 = inlined_call_operand.vmem [shape: bf16[512,256], index: 1, kind: input, shape index: {}]   ;;  %s1526_s2 = inlined_call_operand.vmem [shape: f32[1,256], index: 2, kind: input, shape index: {}]   ;;  %s1527_s3 = inlined_call_operand.vmem [shape: f32[8,256], index: 3, kind: output, shape index: {}]  }
   0x1   :  { %s1287_s14 = smov 0   ;;  %s1289_s15 = smov 0  }
   0x2   :  { %s1291_s16 = smov 0  }
   0x3 LB: > { %s28_s17 = sadd.s32 1, %s1257_s15  ;;  %p76_p1 = scmp.ne.s32.totalorder %s1249_s13, %s1245_s12  ;;  %s1261_s16 = sphi %s1291_s16, %s13_s16   ;;  %s1257_s15 = sphi %s1289_s15, %s1531_s15   ;;  %s1253_s14 = sphi %s1287_s14, %s1530_s14   ;;  %s1249_s13 = sphi %s1285_s13, %s1529_s13   ;;  %s1245_s12 = sphi %s1283_s12, %s1528_s12  }
   0x4   : > { %p30_p0 = scmp.ge.s32.totalorder %s28_s17, 2  ;;  %p77_p2 = scmp.eq.s32.totalorder %s1261_s16, 0 }
   0x5   : > { %s69_s19 = sadd.s32 1, %s1249_s13  ;;  %p1014_p5 = scmp.ge.s32.totalorder %s1261_s16, 2 }
   0x6   : > { %s1533_s17 = smov (%p30_p0, %s28_s17), 0  ;;  %p78_p3 = por %p77_p2, %p76_p1 }
   0x7   : > { %s65_s18 = ssub.s32 %s1257_s15, %s1533_s17  ;;  %169 = sbr.rel (%p1014_p5) target bundleno = 80 (0x50), region = 20 }
   0x8   : > { %p67_p4 = scmp.eq.s32.totalorder %s65_s18, 0 }
   0xa   : > { %s1318_s20 = scalar_select %p67_p4, %s1249_s13, %s69_s19  }
   0xc   : > { %172 = sbr.rel (!%p78_p3) target bundleno = 80 (0x50), region = 24  ;;  %s174_s21 = sand.u32 (%p78_p3), 1, %s1249_s13  }
   0xd   : > { %s1016_s22 = sshll.u32 (%p78_p3), %s1257_s15, 2  ;;  %s1015_s23 = sshll.u32 (%p78_p3), %s174_s21, 8 }
   0xe   : > { %s1326_s26 = scalar_lea.vmem (%p78_p3), %s1525_s1, %s1016_s22  ;;  %s1330_s27 = scalar_lea.vmem (%p78_p3), [#allocation3], %s1015_s23 }
   0xf   : > { %v198_v0 = vld [vmem:[%s1326_s26] sm:$0xf] (%p78_p3)  ;;  %v200_v1 = vld [vmem:[%s1326_s26 + $0x8] sm:$0xf] (%p78_p3)  ;;  %v202_v2 = vld [vmem:[%s1326_s26 + $0x10] sm:$0xf] (%p78_p3) }
  0x10   : > { %199 = vst [vmem:[%s1330_s27] sm:$0xf] (%p78_p3), %v198_v0  ;;  %v204_v3 = vld [vmem:[%s1326_s26 + $0x18] sm:$0xf] (%p78_p3)  ;;  %v206_v4 = vld [vmem:[%s1326_s26 + $0x20] sm:$0xf] (%p78_p3) }
  0x11   : > { %201 = vst [vmem:[%s1330_s27 + $0x4] sm:$0xf] %v200_v1  ;;  %v208_v5 = vld [vmem:[%s1326_s26 + $0x28] sm:$0xf]  ;;  %v210_v6 = vld [vmem:[%s1326_s26 + $0x30] sm:$0xf] }
  0x12   : > { %203 = vst [vmem:[%s1330_s27 + $0x8] sm:$0xf] %v202_v2  ;;  %v212_v7 = vld [vmem:[%s1326_s26 + $0x38] sm:$0xf]  ;;  %v214_v8 = vld [vmem:[%s1326_s26 + $0x40] sm:$0xf] }
  0x13   : > { %205 = vst [vmem:[%s1330_s27 + $0xc] sm:$0xf] %v204_v3  ;;  %v216_v9 = vld [vmem:[%s1326_s26 + $0x48] sm:$0xf]  ;;  %v218_v10 = vld [vmem:[%s1326_s26 + $0x50] sm:$0xf] }
  0x14   : > { %207 = vst [vmem:[%s1330_s27 + $0x10] sm:$0xf] %v206_v4  ;;  %v220_v11 = vld [vmem:[%s1326_s26 + $0x58] sm:$0xf]  ;;  %v222_v12 = vld [vmem:[%s1326_s26 + $0x60] sm:$0xf] }
  0x15   : > { %209 = vst [vmem:[%s1330_s27 + $0x14] sm:$0xf] %v208_v5  ;;  %v224_v13 = vld [vmem:[%s1326_s26 + $0x68] sm:$0xf]  ;;  %v226_v14 = vld [vmem:[%s1326_s26 + $0x70] sm:$0xf] }
  0x16   : > { %211 = vst [vmem:[%s1330_s27 + $0x18] sm:$0xf] %v210_v6  ;;  %v228_v15 = vld [vmem:[%s1326_s26 + $0x78] sm:$0xf]  ;;  %v230_v16 = vld [vmem:[%s1326_s26 + $0x80] sm:$0xf] }
  0x17   : > { %213 = vst [vmem:[%s1330_s27 + $0x1c] sm:$0xf] %v212_v7  ;;  %v232_v17 = vld [vmem:[%s1326_s26 + $0x88] sm:$0xf]  ;;  %v234_v18 = vld [vmem:[%s1326_s26 + $0x90] sm:$0xf] }
  0x18   : > { %215 = vst [vmem:[%s1330_s27 + $0x20] sm:$0xf] %v214_v8  ;;  %v236_v19 = vld [vmem:[%s1326_s26 + $0x98] sm:$0xf]  ;;  %v238_v20 = vld [vmem:[%s1326_s26 + $0xa0] sm:$0xf] }
  0x19   : > { %217 = vst [vmem:[%s1330_s27 + $0x24] sm:$0xf] %v216_v9  ;;  %v240_v21 = vld [vmem:[%s1326_s26 + $0xa8] sm:$0xf]  ;;  %v242_v22 = vld [vmem:[%s1326_s26 + $0xb0] sm:$0xf] }
  0x1a   : > { %219 = vst [vmem:[%s1330_s27 + $0x28] sm:$0xf] %v218_v10  ;;  %v244_v23 = vld [vmem:[%s1326_s26 + $0xb8] sm:$0xf]  ;;  %v246_v24 = vld [vmem:[%s1326_s26 + $0xc0] sm:$0xf] }
  0x1b   : > { %221 = vst [vmem:[%s1330_s27 + $0x2c] sm:$0xf] %v220_v11  ;;  %v248_v25 = vld [vmem:[%s1326_s26 + $0xc8] sm:$0xf]  ;;  %v250_v26 = vld [vmem:[%s1326_s26 + $0xd0] sm:$0xf] }
  0x1c   : > { %223 = vst [vmem:[%s1330_s27 + $0x30] sm:$0xf] %v222_v12  ;;  %v252_v27 = vld [vmem:[%s1326_s26 + $0xd8] sm:$0xf]  ;;  %v254_v28 = vld [vmem:[%s1326_s26 + $0xe0] sm:$0xf] }
  0x1d   : > { %225 = vst [vmem:[%s1330_s27 + $0x34] sm:$0xf] %v224_v13  ;;  %v256_v29 = vld [vmem:[%s1326_s26 + $0xe8] sm:$0xf]  ;;  %v258_v30 = vld [vmem:[%s1326_s26 + $0xf0] sm:$0xf] }
  0x1e   : > { %227 = vst [vmem:[%s1330_s27 + $0x38] sm:$0xf] %v226_v14  ;;  %v260_v31 = vld [vmem:[%s1326_s26 + $0xf8] sm:$0xf]  ;;  %v262_v32 = vld [vmem:[%s1326_s26 + $0x100] sm:$0xf] }
  0x1f   : > { %229 = vst [vmem:[%s1330_s27 + $0x3c] sm:$0xf] %v228_v15  ;;  %v264_v33 = vld [vmem:[%s1326_s26 + $0x108] sm:$0xf]  ;;  %v266_v34 = vld [vmem:[%s1326_s26 + $0x110] sm:$0xf] }
  0x20   : > { %231 = vst [vmem:[%s1330_s27 + $0x40] sm:$0xf] %v230_v16  ;;  %v268_v35 = vld [vmem:[%s1326_s26 + $0x118] sm:$0xf]  ;;  %v270_v36 = vld [vmem:[%s1326_s26 + $0x120] sm:$0xf] }
  0x21   : > { %233 = vst [vmem:[%s1330_s27 + $0x44] sm:$0xf] %v232_v17  ;;  %v272_v37 = vld [vmem:[%s1326_s26 + $0x128] sm:$0xf]  ;;  %v274_v38 = vld [vmem:[%s1326_s26 + $0x130] sm:$0xf] }
  0x22   : > { %235 = vst [vmem:[%s1330_s27 + $0x48] sm:$0xf] %v234_v18  ;;  %v276_v39 = vld [vmem:[%s1326_s26 + $0x138] sm:$0xf]  ;;  %v278_v40 = vld [vmem:[%s1326_s26 + $0x140] sm:$0xf] }
  0x23   : > { %237 = vst [vmem:[%s1330_s27 + $0x4c] sm:$0xf] %v236_v19  ;;  %v280_v41 = vld [vmem:[%s1326_s26 + $0x148] sm:$0xf]  ;;  %v282_v42 = vld [vmem:[%s1326_s26 + $0x150] sm:$0xf] }
  0x24   : > { %239 = vst [vmem:[%s1330_s27 + $0x50] sm:$0xf] %v238_v20  ;;  %v284_v43 = vld [vmem:[%s1326_s26 + $0x158] sm:$0xf]  ;;  %v286_v44 = vld [vmem:[%s1326_s26 + $0x160] sm:$0xf] }
  0x25   : > { %241 = vst [vmem:[%s1330_s27 + $0x54] sm:$0xf] %v240_v21  ;;  %v288_v45 = vld [vmem:[%s1326_s26 + $0x168] sm:$0xf]  ;;  %v290_v46 = vld [vmem:[%s1326_s26 + $0x170] sm:$0xf] }
  0x26   : > { %243 = vst [vmem:[%s1330_s27 + $0x58] sm:$0xf] %v242_v22  ;;  %v292_v47 = vld [vmem:[%s1326_s26 + $0x178] sm:$0xf]  ;;  %v294_v48 = vld [vmem:[%s1326_s26 + $0x180] sm:$0xf] }
  0x27   : > { %245 = vst [vmem:[%s1330_s27 + $0x5c] sm:$0xf] %v244_v23  ;;  %v296_v49 = vld [vmem:[%s1326_s26 + $0x188] sm:$0xf]  ;;  %v298_v50 = vld [vmem:[%s1326_s26 + $0x190] sm:$0xf] }
  0x28   : > { %247 = vst [vmem:[%s1330_s27 + $0x60] sm:$0xf] %v246_v24  ;;  %v300_v51 = vld [vmem:[%s1326_s26 + $0x198] sm:$0xf]  ;;  %v302_v52 = vld [vmem:[%s1326_s26 + $0x1a0] sm:$0xf] }
  0x29   : > { %249 = vst [vmem:[%s1330_s27 + $0x64] sm:$0xf] %v248_v25  ;;  %v304_v53 = vld [vmem:[%s1326_s26 + $0x1a8] sm:$0xf]  ;;  %v306_v54 = vld [vmem:[%s1326_s26 + $0x1b0] sm:$0xf] }
  0x2a   : > { %251 = vst [vmem:[%s1330_s27 + $0x68] sm:$0xf] %v250_v26  ;;  %v308_v55 = vld [vmem:[%s1326_s26 + $0x1b8] sm:$0xf]  ;;  %v310_v56 = vld [vmem:[%s1326_s26 + $0x1c0] sm:$0xf] }
  0x2b   : > { %253 = vst [vmem:[%s1330_s27 + $0x6c] sm:$0xf] %v252_v27  ;;  %v312_v57 = vld [vmem:[%s1326_s26 + $0x1c8] sm:$0xf]  ;;  %v314_v58 = vld [vmem:[%s1326_s26 + $0x1d0] sm:$0xf] }
  0x2c   : > { %255 = vst [vmem:[%s1330_s27 + $0x70] sm:$0xf] %v254_v28  ;;  %v316_v59 = vld [vmem:[%s1326_s26 + $0x1d8] sm:$0xf]  ;;  %v318_v60 = vld [vmem:[%s1326_s26 + $0x1e0] sm:$0xf] }
  0x2d   : > { %257 = vst [vmem:[%s1330_s27 + $0x74] sm:$0xf] %v256_v29  ;;  %v320_v61 = vld [vmem:[%s1326_s26 + $0x1e8] sm:$0xf]  ;;  %v322_v62 = vld [vmem:[%s1326_s26 + $0x1f0] sm:$0xf] }
  0x2e   : > { %259 = vst [vmem:[%s1330_s27 + $0x78] sm:$0xf] %v258_v30  ;;  %v324_v63 = vld [vmem:[%s1326_s26 + $0x1f8] sm:$0xf] }
  0x2f   : > { %261 = vst [vmem:[%s1330_s27 + $0x7c] sm:$0xf] %v260_v31 }
  0x30   : > { %263 = vst [vmem:[%s1330_s27 + $0x80] sm:$0xf] %v262_v32 }
  0x31   : > { %265 = vst [vmem:[%s1330_s27 + $0x84] sm:$0xf] %v264_v33 }
  0x32   : > { %267 = vst [vmem:[%s1330_s27 + $0x88] sm:$0xf] %v266_v34 }
  0x33   : > { %269 = vst [vmem:[%s1330_s27 + $0x8c] sm:$0xf] %v268_v35 }
  0x34   : > { %271 = vst [vmem:[%s1330_s27 + $0x90] sm:$0xf] %v270_v36 }
  0x35   : > { %273 = vst [vmem:[%s1330_s27 + $0x94] sm:$0xf] %v272_v37 }
  0x36   : > { %275 = vst [vmem:[%s1330_s27 + $0x98] sm:$0xf] %v274_v38 }
  0x37   : > { %277 = vst [vmem:[%s1330_s27 + $0x9c] sm:$0xf] %v276_v39 }
  0x38   : > { %279 = vst [vmem:[%s1330_s27 + $0xa0] sm:$0xf] %v278_v40 }
  0x39   : > { %281 = vst [vmem:[%s1330_s27 + $0xa4] sm:$0xf] %v280_v41 }
  0x3a   : > { %283 = vst [vmem:[%s1330_s27 + $0xa8] sm:$0xf] %v282_v42 }
  0x3b   : > { %285 = vst [vmem:[%s1330_s27 + $0xac] sm:$0xf] %v284_v43 }
  0x3c   : > { %287 = vst [vmem:[%s1330_s27 + $0xb0] sm:$0xf] %v286_v44 }
  0x3d   : > { %289 = vst [vmem:[%s1330_s27 + $0xb4] sm:$0xf] %v288_v45 }
  0x3e   : > { %291 = vst [vmem:[%s1330_s27 + $0xb8] sm:$0xf] %v290_v46 }
  0x3f   : > { %293 = vst [vmem:[%s1330_s27 + $0xbc] sm:$0xf] %v292_v47 }
  0x40   : > { %295 = vst [vmem:[%s1330_s27 + $0xc0] sm:$0xf] %v294_v48 }
  0x41   : > { %297 = vst [vmem:[%s1330_s27 + $0xc4] sm:$0xf] %v296_v49 }
  0x42   : > { %299 = vst [vmem:[%s1330_s27 + $0xc8] sm:$0xf] %v298_v50 }
  0x43   : > { %301 = vst [vmem:[%s1330_s27 + $0xcc] sm:$0xf] %v300_v51 }
  0x44   : > { %303 = vst [vmem:[%s1330_s27 + $0xd0] sm:$0xf] %v302_v52 }
  0x45   : > { %305 = vst [vmem:[%s1330_s27 + $0xd4] sm:$0xf] %v304_v53 }
  0x46   : > { %307 = vst [vmem:[%s1330_s27 + $0xd8] sm:$0xf] %v306_v54 }
  0x47   : > { %309 = vst [vmem:[%s1330_s27 + $0xdc] sm:$0xf] %v308_v55 }
  0x48   : > { %311 = vst [vmem:[%s1330_s27 + $0xe0] sm:$0xf] %v310_v56 }
  0x49   : > { %313 = vst [vmem:[%s1330_s27 + $0xe4] sm:$0xf] %v312_v57 }
  0x4a   : > { %315 = vst [vmem:[%s1330_s27 + $0xe8] sm:$0xf] %v314_v58 }
  0x4b   : > { %317 = vst [vmem:[%s1330_s27 + $0xec] sm:$0xf] %v316_v59 }
  0x4c   : > { %319 = vst [vmem:[%s1330_s27 + $0xf0] sm:$0xf] %v318_v60 }
  0x4d   : > { %321 = vst [vmem:[%s1330_s27 + $0xf4] sm:$0xf] %v320_v61 }
  0x4e   : > { %323 = vst [vmem:[%s1330_s27 + $0xf8] sm:$0xf] %v322_v62 }
  0x4f   : > { %325 = vst [vmem:[%s1330_s27 + $0xfc] sm:$0xf] %v324_v63 }
  0x50 PF: > { %p1017_p6 = scmp.ge.s32.totalorder %s1261_s16, 1  ;;  %p482_p7 = scmp.lt.s32.totalorder %s1261_s16, 3 }
  0x52   : > { %p483_p8 = pnand %p1017_p6, %p482_p7 }
  0x53   : > { %s489_s28 = sand.u32 (!%p483_p8), 1, %s1245_s12   ;;  %p538_p9 = scmp.lt.s32.totalorder (!%p483_p8), %s1253_s14, 1 }
  0x54   : > { %486 = sbr.rel (%p483_p8) target bundleno = 264 (0x108), region = 69  ;;  %s1018_s29 = sshll.u32 (!%p483_p8), %s489_s28, 8 }
  0x55   : > { %s1461_s30 = scalar_lea.vmem (!%p483_p8), [#allocation3], %s1018_s29 }
  0x59   : > { %v1157_v0 = vld [vmem:[%s1461_s30 + $0x38] sm:$0xff]  ;;  %v1156_v4 = vld [vmem:[%s1461_s30 + $0x30] sm:$0xff]  ;;  %v1155_v8 = vld [vmem:[%s1461_s30 + $0x28] sm:$0xff]  ;;  %s1535_s14 = smov (!%p538_p9, %s1253_s14), 1 }
  0x5a   : > { %v1165_v1 = vld [vmem:[%s1461_s30 + $0x78] sm:$0xff]  ;;  %827 = vmatpush.bf16.msra.mxu0 %v1157_v0  ;;  %v1164_v5 = vld [vmem:[%s1461_s30 + $0x70] sm:$0xff]  ;;  %v1163_v9 = vld [vmem:[%s1461_s30 + $0x68] sm:$0xff]  ;;  %s540_s10 = scalar_lea.vmem %s1526_s2, %s1535_s14  ;;  %s1019_s11 = sshll.u32 %s1535_s14, 3 }
  0x5b   : > { %v1173_v2 = vld [vmem:[%s1461_s30 + $0xb8] sm:$0xff]  ;;  %840 = vmatpush.bf16.msra.mxu1 %v1165_v1  ;;  %v1172_v6 = vld [vmem:[%s1461_s30 + $0xb0] sm:$0xff]  ;;  %v1171_v10 = vld [vmem:[%s1461_s30 + $0xa8] sm:$0xff]  ;;  %s548_s19 = scalar_lea.vmem %s1527_s3, %s1019_s11 }
  0x5c   : > { %v1181_v3 = vld [vmem:[%s1461_s30 + $0xf8] sm:$0xff]  ;;  %853 = vmatpush.bf16.msra.mxu2 %v1173_v2  ;;  %v1180_v7 = vld [vmem:[%s1461_s30 + $0xf0] sm:$0xff]  ;;  %v1179_v11 = vld [vmem:[%s1461_s30 + $0xe8] sm:$0xff] }
  0x5d   : > { %866 = vmatpush.bf16.msra.mxu3 %v1181_v3  ;;  %v1154_v12 = vld [vmem:[%s1461_s30 + $0x20] sm:$0xff]  ;;  %v1153_v16 = vld [vmem:[%s1461_s30 + $0x18] sm:$0xff]  ;;  %v1152_v20 = vld [vmem:[%s1461_s30 + $0x10] sm:$0xff] }
  0x5e   : > { %828 = vmatpush.bf16.msra.mxu0 %v1156_v4  ;;  %v1162_v13 = vld [vmem:[%s1461_s30 + $0x60] sm:$0xff]  ;;  %v1161_v17 = vld [vmem:[%s1461_s30 + $0x58] sm:$0xff]  ;;  %v1160_v21 = vld [vmem:[%s1461_s30 + $0x50] sm:$0xff] }
  0x5f   : > { %841 = vmatpush.bf16.msra.mxu1 %v1164_v5  ;;  %v1170_v14 = vld [vmem:[%s1461_s30 + $0xa0] sm:$0xff]  ;;  %v1169_v18 = vld [vmem:[%s1461_s30 + $0x98] sm:$0xff]  ;;  %v1168_v22 = vld [vmem:[%s1461_s30 + $0x90] sm:$0xff] }
  0x60   : > { %854 = vmatpush.bf16.msra.mxu2 %v1172_v6  ;;  %v1178_v15 = vld [vmem:[%s1461_s30 + $0xe0] sm:$0xff]  ;;  %v1177_v19 = vld [vmem:[%s1461_s30 + $0xd8] sm:$0xff]  ;;  %v1176_v23 = vld [vmem:[%s1461_s30 + $0xd0] sm:$0xff] }
  0x61   : > { %867 = vmatpush.bf16.msra.mxu3 %v1180_v7  ;;  %v1151_v24 = vld [vmem:[%s1461_s30 + $0x8] sm:$0xff]  ;;  %v555_v26 = vld [vmem:[%s1524_s0] sm:$0xff] }
  0x62   : > { %829 = vmatpush.bf16.msra.mxu0 %v1155_v8  ;;  %v1159_v25 = vld [vmem:[%s1461_s30 + $0x48] sm:$0xff]  ;;  %v623_v30 = vunpack.c.l.b16 %v555_v26  ;;  %v624_v31 = vunpack.c.h.b16 %v555_v26  ;;  %v1150_v32 = vld [vmem:[%s1461_s30] sm:$0xff] }
  0x63   : > { %842 = vmatpush.bf16.msra.mxu1 %v1163_v9  ;;  %v1167_v27 = vld [vmem:[%s1461_s30 + $0x88] sm:$0xff]  ;;  %v1158_v33 = vld [vmem:[%s1461_s30 + $0x40] sm:$0xff] }
  0x64   : > { %855 = vmatpush.bf16.msra.mxu2 %v1171_v10  ;;  %v1175_v28 = vld [vmem:[%s1461_s30 + $0xc8] sm:$0xff]  ;;  %v1166_v36 = vld [vmem:[%s1461_s30 + $0x80] sm:$0xff]  ;;  %v627_v38 = vpack.c.b16 %v623_v30, %v623_v30  ;;  %v628_v39 = vpack.c.b16 %v624_v31, %v624_v31 }
  0x65   : > { %868 = vmatpush.bf16.msra.mxu3 %v1179_v11  ;;  %v556_v29 = vld [vmem:[%s1524_s0 + $0x8] sm:$0xff]  ;;  %v1174_v37 = vld [vmem:[%s1461_s30 + $0xc0] sm:$0xff] }
  0x66   : > { %830 = vmatpush.bf16.msra.mxu0 %v1154_v12  ;;  %v625_v34 = vunpack.c.l.b16 %v556_v29  ;;  %v626_v35 = vunpack.c.h.b16 %v556_v29  ;;  %v1222_v48 = vld [vmem:[%s540_s10] ss:$0 sm:$0xff] }
  0x67   : > { %843 = vmatpush.bf16.msra.mxu1 %v1162_v13 }
  0x68   : > { %856 = vmatpush.bf16.msra.mxu2 %v1170_v14  ;;  %v629_v40 = vpack.c.b16 %v625_v34, %v625_v34  ;;  %v630_v41 = vpack.c.b16 %v626_v35, %v626_v35 }
  0x69   : > { %869 = vmatpush.bf16.msra.mxu3 %v1178_v15 }
  0x6a   : > { %831 = vmatpush.bf16.msra.mxu0 %v1153_v16 }
  0x6b   : > { %844 = vmatpush.bf16.msra.mxu1 %v1161_v17 }
  0x6c   : > { %857 = vmatpush.bf16.msra.mxu2 %v1169_v18 }
  0x6d   : > { %870 = vmatpush.bf16.msra.mxu3 %v1177_v19 }
  0x6e   : > { %832 = vmatpush.bf16.msra.mxu0 %v1152_v20 }
  0x6f   : > { %845 = vmatpush.bf16.msra.mxu1 %v1160_v21 }
  0x70   : > { %858 = vmatpush.bf16.msra.mxu2 %v1168_v22 }
  0x71   : > { %871 = vmatpush.bf16.msra.mxu3 %v1176_v23 }
  0x72   : > { %833 = vmatpush.bf16.msra.mxu0 %v1151_v24 }
  0x73   : > { %846 = vmatpush.bf16.msra.mxu1 %v1159_v25 }
  0x74   : > { %859 = vmatpush.bf16.msra.mxu2 %v1167_v27 }
  0x75   : > { %872 = vmatpush.bf16.msra.mxu3 %v1175_v28 }
  0x76   : > { %834 = vmatpush.bf16.msra.mxu0 %v1150_v32 }
  0x77   : > { %847 = vmatpush.bf16.msra.mxu1 %v1158_v33 }
  0x78   : > { %860 = vmatpush.bf16.msra.mxu2 %v1166_v36 }
  0x79   : > { %873 = vmatpush.bf16.msra.mxu3 %v1174_v37  ;;  %835 = vmatmul.bf16.vlgmr.msra.gmra.mxu0 %v627_v38 }
  0x7a   : > { %848 = vmatmul.bf16.vlgmr.msra.gmra.mxu1 %v628_v39 }
  0x7b   : > { %861 = vmatmul.bf16.vlgmr.msra.gmra.mxu2 %v629_v40 }
  0x7c   : > { %874 = vmatmul.bf16.vlgmr.msra.gmra.mxu3 %v630_v41 }
  0xf6   : > { %v836_v42 = vpop.f32.mrf.mxu0 }
  0xf7   : > { %v849_v43 = vpop.f32.mrf.mxu1 }
  0xf8   : > { %v850_v44 = vadd.f32 %v849_v43, %v836_v42 }
  0xfe   : > { %v862_v45 = vpop.f32.mrf.mxu2  ;;  %v838_v49 = vpop.f32.mrf.mxu0 }
  0xff   : > { %v875_v46 = vpop.f32.mrf.mxu3  ;;  %v863_v47 = vadd.f32 %v862_v45, %v850_v44  ;;  %v851_v50 = vpop.f32.mrf.mxu1 }
 0x101   : > { %v876_v51 = vadd.f32 %v875_v46, %v863_v47 }
 0x103   : > { %v889_v52 = vadd.f32 %v1222_v48, %v876_v51 }
 0x105   : > { %890 = vst [vmem:[%s548_s19] sm:$0xff] %v889_v52 }
 0x106   : > { %v864_v53 = vpop.f32.mrf.mxu2 }
 0x107   : > { %v877_v54 = vpop.f32.mrf.mxu3 }
 0x108 PF: > { %s13_s16 = sadd.s32 1, %s1261_s16   ;;  %s1528_s12 = smov %s1249_s13 }
 0x109   : > { %p10_p10 = scmp.ge.s32.totalorder %s13_s16, 4   ;;  %s1529_s13 = smov %s1318_s20 }
 0x10a   : > { %s1530_s14 = smov %s1257_s15  ;;  %s1531_s15 = smov %s1533_s17 }
 0x10b   :  { %12 = sbr.rel (!%p10_p10) target bundleno = 3 (0x3), region = 122 }

// kernel: cnn_forward.7
= control target key start
LH: loop header
LB: loop body
LE: loop exit
PB: predicated region body
PF: predicated region fallthrough
CT: control target
= control target key end

     0   :  { %s7215_s12 = smov 0   ;;  %s7217_s13 = smov 0   ;;  %s9294_s0 = inlined_call_operand.vmem [shape: bf16[8,3584], index: 0, kind: input, shape index: {}]   ;;  %s9295_s1 = inlined_call_operand.vmem [shape: bf16[3584,1024], index: 1, kind: input, shape index: {}]   ;;  %s9296_s2 = inlined_call_operand.vmem [shape: f32[1,1024], index: 2, kind: input, shape index: {}]   ;;  %s9297_s3 = inlined_call_operand.vmem [shape: bf16[8,1024], index: 3, kind: output, shape index: {}]  }
   0x1   :  { %s7219_s14 = smov 0   ;;  %s7221_s15 = smov 0  }
   0x2   :  { %s7223_s16 = smov 0   ;;  %s7225_s17 = smov 0  }
   0x3   :  { %s7227_s18 = smov 0  }
   0x4 LB: > { %s25_s19 = sadd.s32 1, %s7184_s16  ;;  %s28_s20 = sadd.s32 1, %s7188_s17  ;;  %s7192_s18 = sphi %s7227_s18, %s13_s18   ;;  %s7188_s17 = sphi %s7225_s17, %s9303_s17   ;;  %s7184_s16 = sphi %s7223_s16, %s9302_s16   ;;  %s7180_s15 = sphi %s7221_s15, %s9301_s15   ;;  %s7176_s14 = sphi %s7219_s14, %s9300_s14   ;;  %s7172_s13 = sphi %s7217_s13, %s9299_s13   ;;  %s7168_s12 = sphi %s7215_s12, %s9298_s12  }
   0x5   : > { %p26_p0 = scmp.ge.s32.totalorder %s25_s19, 2  ;;  %p76_p1 = scmp.ne.s32.totalorder %s7172_s13, %s7168_s12 }
   0x6   : > { %p77_p2 = scmp.eq.s32.totalorder %s7192_s18, 0  ;;  %s69_s24 = sadd.s32 1, %s7172_s13 }
   0x7   : > { %s9305_s19 = smov (%p26_p0, %s25_s19), 0  ;;  %s9307_s20 = smov (!%p26_p0, %s28_s20), %s7188_s17 }
   0x8   : > { %p78_p3 = por %p77_p2, %p76_p1  ;;  %p30_p4 = scmp.ge.s32.totalorder %s9307_s20, 2 }
   0x9   : > { %s64_s21 = ssub.s32 %s7184_s16, %s9305_s19  ;;  %p4825_p6 = scmp.ge.s32.totalorder %s7192_s18, 4 }
   0xa   : > { %s9309_s20 = smov (%p30_p4, %s9307_s20), 0 }
   0xb   : > { %s65_s22 = ssub.s32 %s7188_s17, %s9309_s20  ;;  %156 = sbr.rel (%p4825_p6) target bundleno = 472 (0x1d8), region = 16 }
   0xc   : > { %s66_s23 = sor.u32 %s65_s22, %s64_s21 }
   0xd   : > { %p67_p5 = scmp.eq.s32.totalorder %s66_s23, 0 }
   0xf   : > { %s7266_s25 = scalar_select %p67_p5, %s7172_s13, %s69_s24  }
  0x10   : > { %172 = sbr.rel (!%p78_p3) target bundleno = 472 (0x1d8), region = 24  ;;  %s174_s26 = sand.u32 (%p78_p3), 1, %s7172_s13  }
  0x11   : > { %s7079_s27 = smul.u32 (%p78_p3), 3584, %s174_s26  ;;  %s4826_s28 = sshll.u32 (%p78_p3), %s7188_s17, 2 }
  0x12   : > { %s6630_s29 = smul.u32 (%p78_p3), 1792, %s7184_s16 }
  0x13   : > { %s7280_s8 = scalar_lea.vmem (%p78_p3), [#allocation3], %s7079_s27 }
  0x14   : > { %s180_s30 = sadd.s32 (%p78_p3), %s6630_s29, %s4826_s28 }
  0x15   : > { %s4828_s4 = sshll.u32 %s180_s30, 2 }
  0x16   : > { %s7275_s7 = scalar_lea.vmem %s9295_s1, %s4828_s4 }
  0x17   : > { %v195_v0 = vld [vmem:[%s7275_s7] sm:$0xff]  ;;  %v197_v1 = vld [vmem:[%s7275_s7 + $0x8] sm:$0xff] }
  0x18   : > { %v199_v2 = vld [vmem:[%s7275_s7 + $0x20] sm:$0xff]  ;;  %196 = vst [vmem:[%s7280_s8] sm:$0xff] %v195_v0  ;;  %v201_v3 = vld [vmem:[%s7275_s7 + $0x28] sm:$0xff] }
  0x19   : > { %198 = vst [vmem:[%s7280_s8 + $0x8] sm:$0xff] %v197_v1  ;;  %v203_v4 = vld [vmem:[%s7275_s7 + $0x40] sm:$0xff]  ;;  %v205_v5 = vld [vmem:[%s7275_s7 + $0x48] sm:$0xff] }
  0x1a   : > { %200 = vst [vmem:[%s7280_s8 + $0x10] sm:$0xff] %v199_v2  ;;  %v207_v6 = vld [vmem:[%s7275_s7 + $0x60] sm:$0xff]  ;;  %v209_v7 = vld [vmem:[%s7275_s7 + $0x68] sm:$0xff] }
  0x1b   : > { %202 = vst [vmem:[%s7280_s8 + $0x18] sm:$0xff] %v201_v3  ;;  %v211_v8 = vld [vmem:[%s7275_s7 + $0x80] sm:$0xff]  ;;  %v213_v9 = vld [vmem:[%s7275_s7 + $0x88] sm:$0xff] }
  0x1c   : > { %204 = vst [vmem:[%s7280_s8 + $0x20] sm:$0xff] %v203_v4  ;;  %v215_v10 = vld [vmem:[%s7275_s7 + $0xa0] sm:$0xff]  ;;  %v217_v11 = vld [vmem:[%s7275_s7 + $0xa8] sm:$0xff] }
  0x1d   : > { %206 = vst [vmem:[%s7280_s8 + $0x28] sm:$0xff] %v205_v5  ;;  %v219_v12 = vld [vmem:[%s7275_s7 + $0xc0] sm:$0xff]  ;;  %v221_v13 = vld [vmem:[%s7275_s7 + $0xc8] sm:$0xff] }
  0x1e   : > { %208 = vst [vmem:[%s7280_s8 + $0x30] sm:$0xff] %v207_v6  ;;  %v223_v14 = vld [vmem:[%s7275_s7 + $0xe0] sm:$0xff]  ;;  %v225_v15 = vld [vmem:[%s7275_s7 + $0xe8] sm:$0xff] }
  0x1f   : > { %210 = vst [vmem:[%s7280_s8 + $0x38] sm:$0xff] %v209_v7  ;;  %v227_v16 = vld [vmem:[%s7275_s7 + $0x100] sm:$0xff]  ;;  %v229_v17 = vld [vmem:[%s7275_s7 + $0x108] sm:$0xff] }
  0x20   : > { %212 = vst [vmem:[%s7280_s8 + $0x40] sm:$0xff] %v211_v8  ;;  %v231_v18 = vld [vmem:[%s7275_s7 + $0x120] sm:$0xff]  ;;  %v233_v19 = vld [vmem:[%s7275_s7 + $0x128] sm:$0xff] }
  0x21   : > { %214 = vst [vmem:[%s7280_s8 + $0x48] sm:$0xff] %v213_v9  ;;  %v235_v20 = vld [vmem:[%s7275_s7 + $0x140] sm:$0xff]  ;;  %v237_v21 = vld [vmem:[%s7275_s7 + $0x148] sm:$0xff] }
  0x22   : > { %216 = vst [vmem:[%s7280_s8 + $0x50] sm:$0xff] %v215_v10  ;;  %v239_v22 = vld [vmem:[%s7275_s7 + $0x160] sm:$0xff]  ;;  %v241_v23 = vld [vmem:[%s7275_s7 + $0x168] sm:$0xff] }
  0x23   : > { %218 = vst [vmem:[%s7280_s8 + $0x58] sm:$0xff] %v217_v11  ;;  %v243_v24 = vld [vmem:[%s7275_s7 + $0x180] sm:$0xff]  ;;  %v245_v25 = vld [vmem:[%s7275_s7 + $0x188] sm:$0xff] }
  0x24   : > { %220 = vst [vmem:[%s7280_s8 + $0x60] sm:$0xff] %v219_v12  ;;  %v247_v26 = vld [vmem:[%s7275_s7 + $0x1a0] sm:$0xff]  ;;  %v249_v27 = vld [vmem:[%s7275_s7 + $0x1a8] sm:$0xff] }
  0x25   : > { %222 = vst [vmem:[%s7280_s8 + $0x68] sm:$0xff] %v221_v13  ;;  %v251_v28 = vld [vmem:[%s7275_s7 + $0x1c0] sm:$0xff]  ;;  %v253_v29 = vld [vmem:[%s7275_s7 + $0x1c8] sm:$0xff] }
  0x26   : > { %224 = vst [vmem:[%s7280_s8 + $0x70] sm:$0xff] %v223_v14  ;;  %v255_v30 = vld [vmem:[%s7275_s7 + $0x1e0] sm:$0xff]  ;;  %v257_v31 = vld [vmem:[%s7275_s7 + $0x1e8] sm:$0xff] }
  0x27   : > { %226 = vst [vmem:[%s7280_s8 + $0x78] sm:$0xff] %v225_v15  ;;  %v259_v32 = vld [vmem:[%s7275_s7 + $0x200] sm:$0xff]  ;;  %v261_v33 = vld [vmem:[%s7275_s7 + $0x208] sm:$0xff] }
  0x28   : > { %228 = vst [vmem:[%s7280_s8 + $0x80] sm:$0xff] %v227_v16  ;;  %v263_v34 = vld [vmem:[%s7275_s7 + $0x220] sm:$0xff]  ;;  %v265_v35 = vld [vmem:[%s7275_s7 + $0x228] sm:$0xff] }
  0x29   : > { %230 = vst [vmem:[%s7280_s8 + $0x88] sm:$0xff] %v229_v17  ;;  %v267_v36 = vld [vmem:[%s7275_s7 + $0x240] sm:$0xff]  ;;  %v269_v37 = vld [vmem:[%s7275_s7 + $0x248] sm:$0xff] }
  0x2a   : > { %232 = vst [vmem:[%s7280_s8 + $0x90] sm:$0xff] %v231_v18  ;;  %v271_v38 = vld [vmem:[%s7275_s7 + $0x260] sm:$0xff]  ;;  %v273_v39 = vld [vmem:[%s7275_s7 + $0x268] sm:$0xff] }
  0x2b   : > { %234 = vst [vmem:[%s7280_s8 + $0x98] sm:$0xff] %v233_v19  ;;  %v275_v40 = vld [vmem:[%s7275_s7 + $0x280] sm:$0xff]  ;;  %v277_v41 = vld [vmem:[%s7275_s7 + $0x288] sm:$0xff] }
  0x2c   : > { %236 = vst [vmem:[%s7280_s8 + $0xa0] sm:$0xff] %v235_v20  ;;  %v279_v42 = vld [vmem:[%s7275_s7 + $0x2a0] sm:$0xff]  ;;  %v281_v43 = vld [vmem:[%s7275_s7 + $0x2a8] sm:$0xff] }
  0x2d   : > { %238 = vst [vmem:[%s7280_s8 + $0xa8] sm:$0xff] %v237_v21  ;;  %v283_v44 = vld [vmem:[%s7275_s7 + $0x2c0] sm:$0xff]  ;;  %v285_v45 = vld [vmem:[%s7275_s7 + $0x2c8] sm:$0xff] }
  0x2e   : > { %240 = vst [vmem:[%s7280_s8 + $0xb0] sm:$0xff] %v239_v22  ;;  %v287_v46 = vld [vmem:[%s7275_s7 + $0x2e0] sm:$0xff]  ;;  %v289_v47 = vld [vmem:[%s7275_s7 + $0x2e8] sm:$0xff] }
  0x2f   : > { %242 = vst [vmem:[%s7280_s8 + $0xb8] sm:$0xff] %v241_v23  ;;  %v291_v48 = vld [vmem:[%s7275_s7 + $0x300] sm:$0xff]  ;;  %v293_v49 = vld [vmem:[%s7275_s7 + $0x308] sm:$0xff] }
  0x30   : > { %244 = vst [vmem:[%s7280_s8 + $0xc0] sm:$0xff] %v243_v24  ;;  %v295_v50 = vld [vmem:[%s7275_s7 + $0x320] sm:$0xff]  ;;  %v297_v51 = vld [vmem:[%s7275_s7 + $0x328] sm:$0xff] }
  0x31   : > { %246 = vst [vmem:[%s7280_s8 + $0xc8] sm:$0xff] %v245_v25  ;;  %v299_v52 = vld [vmem:[%s7275_s7 + $0x340] sm:$0xff]  ;;  %v301_v53 = vld [vmem:[%s7275_s7 + $0x348] sm:$0xff] }
  0x32   : > { %248 = vst [vmem:[%s7280_s8 + $0xd0] sm:$0xff] %v247_v26  ;;  %v303_v54 = vld [vmem:[%s7275_s7 + $0x360] sm:$0xff]  ;;  %v305_v55 = vld [vmem:[%s7275_s7 + $0x368] sm:$0xff] }
  0x33   : > { %250 = vst [vmem:[%s7280_s8 + $0xd8] sm:$0xff] %v249_v27  ;;  %v307_v56 = vld [vmem:[%s7275_s7 + $0x380] sm:$0xff]  ;;  %v309_v57 = vld [vmem:[%s7275_s7 + $0x388] sm:$0xff] }
  0x34   : > { %252 = vst [vmem:[%s7280_s8 + $0xe0] sm:$0xff] %v251_v28  ;;  %v311_v58 = vld [vmem:[%s7275_s7 + $0x3a0] sm:$0xff]  ;;  %v313_v59 = vld [vmem:[%s7275_s7 + $0x3a8] sm:$0xff] }
  0x35   : > { %254 = vst [vmem:[%s7280_s8 + $0xe8] sm:$0xff] %v253_v29  ;;  %v315_v60 = vld [vmem:[%s7275_s7 + $0x3c0] sm:$0xff]  ;;  %v317_v61 = vld [vmem:[%s7275_s7 + $0x3c8] sm:$0xff] }
  0x36   : > { %256 = vst [vmem:[%s7280_s8 + $0xf0] sm:$0xff] %v255_v30  ;;  %v319_v62 = vld [vmem:[%s7275_s7 + $0x3e0] sm:$0xff]  ;;  %v321_v63 = vld [vmem:[%s7275_s7 + $0x3e8] sm:$0xff] }
  0x37   : > { %258 = vst [vmem:[%s7280_s8 + $0xf8] sm:$0xff] %v257_v31  ;;  %v323_v0 = vld [vmem:[%s7275_s7 + $0x400] sm:$0xff]  ;;  %v325_v1 = vld [vmem:[%s7275_s7 + $0x408] sm:$0xff] }
  0x38   : > { %260 = vst [vmem:[%s7280_s8 + $0x100] sm:$0xff] %v259_v32  ;;  %v327_v2 = vld [vmem:[%s7275_s7 + $0x420] sm:$0xff]  ;;  %v329_v3 = vld [vmem:[%s7275_s7 + $0x428] sm:$0xff] }
  0x39   : > { %262 = vst [vmem:[%s7280_s8 + $0x108] sm:$0xff] %v261_v33  ;;  %v331_v4 = vld [vmem:[%s7275_s7 + $0x440] sm:$0xff]  ;;  %v333_v5 = vld [vmem:[%s7275_s7 + $0x448] sm:$0xff] }
  0x3a   : > { %264 = vst [vmem:[%s7280_s8 + $0x110] sm:$0xff] %v263_v34  ;;  %v335_v6 = vld [vmem:[%s7275_s7 + $0x460] sm:$0xff]  ;;  %v337_v7 = vld [vmem:[%s7275_s7 + $0x468] sm:$0xff] }
  0x3b   : > { %266 = vst [vmem:[%s7280_s8 + $0x118] sm:$0xff] %v265_v35  ;;  %v339_v8 = vld [vmem:[%s7275_s7 + $0x480] sm:$0xff]  ;;  %v341_v9 = vld [vmem:[%s7275_s7 + $0x488] sm:$0xff] }
  0x3c   : > { %268 = vst [vmem:[%s7280_s8 + $0x120] sm:$0xff] %v267_v36  ;;  %v343_v10 = vld [vmem:[%s7275_s7 + $0x4a0] sm:$0xff]  ;;  %v345_v11 = vld [vmem:[%s7275_s7 + $0x4a8] sm:$0xff] }
  0x3d   : > { %270 = vst [vmem:[%s7280_s8 + $0x128] sm:$0xff] %v269_v37  ;;  %v347_v12 = vld [vmem:[%s7275_s7 + $0x4c0] sm:$0xff]  ;;  %v349_v13 = vld [vmem:[%s7275_s7 + $0x4c8] sm:$0xff] }
  0x3e   : > { %272 = vst [vmem:[%s7280_s8 + $0x130] sm:$0xff] %v271_v38  ;;  %v351_v14 = vld [vmem:[%s7275_s7 + $0x4e0] sm:$0xff]  ;;  %v353_v15 = vld [vmem:[%s7275_s7 + $0x4e8] sm:$0xff] }
  0x3f   : > { %274 = vst [vmem:[%s7280_s8 + $0x138] sm:$0xff] %v273_v39  ;;  %v355_v16 = vld [vmem:[%s7275_s7 + $0x500] sm:$0xff]  ;;  %v357_v17 = vld [vmem:[%s7275_s7 + $0x508] sm:$0xff] }
  0x40   : > { %276 = vst [vmem:[%s7280_s8 + $0x140] sm:$0xff] %v275_v40  ;;  %v359_v18 = vld [vmem:[%s7275_s7 + $0x520] sm:$0xff]  ;;  %v361_v19 = vld [vmem:[%s7275_s7 + $0x528] sm:$0xff] }
  0x41   : > { %278 = vst [vmem:[%s7280_s8 + $0x148] sm:$0xff] %v277_v41  ;;  %v363_v20 = vld [vmem:[%s7275_s7 + $0x540] sm:$0xff]  ;;  %v365_v21 = vld [vmem:[%s7275_s7 + $0x548] sm:$0xff] }
  0x42   : > { %280 = vst [vmem:[%s7280_s8 + $0x150] sm:$0xff] %v279_v42  ;;  %v367_v22 = vld [vmem:[%s7275_s7 + $0x560] sm:$0xff]  ;;  %v369_v23 = vld [vmem:[%s7275_s7 + $0x568] sm:$0xff] }
  0x43   : > { %282 = vst [vmem:[%s7280_s8 + $0x158] sm:$0xff] %v281_v43  ;;  %v371_v24 = vld [vmem:[%s7275_s7 + $0x580] sm:$0xff]  ;;  %v373_v25 = vld [vmem:[%s7275_s7 + $0x588] sm:$0xff] }
  0x44   : > { %284 = vst [vmem:[%s7280_s8 + $0x160] sm:$0xff] %v283_v44  ;;  %v375_v26 = vld [vmem:[%s7275_s7 + $0x5a0] sm:$0xff]  ;;  %v377_v27 = vld [vmem:[%s7275_s7 + $0x5a8] sm:$0xff] }
  0x45   : > { %286 = vst [vmem:[%s7280_s8 + $0x168] sm:$0xff] %v285_v45  ;;  %v379_v28 = vld [vmem:[%s7275_s7 + $0x5c0] sm:$0xff]  ;;  %v381_v29 = vld [vmem:[%s7275_s7 + $0x5c8] sm:$0xff] }
  0x46   : > { %288 = vst [vmem:[%s7280_s8 + $0x170] sm:$0xff] %v287_v46  ;;  %v383_v30 = vld [vmem:[%s7275_s7 + $0x5e0] sm:$0xff]  ;;  %v385_v31 = vld [vmem:[%s7275_s7 + $0x5e8] sm:$0xff] }
  0x47   : > { %290 = vst [vmem:[%s7280_s8 + $0x178] sm:$0xff] %v289_v47  ;;  %v387_v32 = vld [vmem:[%s7275_s7 + $0x600] sm:$0xff]  ;;  %v389_v33 = vld [vmem:[%s7275_s7 + $0x608] sm:$0xff] }
  0x48   : > { %292 = vst [vmem:[%s7280_s8 + $0x180] sm:$0xff] %v291_v48  ;;  %v391_v34 = vld [vmem:[%s7275_s7 + $0x620] sm:$0xff]  ;;  %v393_v35 = vld [vmem:[%s7275_s7 + $0x628] sm:$0xff] }
  0x49   : > { %294 = vst [vmem:[%s7280_s8 + $0x188] sm:$0xff] %v293_v49  ;;  %v395_v36 = vld [vmem:[%s7275_s7 + $0x640] sm:$0xff]  ;;  %v397_v37 = vld [vmem:[%s7275_s7 + $0x648] sm:$0xff] }
  0x4a   : > { %296 = vst [vmem:[%s7280_s8 + $0x190] sm:$0xff] %v295_v50  ;;  %v399_v38 = vld [vmem:[%s7275_s7 + $0x660] sm:$0xff]  ;;  %v401_v39 = vld [vmem:[%s7275_s7 + $0x668] sm:$0xff] }
  0x4b   : > { %298 = vst [vmem:[%s7280_s8 + $0x198] sm:$0xff] %v297_v51  ;;  %v403_v40 = vld [vmem:[%s7275_s7 + $0x680] sm:$0xff]  ;;  %v405_v41 = vld [vmem:[%s7275_s7 + $0x688] sm:$0xff] }
  0x4c   : > { %300 = vst [vmem:[%s7280_s8 + $0x1a0] sm:$0xff] %v299_v52  ;;  %v407_v42 = vld [vmem:[%s7275_s7 + $0x6a0] sm:$0xff]  ;;  %v409_v43 = vld [vmem:[%s7275_s7 + $0x6a8] sm:$0xff] }
  0x4d   : > { %302 = vst [vmem:[%s7280_s8 + $0x1a8] sm:$0xff] %v301_v53  ;;  %v411_v44 = vld [vmem:[%s7275_s7 + $0x6c0] sm:$0xff]  ;;  %v413_v45 = vld [vmem:[%s7275_s7 + $0x6c8] sm:$0xff] }
  0x4e   : > { %304 = vst [vmem:[%s7280_s8 + $0x1b0] sm:$0xff] %v303_v54  ;;  %v415_v46 = vld [vmem:[%s7275_s7 + $0x6e0] sm:$0xff]  ;;  %v417_v47 = vld [vmem:[%s7275_s7 + $0x6e8] sm:$0xff] }
  0x4f   : > { %306 = vst [vmem:[%s7280_s8 + $0x1b8] sm:$0xff] %v305_v55  ;;  %v419_v48 = vld [vmem:[%s7275_s7 + $0x700] sm:$0xff]  ;;  %v421_v49 = vld [vmem:[%s7275_s7 + $0x708] sm:$0xff] }
  0x50   : > { %308 = vst [vmem:[%s7280_s8 + $0x1c0] sm:$0xff] %v307_v56  ;;  %v423_v50 = vld [vmem:[%s7275_s7 + $0x720] sm:$0xff]  ;;  %v425_v51 = vld [vmem:[%s7275_s7 + $0x728] sm:$0xff] }
  0x51   : > { %310 = vst [vmem:[%s7280_s8 + $0x1c8] sm:$0xff] %v309_v57  ;;  %v427_v52 = vld [vmem:[%s7275_s7 + $0x740] sm:$0xff]  ;;  %v429_v53 = vld [vmem:[%s7275_s7 + $0x748] sm:$0xff] }
  0x52   : > { %312 = vst [vmem:[%s7280_s8 + $0x1d0] sm:$0xff] %v311_v58  ;;  %v431_v54 = vld [vmem:[%s7275_s7 + $0x760] sm:$0xff]  ;;  %v433_v55 = vld [vmem:[%s7275_s7 + $0x768] sm:$0xff] }
  0x53   : > { %314 = vst [vmem:[%s7280_s8 + $0x1d8] sm:$0xff] %v313_v59  ;;  %v435_v56 = vld [vmem:[%s7275_s7 + $0x780] sm:$0xff]  ;;  %v437_v57 = vld [vmem:[%s7275_s7 + $0x788] sm:$0xff] }
  0x54   : > { %316 = vst [vmem:[%s7280_s8 + $0x1e0] sm:$0xff] %v315_v60  ;;  %v439_v58 = vld [vmem:[%s7275_s7 + $0x7a0] sm:$0xff]  ;;  %v441_v59 = vld [vmem:[%s7275_s7 + $0x7a8] sm:$0xff] }
  0x55   : > { %318 = vst [vmem:[%s7280_s8 + $0x1e8] sm:$0xff] %v317_v61  ;;  %v443_v60 = vld [vmem:[%s7275_s7 + $0x7c0] sm:$0xff]  ;;  %v445_v61 = vld [vmem:[%s7275_s7 + $0x7c8] sm:$0xff] }
  0x56   : > { %320 = vst [vmem:[%s7280_s8 + $0x1f0] sm:$0xff] %v319_v62  ;;  %v447_v62 = vld [vmem:[%s7275_s7 + $0x7e0] sm:$0xff] }
  0x57   : > { %322 = vst [vmem:[%s7280_s8 + $0x1f8] sm:$0xff] %v321_v63  ;;  %v449_v63 = vld [vmem:[%s7275_s7 + $0x7e8] sm:$0xff] }
  0x58   : > { %324 = vst [vmem:[%s7280_s8 + $0x200] sm:$0xff] %v323_v0  ;;  %v451_v0 = vld [vmem:[%s7275_s7 + $0x800] sm:$0xff] }
  0x59   : > { %326 = vst [vmem:[%s7280_s8 + $0x208] sm:$0xff] %v325_v1  ;;  %v453_v1 = vld [vmem:[%s7275_s7 + $0x808] sm:$0xff] }
  0x5a   : > { %328 = vst [vmem:[%s7280_s8 + $0x210] sm:$0xff] %v327_v2  ;;  %v455_v2 = vld [vmem:[%s7275_s7 + $0x820] sm:$0xff] }
  0x5b   : > { %330 = vst [vmem:[%s7280_s8 + $0x218] sm:$0xff] %v329_v3  ;;  %v457_v3 = vld [vmem:[%s7275_s7 + $0x828] sm:$0xff] }
  0x5c   : > { %332 = vst [vmem:[%s7280_s8 + $0x220] sm:$0xff] %v331_v4  ;;  %v459_v4 = vld [vmem:[%s7275_s7 + $0x840] sm:$0xff] }
  0x5d   : > { %334 = vst [vmem:[%s7280_s8 + $0x228] sm:$0xff] %v333_v5  ;;  %v461_v5 = vld [vmem:[%s7275_s7 + $0x848] sm:$0xff] }
  0x5e   : > { %336 = vst [vmem:[%s7280_s8 + $0x230] sm:$0xff] %v335_v6  ;;  %v463_v6 = vld [vmem:[%s7275_s7 + $0x860] sm:$0xff] }
  0x5f   : > { %338 = vst [vmem:[%s7280_s8 + $0x238] sm:$0xff] %v337_v7  ;;  %v465_v7 = vld [vmem:[%s7275_s7 + $0x868] sm:$0xff] }
  0x60   : > { %340 = vst [vmem:[%s7280_s8 + $0x240] sm:$0xff] %v339_v8  ;;  %v467_v8 = vld [vmem:[%s7275_s7 + $0x880] sm:$0xff] }
  0x61   : > { %342 = vst [vmem:[%s7280_s8 + $0x248] sm:$0xff] %v341_v9  ;;  %v469_v9 = vld [vmem:[%s7275_s7 + $0x888] sm:$0xff] }
  0x62   : > { %344 = vst [vmem:[%s7280_s8 + $0x250] sm:$0xff] %v343_v10  ;;  %v471_v10 = vld [vmem:[%s7275_s7 + $0x8a0] sm:$0xff] }
  0x63   : > { %346 = vst [vmem:[%s7280_s8 + $0x258] sm:$0xff] %v345_v11  ;;  %v473_v11 = vld [vmem:[%s7275_s7 + $0x8a8] sm:$0xff] }
  0x64   : > { %348 = vst [vmem:[%s7280_s8 + $0x260] sm:$0xff] %v347_v12  ;;  %v475_v12 = vld [vmem:[%s7275_s7 + $0x8c0] sm:$0xff] }
  0x65   : > { %350 = vst [vmem:[%s7280_s8 + $0x268] sm:$0xff] %v349_v13  ;;  %v477_v13 = vld [vmem:[%s7275_s7 + $0x8c8] sm:$0xff] }
  0x66   : > { %352 = vst [vmem:[%s7280_s8 + $0x270] sm:$0xff] %v351_v14  ;;  %v479_v14 = vld [vmem:[%s7275_s7 + $0x8e0] sm:$0xff] }
  0x67   : > { %354 = vst [vmem:[%s7280_s8 + $0x278] sm:$0xff] %v353_v15  ;;  %v481_v15 = vld [vmem:[%s7275_s7 + $0x8e8] sm:$0xff] }
  0x68   : > { %356 = vst [vmem:[%s7280_s8 + $0x280] sm:$0xff] %v355_v16  ;;  %v483_v16 = vld [vmem:[%s7275_s7 + $0x900] sm:$0xff] }
  0x69   : > { %358 = vst [vmem:[%s7280_s8 + $0x288] sm:$0xff] %v357_v17  ;;  %v485_v17 = vld [vmem:[%s7275_s7 + $0x908] sm:$0xff] }
  0x6a   : > { %360 = vst [vmem:[%s7280_s8 + $0x290] sm:$0xff] %v359_v18  ;;  %v487_v18 = vld [vmem:[%s7275_s7 + $0x920] sm:$0xff] }
  0x6b   : > { %362 = vst [vmem:[%s7280_s8 + $0x298] sm:$0xff] %v361_v19  ;;  %v489_v19 = vld [vmem:[%s7275_s7 + $0x928] sm:$0xff] }
  0x6c   : > { %364 = vst [vmem:[%s7280_s8 + $0x2a0] sm:$0xff] %v363_v20  ;;  %v491_v20 = vld [vmem:[%s7275_s7 + $0x940] sm:$0xff] }
  0x6d   : > { %366 = vst [vmem:[%s7280_s8 + $0x2a8] sm:$0xff] %v365_v21  ;;  %v493_v21 = vld [vmem:[%s7275_s7 + $0x948] sm:$0xff] }
  0x6e   : > { %368 = vst [vmem:[%s7280_s8 + $0x2b0] sm:$0xff] %v367_v22  ;;  %v495_v22 = vld [vmem:[%s7275_s7 + $0x960] sm:$0xff] }
  0x6f   : > { %370 = vst [vmem:[%s7280_s8 + $0x2b8] sm:$0xff] %v369_v23  ;;  %v497_v23 = vld [vmem:[%s7275_s7 + $0x968] sm:$0xff] }
  0x70   : > { %372 = vst [vmem:[%s7280_s8 + $0x2c0] sm:$0xff] %v371_v24  ;;  %v499_v24 = vld [vmem:[%s7275_s7 + $0x980] sm:$0xff] }
  0x71   : > { %374 = vst [vmem:[%s7280_s8 + $0x2c8] sm:$0xff] %v373_v25  ;;  %v501_v25 = vld [vmem:[%s7275_s7 + $0x988] sm:$0xff] }
  0x72   : > { %376 = vst [vmem:[%s7280_s8 + $0x2d0] sm:$0xff] %v375_v26  ;;  %v503_v26 = vld [vmem:[%s7275_s7 + $0x9a0] sm:$0xff] }
  0x73   : > { %378 = vst [vmem:[%s7280_s8 + $0x2d8] sm:$0xff] %v377_v27  ;;  %v505_v27 = vld [vmem:[%s7275_s7 + $0x9a8] sm:$0xff] }
  0x74   : > { %380 = vst [vmem:[%s7280_s8 + $0x2e0] sm:$0xff] %v379_v28  ;;  %v507_v28 = vld [vmem:[%s7275_s7 + $0x9c0] sm:$0xff] }
  0x75   : > { %382 = vst [vmem:[%s7280_s8 + $0x2e8] sm:$0xff] %v381_v29  ;;  %v509_v29 = vld [vmem:[%s7275_s7 + $0x9c8] sm:$0xff] }
  0x76   : > { %384 = vst [vmem:[%s7280_s8 + $0x2f0] sm:$0xff] %v383_v30  ;;  %v511_v30 = vld [vmem:[%s7275_s7 + $0x9e0] sm:$0xff] }
  0x77   : > { %386 = vst [vmem:[%s7280_s8 + $0x2f8] sm:$0xff] %v385_v31  ;;  %v513_v31 = vld [vmem:[%s7275_s7 + $0x9e8] sm:$0xff] }
  0x78   : > { %388 = vst [vmem:[%s7280_s8 + $0x300] sm:$0xff] %v387_v32  ;;  %v515_v32 = vld [vmem:[%s7275_s7 + $0xa00] sm:$0xff] }
  0x79   : > { %390 = vst [vmem:[%s7280_s8 + $0x308] sm:$0xff] %v389_v33  ;;  %v517_v33 = vld [vmem:[%s7275_s7 + $0xa08] sm:$0xff] }
  0x7a   : > { %392 = vst [vmem:[%s7280_s8 + $0x310] sm:$0xff] %v391_v34  ;;  %v519_v34 = vld [vmem:[%s7275_s7 + $0xa20] sm:$0xff] }
  0x7b   : > { %394 = vst [vmem:[%s7280_s8 + $0x318] sm:$0xff] %v393_v35  ;;  %v521_v35 = vld [vmem:[%s7275_s7 + $0xa28] sm:$0xff] }
  0x7c   : > { %396 = vst [vmem:[%s7280_s8 + $0x320] sm:$0xff] %v395_v36  ;;  %v523_v36 = vld [vmem:[%s7275_s7 + $0xa40] sm:$0xff] }
  0x7d   : > { %398 = vst [vmem:[%s7280_s8 + $0x328] sm:$0xff] %v397_v37  ;;  %v525_v37 = vld [vmem:[%s7275_s7 + $0xa48] sm:$0xff] }
  0x7e   : > { %400 = vst [vmem:[%s7280_s8 + $0x330] sm:$0xff] %v399_v38  ;;  %v527_v38 = vld [vmem:[%s7275_s7 + $0xa60] sm:$0xff] }
  0x7f   : > { %402 = vst [vmem:[%s7280_s8 + $0x338] sm:$0xff] %v401_v39  ;;  %v529_v39 = vld [vmem:[%s7275_s7 + $0xa68] sm:$0xff] }
  0x80   : > { %404 = vst [vmem:[%s7280_s8 + $0x340] sm:$0xff] %v403_v40  ;;  %v531_v40 = vld [vmem:[%s7275_s7 + $0xa80] sm:$0xff] }
  0x81   : > { %406 = vst [vmem:[%s7280_s8 + $0x348] sm:$0xff] %v405_v41  ;;  %v533_v41 = vld [vmem:[%s7275_s7 + $0xa88] sm:$0xff] }
  0x82   : > { %408 = vst [vmem:[%s7280_s8 + $0x350] sm:$0xff] %v407_v42  ;;  %v535_v42 = vld [vmem:[%s7275_s7 + $0xaa0] sm:$0xff] }
  0x83   : > { %410 = vst [vmem:[%s7280_s8 + $0x358] sm:$0xff] %v409_v43  ;;  %v537_v43 = vld [vmem:[%s7275_s7 + $0xaa8] sm:$0xff] }
  0x84   : > { %412 = vst [vmem:[%s7280_s8 + $0x360] sm:$0xff] %v411_v44  ;;  %v539_v44 = vld [vmem:[%s7275_s7 + $0xac0] sm:$0xff] }
  0x85   : > { %414 = vst [vmem:[%s7280_s8 + $0x368] sm:$0xff] %v413_v45  ;;  %v541_v45 = vld [vmem:[%s7275_s7 + $0xac8] sm:$0xff] }
  0x86   : > { %416 = vst [vmem:[%s7280_s8 + $0x370] sm:$0xff] %v415_v46  ;;  %v543_v46 = vld [vmem:[%s7275_s7 + $0xae0] sm:$0xff] }
  0x87   : > { %418 = vst [vmem:[%s7280_s8 + $0x378] sm:$0xff] %v417_v47  ;;  %v545_v47 = vld [vmem:[%s7275_s7 + $0xae8] sm:$0xff] }
  0x88   : > { %420 = vst [vmem:[%s7280_s8 + $0x380] sm:$0xff] %v419_v48  ;;  %v547_v48 = vld [vmem:[%s7275_s7 + $0xb00] sm:$0xff] }
  0x89   : > { %422 = vst [vmem:[%s7280_s8 + $0x388] sm:$0xff] %v421_v49  ;;  %v549_v49 = vld [vmem:[%s7275_s7 + $0xb08] sm:$0xff] }
  0x8a   : > { %424 = vst [vmem:[%s7280_s8 + $0x390] sm:$0xff] %v423_v50  ;;  %v551_v50 = vld [vmem:[%s7275_s7 + $0xb20] sm:$0xff] }
  0x8b   : > { %426 = vst [vmem:[%s7280_s8 + $0x398] sm:$0xff] %v425_v51  ;;  %v553_v51 = vld [vmem:[%s7275_s7 + $0xb28] sm:$0xff] }
  0x8c   : > { %428 = vst [vmem:[%s7280_s8 + $0x3a0] sm:$0xff] %v427_v52  ;;  %v555_v52 = vld [vmem:[%s7275_s7 + $0xb40] sm:$0xff] }
  0x8d   : > { %430 = vst [vmem:[%s7280_s8 + $0x3a8] sm:$0xff] %v429_v53  ;;  %v557_v53 = vld [vmem:[%s7275_s7 + $0xb48] sm:$0xff] }
  0x8e   : > { %432 = vst [vmem:[%s7280_s8 + $0x3b0] sm:$0xff] %v431_v54  ;;  %v559_v54 = vld [vmem:[%s7275_s7 + $0xb60] sm:$0xff] }
  0x8f   : > { %434 = vst [vmem:[%s7280_s8 + $0x3b8] sm:$0xff] %v433_v55  ;;  %v561_v55 = vld [vmem:[%s7275_s7 + $0xb68] sm:$0xff] }
  0x90   : > { %436 = vst [vmem:[%s7280_s8 + $0x3c0] sm:$0xff] %v435_v56  ;;  %v563_v56 = vld [vmem:[%s7275_s7 + $0xb80] sm:$0xff] }
  0x91   : > { %438 = vst [vmem:[%s7280_s8 + $0x3c8] sm:$0xff] %v437_v57  ;;  %v565_v57 = vld [vmem:[%s7275_s7 + $0xb88] sm:$0xff] }
  0x92   : > { %440 = vst [vmem:[%s7280_s8 + $0x3d0] sm:$0xff] %v439_v58  ;;  %v567_v58 = vld [vmem:[%s7275_s7 + $0xba0] sm:$0xff] }
  0x93   : > { %442 = vst [vmem:[%s7280_s8 + $0x3d8] sm:$0xff] %v441_v59  ;;  %v569_v59 = vld [vmem:[%s7275_s7 + $0xba8] sm:$0xff] }
  0x94   : > { %444 = vst [vmem:[%s7280_s8 + $0x3e0] sm:$0xff] %v443_v60  ;;  %v571_v60 = vld [vmem:[%s7275_s7 + $0xbc0] sm:$0xff] }
  0x95   : > { %446 = vst [vmem:[%s7280_s8 + $0x3e8] sm:$0xff] %v445_v61  ;;  %v573_v61 = vld [vmem:[%s7275_s7 + $0xbc8] sm:$0xff] }
  0x96   : > { %448 = vst [vmem:[%s7280_s8 + $0x3f0] sm:$0xff] %v447_v62  ;;  %v575_v62 = vld [vmem:[%s7275_s7 + $0xbe0] sm:$0xff] }
  0x97   : > { %450 = vst [vmem:[%s7280_s8 + $0x3f8] sm:$0xff] %v449_v63  ;;  %v577_v63 = vld [vmem:[%s7275_s7 + $0xbe8] sm:$0xff] }
  0x98   : > { %452 = vst [vmem:[%s7280_s8 + $0x400] sm:$0xff] %v451_v0  ;;  %v579_v0 = vld [vmem:[%s7275_s7 + $0xc00] sm:$0xff] }
  0x99   : > { %454 = vst [vmem:[%s7280_s8 + $0x408] sm:$0xff] %v453_v1  ;;  %v581_v1 = vld [vmem:[%s7275_s7 + $0xc08] sm:$0xff] }
  0x9a   : > { %456 = vst [vmem:[%s7280_s8 + $0x410] sm:$0xff] %v455_v2  ;;  %v583_v2 = vld [vmem:[%s7275_s7 + $0xc20] sm:$0xff] }
  0x9b   : > { %458 = vst [vmem:[%s7280_s8 + $0x418] sm:$0xff] %v457_v3  ;;  %v585_v3 = vld [vmem:[%s7275_s7 + $0xc28] sm:$0xff] }
  0x9c   : > { %460 = vst [vmem:[%s7280_s8 + $0x420] sm:$0xff] %v459_v4  ;;  %v587_v4 = vld [vmem:[%s7275_s7 + $0xc40] sm:$0xff] }
  0x9d   : > { %462 = vst [vmem:[%s7280_s8 + $0x428] sm:$0xff] %v461_v5  ;;  %v589_v5 = vld [vmem:[%s7275_s7 + $0xc48] sm:$0xff] }
  0x9e   : > { %464 = vst [vmem:[%s7280_s8 + $0x430] sm:$0xff] %v463_v6  ;;  %v591_v6 = vld [vmem:[%s7275_s7 + $0xc60] sm:$0xff] }
  0x9f   : > { %466 = vst [vmem:[%s7280_s8 + $0x438] sm:$0xff] %v465_v7  ;;  %v593_v7 = vld [vmem:[%s7275_s7 + $0xc68] sm:$0xff] }
  0xa0   : > { %468 = vst [vmem:[%s7280_s8 + $0x440] sm:$0xff] %v467_v8  ;;  %v595_v8 = vld [vmem:[%s7275_s7 + $0xc80] sm:$0xff] }
  0xa1   : > { %470 = vst [vmem:[%s7280_s8 + $0x448] sm:$0xff] %v469_v9  ;;  %v597_v9 = vld [vmem:[%s7275_s7 + $0xc88] sm:$0xff] }
  0xa2   : > { %472 = vst [vmem:[%s7280_s8 + $0x450] sm:$0xff] %v471_v10  ;;  %v599_v10 = vld [vmem:[%s7275_s7 + $0xca0] sm:$0xff] }
  0xa3   : > { %474 = vst [vmem:[%s7280_s8 + $0x458] sm:$0xff] %v473_v11  ;;  %v601_v11 = vld [vmem:[%s7275_s7 + $0xca8] sm:$0xff] }
  0xa4   : > { %476 = vst [vmem:[%s7280_s8 + $0x460] sm:$0xff] %v475_v12  ;;  %v603_v12 = vld [vmem:[%s7275_s7 + $0xcc0] sm:$0xff] }
  0xa5   : > { %478 = vst [vmem:[%s7280_s8 + $0x468] sm:$0xff] %v477_v13  ;;  %v605_v13 = vld [vmem:[%s7275_s7 + $0xcc8] sm:$0xff] }
  0xa6   : > { %480 = vst [vmem:[%s7280_s8 + $0x470] sm:$0xff] %v479_v14  ;;  %v607_v14 = vld [vmem:[%s7275_s7 + $0xce0] sm:$0xff] }
  0xa7   : > { %482 = vst [vmem:[%s7280_s8 + $0x478] sm:$0xff] %v481_v15  ;;  %v609_v15 = vld [vmem:[%s7275_s7 + $0xce8] sm:$0xff] }
  0xa8   : > { %484 = vst [vmem:[%s7280_s8 + $0x480] sm:$0xff] %v483_v16  ;;  %v611_v16 = vld [vmem:[%s7275_s7 + $0xd00] sm:$0xff] }
  0xa9   : > { %486 = vst [vmem:[%s7280_s8 + $0x488] sm:$0xff] %v485_v17  ;;  %v613_v17 = vld [vmem:[%s7275_s7 + $0xd08] sm:$0xff] }
  0xaa   : > { %488 = vst [vmem:[%s7280_s8 + $0x490] sm:$0xff] %v487_v18  ;;  %v615_v18 = vld [vmem:[%s7275_s7 + $0xd20] sm:$0xff] }
  0xab   : > { %490 = vst [vmem:[%s7280_s8 + $0x498] sm:$0xff] %v489_v19  ;;  %v617_v19 = vld [vmem:[%s7275_s7 + $0xd28] sm:$0xff] }
  0xac   : > { %492 = vst [vmem:[%s7280_s8 + $0x4a0] sm:$0xff] %v491_v20  ;;  %v619_v20 = vld [vmem:[%s7275_s7 + $0xd40] sm:$0xff] }
  0xad   : > { %494 = vst [vmem:[%s7280_s8 + $0x4a8] sm:$0xff] %v493_v21  ;;  %v621_v21 = vld [vmem:[%s7275_s7 + $0xd48] sm:$0xff] }
  0xae   : > { %496 = vst [vmem:[%s7280_s8 + $0x4b0] sm:$0xff] %v495_v22  ;;  %v623_v22 = vld [vmem:[%s7275_s7 + $0xd60] sm:$0xff] }
  0xaf   : > { %498 = vst [vmem:[%s7280_s8 + $0x4b8] sm:$0xff] %v497_v23  ;;  %v625_v23 = vld [vmem:[%s7275_s7 + $0xd68] sm:$0xff] }
  0xb0   : > { %500 = vst [vmem:[%s7280_s8 + $0x4c0] sm:$0xff] %v499_v24  ;;  %v627_v24 = vld [vmem:[%s7275_s7 + $0xd80] sm:$0xff] }
  0xb1   : > { %502 = vst [vmem:[%s7280_s8 + $0x4c8] sm:$0xff] %v501_v25  ;;  %v629_v25 = vld [vmem:[%s7275_s7 + $0xd88] sm:$0xff] }
  0xb2   : > { %504 = vst [vmem:[%s7280_s8 + $0x4d0] sm:$0xff] %v503_v26  ;;  %v631_v26 = vld [vmem:[%s7275_s7 + $0xda0] sm:$0xff] }
  0xb3   : > { %506 = vst [vmem:[%s7280_s8 + $0x4d8] sm:$0xff] %v505_v27  ;;  %v633_v27 = vld [vmem:[%s7275_s7 + $0xda8] sm:$0xff] }
  0xb4   : > { %508 = vst [vmem:[%s7280_s8 + $0x4e0] sm:$0xff] %v507_v28  ;;  %v635_v28 = vld [vmem:[%s7275_s7 + $0xdc0] sm:$0xff] }
  0xb5   : > { %510 = vst [vmem:[%s7280_s8 + $0x4e8] sm:$0xff] %v509_v29  ;;  %v637_v29 = vld [vmem:[%s7275_s7 + $0xdc8] sm:$0xff] }
  0xb6   : > { %512 = vst [vmem:[%s7280_s8 + $0x4f0] sm:$0xff] %v511_v30  ;;  %v639_v30 = vld [vmem:[%s7275_s7 + $0xde0] sm:$0xff] }
  0xb7   : > { %514 = vst [vmem:[%s7280_s8 + $0x4f8] sm:$0xff] %v513_v31  ;;  %v641_v31 = vld [vmem:[%s7275_s7 + $0xde8] sm:$0xff] }
  0xb8   : > { %516 = vst [vmem:[%s7280_s8 + $0x500] sm:$0xff] %v515_v32  ;;  %v643_v32 = vld [vmem:[%s7275_s7 + $0xe00] sm:$0xff] }
  0xb9   : > { %518 = vst [vmem:[%s7280_s8 + $0x508] sm:$0xff] %v517_v33  ;;  %v645_v33 = vld [vmem:[%s7275_s7 + $0xe08] sm:$0xff] }
  0xba   : > { %520 = vst [vmem:[%s7280_s8 + $0x510] sm:$0xff] %v519_v34  ;;  %v647_v34 = vld [vmem:[%s7275_s7 + $0xe20] sm:$0xff] }
  0xbb   : > { %522 = vst [vmem:[%s7280_s8 + $0x518] sm:$0xff] %v521_v35  ;;  %v649_v35 = vld [vmem:[%s7275_s7 + $0xe28] sm:$0xff] }
  0xbc   : > { %524 = vst [vmem:[%s7280_s8 + $0x520] sm:$0xff] %v523_v36  ;;  %v651_v36 = vld [vmem:[%s7275_s7 + $0xe40] sm:$0xff] }
  0xbd   : > { %526 = vst [vmem:[%s7280_s8 + $0x528] sm:$0xff] %v525_v37  ;;  %v653_v37 = vld [vmem:[%s7275_s7 + $0xe48] sm:$0xff] }
  0xbe   : > { %528 = vst [vmem:[%s7280_s8 + $0x530] sm:$0xff] %v527_v38  ;;  %v655_v38 = vld [vmem:[%s7275_s7 + $0xe60] sm:$0xff] }
  0xbf   : > { %530 = vst [vmem:[%s7280_s8 + $0x538] sm:$0xff] %v529_v39  ;;  %v657_v39 = vld [vmem:[%s7275_s7 + $0xe68] sm:$0xff] }
  0xc0   : > { %532 = vst [vmem:[%s7280_s8 + $0x540] sm:$0xff] %v531_v40  ;;  %v659_v40 = vld [vmem:[%s7275_s7 + $0xe80] sm:$0xff] }
  0xc1   : > { %534 = vst [vmem:[%s7280_s8 + $0x548] sm:$0xff] %v533_v41  ;;  %v661_v41 = vld [vmem:[%s7275_s7 + $0xe88] sm:$0xff] }
  0xc2   : > { %536 = vst [vmem:[%s7280_s8 + $0x550] sm:$0xff] %v535_v42  ;;  %v663_v42 = vld [vmem:[%s7275_s7 + $0xea0] sm:$0xff] }
  0xc3   : > { %538 = vst [vmem:[%s7280_s8 + $0x558] sm:$0xff] %v537_v43  ;;  %v665_v43 = vld [vmem:[%s7275_s7 + $0xea8] sm:$0xff] }
  0xc4   : > { %540 = vst [vmem:[%s7280_s8 + $0x560] sm:$0xff] %v539_v44  ;;  %v667_v44 = vld [vmem:[%s7275_s7 + $0xec0] sm:$0xff] }
  0xc5   : > { %542 = vst [vmem:[%s7280_s8 + $0x568] sm:$0xff] %v541_v45  ;;  %v669_v45 = vld [vmem:[%s7275_s7 + $0xec8] sm:$0xff] }
  0xc6   : > { %544 = vst [vmem:[%s7280_s8 + $0x570] sm:$0xff] %v543_v46  ;;  %v671_v46 = vld [vmem:[%s7275_s7 + $0xee0] sm:$0xff] }
  0xc7   : > { %546 = vst [vmem:[%s7280_s8 + $0x578] sm:$0xff] %v545_v47  ;;  %v673_v47 = vld [vmem:[%s7275_s7 + $0xee8] sm:$0xff] }
  0xc8   : > { %548 = vst [vmem:[%s7280_s8 + $0x580] sm:$0xff] %v547_v48  ;;  %v675_v48 = vld [vmem:[%s7275_s7 + $0xf00] sm:$0xff] }
  0xc9   : > { %550 = vst [vmem:[%s7280_s8 + $0x588] sm:$0xff] %v549_v49  ;;  %v677_v49 = vld [vmem:[%s7275_s7 + $0xf08] sm:$0xff] }
  0xca   : > { %552 = vst [vmem:[%s7280_s8 + $0x590] sm:$0xff] %v551_v50  ;;  %v679_v50 = vld [vmem:[%s7275_s7 + $0xf20] sm:$0xff] }
  0xcb   : > { %554 = vst [vmem:[%s7280_s8 + $0x598] sm:$0xff] %v553_v51  ;;  %v681_v51 = vld [vmem:[%s7275_s7 + $0xf28] sm:$0xff] }
  0xcc   : > { %556 = vst [vmem:[%s7280_s8 + $0x5a0] sm:$0xff] %v555_v52  ;;  %v683_v52 = vld [vmem:[%s7275_s7 + $0xf40] sm:$0xff] }
  0xcd   : > { %558 = vst [vmem:[%s7280_s8 + $0x5a8] sm:$0xff] %v557_v53  ;;  %v685_v53 = vld [vmem:[%s7275_s7 + $0xf48] sm:$0xff] }
  0xce   : > { %560 = vst [vmem:[%s7280_s8 + $0x5b0] sm:$0xff] %v559_v54  ;;  %v687_v54 = vld [vmem:[%s7275_s7 + $0xf60] sm:$0xff] }
  0xcf   : > { %562 = vst [vmem:[%s7280_s8 + $0x5b8] sm:$0xff] %v561_v55  ;;  %v689_v55 = vld [vmem:[%s7275_s7 + $0xf68] sm:$0xff] }
  0xd0   : > { %564 = vst [vmem:[%s7280_s8 + $0x5c0] sm:$0xff] %v563_v56  ;;  %v691_v56 = vld [vmem:[%s7275_s7 + $0xf80] sm:$0xff] }
  0xd1   : > { %566 = vst [vmem:[%s7280_s8 + $0x5c8] sm:$0xff] %v565_v57  ;;  %v693_v57 = vld [vmem:[%s7275_s7 + $0xf88] sm:$0xff] }
  0xd2   : > { %568 = vst [vmem:[%s7280_s8 + $0x5d0] sm:$0xff] %v567_v58  ;;  %v695_v58 = vld [vmem:[%s7275_s7 + $0xfa0] sm:$0xff] }
  0xd3   : > { %570 = vst [vmem:[%s7280_s8 + $0x5d8] sm:$0xff] %v569_v59  ;;  %v697_v59 = vld [vmem:[%s7275_s7 + $0xfa8] sm:$0xff] }
  0xd4   : > { %572 = vst [vmem:[%s7280_s8 + $0x5e0] sm:$0xff] %v571_v60  ;;  %v699_v60 = vld [vmem:[%s7275_s7 + $0xfc0] sm:$0xff] }
  0xd5   : > { %574 = vst [vmem:[%s7280_s8 + $0x5e8] sm:$0xff] %v573_v61  ;;  %v701_v61 = vld [vmem:[%s7275_s7 + $0xfc8] sm:$0xff] }
  0xd6   : > { %576 = vst [vmem:[%s7280_s8 + $0x5f0] sm:$0xff] %v575_v62  ;;  %v703_v62 = vld [vmem:[%s7275_s7 + $0xfe0] sm:$0xff] }
  0xd7   : > { %578 = vst [vmem:[%s7280_s8 + $0x5f8] sm:$0xff] %v577_v63  ;;  %v705_v63 = vld [vmem:[%s7275_s7 + $0xfe8] sm:$0xff] }
  0xd8   : > { %580 = vst [vmem:[%s7280_s8 + $0x600] sm:$0xff] %v579_v0  ;;  %v707_v0 = vld [vmem:[%s7275_s7 + $0x1000] sm:$0xff] }
  0xd9   : > { %582 = vst [vmem:[%s7280_s8 + $0x608] sm:$0xff] %v581_v1  ;;  %v709_v1 = vld [vmem:[%s7275_s7 + $0x1008] sm:$0xff] }
  0xda   : > { %584 = vst [vmem:[%s7280_s8 + $0x610] sm:$0xff] %v583_v2  ;;  %v711_v2 = vld [vmem:[%s7275_s7 + $0x1020] sm:$0xff] }
  0xdb   : > { %586 = vst [vmem:[%s7280_s8 + $0x618] sm:$0xff] %v585_v3  ;;  %v713_v3 = vld [vmem:[%s7275_s7 + $0x1028] sm:$0xff] }
  0xdc   : > { %588 = vst [vmem:[%s7280_s8 + $0x620] sm:$0xff] %v587_v4  ;;  %v715_v4 = vld [vmem:[%s7275_s7 + $0x1040] sm:$0xff] }
  0xdd   : > { %590 = vst [vmem:[%s7280_s8 + $0x628] sm:$0xff] %v589_v5  ;;  %v717_v5 = vld [vmem:[%s7275_s7 + $0x1048] sm:$0xff] }
  0xde   : > { %592 = vst [vmem:[%s7280_s8 + $0x630] sm:$0xff] %v591_v6  ;;  %v719_v6 = vld [vmem:[%s7275_s7 + $0x1060] sm:$0xff] }
  0xdf   : > { %594 = vst [vmem:[%s7280_s8 + $0x638] sm:$0xff] %v593_v7  ;;  %v721_v7 = vld [vmem:[%s7275_s7 + $0x1068] sm:$0xff] }
  0xe0   : > { %596 = vst [vmem:[%s7280_s8 + $0x640] sm:$0xff] %v595_v8  ;;  %v723_v8 = vld [vmem:[%s7275_s7 + $0x1080] sm:$0xff] }
  0xe1   : > { %598 = vst [vmem:[%s7280_s8 + $0x648] sm:$0xff] %v597_v9  ;;  %v725_v9 = vld [vmem:[%s7275_s7 + $0x1088] sm:$0xff] }
  0xe2   : > { %600 = vst [vmem:[%s7280_s8 + $0x650] sm:$0xff] %v599_v10  ;;  %v727_v10 = vld [vmem:[%s7275_s7 + $0x10a0] sm:$0xff] }
  0xe3   : > { %602 = vst [vmem:[%s7280_s8 + $0x658] sm:$0xff] %v601_v11  ;;  %v729_v11 = vld [vmem:[%s7275_s7 + $0x10a8] sm:$0xff] }
  0xe4   : > { %604 = vst [vmem:[%s7280_s8 + $0x660] sm:$0xff] %v603_v12  ;;  %v731_v12 = vld [vmem:[%s7275_s7 + $0x10c0] sm:$0xff] }
  0xe5   : > { %606 = vst [vmem:[%s7280_s8 + $0x668] sm:$0xff] %v605_v13  ;;  %v733_v13 = vld [vmem:[%s7275_s7 + $0x10c8] sm:$0xff] }
  0xe6   : > { %608 = vst [vmem:[%s7280_s8 + $0x670] sm:$0xff] %v607_v14  ;;  %v735_v14 = vld [vmem:[%s7275_s7 + $0x10e0] sm:$0xff] }
  0xe7   : > { %610 = vst [vmem:[%s7280_s8 + $0x678] sm:$0xff] %v609_v15  ;;  %v737_v15 = vld [vmem:[%s7275_s7 + $0x10e8] sm:$0xff] }
  0xe8   : > { %612 = vst [vmem:[%s7280_s8 + $0x680] sm:$0xff] %v611_v16  ;;  %v739_v16 = vld [vmem:[%s7275_s7 + $0x1100] sm:$0xff] }
  0xe9   : > { %614 = vst [vmem:[%s7280_s8 + $0x688] sm:$0xff] %v613_v17  ;;  %v741_v17 = vld [vmem:[%s7275_s7 + $0x1108] sm:$0xff] }
  0xea   : > { %616 = vst [vmem:[%s7280_s8 + $0x690] sm:$0xff] %v615_v18  ;;  %v743_v18 = vld [vmem:[%s7275_s7 + $0x1120] sm:$0xff] }
  0xeb   : > { %618 = vst [vmem:[%s7280_s8 + $0x698] sm:$0xff] %v617_v19  ;;  %v745_v19 = vld [vmem:[%s7275_s7 + $0x1128] sm:$0xff] }
  0xec   : > { %620 = vst [vmem:[%s7280_s8 + $0x6a0] sm:$0xff] %v619_v20  ;;  %v747_v20 = vld [vmem:[%s7275_s7 + $0x1140] sm:$0xff] }
  0xed   : > { %622 = vst [vmem:[%s7280_s8 + $0x6a8] sm:$0xff] %v621_v21  ;;  %v749_v21 = vld [vmem:[%s7275_s7 + $0x1148] sm:$0xff] }
  0xee   : > { %624 = vst [vmem:[%s7280_s8 + $0x6b0] sm:$0xff] %v623_v22  ;;  %v751_v22 = vld [vmem:[%s7275_s7 + $0x1160] sm:$0xff] }
  0xef   : > { %626 = vst [vmem:[%s7280_s8 + $0x6b8] sm:$0xff] %v625_v23  ;;  %v753_v23 = vld [vmem:[%s7275_s7 + $0x1168] sm:$0xff] }
  0xf0   : > { %628 = vst [vmem:[%s7280_s8 + $0x6c0] sm:$0xff] %v627_v24  ;;  %v755_v24 = vld [vmem:[%s7275_s7 + $0x1180] sm:$0xff] }
  0xf1   : > { %630 = vst [vmem:[%s7280_s8 + $0x6c8] sm:$0xff] %v629_v25  ;;  %v757_v25 = vld [vmem:[%s7275_s7 + $0x1188] sm:$0xff] }
  0xf2   : > { %632 = vst [vmem:[%s7280_s8 + $0x6d0] sm:$0xff] %v631_v26  ;;  %v759_v26 = vld [vmem:[%s7275_s7 + $0x11a0] sm:$0xff] }
  0xf3   : > { %634 = vst [vmem:[%s7280_s8 + $0x6d8] sm:$0xff] %v633_v27  ;;  %v761_v27 = vld [vmem:[%s7275_s7 + $0x11a8] sm:$0xff] }
  0xf4   : > { %636 = vst [vmem:[%s7280_s8 + $0x6e0] sm:$0xff] %v635_v28  ;;  %v763_v28 = vld [vmem:[%s7275_s7 + $0x11c0] sm:$0xff] }
  0xf5   : > { %638 = vst [vmem:[%s7280_s8 + $0x6e8] sm:$0xff] %v637_v29  ;;  %v765_v29 = vld [vmem:[%s7275_s7 + $0x11c8] sm:$0xff] }
  0xf6   : > { %640 = vst [vmem:[%s7280_s8 + $0x6f0] sm:$0xff] %v639_v30  ;;  %v767_v30 = vld [vmem:[%s7275_s7 + $0x11e0] sm:$0xff] }
  0xf7   : > { %642 = vst [vmem:[%s7280_s8 + $0x6f8] sm:$0xff] %v641_v31  ;;  %v769_v31 = vld [vmem:[%s7275_s7 + $0x11e8] sm:$0xff] }
  0xf8   : > { %644 = vst [vmem:[%s7280_s8 + $0x700] sm:$0xff] %v643_v32  ;;  %v771_v32 = vld [vmem:[%s7275_s7 + $0x1200] sm:$0xff] }
  0xf9   : > { %646 = vst [vmem:[%s7280_s8 + $0x708] sm:$0xff] %v645_v33  ;;  %v773_v33 = vld [vmem:[%s7275_s7 + $0x1208] sm:$0xff] }
  0xfa   : > { %648 = vst [vmem:[%s7280_s8 + $0x710] sm:$0xff] %v647_v34  ;;  %v775_v34 = vld [vmem:[%s7275_s7 + $0x1220] sm:$0xff] }
  0xfb   : > { %650 = vst [vmem:[%s7280_s8 + $0x718] sm:$0xff] %v649_v35  ;;  %v777_v35 = vld [vmem:[%s7275_s7 + $0x1228] sm:$0xff] }
  0xfc   : > { %652 = vst [vmem:[%s7280_s8 + $0x720] sm:$0xff] %v651_v36  ;;  %v779_v36 = vld [vmem:[%s7275_s7 + $0x1240] sm:$0xff] }
  0xfd   : > { %654 = vst [vmem:[%s7280_s8 + $0x728] sm:$0xff] %v653_v37  ;;  %v781_v37 = vld [vmem:[%s7275_s7 + $0x1248] sm:$0xff] }
  0xfe   : > { %656 = vst [vmem:[%s7280_s8 + $0x730] sm:$0xff] %v655_v38  ;;  %v783_v38 = vld [vmem:[%s7275_s7 + $0x1260] sm:$0xff] }
  0xff   : > { %658 = vst [vmem:[%s7280_s8 + $0x738] sm:$0xff] %v657_v39  ;;  %v785_v39 = vld [vmem:[%s7275_s7 + $0x1268] sm:$0xff] }
 0x100   : > { %660 = vst [vmem:[%s7280_s8 + $0x740] sm:$0xff] %v659_v40  ;;  %v787_v40 = vld [vmem:[%s7275_s7 + $0x1280] sm:$0xff] }
 0x101   : > { %662 = vst [vmem:[%s7280_s8 + $0x748] sm:$0xff] %v661_v41  ;;  %v789_v41 = vld [vmem:[%s7275_s7 + $0x1288] sm:$0xff] }
 0x102   : > { %664 = vst [vmem:[%s7280_s8 + $0x750] sm:$0xff] %v663_v42  ;;  %v791_v42 = vld [vmem:[%s7275_s7 + $0x12a0] sm:$0xff] }
 0x103   : > { %666 = vst [vmem:[%s7280_s8 + $0x758] sm:$0xff] %v665_v43  ;;  %v793_v43 = vld [vmem:[%s7275_s7 + $0x12a8] sm:$0xff] }
 0x104   : > { %668 = vst [vmem:[%s7280_s8 + $0x760] sm:$0xff] %v667_v44  ;;  %v795_v44 = vld [vmem:[%s7275_s7 + $0x12c0] sm:$0xff] }
 0x105   : > { %670 = vst [vmem:[%s7280_s8 + $0x768] sm:$0xff] %v669_v45  ;;  %v797_v45 = vld [vmem:[%s7275_s7 + $0x12c8] sm:$0xff] }
 0x106   : > { %672 = vst [vmem:[%s7280_s8 + $0x770] sm:$0xff] %v671_v46  ;;  %v799_v46 = vld [vmem:[%s7275_s7 + $0x12e0] sm:$0xff] }
 0x107   : > { %674 = vst [vmem:[%s7280_s8 + $0x778] sm:$0xff] %v673_v47  ;;  %v801_v47 = vld [vmem:[%s7275_s7 + $0x12e8] sm:$0xff] }
 0x108   : > { %676 = vst [vmem:[%s7280_s8 + $0x780] sm:$0xff] %v675_v48  ;;  %v803_v48 = vld [vmem:[%s7275_s7 + $0x1300] sm:$0xff] }
 0x109   : > { %678 = vst [vmem:[%s7280_s8 + $0x788] sm:$0xff] %v677_v49  ;;  %v805_v49 = vld [vmem:[%s7275_s7 + $0x1308] sm:$0xff] }
 0x10a   : > { %680 = vst [vmem:[%s7280_s8 + $0x790] sm:$0xff] %v679_v50  ;;  %v807_v50 = vld [vmem:[%s7275_s7 + $0x1320] sm:$0xff] }
 0x10b   : > { %682 = vst [vmem:[%s7280_s8 + $0x798] sm:$0xff] %v681_v51  ;;  %v809_v51 = vld [vmem:[%s7275_s7 + $0x1328] sm:$0xff] }
 0x10c   : > { %684 = vst [vmem:[%s7280_s8 + $0x7a0] sm:$0xff] %v683_v52  ;;  %v811_v52 = vld [vmem:[%s7275_s7 + $0x1340] sm:$0xff] }
 0x10d   : > { %686 = vst [vmem:[%s7280_s8 + $0x7a8] sm:$0xff] %v685_v53  ;;  %v813_v53 = vld [vmem:[%s7275_s7 + $0x1348] sm:$0xff] }
 0x10e   : > { %688 = vst [vmem:[%s7280_s8 + $0x7b0] sm:$0xff] %v687_v54  ;;  %v815_v54 = vld [vmem:[%s7275_s7 + $0x1360] sm:$0xff] }
 0x10f   : > { %690 = vst [vmem:[%s7280_s8 + $0x7b8] sm:$0xff] %v689_v55  ;;  %v817_v55 = vld [vmem:[%s7275_s7 + $0x1368] sm:$0xff] }
 0x110   : > { %692 = vst [vmem:[%s7280_s8 + $0x7c0] sm:$0xff] %v691_v56  ;;  %v819_v56 = vld [vmem:[%s7275_s7 + $0x1380] sm:$0xff] }
 0x111   : > { %694 = vst [vmem:[%s7280_s8 + $0x7c8] sm:$0xff] %v693_v57  ;;  %v821_v57 = vld [vmem:[%s7275_s7 + $0x1388] sm:$0xff] }
 0x112   : > { %696 = vst [vmem:[%s7280_s8 + $0x7d0] sm:$0xff] %v695_v58  ;;  %v823_v58 = vld [vmem:[%s7275_s7 + $0x13a0] sm:$0xff] }
 0x113   : > { %698 = vst [vmem:[%s7280_s8 + $0x7d8] sm:$0xff] %v697_v59  ;;  %v825_v59 = vld [vmem:[%s7275_s7 + $0x13a8] sm:$0xff] }
 0x114   : > { %700 = vst [vmem:[%s7280_s8 + $0x7e0] sm:$0xff] %v699_v60  ;;  %v827_v60 = vld [vmem:[%s7275_s7 + $0x13c0] sm:$0xff] }
 0x115   : > { %702 = vst [vmem:[%s7280_s8 + $0x7e8] sm:$0xff] %v701_v61  ;;  %v829_v61 = vld [vmem:[%s7275_s7 + $0x13c8] sm:$0xff] }
 0x116   : > { %704 = vst [vmem:[%s7280_s8 + $0x7f0] sm:$0xff] %v703_v62  ;;  %v831_v62 = vld [vmem:[%s7275_s7 + $0x13e0] sm:$0xff] }
 0x117   : > { %706 = vst [vmem:[%s7280_s8 + $0x7f8] sm:$0xff] %v705_v63  ;;  %v833_v63 = vld [vmem:[%s7275_s7 + $0x13e8] sm:$0xff] }
 0x118   : > { %708 = vst [vmem:[%s7280_s8 + $0x800] sm:$0xff] %v707_v0  ;;  %v835_v0 = vld [vmem:[%s7275_s7 + $0x1400] sm:$0xff] }
 0x119   : > { %710 = vst [vmem:[%s7280_s8 + $0x808] sm:$0xff] %v709_v1  ;;  %v837_v1 = vld [vmem:[%s7275_s7 + $0x1408] sm:$0xff] }
 0x11a   : > { %712 = vst [vmem:[%s7280_s8 + $0x810] sm:$0xff] %v711_v2  ;;  %v839_v2 = vld [vmem:[%s7275_s7 + $0x1420] sm:$0xff] }
 0x11b   : > { %714 = vst [vmem:[%s7280_s8 + $0x818] sm:$0xff] %v713_v3  ;;  %v841_v3 = vld [vmem:[%s7275_s7 + $0x1428] sm:$0xff] }
 0x11c   : > { %716 = vst [vmem:[%s7280_s8 + $0x820] sm:$0xff] %v715_v4  ;;  %v843_v4 = vld [vmem:[%s7275_s7 + $0x1440] sm:$0xff] }
 0x11d   : > { %718 = vst [vmem:[%s7280_s8 + $0x828] sm:$0xff] %v717_v5  ;;  %v845_v5 = vld [vmem:[%s7275_s7 + $0x1448] sm:$0xff] }
 0x11e   : > { %720 = vst [vmem:[%s7280_s8 + $0x830] sm:$0xff] %v719_v6  ;;  %v847_v6 = vld [vmem:[%s7275_s7 + $0x1460] sm:$0xff] }
 0x11f   : > { %722 = vst [vmem:[%s7280_s8 + $0x838] sm:$0xff] %v721_v7  ;;  %v849_v7 = vld [vmem:[%s7275_s7 + $0x1468] sm:$0xff] }
 0x120   : > { %724 = vst [vmem:[%s7280_s8 + $0x840] sm:$0xff] %v723_v8  ;;  %v851_v8 = vld [vmem:[%s7275_s7 + $0x1480] sm:$0xff] }
 0x121   : > { %726 = vst [vmem:[%s7280_s8 + $0x848] sm:$0xff] %v725_v9  ;;  %v853_v9 = vld [vmem:[%s7275_s7 + $0x1488] sm:$0xff] }
 0x122   : > { %728 = vst [vmem:[%s7280_s8 + $0x850] sm:$0xff] %v727_v10  ;;  %v855_v10 = vld [vmem:[%s7275_s7 + $0x14a0] sm:$0xff] }
 0x123   : > { %730 = vst [vmem:[%s7280_s8 + $0x858] sm:$0xff] %v729_v11  ;;  %v857_v11 = vld [vmem:[%s7275_s7 + $0x14a8] sm:$0xff] }
 0x124   : > { %732 = vst [vmem:[%s7280_s8 + $0x860] sm:$0xff] %v731_v12  ;;  %v859_v12 = vld [vmem:[%s7275_s7 + $0x14c0] sm:$0xff] }
 0x125   : > { %734 = vst [vmem:[%s7280_s8 + $0x868] sm:$0xff] %v733_v13  ;;  %v861_v13 = vld [vmem:[%s7275_s7 + $0x14c8] sm:$0xff] }
 0x126   : > { %736 = vst [vmem:[%s7280_s8 + $0x870] sm:$0xff] %v735_v14  ;;  %v863_v14 = vld [vmem:[%s7275_s7 + $0x14e0] sm:$0xff] }
 0x127   : > { %738 = vst [vmem:[%s7280_s8 + $0x878] sm:$0xff] %v737_v15  ;;  %v865_v15 = vld [vmem:[%s7275_s7 + $0x14e8] sm:$0xff] }
 0x128   : > { %740 = vst [vmem:[%s7280_s8 + $0x880] sm:$0xff] %v739_v16  ;;  %v867_v16 = vld [vmem:[%s7275_s7 + $0x1500] sm:$0xff] }
 0x129   : > { %742 = vst [vmem:[%s7280_s8 + $0x888] sm:$0xff] %v741_v17  ;;  %v869_v17 = vld [vmem:[%s7275_s7 + $0x1508] sm:$0xff] }
 0x12a   : > { %744 = vst [vmem:[%s7280_s8 + $0x890] sm:$0xff] %v743_v18  ;;  %v871_v18 = vld [vmem:[%s7275_s7 + $0x1520] sm:$0xff] }
 0x12b   : > { %746 = vst [vmem:[%s7280_s8 + $0x898] sm:$0xff] %v745_v19  ;;  %v873_v19 = vld [vmem:[%s7275_s7 + $0x1528] sm:$0xff] }
 0x12c   : > { %748 = vst [vmem:[%s7280_s8 + $0x8a0] sm:$0xff] %v747_v20  ;;  %v875_v20 = vld [vmem:[%s7275_s7 + $0x1540] sm:$0xff] }
 0x12d   : > { %750 = vst [vmem:[%s7280_s8 + $0x8a8] sm:$0xff] %v749_v21  ;;  %v877_v21 = vld [vmem:[%s7275_s7 + $0x1548] sm:$0xff] }
 0x12e   : > { %752 = vst [vmem:[%s7280_s8 + $0x8b0] sm:$0xff] %v751_v22  ;;  %v879_v22 = vld [vmem:[%s7275_s7 + $0x1560] sm:$0xff] }
 0x12f   : > { %754 = vst [vmem:[%s7280_s8 + $0x8b8] sm:$0xff] %v753_v23  ;;  %v881_v23 = vld [vmem:[%s7275_s7 + $0x1568] sm:$0xff] }
 0x130   : > { %756 = vst [vmem:[%s7280_s8 + $0x8c0] sm:$0xff] %v755_v24  ;;  %v883_v24 = vld [vmem:[%s7275_s7 + $0x1580] sm:$0xff] }
 0x131   : > { %758 = vst [vmem:[%s7280_s8 + $0x8c8] sm:$0xff] %v757_v25  ;;  %v885_v25 = vld [vmem:[%s7275_s7 + $0x1588] sm:$0xff] }
 0x132   : > { %760 = vst [vmem:[%s7280_s8 + $0x8d0] sm:$0xff] %v759_v26  ;;  %v887_v26 = vld [vmem:[%s7275_s7 + $0x15a0] sm:$0xff] }
 0x133   : > { %762 = vst [vmem:[%s7280_s8 + $0x8d8] sm:$0xff] %v761_v27  ;;  %v889_v27 = vld [vmem:[%s7275_s7 + $0x15a8] sm:$0xff] }
 0x134   : > { %764 = vst [vmem:[%s7280_s8 + $0x8e0] sm:$0xff] %v763_v28  ;;  %v891_v28 = vld [vmem:[%s7275_s7 + $0x15c0] sm:$0xff] }
 0x135   : > { %766 = vst [vmem:[%s7280_s8 + $0x8e8] sm:$0xff] %v765_v29  ;;  %v893_v29 = vld [vmem:[%s7275_s7 + $0x15c8] sm:$0xff] }
 0x136   : > { %768 = vst [vmem:[%s7280_s8 + $0x8f0] sm:$0xff] %v767_v30  ;;  %v895_v30 = vld [vmem:[%s7275_s7 + $0x15e0] sm:$0xff] }
 0x137   : > { %770 = vst [vmem:[%s7280_s8 + $0x8f8] sm:$0xff] %v769_v31  ;;  %v897_v31 = vld [vmem:[%s7275_s7 + $0x15e8] sm:$0xff] }
 0x138   : > { %772 = vst [vmem:[%s7280_s8 + $0x900] sm:$0xff] %v771_v32  ;;  %v899_v32 = vld [vmem:[%s7275_s7 + $0x1600] sm:$0xff] }
 0x139   : > { %774 = vst [vmem:[%s7280_s8 + $0x908] sm:$0xff] %v773_v33  ;;  %v901_v33 = vld [vmem:[%s7275_s7 + $0x1608] sm:$0xff] }
 0x13a   : > { %776 = vst [vmem:[%s7280_s8 + $0x910] sm:$0xff] %v775_v34  ;;  %v903_v34 = vld [vmem:[%s7275_s7 + $0x1620] sm:$0xff] }
 0x13b   : > { %778 = vst [vmem:[%s7280_s8 + $0x918] sm:$0xff] %v777_v35  ;;  %v905_v35 = vld [vmem:[%s7275_s7 + $0x1628] sm:$0xff] }
 0x13c   : > { %780 = vst [vmem:[%s7280_s8 + $0x920] sm:$0xff] %v779_v36  ;;  %v907_v36 = vld [vmem:[%s7275_s7 + $0x1640] sm:$0xff] }
 0x13d   : > { %782 = vst [vmem:[%s7280_s8 + $0x928] sm:$0xff] %v781_v37  ;;  %v909_v37 = vld [vmem:[%s7275_s7 + $0x1648] sm:$0xff] }
 0x13e   : > { %784 = vst [vmem:[%s7280_s8 + $0x930] sm:$0xff] %v783_v38  ;;  %v911_v38 = vld [vmem:[%s7275_s7 + $0x1660] sm:$0xff] }
 0x13f   : > { %786 = vst [vmem:[%s7280_s8 + $0x938] sm:$0xff] %v785_v39  ;;  %v913_v39 = vld [vmem:[%s7275_s7 + $0x1668] sm:$0xff] }
 0x140   : > { %788 = vst [vmem:[%s7280_s8 + $0x940] sm:$0xff] %v787_v40  ;;  %v915_v40 = vld [vmem:[%s7275_s7 + $0x1680] sm:$0xff] }
 0x141   : > { %790 = vst [vmem:[%s7280_s8 + $0x948] sm:$0xff] %v789_v41  ;;  %v917_v41 = vld [vmem:[%s7275_s7 + $0x1688] sm:$0xff] }
 0x142   : > { %792 = vst [vmem:[%s7280_s8 + $0x950] sm:$0xff] %v791_v42  ;;  %v919_v42 = vld [vmem:[%s7275_s7 + $0x16a0] sm:$0xff] }
 0x143   : > { %794 = vst [vmem:[%s7280_s8 + $0x958] sm:$0xff] %v793_v43  ;;  %v921_v43 = vld [vmem:[%s7275_s7 + $0x16a8] sm:$0xff] }
 0x144   : > { %796 = vst [vmem:[%s7280_s8 + $0x960] sm:$0xff] %v795_v44  ;;  %v923_v44 = vld [vmem:[%s7275_s7 + $0x16c0] sm:$0xff] }
 0x145   : > { %798 = vst [vmem:[%s7280_s8 + $0x968] sm:$0xff] %v797_v45  ;;  %v925_v45 = vld [vmem:[%s7275_s7 + $0x16c8] sm:$0xff] }
 0x146   : > { %800 = vst [vmem:[%s7280_s8 + $0x970] sm:$0xff] %v799_v46  ;;  %v927_v46 = vld [vmem:[%s7275_s7 + $0x16e0] sm:$0xff] }
 0x147   : > { %802 = vst [vmem:[%s7280_s8 + $0x978] sm:$0xff] %v801_v47  ;;  %v929_v47 = vld [vmem:[%s7275_s7 + $0x16e8] sm:$0xff] }
 0x148   : > { %804 = vst [vmem:[%s7280_s8 + $0x980] sm:$0xff] %v803_v48  ;;  %v931_v48 = vld [vmem:[%s7275_s7 + $0x1700] sm:$0xff] }
 0x149   : > { %806 = vst [vmem:[%s7280_s8 + $0x988] sm:$0xff] %v805_v49  ;;  %v933_v49 = vld [vmem:[%s7275_s7 + $0x1708] sm:$0xff] }
 0x14a   : > { %808 = vst [vmem:[%s7280_s8 + $0x990] sm:$0xff] %v807_v50  ;;  %v935_v50 = vld [vmem:[%s7275_s7 + $0x1720] sm:$0xff] }
 0x14b   : > { %810 = vst [vmem:[%s7280_s8 + $0x998] sm:$0xff] %v809_v51  ;;  %v937_v51 = vld [vmem:[%s7275_s7 + $0x1728] sm:$0xff] }
 0x14c   : > { %812 = vst [vmem:[%s7280_s8 + $0x9a0] sm:$0xff] %v811_v52  ;;  %v939_v52 = vld [vmem:[%s7275_s7 + $0x1740] sm:$0xff] }
 0x14d   : > { %814 = vst [vmem:[%s7280_s8 + $0x9a8] sm:$0xff] %v813_v53  ;;  %v941_v53 = vld [vmem:[%s7275_s7 + $0x1748] sm:$0xff] }
 0x14e   : > { %816 = vst [vmem:[%s7280_s8 + $0x9b0] sm:$0xff] %v815_v54  ;;  %v943_v54 = vld [vmem:[%s7275_s7 + $0x1760] sm:$0xff] }
 0x14f   : > { %818 = vst [vmem:[%s7280_s8 + $0x9b8] sm:$0xff] %v817_v55  ;;  %v945_v55 = vld [vmem:[%s7275_s7 + $0x1768] sm:$0xff] }
 0x150   : > { %820 = vst [vmem:[%s7280_s8 + $0x9c0] sm:$0xff] %v819_v56  ;;  %v947_v56 = vld [vmem:[%s7275_s7 + $0x1780] sm:$0xff] }
 0x151   : > { %822 = vst [vmem:[%s7280_s8 + $0x9c8] sm:$0xff] %v821_v57  ;;  %v949_v57 = vld [vmem:[%s7275_s7 + $0x1788] sm:$0xff] }
 0x152   : > { %824 = vst [vmem:[%s7280_s8 + $0x9d0] sm:$0xff] %v823_v58  ;;  %v951_v58 = vld [vmem:[%s7275_s7 + $0x17a0] sm:$0xff] }
 0x153   : > { %826 = vst [vmem:[%s7280_s8 + $0x9d8] sm:$0xff] %v825_v59  ;;  %v953_v59 = vld [vmem:[%s7275_s7 + $0x17a8] sm:$0xff] }
 0x154   : > { %828 = vst [vmem:[%s7280_s8 + $0x9e0] sm:$0xff] %v827_v60  ;;  %v955_v60 = vld [vmem:[%s7275_s7 + $0x17c0] sm:$0xff] }
 0x155   : > { %830 = vst [vmem:[%s7280_s8 + $0x9e8] sm:$0xff] %v829_v61  ;;  %v957_v61 = vld [vmem:[%s7275_s7 + $0x17c8] sm:$0xff] }
 0x156   : > { %832 = vst [vmem:[%s7280_s8 + $0x9f0] sm:$0xff] %v831_v62  ;;  %v959_v62 = vld [vmem:[%s7275_s7 + $0x17e0] sm:$0xff] }
 0x157   : > { %834 = vst [vmem:[%s7280_s8 + $0x9f8] sm:$0xff] %v833_v63  ;;  %v961_v63 = vld [vmem:[%s7275_s7 + $0x17e8] sm:$0xff] }
 0x158   : > { %836 = vst [vmem:[%s7280_s8 + $0xa00] sm:$0xff] %v835_v0  ;;  %v963_v0 = vld [vmem:[%s7275_s7 + $0x1800] sm:$0xff] }
 0x159   : > { %838 = vst [vmem:[%s7280_s8 + $0xa08] sm:$0xff] %v837_v1  ;;  %v965_v1 = vld [vmem:[%s7275_s7 + $0x1808] sm:$0xff] }
 0x15a   : > { %840 = vst [vmem:[%s7280_s8 + $0xa10] sm:$0xff] %v839_v2  ;;  %v967_v2 = vld [vmem:[%s7275_s7 + $0x1820] sm:$0xff] }
 0x15b   : > { %842 = vst [vmem:[%s7280_s8 + $0xa18] sm:$0xff] %v841_v3  ;;  %v969_v3 = vld [vmem:[%s7275_s7 + $0x1828] sm:$0xff] }
 0x15c   : > { %844 = vst [vmem:[%s7280_s8 + $0xa20] sm:$0xff] %v843_v4  ;;  %v971_v4 = vld [vmem:[%s7275_s7 + $0x1840] sm:$0xff] }
 0x15d   : > { %846 = vst [vmem:[%s7280_s8 + $0xa28] sm:$0xff] %v845_v5  ;;  %v973_v5 = vld [vmem:[%s7275_s7 + $0x1848] sm:$0xff] }
 0x15e   : > { %848 = vst [vmem:[%s7280_s8 + $0xa30] sm:$0xff] %v847_v6  ;;  %v975_v6 = vld [vmem:[%s7275_s7 + $0x1860] sm:$0xff] }
 0x15f   : > { %850 = vst [vmem:[%s7280_s8 + $0xa38] sm:$0xff] %v849_v7  ;;  %v977_v7 = vld [vmem:[%s7275_s7 + $0x1868] sm:$0xff] }
 0x160   : > { %852 = vst [vmem:[%s7280_s8 + $0xa40] sm:$0xff] %v851_v8  ;;  %v979_v8 = vld [vmem:[%s7275_s7 + $0x1880] sm:$0xff] }
 0x161   : > { %854 = vst [vmem:[%s7280_s8 + $0xa48] sm:$0xff] %v853_v9  ;;  %v981_v9 = vld [vmem:[%s7275_s7 + $0x1888] sm:$0xff] }
 0x162   : > { %856 = vst [vmem:[%s7280_s8 + $0xa50] sm:$0xff] %v855_v10  ;;  %v983_v10 = vld [vmem:[%s7275_s7 + $0x18a0] sm:$0xff] }
 0x163   : > { %858 = vst [vmem:[%s7280_s8 + $0xa58] sm:$0xff] %v857_v11  ;;  %v985_v11 = vld [vmem:[%s7275_s7 + $0x18a8] sm:$0xff] }
 0x164   : > { %860 = vst [vmem:[%s7280_s8 + $0xa60] sm:$0xff] %v859_v12  ;;  %v987_v12 = vld [vmem:[%s7275_s7 + $0x18c0] sm:$0xff] }
 0x165   : > { %862 = vst [vmem:[%s7280_s8 + $0xa68] sm:$0xff] %v861_v13  ;;  %v989_v13 = vld [vmem:[%s7275_s7 + $0x18c8] sm:$0xff] }
 0x166   : > { %864 = vst [vmem:[%s7280_s8 + $0xa70] sm:$0xff] %v863_v14  ;;  %v991_v14 = vld [vmem:[%s7275_s7 + $0x18e0] sm:$0xff] }
 0x167   : > { %866 = vst [vmem:[%s7280_s8 + $0xa78] sm:$0xff] %v865_v15  ;;  %v993_v15 = vld [vmem:[%s7275_s7 + $0x18e8] sm:$0xff] }
 0x168   : > { %868 = vst [vmem:[%s7280_s8 + $0xa80] sm:$0xff] %v867_v16  ;;  %v995_v16 = vld [vmem:[%s7275_s7 + $0x1900] sm:$0xff] }
 0x169   : > { %870 = vst [vmem:[%s7280_s8 + $0xa88] sm:$0xff] %v869_v17  ;;  %v997_v17 = vld [vmem:[%s7275_s7 + $0x1908] sm:$0xff] }
 0x16a   : > { %872 = vst [vmem:[%s7280_s8 + $0xa90] sm:$0xff] %v871_v18  ;;  %v999_v18 = vld [vmem:[%s7275_s7 + $0x1920] sm:$0xff] }
 0x16b   : > { %874 = vst [vmem:[%s7280_s8 + $0xa98] sm:$0xff] %v873_v19  ;;  %v1001_v19 = vld [vmem:[%s7275_s7 + $0x1928] sm:$0xff] }
 0x16c   : > { %876 = vst [vmem:[%s7280_s8 + $0xaa0] sm:$0xff] %v875_v20  ;;  %v1003_v20 = vld [vmem:[%s7275_s7 + $0x1940] sm:$0xff] }
 0x16d   : > { %878 = vst [vmem:[%s7280_s8 + $0xaa8] sm:$0xff] %v877_v21  ;;  %v1005_v21 = vld [vmem:[%s7275_s7 + $0x1948] sm:$0xff] }
 0x16e   : > { %880 = vst [vmem:[%s7280_s8 + $0xab0] sm:$0xff] %v879_v22  ;;  %v1007_v22 = vld [vmem:[%s7275_s7 + $0x1960] sm:$0xff] }
 0x16f   : > { %882 = vst [vmem:[%s7280_s8 + $0xab8] sm:$0xff] %v881_v23  ;;  %v1009_v23 = vld [vmem:[%s7275_s7 + $0x1968] sm:$0xff] }
 0x170   : > { %884 = vst [vmem:[%s7280_s8 + $0xac0] sm:$0xff] %v883_v24  ;;  %v1011_v24 = vld [vmem:[%s7275_s7 + $0x1980] sm:$0xff] }
 0x171   : > { %886 = vst [vmem:[%s7280_s8 + $0xac8] sm:$0xff] %v885_v25  ;;  %v1013_v25 = vld [vmem:[%s7275_s7 + $0x1988] sm:$0xff] }
 0x172   : > { %888 = vst [vmem:[%s7280_s8 + $0xad0] sm:$0xff] %v887_v26  ;;  %v1015_v26 = vld [vmem:[%s7275_s7 + $0x19a0] sm:$0xff] }
 0x173   : > { %890 = vst [vmem:[%s7280_s8 + $0xad8] sm:$0xff] %v889_v27  ;;  %v1017_v27 = vld [vmem:[%s7275_s7 + $0x19a8] sm:$0xff] }
 0x174   : > { %892 = vst [vmem:[%s7280_s8 + $0xae0] sm:$0xff] %v891_v28  ;;  %v1019_v28 = vld [vmem:[%s7275_s7 + $0x19c0] sm:$0xff] }
 0x175   : > { %894 = vst [vmem:[%s7280_s8 + $0xae8] sm:$0xff] %v893_v29  ;;  %v1021_v29 = vld [vmem:[%s7275_s7 + $0x19c8] sm:$0xff] }
 0x176   : > { %896 = vst [vmem:[%s7280_s8 + $0xaf0] sm:$0xff] %v895_v30  ;;  %v1023_v30 = vld [vmem:[%s7275_s7 + $0x19e0] sm:$0xff] }
 0x177   : > { %898 = vst [vmem:[%s7280_s8 + $0xaf8] sm:$0xff] %v897_v31  ;;  %v1025_v31 = vld [vmem:[%s7275_s7 + $0x19e8] sm:$0xff] }
 0x178   : > { %900 = vst [vmem:[%s7280_s8 + $0xb00] sm:$0xff] %v899_v32  ;;  %v1027_v32 = vld [vmem:[%s7275_s7 + $0x1a00] sm:$0xff] }
 0x179   : > { %902 = vst [vmem:[%s7280_s8 + $0xb08] sm:$0xff] %v901_v33  ;;  %v1029_v33 = vld [vmem:[%s7275_s7 + $0x1a08] sm:$0xff] }
 0x17a   : > { %904 = vst [vmem:[%s7280_s8 + $0xb10] sm:$0xff] %v903_v34  ;;  %v1031_v34 = vld [vmem:[%s7275_s7 + $0x1a20] sm:$0xff] }
 0x17b   : > { %906 = vst [vmem:[%s7280_s8 + $0xb18] sm:$0xff] %v905_v35  ;;  %v1033_v35 = vld [vmem:[%s7275_s7 + $0x1a28] sm:$0xff] }
 0x17c   : > { %908 = vst [vmem:[%s7280_s8 + $0xb20] sm:$0xff] %v907_v36  ;;  %v1035_v36 = vld [vmem:[%s7275_s7 + $0x1a40] sm:$0xff] }
 0x17d   : > { %910 = vst [vmem:[%s7280_s8 + $0xb28] sm:$0xff] %v909_v37  ;;  %v1037_v37 = vld [vmem:[%s7275_s7 + $0x1a48] sm:$0xff] }
 0x17e   : > { %912 = vst [vmem:[%s7280_s8 + $0xb30] sm:$0xff] %v911_v38  ;;  %v1039_v38 = vld [vmem:[%s7275_s7 + $0x1a60] sm:$0xff] }
 0x17f   : > { %914 = vst [vmem:[%s7280_s8 + $0xb38] sm:$0xff] %v913_v39  ;;  %v1041_v39 = vld [vmem:[%s7275_s7 + $0x1a68] sm:$0xff] }
 0x180   : > { %916 = vst [vmem:[%s7280_s8 + $0xb40] sm:$0xff] %v915_v40  ;;  %v1043_v40 = vld [vmem:[%s7275_s7 + $0x1a80] sm:$0xff] }
 0x181   : > { %918 = vst [vmem:[%s7280_s8 + $0xb48] sm:$0xff] %v917_v41  ;;  %v1045_v41 = vld [vmem:[%s7275_s7 + $0x1a88] sm:$0xff] }
 0x182   : > { %920 = vst [vmem:[%s7280_s8 + $0xb50] sm:$0xff] %v919_v42  ;;  %v1047_v42 = vld [vmem:[%s7275_s7 + $0x1aa0] sm:$0xff] }
 0x183   : > { %922 = vst [vmem:[%s7280_s8 + $0xb58] sm:$0xff] %v921_v43  ;;  %v1049_v43 = vld [vmem:[%s7275_s7 + $0x1aa8] sm:$0xff] }
 0x184   : > { %924 = vst [vmem:[%s7280_s8 + $0xb60] sm:$0xff] %v923_v44  ;;  %v1051_v44 = vld [vmem:[%s7275_s7 + $0x1ac0] sm:$0xff] }
 0x185   : > { %926 = vst [vmem:[%s7280_s8 + $0xb68] sm:$0xff] %v925_v45  ;;  %v1053_v45 = vld [vmem:[%s7275_s7 + $0x1ac8] sm:$0xff] }
 0x186   : > { %928 = vst [vmem:[%s7280_s8 + $0xb70] sm:$0xff] %v927_v46  ;;  %v1055_v46 = vld [vmem:[%s7275_s7 + $0x1ae0] sm:$0xff] }
 0x187   : > { %930 = vst [vmem:[%s7280_s8 + $0xb78] sm:$0xff] %v929_v47  ;;  %v1057_v47 = vld [vmem:[%s7275_s7 + $0x1ae8] sm:$0xff] }
 0x188   : > { %932 = vst [vmem:[%s7280_s8 + $0xb80] sm:$0xff] %v931_v48  ;;  %v1059_v48 = vld [vmem:[%s7275_s7 + $0x1b00] sm:$0xff] }
 0x189   : > { %934 = vst [vmem:[%s7280_s8 + $0xb88] sm:$0xff] %v933_v49  ;;  %v1061_v49 = vld [vmem:[%s7275_s7 + $0x1b08] sm:$0xff] }
 0x18a   : > { %936 = vst [vmem:[%s7280_s8 + $0xb90] sm:$0xff] %v935_v50  ;;  %v1063_v50 = vld [vmem:[%s7275_s7 + $0x1b20] sm:$0xff] }
 0x18b   : > { %938 = vst [vmem:[%s7280_s8 + $0xb98] sm:$0xff] %v937_v51  ;;  %v1065_v51 = vld [vmem:[%s7275_s7 + $0x1b28] sm:$0xff] }
 0x18c   : > { %940 = vst [vmem:[%s7280_s8 + $0xba0] sm:$0xff] %v939_v52  ;;  %v1067_v52 = vld [vmem:[%s7275_s7 + $0x1b40] sm:$0xff] }
 0x18d   : > { %942 = vst [vmem:[%s7280_s8 + $0xba8] sm:$0xff] %v941_v53  ;;  %v1069_v53 = vld [vmem:[%s7275_s7 + $0x1b48] sm:$0xff] }
 0x18e   : > { %944 = vst [vmem:[%s7280_s8 + $0xbb0] sm:$0xff] %v943_v54  ;;  %v1071_v54 = vld [vmem:[%s7275_s7 + $0x1b60] sm:$0xff] }
 0x18f   : > { %946 = vst [vmem:[%s7280_s8 + $0xbb8] sm:$0xff] %v945_v55  ;;  %v1073_v55 = vld [vmem:[%s7275_s7 + $0x1b68] sm:$0xff] }
 0x190   : > { %948 = vst [vmem:[%s7280_s8 + $0xbc0] sm:$0xff] %v947_v56  ;;  %v1075_v56 = vld [vmem:[%s7275_s7 + $0x1b80] sm:$0xff] }
 0x191   : > { %950 = vst [vmem:[%s7280_s8 + $0xbc8] sm:$0xff] %v949_v57  ;;  %v1077_v57 = vld [vmem:[%s7275_s7 + $0x1b88] sm:$0xff] }
 0x192   : > { %952 = vst [vmem:[%s7280_s8 + $0xbd0] sm:$0xff] %v951_v58  ;;  %v1079_v58 = vld [vmem:[%s7275_s7 + $0x1ba0] sm:$0xff] }
 0x193   : > { %954 = vst [vmem:[%s7280_s8 + $0xbd8] sm:$0xff] %v953_v59  ;;  %v1081_v59 = vld [vmem:[%s7275_s7 + $0x1ba8] sm:$0xff] }
 0x194   : > { %956 = vst [vmem:[%s7280_s8 + $0xbe0] sm:$0xff] %v955_v60  ;;  %v1083_v60 = vld [vmem:[%s7275_s7 + $0x1bc0] sm:$0xff] }
 0x195   : > { %958 = vst [vmem:[%s7280_s8 + $0xbe8] sm:$0xff] %v957_v61  ;;  %v1085_v61 = vld [vmem:[%s7275_s7 + $0x1bc8] sm:$0xff] }
 0x196   : > { %960 = vst [vmem:[%s7280_s8 + $0xbf0] sm:$0xff] %v959_v62  ;;  %v1087_v62 = vld [vmem:[%s7275_s7 + $0x1be0] sm:$0xff] }
 0x197   : > { %962 = vst [vmem:[%s7280_s8 + $0xbf8] sm:$0xff] %v961_v63  ;;  %v1089_v63 = vld [vmem:[%s7275_s7 + $0x1be8] sm:$0xff] }
 0x198   : > { %964 = vst [vmem:[%s7280_s8 + $0xc00] sm:$0xff] %v963_v0 }
 0x199   : > { %966 = vst [vmem:[%s7280_s8 + $0xc08] sm:$0xff] %v965_v1 }
 0x19a   : > { %968 = vst [vmem:[%s7280_s8 + $0xc10] sm:$0xff] %v967_v2 }
 0x19b   : > { %970 = vst [vmem:[%s7280_s8 + $0xc18] sm:$0xff] %v969_v3 }
 0x19c   : > { %972 = vst [vmem:[%s7280_s8 + $0xc20] sm:$0xff] %v971_v4 }
 0x19d   : > { %974 = vst [vmem:[%s7280_s8 + $0xc28] sm:$0xff] %v973_v5 }
 0x19e   : > { %976 = vst [vmem:[%s7280_s8 + $0xc30] sm:$0xff] %v975_v6 }
 0x19f   : > { %978 = vst [vmem:[%s7280_s8 + $0xc38] sm:$0xff] %v977_v7 }
 0x1a0   : > { %980 = vst [vmem:[%s7280_s8 + $0xc40] sm:$0xff] %v979_v8 }
 0x1a1   : > { %982 = vst [vmem:[%s7280_s8 + $0xc48] sm:$0xff] %v981_v9 }
 0x1a2   : > { %984 = vst [vmem:[%s7280_s8 + $0xc50] sm:$0xff] %v983_v10 }
 0x1a3   : > { %986 = vst [vmem:[%s7280_s8 + $0xc58] sm:$0xff] %v985_v11 }
 0x1a4   : > { %988 = vst [vmem:[%s7280_s8 + $0xc60] sm:$0xff] %v987_v12 }
 0x1a5   : > { %990 = vst [vmem:[%s7280_s8 + $0xc68] sm:$0xff] %v989_v13 }
 0x1a6   : > { %992 = vst [vmem:[%s7280_s8 + $0xc70] sm:$0xff] %v991_v14 }
 0x1a7   : > { %994 = vst [vmem:[%s7280_s8 + $0xc78] sm:$0xff] %v993_v15 }
 0x1a8   : > { %996 = vst [vmem:[%s7280_s8 + $0xc80] sm:$0xff] %v995_v16 }
 0x1a9   : > { %998 = vst [vmem:[%s7280_s8 + $0xc88] sm:$0xff] %v997_v17 }
 0x1aa   : > { %1000 = vst [vmem:[%s7280_s8 + $0xc90] sm:$0xff] %v999_v18 }
 0x1ab   : > { %1002 = vst [vmem:[%s7280_s8 + $0xc98] sm:$0xff] %v1001_v19 }
 0x1ac   : > { %1004 = vst [vmem:[%s7280_s8 + $0xca0] sm:$0xff] %v1003_v20 }
 0x1ad   : > { %1006 = vst [vmem:[%s7280_s8 + $0xca8] sm:$0xff] %v1005_v21 }
 0x1ae   : > { %1008 = vst [vmem:[%s7280_s8 + $0xcb0] sm:$0xff] %v1007_v22 }
 0x1af   : > { %1010 = vst [vmem:[%s7280_s8 + $0xcb8] sm:$0xff] %v1009_v23 }
 0x1b0   : > { %1012 = vst [vmem:[%s7280_s8 + $0xcc0] sm:$0xff] %v1011_v24 }
 0x1b1   : > { %1014 = vst [vmem:[%s7280_s8 + $0xcc8] sm:$0xff] %v1013_v25 }
 0x1b2   : > { %1016 = vst [vmem:[%s7280_s8 + $0xcd0] sm:$0xff] %v1015_v26 }
 0x1b3   : > { %1018 = vst [vmem:[%s7280_s8 + $0xcd8] sm:$0xff] %v1017_v27 }
 0x1b4   : > { %1020 = vst [vmem:[%s7280_s8 + $0xce0] sm:$0xff] %v1019_v28 }
 0x1b5   : > { %1022 = vst [vmem:[%s7280_s8 + $0xce8] sm:$0xff] %v1021_v29 }
 0x1b6   : > { %1024 = vst [vmem:[%s7280_s8 + $0xcf0] sm:$0xff] %v1023_v30 }
 0x1b7   : > { %1026 = vst [vmem:[%s7280_s8 + $0xcf8] sm:$0xff] %v1025_v31 }
 0x1b8   : > { %1028 = vst [vmem:[%s7280_s8 + $0xd00] sm:$0xff] %v1027_v32 }
 0x1b9   : > { %1030 = vst [vmem:[%s7280_s8 + $0xd08] sm:$0xff] %v1029_v33 }
 0x1ba   : > { %1032 = vst [vmem:[%s7280_s8 + $0xd10] sm:$0xff] %v1031_v34 }
 0x1bb   : > { %1034 = vst [vmem:[%s7280_s8 + $0xd18] sm:$0xff] %v1033_v35 }
 0x1bc   : > { %1036 = vst [vmem:[%s7280_s8 + $0xd20] sm:$0xff] %v1035_v36 }
 0x1bd   : > { %1038 = vst [vmem:[%s7280_s8 + $0xd28] sm:$0xff] %v1037_v37 }
 0x1be   : > { %1040 = vst [vmem:[%s7280_s8 + $0xd30] sm:$0xff] %v1039_v38 }
 0x1bf   : > { %1042 = vst [vmem:[%s7280_s8 + $0xd38] sm:$0xff] %v1041_v39 }
 0x1c0   : > { %1044 = vst [vmem:[%s7280_s8 + $0xd40] sm:$0xff] %v1043_v40 }
 0x1c1   : > { %1046 = vst [vmem:[%s7280_s8 + $0xd48] sm:$0xff] %v1045_v41 }
 0x1c2   : > { %1048 = vst [vmem:[%s7280_s8 + $0xd50] sm:$0xff] %v1047_v42 }
 0x1c3   : > { %1050 = vst [vmem:[%s7280_s8 + $0xd58] sm:$0xff] %v1049_v43 }
 0x1c4   : > { %1052 = vst [vmem:[%s7280_s8 + $0xd60] sm:$0xff] %v1051_v44 }
 0x1c5   : > { %1054 = vst [vmem:[%s7280_s8 + $0xd68] sm:$0xff] %v1053_v45 }
 0x1c6   : > { %1056 = vst [vmem:[%s7280_s8 + $0xd70] sm:$0xff] %v1055_v46 }
 0x1c7   : > { %1058 = vst [vmem:[%s7280_s8 + $0xd78] sm:$0xff] %v1057_v47 }
 0x1c8   : > { %1060 = vst [vmem:[%s7280_s8 + $0xd80] sm:$0xff] %v1059_v48 }
 0x1c9   : > { %1062 = vst [vmem:[%s7280_s8 + $0xd88] sm:$0xff] %v1061_v49 }
 0x1ca   : > { %1064 = vst [vmem:[%s7280_s8 + $0xd90] sm:$0xff] %v1063_v50 }
 0x1cb   : > { %1066 = vst [vmem:[%s7280_s8 + $0xd98] sm:$0xff] %v1065_v51 }
 0x1cc   : > { %1068 = vst [vmem:[%s7280_s8 + $0xda0] sm:$0xff] %v1067_v52 }
 0x1cd   : > { %1070 = vst [vmem:[%s7280_s8 + $0xda8] sm:$0xff] %v1069_v53 }
 0x1ce   : > { %1072 = vst [vmem:[%s7280_s8 + $0xdb0] sm:$0xff] %v1071_v54 }
 0x1cf   : > { %1074 = vst [vmem:[%s7280_s8 + $0xdb8] sm:$0xff] %v1073_v55 }
 0x1d0   : > { %1076 = vst [vmem:[%s7280_s8 + $0xdc0] sm:$0xff] %v1075_v56 }
 0x1d1   : > { %1078 = vst [vmem:[%s7280_s8 + $0xdc8] sm:$0xff] %v1077_v57 }
 0x1d2   : > { %1080 = vst [vmem:[%s7280_s8 + $0xdd0] sm:$0xff] %v1079_v58 }
 0x1d3   : > { %1082 = vst [vmem:[%s7280_s8 + $0xdd8] sm:$0xff] %v1081_v59 }
 0x1d4   : > { %1084 = vst [vmem:[%s7280_s8 + $0xde0] sm:$0xff] %v1083_v60 }
 0x1d5   : > { %1086 = vst [vmem:[%s7280_s8 + $0xde8] sm:$0xff] %v1085_v61 }
 0x1d6   : > { %1088 = vst [vmem:[%s7280_s8 + $0xdf0] sm:$0xff] %v1087_v62 }
 0x1d7   : > { %1090 = vst [vmem:[%s7280_s8 + $0xdf8] sm:$0xff] %v1089_v63 }
 0x1d8 PF: > { %p4829_p7 = scmp.ge.s32.totalorder %s7192_s18, 1  ;;  %p1103_p8 = scmp.lt.s32.totalorder %s7192_s18, 5 }
 0x1da   : > { %p1104_p9 = pnand %p4829_p7, %p1103_p8 }
 0x1db   : > { %s1110_s9 = sand.u32 (!%p1104_p9), 1, %s7168_s12   ;;  %s1150_s10 = smul.u32 (!%p1104_p9), 14, %s7176_s14 }
 0x1dc   : > { %1107 = sbr.rel (%p1104_p9) target bundleno = 1101 (0x44d), region = 51  ;;  %s4831_s21 = sshll.u32 (!%p1104_p9), %s7180_s15, 2 }
 0x1dd   : > { %s7080_s11 = smul.u32 (!%p1104_p9), 3584, %s1110_s9  ;;  %p1153_p10 = scmp.lt.s32.totalorder (!%p1104_p9), %s1150_s10, 27 }
 0x1de   : > { %p1163_p11 = scmp.lt.s32.totalorder (!%p1104_p9), %s4831_s21, 7  ;;  %p4834_p12 = scmp.ne.s32.totalorder (!%p1104_p9), %s7176_s14, 0 }
 0x1df   : > { %s8197_s5 = scalar_lea.vmem (!%p1104_p9), [#allocation3], %s7080_s11 }
 0x1e1   : > { %s9311_s10 = smov (!%p1153_p10, %s1150_s10), 27  ;;  %s9313_s21 = smov (!%p1163_p11, %s4831_s21), 7 }
 0x1e2   : > { %s4830_s22 = sshll.u32 %s9311_s10, 2  ;;  %s1165_s12 = scalar_lea.vmem %s9296_s2, %s9313_s21 }
 0x1e3   : > { %s8185_s26 = scalar_lea.vmem %s9294_s0, %s4830_s22  ;;  %s4833_s29 = sshll.u32 %s9313_s21, 2 }
 0x1e4   : > { %s8195_s4 = scalar_lea.vmem %s9297_s3, %s4833_s29  ;;  %1180 = sbr.rel (%p4834_p12) target bundleno = 494 (0x1ee), region = 59 }
 0x1e9   : > { %v7194_v0 = vmov 0.0  }
 0x1ea   : > { %1181 = vst [vmem:[#allocation2 + $0x10] sm:$0xff] %v7194_v0 }
 0x1eb   : > { %1182 = vst [vmem:[#allocation2] sm:$0xff] %v7194_v0 }
 0x1ec   : > { %1183 = vst [vmem:[#allocation2 + $0x18] sm:$0xff] %v7194_v0 }
 0x1ed   : > { %1184 = vst [vmem:[#allocation2 + $0x8] sm:$0xff] %v7194_v0 }
 0x1ee PF: > { %v4949_v1 = vld [vmem:[%s8197_s5 + $0xe0] sm:$0xf]  ;;  %v6661_v2 = vld [vmem:[%s8197_s5 + $0xec] sm:$0xf0]  ;;  %p6627_p13 = scmp.ne.s32.totalorder %s7176_s14, 1 }
 0x1ef   : > { %v5077_v3 = vld [vmem:[%s8197_s5 + $0x1e0] sm:$0xf]  ;;  %v4950_v4 = vor.u32 %v6661_v2, %v4949_v1  ;;  %v6693_v5 = vld [vmem:[%s8197_s5 + $0x1ec] sm:$0xf0] }
 0x1f0   : > { %v5205_v6 = vld [vmem:[%s8197_s5 + $0x2e0] sm:$0xf]  ;;  %v6725_v7 = vld [vmem:[%s8197_s5 + $0x2ec] sm:$0xf0]  ;;  %v5078_v8 = vor.u32 %v6693_v5, %v5077_v3 }
 0x1f1   : > { %v5206_v9 = vor.u32 %v6725_v7, %v5205_v6  ;;  %v5333_v10 = vld [vmem:[%s8197_s5 + $0x3e0] sm:$0xf]  ;;  %v6757_v11 = vld [vmem:[%s8197_s5 + $0x3ec] sm:$0xf0]  ;;  %3933 = vmatpush.bf16.msra.mxu0 %v4950_v4 }
 0x1f2   : > { %v4933_v12 = vld [vmem:[%s8197_s5 + $0xc0] sm:$0xf]  ;;  %v5334_v13 = vor.u32 %v6757_v11, %v5333_v10  ;;  %v6657_v14 = vld [vmem:[%s8197_s5 + $0xcc] sm:$0xf0]  ;;  %3946 = vmatpush.bf16.msra.mxu1 %v5078_v8 }
 0x1f3   : > { %v5061_v15 = vld [vmem:[%s8197_s5 + $0x1c0] sm:$0xf]  ;;  %v6689_v16 = vld [vmem:[%s8197_s5 + $0x1cc] sm:$0xf0]  ;;  %3959 = vmatpush.bf16.msra.mxu2 %v5206_v9  ;;  %v4934_v17 = vor.u32 %v6657_v14, %v4933_v12 }
 0x1f4   : > { %v5062_v18 = vor.u32 %v6689_v16, %v5061_v15  ;;  %v5189_v19 = vld [vmem:[%s8197_s5 + $0x2c0] sm:$0xf]  ;;  %v6721_v20 = vld [vmem:[%s8197_s5 + $0x2cc] sm:$0xf0]  ;;  %3972 = vmatpush.bf16.msra.mxu3 %v5334_v13 }
 0x1f5   : > { %v5317_v21 = vld [vmem:[%s8197_s5 + $0x3c0] sm:$0xf]  ;;  %v5190_v22 = vor.u32 %v6721_v20, %v5189_v19  ;;  %v6753_v23 = vld [vmem:[%s8197_s5 + $0x3cc] sm:$0xf0]  ;;  %3934 = vmatpush.bf16.msra.mxu0 %v4934_v17 }
 0x1f6   : > { %v4917_v24 = vld [vmem:[%s8197_s5 + $0xa0] sm:$0xf]  ;;  %v6653_v25 = vld [vmem:[%s8197_s5 + $0xac] sm:$0xf0]  ;;  %v5318_v26 = vor.u32 %v6753_v23, %v5317_v21  ;;  %3947 = vmatpush.bf16.msra.mxu1 %v5062_v18 }
 0x1f7   : > { %v5045_v27 = vld [vmem:[%s8197_s5 + $0x1a0] sm:$0xf]  ;;  %v6685_v28 = vld [vmem:[%s8197_s5 + $0x1ac] sm:$0xf0]  ;;  %v4918_v30 = vor.u32 %v6653_v25, %v4917_v24  ;;  %3960 = vmatpush.bf16.msra.mxu2 %v5190_v22 }
 0x1f8   : > { %v5173_v29 = vld [vmem:[%s8197_s5 + $0x2a0] sm:$0xf]  ;;  %v6717_v31 = vld [vmem:[%s8197_s5 + $0x2ac] sm:$0xf0]  ;;  %v5046_v34 = vor.u32 %v6685_v28, %v5045_v27  ;;  %3973 = vmatpush.bf16.msra.mxu3 %v5318_v26 }
 0x1f9   : > { %v5301_v32 = vld [vmem:[%s8197_s5 + $0x3a0] sm:$0xf]  ;;  %v6749_v33 = vld [vmem:[%s8197_s5 + $0x3ac] sm:$0xf0]  ;;  %v5174_v35 = vor.u32 %v6717_v31, %v5173_v29  ;;  %3935 = vmatpush.bf16.msra.mxu0 %v4918_v30 }
 0x1fa   : > { %v4901_v36 = vld [vmem:[%s8197_s5 + $0x80] sm:$0xf]  ;;  %v6649_v37 = vld [vmem:[%s8197_s5 + $0x8c] sm:$0xf0]  ;;  %v5302_v39 = vor.u32 %v6749_v33, %v5301_v32  ;;  %3948 = vmatpush.bf16.msra.mxu1 %v5046_v34 }
 0x1fb   : > { %v5029_v38 = vld [vmem:[%s8197_s5 + $0x180] sm:$0xf]  ;;  %v6681_v40 = vld [vmem:[%s8197_s5 + $0x18c] sm:$0xf0]  ;;  %v4902_v45 = vor.u32 %v6649_v37, %v4901_v36  ;;  %3961 = vmatpush.bf16.msra.mxu2 %v5174_v35 }
 0x1fc   : > { %v5157_v41 = vld [vmem:[%s8197_s5 + $0x280] sm:$0xf]  ;;  %v6713_v42 = vld [vmem:[%s8197_s5 + $0x28c] sm:$0xf0]  ;;  %v5030_v46 = vor.u32 %v6681_v40, %v5029_v38  ;;  %3974 = vmatpush.bf16.msra.mxu3 %v5302_v39 }
 0x1fd   : > { %v5285_v43 = vld [vmem:[%s8197_s5 + $0x380] sm:$0xf]  ;;  %v6745_v44 = vld [vmem:[%s8197_s5 + $0x38c] sm:$0xf0]  ;;  %v5158_v47 = vor.u32 %v6713_v42, %v5157_v41  ;;  %3936 = vmatpush.bf16.msra.mxu0 %v4902_v45 }
 0x1fe   : > { %v4885_v48 = vld [vmem:[%s8197_s5 + $0x60] sm:$0xf]  ;;  %v6645_v49 = vld [vmem:[%s8197_s5 + $0x6c] sm:$0xf0]  ;;  %v5286_v51 = vor.u32 %v6745_v44, %v5285_v43  ;;  %3949 = vmatpush.bf16.msra.mxu1 %v5030_v46 }
 0x1ff   : > { %v5013_v50 = vld [vmem:[%s8197_s5 + $0x160] sm:$0xf]  ;;  %v6677_v52 = vld [vmem:[%s8197_s5 + $0x16c] sm:$0xf0]  ;;  %v4886_v57 = vor.u32 %v6645_v49, %v4885_v48  ;;  %3962 = vmatpush.bf16.msra.mxu2 %v5158_v47 }
 0x200   : > { %v5141_v53 = vld [vmem:[%s8197_s5 + $0x260] sm:$0xf]  ;;  %v6709_v54 = vld [vmem:[%s8197_s5 + $0x26c] sm:$0xf0]  ;;  %v5014_v58 = vor.u32 %v6677_v52, %v5013_v50  ;;  %3975 = vmatpush.bf16.msra.mxu3 %v5286_v51 }
 0x201   : > { %v5269_v55 = vld [vmem:[%s8197_s5 + $0x360] sm:$0xf]  ;;  %v6741_v56 = vld [vmem:[%s8197_s5 + $0x36c] sm:$0xf0]  ;;  %v5142_v59 = vor.u32 %v6709_v54, %v5141_v53  ;;  %3937 = vmatpush.bf16.msra.mxu0 %v4886_v57 }
 0x202   : > { %v4869_v60 = vld [vmem:[%s8197_s5 + $0x40] sm:$0xf]  ;;  %v6641_v61 = vld [vmem:[%s8197_s5 + $0x4c] sm:$0xf0]  ;;  %v5270_v63 = vor.u32 %v6741_v56, %v5269_v55  ;;  %3950 = vmatpush.bf16.msra.mxu1 %v5014_v58 }
 0x203   : > { %v4997_v62 = vld [vmem:[%s8197_s5 + $0x140] sm:$0xf]  ;;  %v6673_v0 = vld [vmem:[%s8197_s5 + $0x14c] sm:$0xf0]  ;;  %v4870_v5 = vor.u32 %v6641_v61, %v4869_v60  ;;  %3963 = vmatpush.bf16.msra.mxu2 %v5142_v59  ;;  %v1190_v59 = vld [vmem:[%s8185_s26 + $0x8] sm:$0xff] }
 0x204   : > { %v5125_v1 = vld [vmem:[%s8197_s5 + $0x240] sm:$0xf]  ;;  %v6705_v2 = vld [vmem:[%s8197_s5 + $0x24c] sm:$0xf0]  ;;  %v4998_v6 = vor.u32 %v6673_v0, %v4997_v62  ;;  %3976 = vmatpush.bf16.msra.mxu3 %v5270_v63  ;;  %v1653_v0 = vunpack.c.l.b16 %v1190_v59 }
 0x205   : > { %v5253_v3 = vld [vmem:[%s8197_s5 + $0x340] sm:$0xf]  ;;  %v6737_v4 = vld [vmem:[%s8197_s5 + $0x34c] sm:$0xf0]  ;;  %v5126_v7 = vor.u32 %v6705_v2, %v5125_v1  ;;  %3938 = vmatpush.bf16.msra.mxu0 %v4870_v5  ;;  %v1654_v1 = vunpack.c.h.b16 %v1190_v59 }
 0x206   : > { %v4853_v8 = vld [vmem:[%s8197_s5 + $0x20] sm:$0xf]  ;;  %v6637_v9 = vld [vmem:[%s8197_s5 + $0x2c] sm:$0xf0]  ;;  %v5254_v11 = vor.u32 %v6737_v4, %v5253_v3  ;;  %3951 = vmatpush.bf16.msra.mxu1 %v4998_v6  ;;  %v8289_v5 = vpack.c.b16 %v1653_v0, %v1653_v0 }
 0x207   : > { %v4981_v10 = vld [vmem:[%s8197_s5 + $0x120] sm:$0xf]  ;;  %v6669_v12 = vld [vmem:[%s8197_s5 + $0x12c] sm:$0xf0]  ;;  %v4854_v17 = vor.u32 %v6637_v9, %v4853_v8  ;;  %3964 = vmatpush.bf16.msra.mxu2 %v5126_v7  ;;  %v8292_v7 = vpack.c.b16 %v1654_v1, %v1654_v1 }
 0x208   : > { %v5109_v13 = vld [vmem:[%s8197_s5 + $0x220] sm:$0xf]  ;;  %v6701_v14 = vld [vmem:[%s8197_s5 + $0x22c] sm:$0xf0]  ;;  %v4982_v20 = vor.u32 %v6669_v12, %v4981_v10  ;;  %3977 = vmatpush.bf16.msra.mxu3 %v5254_v11 }
 0x209   : > { %v5237_v15 = vld [vmem:[%s8197_s5 + $0x320] sm:$0xf]  ;;  %v6733_v16 = vld [vmem:[%s8197_s5 + $0x32c] sm:$0xf0]  ;;  %v5110_v21 = vor.u32 %v6701_v14, %v5109_v13  ;;  %3939 = vmatpush.bf16.msra.mxu0 %v4854_v17 }
 0x20a   : > { %v4837_v18 = vld [vmem:[%s8197_s5] sm:$0xf]  ;;  %v6633_v19 = vld [vmem:[%s8197_s5 + $0xc] sm:$0xf0]  ;;  %v5238_v25 = vor.u32 %v6733_v16, %v5237_v15  ;;  %3952 = vmatpush.bf16.msra.mxu1 %v4982_v20 }
 0x20b   : > { %v4965_v22 = vld [vmem:[%s8197_s5 + $0x100] sm:$0xf]  ;;  %v6665_v23 = vld [vmem:[%s8197_s5 + $0x10c] sm:$0xf0]  ;;  %v4838_v32 = vor.u32 %v6633_v19, %v4837_v18  ;;  %3965 = vmatpush.bf16.msra.mxu2 %v5110_v21 }
 0x20c   : > { %v5093_v24 = vld [vmem:[%s8197_s5 + $0x200] sm:$0xf]  ;;  %v6697_v26 = vld [vmem:[%s8197_s5 + $0x20c] sm:$0xf0]  ;;  %v4966_v36 = vor.u32 %v6665_v23, %v4965_v22  ;;  %3978 = vmatpush.bf16.msra.mxu3 %v5238_v25 }
 0x20d   : > { %v5221_v27 = vld [vmem:[%s8197_s5 + $0x300] sm:$0xf]  ;;  %v6729_v28 = vld [vmem:[%s8197_s5 + $0x30c] sm:$0xf0]  ;;  %v5094_v37 = vor.u32 %v6697_v26, %v5093_v24  ;;  %3940 = vmatpush.bf16.msra.mxu0 %v4838_v32 }
 0x20e   : > { %v5461_v29 = vld [vmem:[%s8197_s5 + $0x4e0] sm:$0xf]  ;;  %v6789_v30 = vld [vmem:[%s8197_s5 + $0x4ec] sm:$0xf0]  ;;  %v5222_v40 = vor.u32 %v6729_v28, %v5221_v27  ;;  %3953 = vmatpush.bf16.msra.mxu1 %v4966_v36 }
 0x20f   : > { %v5589_v31 = vld [vmem:[%s8197_s5 + $0x5e0] sm:$0xf]  ;;  %v6821_v33 = vld [vmem:[%s8197_s5 + $0x5ec] sm:$0xf0]  ;;  %v5462_v41 = vor.u32 %v6789_v30, %v5461_v29  ;;  %3966 = vmatpush.bf16.msra.mxu2 %v5094_v37 }
 0x210   : > { %v5717_v34 = vld [vmem:[%s8197_s5 + $0x6e0] sm:$0xf]  ;;  %v6853_v35 = vld [vmem:[%s8197_s5 + $0x6ec] sm:$0xf0]  ;;  %v5590_v42 = vor.u32 %v6821_v33, %v5589_v31  ;;  %3979 = vmatpush.bf16.msra.mxu3 %v5222_v40 }
 0x211   : > { %v5845_v38 = vld [vmem:[%s8197_s5 + $0x7e0] sm:$0xf]  ;;  %v6885_v39 = vld [vmem:[%s8197_s5 + $0x7ec] sm:$0xf0]  ;;  %v5718_v43 = vor.u32 %v6853_v35, %v5717_v34  ;;  %3985 = vmatpush.bf16.msrb.mxu0 %v5462_v41 }
 0x212   : > { %v5445_v44 = vld [vmem:[%s8197_s5 + $0x4c0] sm:$0xf]  ;;  %v6785_v45 = vld [vmem:[%s8197_s5 + $0x4cc] sm:$0xf0]  ;;  %v5846_v47 = vor.u32 %v6885_v39, %v5845_v38  ;;  %3998 = vmatpush.bf16.msrb.mxu1 %v5590_v42  ;;  %3967 = vmatmul.bf16.vlgmr.msra.gmra.mxu2 %v8289_v5 }
 0x213   : > { %v5573_v46 = vld [vmem:[%s8197_s5 + $0x5c0] sm:$0xf]  ;;  %v6817_v48 = vld [vmem:[%s8197_s5 + $0x5cc] sm:$0xf0]  ;;  %v5446_v53 = vor.u32 %v6785_v45, %v5445_v44  ;;  %4011 = vmatpush.bf16.msrb.mxu2 %v5718_v43  ;;  %3980 = vmatmul.bf16.vlgmr.msra.gmra.mxu3 %v8292_v7 }
 0x214   : > { %v5701_v49 = vld [vmem:[%s8197_s5 + $0x6c0] sm:$0xf]  ;;  %v6849_v50 = vld [vmem:[%s8197_s5 + $0x6cc] sm:$0xf0]  ;;  %v5574_v55 = vor.u32 %v6817_v48, %v5573_v46  ;;  %4024 = vmatpush.bf16.msrb.mxu3 %v5846_v47 }
 0x215   : > { %v5829_v51 = vld [vmem:[%s8197_s5 + $0x7c0] sm:$0xf]  ;;  %v6881_v52 = vld [vmem:[%s8197_s5 + $0x7cc] sm:$0xf0]  ;;  %v5702_v56 = vor.u32 %v6849_v50, %v5701_v49  ;;  %3986 = vmatpush.bf16.msrb.mxu0 %v5446_v53 }
 0x216   : > { %v5429_v54 = vld [vmem:[%s8197_s5 + $0x4a0] sm:$0xf]  ;;  %v6781_v57 = vld [vmem:[%s8197_s5 + $0x4ac] sm:$0xf0]  ;;  %v5830_v60 = vor.u32 %v6881_v52, %v5829_v51  ;;  %3999 = vmatpush.bf16.msrb.mxu1 %v5574_v55 }
 0x217   : > { %v5557_v58 = vld [vmem:[%s8197_s5 + $0x5a0] sm:$0xf]  ;;  %v6813_v61 = vld [vmem:[%s8197_s5 + $0x5ac] sm:$0xf0]  ;;  %v5430_v4 = vor.u32 %v6781_v57, %v5429_v54  ;;  %4012 = vmatpush.bf16.msrb.mxu2 %v5702_v56 }
 0x218   : > { %v5685_v62 = vld [vmem:[%s8197_s5 + $0x6a0] sm:$0xf]  ;;  %v6845_v63 = vld [vmem:[%s8197_s5 + $0x6ac] sm:$0xf0]  ;;  %v5558_v8 = vor.u32 %v6813_v61, %v5557_v58  ;;  %4025 = vmatpush.bf16.msrb.mxu3 %v5830_v60 }
 0x219   : > { %v5813_v2 = vld [vmem:[%s8197_s5 + $0x7a0] sm:$0xf]  ;;  %v6877_v3 = vld [vmem:[%s8197_s5 + $0x7ac] sm:$0xf0]  ;;  %v5686_v9 = vor.u32 %v6845_v63, %v5685_v62  ;;  %3987 = vmatpush.bf16.msrb.mxu0 %v5430_v4  ;;  %v1192_v4 = vld [vmem:[%s8185_s26 + $0x18] sm:$0xff] }
 0x21a   : > { %v1189_v6 = vld [vmem:[%s8185_s26] sm:$0xff]  ;;  %v6777_v11 = vld [vmem:[%s8197_s5 + $0x48c] sm:$0xf0]  ;;  %v5814_v15 = vor.u32 %v6877_v3, %v5813_v2  ;;  %4000 = vmatpush.bf16.msrb.mxu1 %v5558_v8 }
 0x21b   : > { %v5413_v10 = vld [vmem:[%s8197_s5 + $0x480] sm:$0xf]  ;;  %v1651_v13 = vunpack.c.l.b16 %v1189_v6  ;;  %v1652_v14 = vunpack.c.h.b16 %v1189_v6  ;;  %v6809_v16 = vld [vmem:[%s8197_s5 + $0x58c] sm:$0xf0]  ;;  %4013 = vmatpush.bf16.msrb.mxu2 %v5686_v9 }
 0x21c   : > { %v5541_v12 = vld [vmem:[%s8197_s5 + $0x580] sm:$0xf]  ;;  %v6841_v18 = vld [vmem:[%s8197_s5 + $0x68c] sm:$0xf0]  ;;  %v5414_v23 = vor.u32 %v6777_v11, %v5413_v10  ;;  %4026 = vmatpush.bf16.msrb.mxu3 %v5814_v15 }
 0x21d   : > { %v5669_v17 = vld [vmem:[%s8197_s5 + $0x680] sm:$0xf]  ;;  %v6873_v20 = vld [vmem:[%s8197_s5 + $0x78c] sm:$0xf0]  ;;  %v8303_v21 = vpack.c.b16 %v1651_v13, %v1651_v13  ;;  %v8306_v22 = vpack.c.b16 %v1652_v14, %v1652_v14  ;;  %v5542_v24 = vor.u32 %v6809_v16, %v5541_v12 }
 0x21e   : > { %v5797_v19 = vld [vmem:[%s8197_s5 + $0x780] sm:$0xf]  ;;  %v5670_v25 = vor.u32 %v6841_v18, %v5669_v17  ;;  %v6773_v27 = vld [vmem:[%s8197_s5 + $0x46c] sm:$0xf0]  ;;  %3988 = vmatpush.bf16.msrb.mxu0 %v5414_v23  ;;  %v1657_v18 = vunpack.c.l.b16 %v1192_v4 }
 0x21f   : > { %v5397_v26 = vld [vmem:[%s8197_s5 + $0x460] sm:$0xf]  ;;  %v5798_v29 = vor.u32 %v6873_v20, %v5797_v19  ;;  %v6805_v30 = vld [vmem:[%s8197_s5 + $0x56c] sm:$0xf0]  ;;  %3941 = vmatmul.bf16.vlgmr.msra.gmra.mxu0 %v8303_v21  ;;  %3954 = vmatmul.bf16.vlgmr.msra.gmra.mxu1 %v8306_v22 }
 0x220   : > { %v5525_v28 = vld [vmem:[%s8197_s5 + $0x560] sm:$0xf]  ;;  %v6837_v32 = vld [vmem:[%s8197_s5 + $0x66c] sm:$0xf0]  ;;  %v5398_v35 = vor.u32 %v6773_v27, %v5397_v26  ;;  %4001 = vmatpush.bf16.msrb.mxu1 %v5542_v24  ;;  %4014 = vmatpush.bf16.msrb.mxu2 %v5670_v25  ;;  %v1658_v26 = vunpack.c.h.b16 %v1192_v4 }
 0x221   : > { %v5653_v31 = vld [vmem:[%s8197_s5 + $0x660] sm:$0xf]  ;;  %v6869_v34 = vld [vmem:[%s8197_s5 + $0x76c] sm:$0xf0]  ;;  %v5526_v36 = vor.u32 %v6805_v30, %v5525_v28  ;;  %4027 = vmatpush.bf16.msrb.mxu3 %v5798_v29 }
 0x222   : > { %v5781_v33 = vld [vmem:[%s8197_s5 + $0x760] sm:$0xf]  ;;  %v5654_v37 = vor.u32 %v6837_v32, %v5653_v31  ;;  %v6769_v39 = vld [vmem:[%s8197_s5 + $0x44c] sm:$0xf0]  ;;  %3989 = vmatpush.bf16.msrb.mxu0 %v5398_v35 }
 0x223   : > { %v5381_v38 = vld [vmem:[%s8197_s5 + $0x440] sm:$0xf]  ;;  %v5782_v41 = vor.u32 %v6869_v34, %v5781_v33  ;;  %v6801_v42 = vld [vmem:[%s8197_s5 + $0x54c] sm:$0xf0] }
 0x224   : > { %v5509_v40 = vld [vmem:[%s8197_s5 + $0x540] sm:$0xf]  ;;  %v6833_v44 = vld [vmem:[%s8197_s5 + $0x64c] sm:$0xf0]  ;;  %v5382_v47 = vor.u32 %v6769_v39, %v5381_v38  ;;  %4002 = vmatpush.bf16.msrb.mxu1 %v5526_v36  ;;  %4015 = vmatpush.bf16.msrb.mxu2 %v5654_v37  ;;  %v8358_v39 = vpack.c.b16 %v1657_v18, %v1657_v18 }
 0x225   : > { %v5637_v43 = vld [vmem:[%s8197_s5 + $0x640] sm:$0xf]  ;;  %v6865_v46 = vld [vmem:[%s8197_s5 + $0x74c] sm:$0xf0]  ;;  %v5510_v48 = vor.u32 %v6801_v42, %v5509_v40  ;;  %4028 = vmatpush.bf16.msrb.mxu3 %v5782_v41 }
 0x226   : > { %v5765_v45 = vld [vmem:[%s8197_s5 + $0x740] sm:$0xf]  ;;  %v5638_v49 = vor.u32 %v6833_v44, %v5637_v43  ;;  %v6765_v51 = vld [vmem:[%s8197_s5 + $0x42c] sm:$0xf0]  ;;  %3990 = vmatpush.bf16.msrb.mxu0 %v5382_v47  ;;  %v8364_v43 = vpack.c.b16 %v1658_v26, %v1658_v26 }
 0x227   : > { %v5365_v50 = vld [vmem:[%s8197_s5 + $0x420] sm:$0xf]  ;;  %v5766_v53 = vor.u32 %v6865_v46, %v5765_v45  ;;  %v6797_v54 = vld [vmem:[%s8197_s5 + $0x52c] sm:$0xf0] }
 0x228   : > { %v5493_v52 = vld [vmem:[%s8197_s5 + $0x520] sm:$0xf]  ;;  %v6829_v56 = vld [vmem:[%s8197_s5 + $0x62c] sm:$0xf0]  ;;  %v5366_v60 = vor.u32 %v6765_v51, %v5365_v50  ;;  %4003 = vmatpush.bf16.msrb.mxu1 %v5510_v48  ;;  %4016 = vmatpush.bf16.msrb.mxu2 %v5638_v49 }
 0x229   : > { %v5621_v55 = vld [vmem:[%s8197_s5 + $0x620] sm:$0xf]  ;;  %v6861_v58 = vld [vmem:[%s8197_s5 + $0x72c] sm:$0xf0]  ;;  %v5494_v0 = vor.u32 %v6797_v54, %v5493_v52  ;;  %4029 = vmatpush.bf16.msrb.mxu3 %v5766_v53 }
 0x22a   : > { %v5749_v57 = vld [vmem:[%s8197_s5 + $0x720] sm:$0xf]  ;;  %v6761_v61 = vld [vmem:[%s8197_s5 + $0x40c] sm:$0xf0]  ;;  %v5622_v1 = vor.u32 %v6829_v56, %v5621_v55  ;;  %3991 = vmatpush.bf16.msrb.mxu0 %v5366_v60 }
 0x22b   : > { %v5349_v59 = vld [vmem:[%s8197_s5 + $0x400] sm:$0xf]  ;;  %v6793_v63 = vld [vmem:[%s8197_s5 + $0x50c] sm:$0xf0]  ;;  %v5750_v6 = vor.u32 %v6861_v58, %v5749_v57 }
 0x22c   : > { %v5477_v62 = vld [vmem:[%s8197_s5 + $0x500] sm:$0xf]  ;;  %v6825_v3 = vld [vmem:[%s8197_s5 + $0x60c] sm:$0xf0]  ;;  %v5350_v14 = vor.u32 %v6761_v61, %v5349_v59  ;;  %4004 = vmatpush.bf16.msrb.mxu1 %v5494_v0  ;;  %4017 = vmatpush.bf16.msrb.mxu2 %v5622_v1 }
 0x22d   : > { %v5605_v2 = vld [vmem:[%s8197_s5 + $0x600] sm:$0xf]  ;;  %v6857_v9 = vld [vmem:[%s8197_s5 + $0x70c] sm:$0xf0]  ;;  %v5478_v19 = vor.u32 %v6793_v63, %v5477_v62  ;;  %4030 = vmatpush.bf16.msrb.mxu3 %v5750_v6 }
 0x22e   : > { %v5733_v8 = vld [vmem:[%s8197_s5 + $0x700] sm:$0xf]  ;;  %v1191_v10 = vld [vmem:[%s8185_s26 + $0x10] sm:$0xff]  ;;  %v5606_v20 = vor.u32 %v6825_v3, %v5605_v2  ;;  %3992 = vmatpush.bf16.msrb.mxu0 %v5350_v14 }
 0x22f   : > { %v5973_v11 = vld [vmem:[%s8197_s5 + $0x8e0] sm:$0xf]  ;;  %v6917_v12 = vld [vmem:[%s8197_s5 + $0x8ec] sm:$0xf0]  ;;  %v1655_v25 = vunpack.c.l.b16 %v1191_v10  ;;  %v5734_v27 = vor.u32 %v6857_v9, %v5733_v8  ;;  %v1656_v29 = vunpack.c.h.b16 %v1191_v10 }
 0x230   : > { %v6101_v13 = vld [vmem:[%s8197_s5 + $0x9e0] sm:$0xf]  ;;  %v6949_v15 = vld [vmem:[%s8197_s5 + $0x9ec] sm:$0xf0]  ;;  %v5974_v28 = vor.u32 %v6917_v12, %v5973_v11  ;;  %4005 = vmatpush.bf16.msrb.mxu1 %v5478_v19  ;;  %4018 = vmatpush.bf16.msrb.mxu2 %v5606_v20 }
 0x231   : > { %v6229_v16 = vld [vmem:[%s8197_s5 + $0xae0] sm:$0xf]  ;;  %v6981_v17 = vld [vmem:[%s8197_s5 + $0xaec] sm:$0xf0]  ;;  %v6102_v30 = vor.u32 %v6949_v15, %v6101_v13  ;;  %v8362_v42 = vpack.c.b16 %v1655_v25, %v1655_v25  ;;  %4031 = vmatpush.bf16.msrb.mxu3 %v5734_v27  ;;  %v8366_v45 = vpack.c.b16 %v1656_v29, %v1656_v29 }
 0x232   : > { %v6357_v23 = vld [vmem:[%s8197_s5 + $0xbe0] sm:$0xf]  ;;  %v7013_v24 = vld [vmem:[%s8197_s5 + $0xbec] sm:$0xf0]  ;;  %v6230_v31 = vor.u32 %v6981_v17, %v6229_v16  ;;  %4037 = vmatpush.bf16.msra.mxu0 %v5974_v28 }
 0x233   : > { %v5957_v32 = vld [vmem:[%s8197_s5 + $0x8c0] sm:$0xf]  ;;  %v6913_v33 = vld [vmem:[%s8197_s5 + $0x8cc] sm:$0xf0]  ;;  %v6358_v35 = vor.u32 %v7013_v24, %v6357_v23  ;;  %4019 = vmatmul.bf16.vlgmr.msrb.gmra.mxu2 %v8358_v39  ;;  %3993 = vmatmul.bf16.vlgmr.msrb.gmra.mxu0 %v8362_v42 }
 0x234   : > { %v6085_v34 = vld [vmem:[%s8197_s5 + $0x9c0] sm:$0xf]  ;;  %v6945_v36 = vld [vmem:[%s8197_s5 + $0x9cc] sm:$0xf0]  ;;  %v5958_v44 = vor.u32 %v6913_v33, %v5957_v32  ;;  %4050 = vmatpush.bf16.msra.mxu1 %v6102_v30  ;;  %4063 = vmatpush.bf16.msra.mxu2 %v6230_v31 }
 0x235   : > { %v6213_v37 = vld [vmem:[%s8197_s5 + $0xac0] sm:$0xf]  ;;  %v6977_v38 = vld [vmem:[%s8197_s5 + $0xacc] sm:$0xf0]  ;;  %v6086_v46 = vor.u32 %v6945_v36, %v6085_v34  ;;  %4076 = vmatpush.bf16.msra.mxu3 %v6358_v35  ;;  %4006 = vmatmul.bf16.vlgmr.msrb.gmra.mxu1 %v8366_v45 }
 0x236   : > { %v6341_v40 = vld [vmem:[%s8197_s5 + $0xbc0] sm:$0xf]  ;;  %v7009_v41 = vld [vmem:[%s8197_s5 + $0xbcc] sm:$0xf0]  ;;  %v6214_v47 = vor.u32 %v6977_v38, %v6213_v37  ;;  %4032 = vmatmul.bf16.vlgmr.msrb.gmra.mxu3 %v8364_v43  ;;  %4038 = vmatpush.bf16.msra.mxu0 %v5958_v44 }
 0x237   : > { %v5941_v48 = vld [vmem:[%s8197_s5 + $0x8a0] sm:$0xf]  ;;  %v6909_v49 = vld [vmem:[%s8197_s5 + $0x8ac] sm:$0xf0]  ;;  %v6342_v51 = vor.u32 %v7009_v41, %v6341_v40 }
 0x238   : > { %v6069_v50 = vld [vmem:[%s8197_s5 + $0x9a0] sm:$0xf]  ;;  %v6941_v52 = vld [vmem:[%s8197_s5 + $0x9ac] sm:$0xf0]  ;;  %v5942_v57 = vor.u32 %v6909_v49, %v5941_v48  ;;  %4051 = vmatpush.bf16.msra.mxu1 %v6086_v46  ;;  %4064 = vmatpush.bf16.msra.mxu2 %v6214_v47 }
 0x239   : > { %v6197_v53 = vld [vmem:[%s8197_s5 + $0xaa0] sm:$0xf]  ;;  %v6973_v54 = vld [vmem:[%s8197_s5 + $0xaac] sm:$0xf0]  ;;  %v6070_v58 = vor.u32 %v6941_v52, %v6069_v50  ;;  %4077 = vmatpush.bf16.msra.mxu3 %v6342_v51 }
 0x23a   : > { %v6325_v55 = vld [vmem:[%s8197_s5 + $0xba0] sm:$0xf]  ;;  %v7005_v56 = vld [vmem:[%s8197_s5 + $0xbac] sm:$0xf0]  ;;  %v6198_v59 = vor.u32 %v6973_v54, %v6197_v53  ;;  %4039 = vmatpush.bf16.msra.mxu0 %v5942_v57 }
 0x23b   : > { %v5925_v60 = vld [vmem:[%s8197_s5 + $0x880] sm:$0xf]  ;;  %v6905_v61 = vld [vmem:[%s8197_s5 + $0x88c] sm:$0xf0]  ;;  %v6326_v63 = vor.u32 %v7005_v56, %v6325_v55 }
 0x23c   : > { %v6053_v62 = vld [vmem:[%s8197_s5 + $0x980] sm:$0xf]  ;;  %v6937_v0 = vld [vmem:[%s8197_s5 + $0x98c] sm:$0xf0]  ;;  %v5926_v6 = vor.u32 %v6905_v61, %v5925_v60  ;;  %4052 = vmatpush.bf16.msra.mxu1 %v6070_v58  ;;  %4065 = vmatpush.bf16.msra.mxu2 %v6198_v59 }
 0x23d   : > { %v6181_v1 = vld [vmem:[%s8197_s5 + $0xa80] sm:$0xf]  ;;  %v6969_v2 = vld [vmem:[%s8197_s5 + $0xa8c] sm:$0xf0]  ;;  %v6054_v8 = vor.u32 %v6937_v0, %v6053_v62  ;;  %4078 = vmatpush.bf16.msra.mxu3 %v6326_v63  ;;  %v1194_v62 = vld [vmem:[%s8185_s26 + $0x28] sm:$0xff] }
 0x23e   : > { %v6309_v3 = vld [vmem:[%s8197_s5 + $0xb80] sm:$0xf]  ;;  %v7001_v4 = vld [vmem:[%s8197_s5 + $0xb8c] sm:$0xf0]  ;;  %v6182_v9 = vor.u32 %v6969_v2, %v6181_v1  ;;  %4040 = vmatpush.bf16.msra.mxu0 %v5926_v6  ;;  %v4951_v6 = vld [vmem:[%s8197_s5 + $0xf0] sm:$0xf0] }
 0x23f   : > { %v5909_v10 = vld [vmem:[%s8197_s5 + $0x860] sm:$0xf]  ;;  %v6901_v11 = vld [vmem:[%s8197_s5 + $0x86c] sm:$0xf0]  ;;  %v6310_v13 = vor.u32 %v7001_v4, %v6309_v3  ;;  %v6659_v4 = vld [vmem:[%s8197_s5 + $0xe4] sm:$0xf] }
 0x240   : > { %v6037_v12 = vld [vmem:[%s8197_s5 + $0x960] sm:$0xf]  ;;  %v6933_v14 = vld [vmem:[%s8197_s5 + $0x96c] sm:$0xf0]  ;;  %v5910_v19 = vor.u32 %v6901_v11, %v5909_v10  ;;  %4053 = vmatpush.bf16.msra.mxu1 %v6054_v8  ;;  %4066 = vmatpush.bf16.msra.mxu2 %v6182_v9  ;;  %v6691_v11 = vld [vmem:[%s8197_s5 + $0x1e4] sm:$0xf] }
 0x241   : > { %v6165_v15 = vld [vmem:[%s8197_s5 + $0xa60] sm:$0xf]  ;;  %v6965_v16 = vld [vmem:[%s8197_s5 + $0xa6c] sm:$0xf0]  ;;  %v6038_v20 = vor.u32 %v6933_v14, %v6037_v12  ;;  %4079 = vmatpush.bf16.msra.mxu3 %v6310_v13  ;;  %v5079_v12 = vld [vmem:[%s8197_s5 + $0x1f0] sm:$0xf0]  ;;  %v1661_v13 = vunpack.c.l.b16 %v1194_v62 }
 0x242   : > { %v6293_v17 = vld [vmem:[%s8197_s5 + $0xb60] sm:$0xf]  ;;  %v6997_v18 = vld [vmem:[%s8197_s5 + $0xb6c] sm:$0xf0]  ;;  %v6166_v23 = vor.u32 %v6965_v16, %v6165_v15  ;;  %4041 = vmatpush.bf16.msra.mxu0 %v5910_v19  ;;  %v4954_v19 = vor.u32 %v6659_v4, %v4951_v6 }
 0x243   : > { %v5893_v24 = vld [vmem:[%s8197_s5 + $0x840] sm:$0xf]  ;;  %v6897_v25 = vld [vmem:[%s8197_s5 + $0x84c] sm:$0xf0]  ;;  %v6294_v27 = vor.u32 %v6997_v18, %v6293_v17  ;;  %v1662_v17 = vunpack.c.h.b16 %v1194_v62  ;;  %v5031_v62 = vld [vmem:[%s8197_s5 + $0x190] sm:$0xf0] }
 0x244   : > { %v6021_v26 = vld [vmem:[%s8197_s5 + $0x940] sm:$0xf]  ;;  %v6929_v28 = vld [vmem:[%s8197_s5 + $0x94c] sm:$0xf0]  ;;  %v5894_v33 = vor.u32 %v6897_v25, %v5893_v24  ;;  %4054 = vmatpush.bf16.msra.mxu1 %v6038_v20  ;;  %4067 = vmatpush.bf16.msra.mxu2 %v6166_v23  ;;  %v5082_v25 = vor.u32 %v6691_v11, %v5079_v12  ;;  %v6675_v11 = vld [vmem:[%s8197_s5 + $0x164] sm:$0xf] }
 0x245   : > { %v6149_v29 = vld [vmem:[%s8197_s5 + $0xa40] sm:$0xf]  ;;  %v6961_v30 = vld [vmem:[%s8197_s5 + $0xa4c] sm:$0xf0]  ;;  %v6022_v34 = vor.u32 %v6929_v28, %v6021_v26  ;;  %4080 = vmatpush.bf16.msra.mxu3 %v6294_v27  ;;  %v6655_v28 = vld [vmem:[%s8197_s5 + $0xc4] sm:$0xf] }
 0x246   : > { %v6277_v31 = vld [vmem:[%s8197_s5 + $0xb40] sm:$0xf]  ;;  %v6993_v32 = vld [vmem:[%s8197_s5 + $0xb4c] sm:$0xf0]  ;;  %v6150_v35 = vor.u32 %v6961_v30, %v6149_v29  ;;  %4042 = vmatpush.bf16.msra.mxu0 %v5894_v33  ;;  %v4935_v29 = vld [vmem:[%s8197_s5 + $0xd0] sm:$0xf0]  ;;  %v8438_v30 = vpack.c.b16 %v1661_v13, %v1661_v13 }
 0x247   : > { %v5877_v36 = vld [vmem:[%s8197_s5 + $0x820] sm:$0xf]  ;;  %v6893_v37 = vld [vmem:[%s8197_s5 + $0x82c] sm:$0xf0]  ;;  %v6278_v40 = vor.u32 %v6993_v32, %v6277_v31  ;;  %v6687_v32 = vld [vmem:[%s8197_s5 + $0x1c4] sm:$0xf] }
 0x248   : > { %v6005_v38 = vld [vmem:[%s8197_s5 + $0x920] sm:$0xf]  ;;  %v6925_v41 = vld [vmem:[%s8197_s5 + $0x92c] sm:$0xf0]  ;;  %v5878_v50 = vor.u32 %v6893_v37, %v5877_v36  ;;  %4055 = vmatpush.bf16.msra.mxu1 %v6022_v34  ;;  %4068 = vmatpush.bf16.msra.mxu2 %v6150_v35  ;;  %v5063_v33 = vld [vmem:[%s8197_s5 + $0x1d0] sm:$0xf0]  ;;  %v8444_v34 = vpack.c.b16 %v1662_v17, %v1662_v17  ;;  %v4938_v37 = vor.u32 %v6655_v28, %v4935_v29 }
 0x249   : > { %v6133_v44 = vld [vmem:[%s8197_s5 + $0xa20] sm:$0xf]  ;;  %v6957_v46 = vld [vmem:[%s8197_s5 + $0xa2c] sm:$0xf0]  ;;  %v6006_v54 = vor.u32 %v6925_v41, %v6005_v38  ;;  %4081 = vmatpush.bf16.msra.mxu3 %v6278_v40  ;;  %v5015_v12 = vld [vmem:[%s8197_s5 + $0x170] sm:$0xf0] }
 0x24a   : > { %v6261_v47 = vld [vmem:[%s8197_s5 + $0xb20] sm:$0xf]  ;;  %v6989_v48 = vld [vmem:[%s8197_s5 + $0xb2c] sm:$0xf0]  ;;  %v6134_v55 = vor.u32 %v6957_v46, %v6133_v44  ;;  %4043 = vmatpush.bf16.msra.mxu0 %v5878_v50  ;;  %v5066_v44 = vor.u32 %v6687_v32, %v5063_v33  ;;  %v5047_v50 = vld [vmem:[%s8197_s5 + $0x1b0] sm:$0xf0] }
 0x24b   : > { %v5861_v49 = vld [vmem:[%s8197_s5 + $0x800] sm:$0xf]  ;;  %v6889_v51 = vld [vmem:[%s8197_s5 + $0x80c] sm:$0xf0]  ;;  %v6262_v59 = vor.u32 %v6989_v48, %v6261_v47  ;;  %v6651_v47 = vld [vmem:[%s8197_s5 + $0xa4] sm:$0xf] }
 0x24c   : > { %v5989_v52 = vld [vmem:[%s8197_s5 + $0x900] sm:$0xf]  ;;  %v6921_v53 = vld [vmem:[%s8197_s5 + $0x90c] sm:$0xf0]  ;;  %v5862_v2 = vor.u32 %v6889_v51, %v5861_v49  ;;  %4056 = vmatpush.bf16.msra.mxu1 %v6006_v54  ;;  %4069 = vmatpush.bf16.msra.mxu2 %v6134_v55  ;;  %v4919_v48 = vld [vmem:[%s8197_s5 + $0xb0] sm:$0xf0] }
 0x24d   : > { %v6117_v56 = vld [vmem:[%s8197_s5 + $0xa00] sm:$0xf]  ;;  %v6953_v57 = vld [vmem:[%s8197_s5 + $0xa0c] sm:$0xf0]  ;;  %v5990_v9 = vor.u32 %v6921_v53, %v5989_v52  ;;  %4082 = vmatpush.bf16.msra.mxu3 %v6262_v59  ;;  %v6683_v49 = vld [vmem:[%s8197_s5 + $0x1a4] sm:$0xf]  ;;  %v4922_v53 = vor.u32 %v6651_v47, %v4919_v48 }
 0x24e   : > { %v1193_v58 = vld [vmem:[%s8185_s26 + $0x20] sm:$0xff]  ;;  %v6985_v61 = vld [vmem:[%s8197_s5 + $0xb0c] sm:$0xf0]  ;;  %v6118_v10 = vor.u32 %v6953_v57, %v6117_v56  ;;  %4044 = vmatpush.bf16.msra.mxu0 %v5862_v2  ;;  %v5050_v57 = vor.u32 %v6683_v49, %v5047_v50 }
 0x24f   : > { %v6245_v60 = vld [vmem:[%s8197_s5 + $0xb00] sm:$0xf]  ;;  %v7045_v0 = vld [vmem:[%s8197_s5 + $0xcec] sm:$0xf0]  ;;  %v1659_v8 = vunpack.c.l.b16 %v1193_v58  ;;  %v1660_v14 = vunpack.c.h.b16 %v1193_v58  ;;  %v6647_v59 = vld [vmem:[%s8197_s5 + $0x84] sm:$0xf] }
 0x250   : > { %v6485_v63 = vld [vmem:[%s8197_s5 + $0xce0] sm:$0xf]  ;;  %v7077_v3 = vld [vmem:[%s8197_s5 + $0xdec] sm:$0xf0]  ;;  %v6246_v15 = vor.u32 %v6985_v61, %v6245_v60  ;;  %4057 = vmatpush.bf16.msra.mxu1 %v5990_v9  ;;  %4070 = vmatpush.bf16.msra.mxu2 %v6118_v10  ;;  %v4903_v60 = vld [vmem:[%s8197_s5 + $0x90] sm:$0xf0] }
 0x251   : > { %v6613_v1 = vld [vmem:[%s8197_s5 + $0xde0] sm:$0xf]  ;;  %v6486_v16 = vor.u32 %v7045_v0, %v6485_v63  ;;  %v7041_v23 = vld [vmem:[%s8197_s5 + $0xccc] sm:$0xf0]  ;;  %v8433_v26 = vpack.c.b16 %v1659_v8, %v1659_v8  ;;  %v8440_v31 = vpack.c.b16 %v1660_v14, %v1660_v14  ;;  %v6679_v61 = vld [vmem:[%s8197_s5 + $0x184] sm:$0xf] }
 0x252   : > { %v6614_v18 = vor.u32 %v7077_v3, %v6613_v1  ;;  %v6469_v20 = vld [vmem:[%s8197_s5 + $0xcc0] sm:$0xf]  ;;  %v7073_v27 = vld [vmem:[%s8197_s5 + $0xdcc] sm:$0xf0]  ;;  %4083 = vmatpush.bf16.msra.mxu3 %v6246_v15  ;;  %v4906_v1 = vor.u32 %v6647_v59, %v4903_v60  ;;  %v5034_v6 = vor.u32 %v6679_v61, %v5031_v62  ;;  %v6643_v9 = vld [vmem:[%s8197_s5 + $0x64] sm:$0xf] }
 0x253   : > { %v6597_v24 = vld [vmem:[%s8197_s5 + $0xdc0] sm:$0xf]  ;;  %4089 = vmatpush.bf16.msrb.mxu0 %v6486_v16  ;;  %v6470_v35 = vor.u32 %v7041_v23, %v6469_v20  ;;  %v7037_v40 = vld [vmem:[%s8197_s5 + $0xcac] sm:$0xf0]  ;;  %4071 = vmatmul.bf16.vlgmr.msra.gmra.mxu2 %v8438_v30  ;;  %v4887_v10 = vld [vmem:[%s8197_s5 + $0x70] sm:$0xf0] }
 0x254   : > { %4102 = vmatpush.bf16.msrb.mxu1 %v6614_v18  ;;  %4115 = vmatpush.bf16.msrb.mxu2 %v4954_v19  ;;  %v6598_v36 = vor.u32 %v7073_v27, %v6597_v24  ;;  %v6453_v38 = vld [vmem:[%s8197_s5 + $0xca0] sm:$0xf]  ;;  %v7069_v46 = vld [vmem:[%s8197_s5 + $0xdac] sm:$0xf0]  ;;  %v4890_v15 = vor.u32 %v6643_v9, %v4887_v10  ;;  %v5018_v19 = vor.u32 %v6675_v11, %v5015_v12  ;;  %v6639_v23 = vld [vmem:[%s8197_s5 + $0x44] sm:$0xf] }
 0x255   : > { %v6581_v41 = vld [vmem:[%s8197_s5 + $0xda0] sm:$0xf]  ;;  %4045 = vmatmul.bf16.vlgmr.msra.gmra.mxu0 %v8433_v26  ;;  %4058 = vmatmul.bf16.vlgmr.msra.gmra.mxu1 %v8440_v31  ;;  %v6454_v51 = vor.u32 %v7037_v40, %v6453_v38  ;;  %v7033_v55 = vld [vmem:[%s8197_s5 + $0xc8c] sm:$0xf0]  ;;  %v4871_v24 = vld [vmem:[%s8197_s5 + $0x50] sm:$0xf0] }
 0x256   : > { %4128 = vmatpush.bf16.msrb.mxu3 %v5082_v25  ;;  %v6582_v52 = vor.u32 %v7069_v46, %v6581_v41  ;;  %v6437_v54 = vld [vmem:[%s8197_s5 + $0xc80] sm:$0xf]  ;;  %v7065_v58 = vld [vmem:[%s8197_s5 + $0xd8c] sm:$0xf0]  ;;  %v6671_v25 = vld [vmem:[%s8197_s5 + $0x144] sm:$0xf]  ;;  %v4874_v32 = vor.u32 %v6639_v23, %v4871_v24 }
 0x257   : > { %4084 = vmatmul.bf16.vlgmr.msra.gmra.mxu3 %v8444_v34  ;;  %4090 = vmatpush.bf16.msrb.mxu0 %v6470_v35  ;;  %v6565_v56 = vld [vmem:[%s8197_s5 + $0xd80] sm:$0xf]  ;;  %v6438_v63 = vor.u32 %v7033_v55, %v6437_v54  ;;  %v7029_v3 = vld [vmem:[%s8197_s5 + $0xc6c] sm:$0xf0]  ;;  %v4999_v27 = vld [vmem:[%s8197_s5 + $0x150] sm:$0xf0] }
 0x258   : > { %4103 = vmatpush.bf16.msrb.mxu1 %v6598_v36  ;;  %4116 = vmatpush.bf16.msrb.mxu2 %v4938_v37  ;;  %v6566_v0 = vor.u32 %v7065_v58, %v6565_v56  ;;  %v6421_v2 = vld [vmem:[%s8197_s5 + $0xc60] sm:$0xf]  ;;  %v7061_v8 = vld [vmem:[%s8197_s5 + $0xd6c] sm:$0xf0]  ;;  %v5002_v37 = vor.u32 %v6671_v25, %v4999_v27  ;;  %v6635_v40 = vld [vmem:[%s8197_s5 + $0x24] sm:$0xf] }
 0x259   : > { %v6549_v4 = vld [vmem:[%s8197_s5 + $0xd60] sm:$0xf]  ;;  %v6422_v13 = vor.u32 %v7029_v3, %v6421_v2  ;;  %v7025_v17 = vld [vmem:[%s8197_s5 + $0xc4c] sm:$0xf0]  ;;  %v4855_v41 = vld [vmem:[%s8197_s5 + $0x30] sm:$0xf0] }
 0x25a   : > { %4129 = vmatpush.bf16.msrb.mxu3 %v5066_v44  ;;  %v6550_v14 = vor.u32 %v7061_v8, %v6549_v4  ;;  %v6405_v16 = vld [vmem:[%s8197_s5 + $0xc40] sm:$0xf]  ;;  %v7057_v20 = vld [vmem:[%s8197_s5 + $0xd4c] sm:$0xf0]  ;;  %v6667_v44 = vld [vmem:[%s8197_s5 + $0x124] sm:$0xf] }
 0x25b   : > { %4091 = vmatpush.bf16.msrb.mxu0 %v6454_v51  ;;  %v6533_v18 = vld [vmem:[%s8197_s5 + $0xd40] sm:$0xf]  ;;  %v6406_v28 = vor.u32 %v7025_v17, %v6405_v16  ;;  %v7021_v35 = vld [vmem:[%s8197_s5 + $0xc2c] sm:$0xf0]  ;;  %v4983_v46 = vld [vmem:[%s8197_s5 + $0x130] sm:$0xf0] }
 0x25c   : > { %4104 = vmatpush.bf16.msrb.mxu1 %v6582_v52  ;;  %4117 = vmatpush.bf16.msrb.mxu2 %v4922_v53  ;;  %v6534_v29 = vor.u32 %v7057_v20, %v6533_v18  ;;  %v6389_v33 = vld [vmem:[%s8197_s5 + $0xc20] sm:$0xf]  ;;  %v7053_v38 = vld [vmem:[%s8197_s5 + $0xd2c] sm:$0xf0]  ;;  %v4858_v52 = vor.u32 %v6635_v40, %v4855_v41  ;;  %v6631_v54 = vld [vmem:[%s8197_s5 + $0x4] sm:$0xf]  ;;  %v4986_v56 = vor.u32 %v6667_v44, %v4983_v46 }
 0x25d   : > { %v6517_v36 = vld [vmem:[%s8197_s5 + $0xd20] sm:$0xf]  ;;  %v6390_v47 = vor.u32 %v7021_v35, %v6389_v33  ;;  %v7017_v49 = vld [vmem:[%s8197_s5 + $0xc0c] sm:$0xf0]  ;;  %v6663_v58 = vld [vmem:[%s8197_s5 + $0x104] sm:$0xf] }
 0x25e   : > { %4130 = vmatpush.bf16.msrb.mxu3 %v5050_v57  ;;  %v6373_v48 = vld [vmem:[%s8197_s5 + $0xc00] sm:$0xf]  ;;  %v6518_v51 = vor.u32 %v7053_v38, %v6517_v36  ;;  %v7049_v53 = vld [vmem:[%s8197_s5 + $0xd0c] sm:$0xf0]  ;;  %v4839_v57 = vld [vmem:[%s8197_s5 + $0x10] sm:$0xf0] }
 0x25f   : > { %4092 = vmatpush.bf16.msrb.mxu0 %v6438_v63  ;;  %v6501_v50 = vld [vmem:[%s8197_s5 + $0xd00] sm:$0xf]  ;;  %v1195_v55 = vld [vmem:[%s8185_s26 + $0x30] sm:$0xff]  ;;  %v6723_v60 = vld [vmem:[%s8197_s5 + $0x2e4] sm:$0xf]  ;;  %v6374_v63 = vor.u32 %v7017_v49, %v6373_v48 }
 0x260   : > { %4105 = vmatpush.bf16.msrb.mxu1 %v6566_v0  ;;  %4118 = vmatpush.bf16.msrb.mxu2 %v4906_v1  ;;  %v4967_v59 = vld [vmem:[%s8197_s5 + $0x110] sm:$0xf0]  ;;  %v6755_v62 = vld [vmem:[%s8197_s5 + $0x3e4] sm:$0xf]  ;;  %v1663_v3 = vunpack.c.l.b16 %v1195_v55  ;;  %v6502_v4 = vor.u32 %v7049_v53, %v6501_v50  ;;  %v1664_v10 = vunpack.c.h.b16 %v1195_v55 }
 0x261   : > { %v5207_v61 = vld [vmem:[%s8197_s5 + $0x2f0] sm:$0xf0]  ;;  %v6787_v1 = vld [vmem:[%s8197_s5 + $0x4e4] sm:$0xf]  ;;  %v4970_v11 = vor.u32 %v6663_v58, %v4967_v59 }
 0x262   : > { %4131 = vmatpush.bf16.msrb.mxu3 %v5034_v6  ;;  %v5335_v0 = vld [vmem:[%s8197_s5 + $0x3f0] sm:$0xf0]  ;;  %v4842_v6 = vor.u32 %v6631_v54, %v4839_v57  ;;  %v6819_v8 = vld [vmem:[%s8197_s5 + $0x5e4] sm:$0xf]  ;;  %v5210_v12 = vor.u32 %v6723_v60, %v5207_v61  ;;  %v8515_v25 = vpack.c.b16 %v1664_v10, %v1664_v10 }
 0x263   : > { %4093 = vmatpush.bf16.msrb.mxu0 %v6422_v13  ;;  %v5463_v2 = vld [vmem:[%s8197_s5 + $0x4f0] sm:$0xf0]  ;;  %v5338_v13 = vor.u32 %v6755_v62, %v5335_v0  ;;  %v6751_v17 = vld [vmem:[%s8197_s5 + $0x3c4] sm:$0xf] }
 0x264   : > { %4106 = vmatpush.bf16.msrb.mxu1 %v6550_v14  ;;  %4119 = vmatpush.bf16.msrb.mxu2 %v4890_v15  ;;  %v5591_v9 = vld [vmem:[%s8197_s5 + $0x5f0] sm:$0xf0]  ;;  %v5466_v14 = vor.u32 %v6787_v1, %v5463_v2  ;;  %v6719_v15 = vld [vmem:[%s8197_s5 + $0x2c4] sm:$0xf] }
 0x265   : > { %v5191_v16 = vld [vmem:[%s8197_s5 + $0x2d0] sm:$0xf0]  ;;  %v5594_v18 = vor.u32 %v6819_v8, %v5591_v9  ;;  %v6783_v23 = vld [vmem:[%s8197_s5 + $0x4c4] sm:$0xf] }
 0x266   : > { %4132 = vmatpush.bf16.msrb.mxu3 %v5018_v19  ;;  %v8510_v19 = vpack.c.b16 %v1663_v3, %v1663_v3  ;;  %v5319_v20 = vld [vmem:[%s8197_s5 + $0x3d0] sm:$0xf0]  ;;  %v6815_v27 = vld [vmem:[%s8197_s5 + $0x5c4] sm:$0xf] }
 0x267   : > { %4094 = vmatpush.bf16.msrb.mxu0 %v6406_v28  ;;  %v5447_v24 = vld [vmem:[%s8197_s5 + $0x4d0] sm:$0xf0]  ;;  %v6715_v35 = vld [vmem:[%s8197_s5 + $0x2a4] sm:$0xf] }
 0x268   : > { %4107 = vmatpush.bf16.msrb.mxu1 %v6534_v29  ;;  %4120 = vmatpush.bf16.msrb.mxu2 %v4874_v32  ;;  %v5575_v28 = vld [vmem:[%s8197_s5 + $0x5d0] sm:$0xf0]  ;;  %v5194_v29 = vor.u32 %v6719_v15, %v5191_v16  ;;  %v5322_v32 = vor.u32 %v6751_v17, %v5319_v20  ;;  %v5450_v33 = vor.u32 %v6783_v23, %v5447_v24  ;;  %v6779_v41 = vld [vmem:[%s8197_s5 + $0x4a4] sm:$0xf] }
 0x269   : > { %v5175_v36 = vld [vmem:[%s8197_s5 + $0x2b0] sm:$0xf0]  ;;  %v5578_v38 = vor.u32 %v6815_v27, %v5575_v28  ;;  %v6811_v46 = vld [vmem:[%s8197_s5 + $0x5a4] sm:$0xf] }
 0x26a   : > { %4133 = vmatpush.bf16.msrb.mxu3 %v5002_v37  ;;  %v6747_v37 = vld [vmem:[%s8197_s5 + $0x3a4] sm:$0xf]  ;;  %v5303_v40 = vld [vmem:[%s8197_s5 + $0x3b0] sm:$0xf0]  ;;  %v5178_v48 = vor.u32 %v6715_v35, %v5175_v36 }
 0x26b   : > { %4095 = vmatpush.bf16.msrb.mxu0 %v6390_v47  ;;  %v5431_v44 = vld [vmem:[%s8197_s5 + $0x4b0] sm:$0xf0]  ;;  %v5306_v49 = vor.u32 %v6747_v37, %v5303_v40  ;;  %v6743_v53 = vld [vmem:[%s8197_s5 + $0x384] sm:$0xf] }
 0x26c   : > { %4108 = vmatpush.bf16.msrb.mxu1 %v6518_v51  ;;  %4121 = vmatpush.bf16.msrb.mxu2 %v4858_v52  ;;  %v5559_v47 = vld [vmem:[%s8197_s5 + $0x5b0] sm:$0xf0]  ;;  %v5434_v50 = vor.u32 %v6779_v41, %v5431_v44  ;;  %v6711_v51 = vld [vmem:[%s8197_s5 + $0x284] sm:$0xf] }
 0x26d   : > { %v5159_v52 = vld [vmem:[%s8197_s5 + $0x290] sm:$0xf0]  ;;  %v5562_v54 = vor.u32 %v6811_v46, %v5559_v47  ;;  %v6807_v58 = vld [vmem:[%s8197_s5 + $0x584] sm:$0xf] }
 0x26e   : > { %4134 = vmatpush.bf16.msrb.mxu3 %v4986_v56  ;;  %v5287_v55 = vld [vmem:[%s8197_s5 + $0x390] sm:$0xf0]  ;;  %v6775_v56 = vld [vmem:[%s8197_s5 + $0x484] sm:$0xf]  ;;  %v5162_v60 = vor.u32 %v6711_v51, %v5159_v52 }
 0x26f   : > { %4096 = vmatpush.bf16.msrb.mxu0 %v6374_v63  ;;  %v5415_v57 = vld [vmem:[%s8197_s5 + $0x490] sm:$0xf0]  ;;  %v5290_v61 = vor.u32 %v6743_v53, %v5287_v55  ;;  %v6707_v63 = vld [vmem:[%s8197_s5 + $0x264] sm:$0xf] }
 0x270   : > { %4109 = vmatpush.bf16.msrb.mxu1 %v6502_v4  ;;  %4122 = vmatpush.bf16.msrb.mxu2 %v4842_v6  ;;  %v5543_v59 = vld [vmem:[%s8197_s5 + $0x590] sm:$0xf0]  ;;  %v5418_v62 = vor.u32 %v6775_v56, %v5415_v57  ;;  %v6739_v1 = vld [vmem:[%s8197_s5 + $0x364] sm:$0xf] }
 0x271   : > { %v5143_v0 = vld [vmem:[%s8197_s5 + $0x270] sm:$0xf0]  ;;  %v5546_v2 = vor.u32 %v6807_v58, %v5543_v59  ;;  %v6771_v4 = vld [vmem:[%s8197_s5 + $0x464] sm:$0xf] }
 0x272   : > { %4135 = vmatpush.bf16.msrb.mxu3 %v4970_v11  ;;  %4097 = vmatmul.bf16.vlgmr.msrb.gmra.mxu0 %v8510_v19  ;;  %v5271_v3 = vld [vmem:[%s8197_s5 + $0x370] sm:$0xf0]  ;;  %v6803_v8 = vld [vmem:[%s8197_s5 + $0x564] sm:$0xf]  ;;  %v5146_v10 = vor.u32 %v6707_v63, %v5143_v0 }
 0x273   : > { %4141 = vmatpush.bf16.msra.mxu0 %v5210_v12  ;;  %4110 = vmatmul.bf16.vlgmr.msrb.gmra.mxu1 %v8515_v25  ;;  %v5399_v6 = vld [vmem:[%s8197_s5 + $0x470] sm:$0xf0]  ;;  %v5274_v11 = vor.u32 %v6739_v1, %v5271_v3  ;;  %v6735_v15 = vld [vmem:[%s8197_s5 + $0x344] sm:$0xf] }
 0x274   : > { %4154 = vmatpush.bf16.msra.mxu1 %v5338_v13  ;;  %4167 = vmatpush.bf16.msra.mxu2 %v5466_v14  ;;  %v5527_v9 = vld [vmem:[%s8197_s5 + $0x570] sm:$0xf0]  ;;  %v5402_v12 = vor.u32 %v6771_v4, %v5399_v6  ;;  %v6703_v13 = vld [vmem:[%s8197_s5 + $0x244] sm:$0xf] }
 0x275   : > { %4123 = vmatmul.bf16.vlgmr.msrb.gmra.mxu2 %v8303_v21  ;;  %4136 = vmatmul.bf16.vlgmr.msrb.gmra.mxu3 %v8306_v22  ;;  %v5127_v14 = vld [vmem:[%s8197_s5 + $0x250] sm:$0xf0]  ;;  %v5530_v16 = vor.u32 %v6803_v8, %v5527_v9  ;;  %v6799_v23 = vld [vmem:[%s8197_s5 + $0x544] sm:$0xf] }
 0x276   : > { %4180 = vmatpush.bf16.msra.mxu3 %v5594_v18  ;;  %v5255_v17 = vld [vmem:[%s8197_s5 + $0x350] sm:$0xf0]  ;;  %v6767_v18 = vld [vmem:[%s8197_s5 + $0x444] sm:$0xf]  ;;  %v5130_v27 = vor.u32 %v6703_v13, %v5127_v14 }
 0x277   : > { %4142 = vmatpush.bf16.msra.mxu0 %v5194_v29  ;;  %v5383_v20 = vld [vmem:[%s8197_s5 + $0x450] sm:$0xf0]  ;;  %v5258_v28 = vor.u32 %v6735_v15, %v5255_v17  ;;  %v6731_v35 = vld [vmem:[%s8197_s5 + $0x324] sm:$0xf] }
 0x278   : > { %4155 = vmatpush.bf16.msra.mxu1 %v5322_v32  ;;  %4168 = vmatpush.bf16.msra.mxu2 %v5450_v33  ;;  %v5511_v24 = vld [vmem:[%s8197_s5 + $0x550] sm:$0xf0]  ;;  %v5386_v29 = vor.u32 %v6767_v18, %v5383_v20  ;;  %v6699_v32 = vld [vmem:[%s8197_s5 + $0x224] sm:$0xf] }
 0x279   : > { %v5111_v33 = vld [vmem:[%s8197_s5 + $0x230] sm:$0xf0]  ;;  %v5514_v36 = vor.u32 %v6799_v23, %v5511_v24  ;;  %v6795_v41 = vld [vmem:[%s8197_s5 + $0x524] sm:$0xf] }
 0x27a   : > { %4181 = vmatpush.bf16.msra.mxu3 %v5578_v38  ;;  %v5239_v37 = vld [vmem:[%s8197_s5 + $0x330] sm:$0xf0]  ;;  %v6763_v38 = vld [vmem:[%s8197_s5 + $0x424] sm:$0xf]  ;;  %v5114_v46 = vor.u32 %v6699_v32, %v5111_v33 }
 0x27b   : > { %4143 = vmatpush.bf16.msra.mxu0 %v5178_v48  ;;  %v5367_v40 = vld [vmem:[%s8197_s5 + $0x430] sm:$0xf0]  ;;  %v6695_v47 = vld [vmem:[%s8197_s5 + $0x204] sm:$0xf] }
 0x27c   : > { %4156 = vmatpush.bf16.msra.mxu1 %v5306_v49  ;;  %4169 = vmatpush.bf16.msra.mxu2 %v5434_v50  ;;  %v5495_v44 = vld [vmem:[%s8197_s5 + $0x530] sm:$0xf0]  ;;  %v5242_v49 = vor.u32 %v6731_v35, %v5239_v37  ;;  %v5370_v50 = vor.u32 %v6763_v38, %v5367_v40  ;;  %v6727_v51 = vld [vmem:[%s8197_s5 + $0x304] sm:$0xf] }
 0x27d   : > { %v5095_v48 = vld [vmem:[%s8197_s5 + $0x210] sm:$0xf0]  ;;  %v6759_v53 = vld [vmem:[%s8197_s5 + $0x404] sm:$0xf] }
 0x27e   : > { %4182 = vmatpush.bf16.msra.mxu3 %v5562_v54  ;;  %v5223_v52 = vld [vmem:[%s8197_s5 + $0x310] sm:$0xf0]  ;;  %v5498_v54 = vor.u32 %v6795_v41, %v5495_v44  ;;  %v6791_v56 = vld [vmem:[%s8197_s5 + $0x504] sm:$0xf] }
 0x27f   : > { %4144 = vmatpush.bf16.msra.mxu0 %v5162_v60  ;;  %v5351_v55 = vld [vmem:[%s8197_s5 + $0x410] sm:$0xf0]  ;;  %v6851_v58 = vld [vmem:[%s8197_s5 + $0x6e4] sm:$0xf]  ;;  %v5226_v1 = vor.u32 %v6727_v51, %v5223_v52 }
 0x280   : > { %4157 = vmatpush.bf16.msra.mxu1 %v5290_v61  ;;  %4170 = vmatpush.bf16.msra.mxu2 %v5418_v62  ;;  %v5479_v57 = vld [vmem:[%s8197_s5 + $0x510] sm:$0xf0]  ;;  %v6883_v60 = vld [vmem:[%s8197_s5 + $0x7e4] sm:$0xf]  ;;  %v5098_v61 = vor.u32 %v6695_v47, %v5095_v48 }
 0x281   : > { %v5719_v59 = vld [vmem:[%s8197_s5 + $0x6f0] sm:$0xf0]  ;;  %v6915_v63 = vld [vmem:[%s8197_s5 + $0x8e4] sm:$0xf]  ;;  %v5482_v6 = vor.u32 %v6791_v56, %v5479_v57 }
 0x282   : > { %4183 = vmatpush.bf16.msra.mxu3 %v5546_v2  ;;  %v5847_v62 = vld [vmem:[%s8197_s5 + $0x7f0] sm:$0xf0]  ;;  %v5354_v2 = vor.u32 %v6759_v53, %v5351_v55  ;;  %v6947_v3 = vld [vmem:[%s8197_s5 + $0x9e4] sm:$0xf]  ;;  %v5722_v8 = vor.u32 %v6851_v58, %v5719_v59 }
 0x283   : > { %4145 = vmatpush.bf16.msra.mxu0 %v5146_v10  ;;  %v5975_v0 = vld [vmem:[%s8197_s5 + $0x8f0] sm:$0xf0]  ;;  %v5850_v9 = vor.u32 %v6883_v60, %v5847_v62  ;;  %v6879_v13 = vld [vmem:[%s8197_s5 + $0x7c4] sm:$0xf] }
 0x284   : > { %4158 = vmatpush.bf16.msra.mxu1 %v5274_v11  ;;  %4171 = vmatpush.bf16.msra.mxu2 %v5402_v12  ;;  %v6103_v4 = vld [vmem:[%s8197_s5 + $0x9f0] sm:$0xf0]  ;;  %v5978_v10 = vor.u32 %v6915_v63, %v5975_v0  ;;  %v6847_v11 = vld [vmem:[%s8197_s5 + $0x6c4] sm:$0xf] }
 0x285   : > { %v5703_v12 = vld [vmem:[%s8197_s5 + $0x6d0] sm:$0xf0]  ;;  %v6106_v14 = vor.u32 %v6947_v3, %v6103_v4  ;;  %v6943_v18 = vld [vmem:[%s8197_s5 + $0x9c4] sm:$0xf] }
 0x286   : > { %4184 = vmatpush.bf16.msra.mxu3 %v5530_v16  ;;  %v5831_v15 = vld [vmem:[%s8197_s5 + $0x7d0] sm:$0xf0]  ;;  %v6911_v16 = vld [vmem:[%s8197_s5 + $0x8c4] sm:$0xf]  ;;  %v5706_v23 = vor.u32 %v6847_v11, %v5703_v12 }
 0x287   : > { %4146 = vmatpush.bf16.msra.mxu0 %v5130_v27  ;;  %v5959_v17 = vld [vmem:[%s8197_s5 + $0x8d0] sm:$0xf0]  ;;  %v5834_v24 = vor.u32 %v6879_v13, %v5831_v15  ;;  %v6875_v32 = vld [vmem:[%s8197_s5 + $0x7a4] sm:$0xf] }
 0x288   : > { %4159 = vmatpush.bf16.msra.mxu1 %v5258_v28  ;;  %4172 = vmatpush.bf16.msra.mxu2 %v5386_v29  ;;  %v6087_v20 = vld [vmem:[%s8197_s5 + $0x9d0] sm:$0xf0]  ;;  %v5962_v27 = vor.u32 %v6911_v16, %v5959_v17  ;;  %v6843_v28 = vld [vmem:[%s8197_s5 + $0x6a4] sm:$0xf] }
 0x289   : > { %v5687_v29 = vld [vmem:[%s8197_s5 + $0x6b0] sm:$0xf0]  ;;  %v6090_v33 = vor.u32 %v6943_v18, %v6087_v20  ;;  %v6939_v38 = vld [vmem:[%s8197_s5 + $0x9a4] sm:$0xf] }
 0x28a   : > { %4185 = vmatpush.bf16.msra.mxu3 %v5514_v36  ;;  %v5815_v35 = vld [vmem:[%s8197_s5 + $0x7b0] sm:$0xf0]  ;;  %v6907_v36 = vld [vmem:[%s8197_s5 + $0x8a4] sm:$0xf]  ;;  %v5690_v41 = vor.u32 %v6843_v28, %v5687_v29 }
 0x28b   : > { %4147 = vmatpush.bf16.msra.mxu0 %v5114_v46  ;;  %v5943_v37 = vld [vmem:[%s8197_s5 + $0x8b0] sm:$0xf0]  ;;  %v5818_v44 = vor.u32 %v6875_v32, %v5815_v35  ;;  %v6839_v47 = vld [vmem:[%s8197_s5 + $0x684] sm:$0xf] }
 0x28c   : > { %4160 = vmatpush.bf16.msra.mxu1 %v5242_v49  ;;  %4173 = vmatpush.bf16.msra.mxu2 %v5370_v50  ;;  %v6071_v40 = vld [vmem:[%s8197_s5 + $0x9b0] sm:$0xf0]  ;;  %v5946_v46 = vor.u32 %v6907_v36, %v5943_v37  ;;  %v6871_v49 = vld [vmem:[%s8197_s5 + $0x784] sm:$0xf] }
 0x28d   : > { %v5671_v48 = vld [vmem:[%s8197_s5 + $0x690] sm:$0xf0]  ;;  %v6074_v50 = vor.u32 %v6939_v38, %v6071_v40  ;;  %v6903_v52 = vld [vmem:[%s8197_s5 + $0x884] sm:$0xf] }
 0x28e   : > { %4186 = vmatpush.bf16.msra.mxu3 %v5498_v54  ;;  %v5799_v51 = vld [vmem:[%s8197_s5 + $0x790] sm:$0xf0]  ;;  %v6935_v54 = vld [vmem:[%s8197_s5 + $0x984] sm:$0xf]  ;;  %v5674_v56 = vor.u32 %v6839_v47, %v5671_v48 }
 0x28f   : > { %4148 = vmatpush.bf16.msra.mxu0 %v5098_v61  ;;  %v5927_v53 = vld [vmem:[%s8197_s5 + $0x890] sm:$0xf0]  ;;  %v5802_v57 = vor.u32 %v6871_v49, %v5799_v51  ;;  %v6835_v59 = vld [vmem:[%s8197_s5 + $0x664] sm:$0xf] }
 0x290   : > { %4161 = vmatpush.bf16.msra.mxu1 %v5226_v1  ;;  %4174 = vmatpush.bf16.msra.mxu2 %v5354_v2  ;;  %v6055_v55 = vld [vmem:[%s8197_s5 + $0x990] sm:$0xf0]  ;;  %v5930_v58 = vor.u32 %v6903_v52, %v5927_v53  ;;  %v6867_v61 = vld [vmem:[%s8197_s5 + $0x764] sm:$0xf] }
 0x291   : > { %v5655_v60 = vld [vmem:[%s8197_s5 + $0x670] sm:$0xf0]  ;;  %v6058_v62 = vor.u32 %v6935_v54, %v6055_v55  ;;  %v6899_v0 = vld [vmem:[%s8197_s5 + $0x864] sm:$0xf] }
 0x292   : > { %4187 = vmatpush.bf16.msra.mxu3 %v5482_v6  ;;  %4149 = vmatmul.bf16.vlgmr.msra.gmra.mxu0 %v8289_v5  ;;  %v5783_v63 = vld [vmem:[%s8197_s5 + $0x770] sm:$0xf0]  ;;  %v6931_v2 = vld [vmem:[%s8197_s5 + $0x964] sm:$0xf]  ;;  %v5658_v4 = vor.u32 %v6835_v59, %v5655_v60 }
 0x293   : > { %4193 = vmatpush.bf16.msrb.mxu0 %v5722_v8  ;;  %4175 = vmatmul.bf16.vlgmr.msra.gmra.mxu2 %v8362_v42  ;;  %v5911_v1 = vld [vmem:[%s8197_s5 + $0x870] sm:$0xf0]  ;;  %v5786_v6 = vor.u32 %v6867_v61, %v5783_v63  ;;  %v6863_v11 = vld [vmem:[%s8197_s5 + $0x744] sm:$0xf] }
 0x294   : > { %4206 = vmatpush.bf16.msrb.mxu1 %v5850_v9  ;;  %4219 = vmatpush.bf16.msrb.mxu2 %v5978_v10  ;;  %v6039_v3 = vld [vmem:[%s8197_s5 + $0x970] sm:$0xf0]  ;;  %v5914_v8 = vor.u32 %v6899_v0, %v5911_v1  ;;  %v6831_v9 = vld [vmem:[%s8197_s5 + $0x644] sm:$0xf] }
 0x295   : > { %4188 = vmatmul.bf16.vlgmr.msra.gmra.mxu3 %v8366_v45  ;;  %4162 = vmatmul.bf16.vlgmr.msra.gmra.mxu1 %v8292_v7  ;;  %v5639_v10 = vld [vmem:[%s8197_s5 + $0x650] sm:$0xf0]  ;;  %v6042_v12 = vor.u32 %v6931_v2, %v6039_v3  ;;  %v6927_v16 = vld [vmem:[%s8197_s5 + $0x944] sm:$0xf] }
 0x296   : > { %4232 = vmatpush.bf16.msrb.mxu3 %v6106_v14  ;;  %v5767_v13 = vld [vmem:[%s8197_s5 + $0x750] sm:$0xf0]  ;;  %v6895_v14 = vld [vmem:[%s8197_s5 + $0x844] sm:$0xf]  ;;  %v5642_v20 = vor.u32 %v6831_v9, %v5639_v10  ;;  %v8635_v40 = vpop.f32.mrf.mxu3 }
 0x297   : > { %4194 = vmatpush.bf16.msrb.mxu0 %v5706_v23  ;;  %v5895_v15 = vld [vmem:[%s8197_s5 + $0x850] sm:$0xf0]  ;;  %v6827_v28 = vld [vmem:[%s8197_s5 + $0x624] sm:$0xf] }
 0x298   : > { %4207 = vmatpush.bf16.msrb.mxu1 %v5834_v24  ;;  %4220 = vmatpush.bf16.msrb.mxu2 %v5962_v27  ;;  %v6023_v17 = vld [vmem:[%s8197_s5 + $0x950] sm:$0xf0]  ;;  %v5770_v24 = vor.u32 %v6863_v11, %v5767_v13  ;;  %v5898_v27 = vor.u32 %v6895_v14, %v5895_v15  ;;  %v6859_v32 = vld [vmem:[%s8197_s5 + $0x724] sm:$0xf] }
 0x299   : > { %v5623_v29 = vld [vmem:[%s8197_s5 + $0x630] sm:$0xf0]  ;;  %v6026_v35 = vor.u32 %v6927_v16, %v6023_v17  ;;  %v6891_v37 = vld [vmem:[%s8197_s5 + $0x824] sm:$0xf] }
 0x29a   : > { %4233 = vmatpush.bf16.msrb.mxu3 %v6090_v33  ;;  %v8630_v33 = vpop.f32.mrf.mxu2  ;;  %v5751_v36 = vld [vmem:[%s8197_s5 + $0x730] sm:$0xf0]  ;;  %v6823_v47 = vld [vmem:[%s8197_s5 + $0x604] sm:$0xf] }
 0x29b   : > { %4195 = vmatpush.bf16.msrb.mxu0 %v5690_v41  ;;  %v5879_v38 = vld [vmem:[%s8197_s5 + $0x830] sm:$0xf0]  ;;  %v6923_v41 = vld [vmem:[%s8197_s5 + $0x924] sm:$0xf]  ;;  %v5754_v49 = vor.u32 %v6859_v32, %v5751_v36 }
 0x29c   : > { %4208 = vmatpush.bf16.msrb.mxu1 %v5818_v44  ;;  %4221 = vmatpush.bf16.msrb.mxu2 %v5946_v46  ;;  %v8623_v18 = vpop.f32.mrf.mxu0  ;;  %v8625_v23 = vpop.f32.mrf.mxu1  ;;  %v6007_v44 = vld [vmem:[%s8197_s5 + $0x930] sm:$0xf0]  ;;  %v5626_v46 = vor.u32 %v6827_v28, %v5623_v29  ;;  %v6855_v51 = vld [vmem:[%s8197_s5 + $0x704] sm:$0xf] }
 0x29d   : > { %v5607_v48 = vld [vmem:[%s8197_s5 + $0x610] sm:$0xf0]  ;;  %v6887_v53 = vld [vmem:[%s8197_s5 + $0x804] sm:$0xf]  ;;  %v6010_v54 = vor.u32 %v6923_v41, %v6007_v44 }
 0x29e   : > { %4234 = vmatpush.bf16.msrb.mxu3 %v6074_v50  ;;  %v5882_v50 = vor.u32 %v6891_v37, %v5879_v38  ;;  %v5735_v52 = vld [vmem:[%s8197_s5 + $0x710] sm:$0xf0]  ;;  %v7011_v60 = vld [vmem:[%s8197_s5 + $0xbe4] sm:$0xf] }
 0x29f   : > { %4196 = vmatpush.bf16.msrb.mxu0 %v5674_v56  ;;  %v5863_v55 = vld [vmem:[%s8197_s5 + $0x810] sm:$0xf0]  ;;  %v6919_v56 = vld [vmem:[%s8197_s5 + $0x904] sm:$0xf]  ;;  %v5738_v3 = vor.u32 %v6855_v51, %v5735_v52 }
 0x2a0   : > { %4209 = vmatpush.bf16.msrb.mxu1 %v5802_v57  ;;  %4222 = vmatpush.bf16.msrb.mxu2 %v5930_v58  ;;  %v5991_v57 = vld [vmem:[%s8197_s5 + $0x910] sm:$0xf0]  ;;  %v6979_v58 = vld [vmem:[%s8197_s5 + $0xae4] sm:$0xf] }
 0x2a1   : > { %v6231_v59 = vld [vmem:[%s8197_s5 + $0xaf0] sm:$0xf0]  ;;  %v7043_v0 = vld [vmem:[%s8197_s5 + $0xce4] sm:$0xf]  ;;  %v5994_v10 = vor.u32 %v6919_v56, %v5991_v57 }
 0x2a2   : > { %4235 = vmatpush.bf16.msrb.mxu3 %v6058_v62  ;;  %v5610_v62 = vor.u32 %v6823_v47, %v5607_v48  ;;  %v6359_v63 = vld [vmem:[%s8197_s5 + $0xbf0] sm:$0xf0]  ;;  %v3970_v9 = vpop.f32.mrf.mxu2  ;;  %v6234_v11 = vor.u32 %v6979_v58, %v6231_v59  ;;  %v6975_v15 = vld [vmem:[%s8197_s5 + $0xac4] sm:$0xf] }
 0x2a3   : > { %4197 = vmatpush.bf16.msrb.mxu0 %v5658_v4  ;;  %v6487_v1 = vld [vmem:[%s8197_s5 + $0xcf0] sm:$0xf0]  ;;  %v5866_v4 = vor.u32 %v6887_v53, %v5863_v55  ;;  %v6362_v13 = vor.u32 %v7011_v60, %v6359_v63  ;;  %v7007_v17 = vld [vmem:[%s8197_s5 + $0xbc4] sm:$0xf] }
 0x2a4   : > { %4210 = vmatpush.bf16.msrb.mxu1 %v5786_v6  ;;  %4223 = vmatpush.bf16.msrb.mxu2 %v5914_v8  ;;  %v3944_v61 = vpop.f32.mrf.mxu0  ;;  %v3957_v2 = vpop.f32.mrf.mxu1  ;;  %v7075_v6 = vld [vmem:[%s8197_s5 + $0xde4] sm:$0xf]  ;;  %v6615_v8 = vld [vmem:[%s8197_s5 + $0xdf0] sm:$0xf0]  ;;  %v6490_v14 = vor.u32 %v7043_v0, %v6487_v1 }
 0x2a5   : > { %v6215_v16 = vld [vmem:[%s8197_s5 + $0xad0] sm:$0xf0]  ;;  %v7071_v29 = vld [vmem:[%s8197_s5 + $0xdc4] sm:$0xf] }
 0x2a6   : > { %4236 = vmatpush.bf16.msrb.mxu3 %v6042_v12  ;;  %v3983_v12 = vpop.f32.mrf.mxu3  ;;  %v6471_v28 = vld [vmem:[%s8197_s5 + $0xcd0] sm:$0xf0]  ;;  %v6971_v38 = vld [vmem:[%s8197_s5 + $0xaa4] sm:$0xf] }
 0x2a7   : > { %4198 = vmatpush.bf16.msrb.mxu0 %v5642_v20  ;;  %v6618_v20 = vor.u32 %v7075_v6, %v6615_v8  ;;  %v6599_v32 = vld [vmem:[%s8197_s5 + $0xdd0] sm:$0xf0]  ;;  %v7003_v44 = vld [vmem:[%s8197_s5 + $0xba4] sm:$0xf] }
 0x2a8   : > { %4211 = vmatpush.bf16.msrb.mxu1 %v5770_v24  ;;  %4224 = vmatpush.bf16.msrb.mxu2 %v5898_v27  ;;  %v6343_v24 = vld [vmem:[%s8197_s5 + $0xbd0] sm:$0xf0]  ;;  %v7039_v27 = vld [vmem:[%s8197_s5 + $0xcc4] sm:$0xf] }
 0x2a9   : > { %v6346_v36 = vor.u32 %v7007_v17, %v6343_v24  ;;  %v6474_v37 = vor.u32 %v7039_v27, %v6471_v28  ;;  %v6199_v41 = vld [vmem:[%s8197_s5 + $0xab0] sm:$0xf0]  ;;  %v7035_v48 = vld [vmem:[%s8197_s5 + $0xca4] sm:$0xf] }
 0x2aa   : > { %4237 = vmatpush.bf16.msrb.mxu3 %v6026_v35  ;;  %v6218_v35 = vor.u32 %v6975_v15, %v6215_v16  ;;  %v6327_v47 = vld [vmem:[%s8197_s5 + $0xbb0] sm:$0xf0]  ;;  %v6202_v52 = vor.u32 %v6971_v38, %v6199_v41  ;;  %v6967_v55 = vld [vmem:[%s8197_s5 + $0xa84] sm:$0xf] }
 0x2ab   : > { %4199 = vmatpush.bf16.msrb.mxu0 %v5626_v46  ;;  %v6602_v46 = vor.u32 %v7071_v29, %v6599_v32  ;;  %v6583_v51 = vld [vmem:[%s8197_s5 + $0xdb0] sm:$0xf0]  ;;  %v6330_v53 = vor.u32 %v7003_v44, %v6327_v47  ;;  %v6999_v57 = vld [vmem:[%s8197_s5 + $0xb84] sm:$0xf] }
 0x2ac   : > { %4212 = vmatpush.bf16.msrb.mxu1 %v5754_v49  ;;  %4225 = vmatpush.bf16.msrb.mxu2 %v5882_v50  ;;  %v6455_v49 = vld [vmem:[%s8197_s5 + $0xcb0] sm:$0xf0]  ;;  %v7067_v50 = vld [vmem:[%s8197_s5 + $0xda4] sm:$0xf] }
 0x2ad   : > { %v6183_v56 = vld [vmem:[%s8197_s5 + $0xa90] sm:$0xf0]  ;;  %v6586_v58 = vor.u32 %v7067_v50, %v6583_v51  ;;  %v7031_v60 = vld [vmem:[%s8197_s5 + $0xc84] sm:$0xf] }
 0x2ae   : > { %4238 = vmatpush.bf16.msrb.mxu3 %v6010_v54  ;;  %v6458_v54 = vor.u32 %v7035_v48, %v6455_v49  ;;  %v6311_v59 = vld [vmem:[%s8197_s5 + $0xb90] sm:$0xf0]  ;;  %v6186_v0 = vor.u32 %v6967_v55, %v6183_v56  ;;  %v6995_v8 = vld [vmem:[%s8197_s5 + $0xb64] sm:$0xf] }
 0x2af   : > { %4200 = vmatpush.bf16.msrb.mxu0 %v5610_v62  ;;  %v6439_v61 = vld [vmem:[%s8197_s5 + $0xc90] sm:$0xf0]  ;;  %v7063_v62 = vld [vmem:[%s8197_s5 + $0xd84] sm:$0xf]  ;;  %v6314_v2 = vor.u32 %v6999_v57, %v6311_v59 }
 0x2b0   : > { %4213 = vmatpush.bf16.msrb.mxu1 %v5738_v3  ;;  %4226 = vmatpush.bf16.msrb.mxu2 %v5866_v4  ;;  %v6567_v63 = vld [vmem:[%s8197_s5 + $0xd90] sm:$0xf0]  ;;  %v8683_v1 = vpop.f32.mrf.mxu0  ;;  %v6442_v3 = vor.u32 %v7031_v60, %v6439_v61  ;;  %v6963_v4 = vld [vmem:[%s8197_s5 + $0xa64] sm:$0xf] }
 0x2b1   : > { %v6167_v6 = vld [vmem:[%s8197_s5 + $0xa70] sm:$0xf0]  ;;  %v7027_v12 = vld [vmem:[%s8197_s5 + $0xc64] sm:$0xf] }
 0x2b2   : > { %4239 = vmatpush.bf16.msrb.mxu3 %v5994_v10  ;;  %4201 = vmatmul.bf16.vlgmr.msrb.gmra.mxu0 %v8358_v39  ;;  %v8688_v9 = vpop.f32.mrf.mxu1  ;;  %v6570_v10 = vor.u32 %v7063_v62, %v6567_v63  ;;  %v6551_v15 = vld [vmem:[%s8197_s5 + $0xd70] sm:$0xf0]  ;;  %v6170_v16 = vor.u32 %v6963_v4, %v6167_v6  ;;  %v6959_v24 = vld [vmem:[%s8197_s5 + $0xa44] sm:$0xf] }
 0x2b3   : > { %4245 = vmatpush.bf16.msra.mxu0 %v6234_v11  ;;  %4227 = vmatmul.bf16.vlgmr.msrb.gmra.mxu2 %v8433_v26  ;;  %v6295_v11 = vld [vmem:[%s8197_s5 + $0xb70] sm:$0xf0]  ;;  %v6991_v28 = vld [vmem:[%s8197_s5 + $0xb44] sm:$0xf] }
 0x2b4   : > { %4258 = vmatpush.bf16.msra.mxu1 %v6362_v13  ;;  %4271 = vmatpush.bf16.msra.mxu2 %v6490_v14  ;;  %v6423_v13 = vld [vmem:[%s8197_s5 + $0xc70] sm:$0xf0]  ;;  %v7059_v14 = vld [vmem:[%s8197_s5 + $0xd64] sm:$0xf]  ;;  %v6298_v17 = vor.u32 %v6995_v8, %v6295_v11 }
 0x2b5   : > { %4214 = vmatmul.bf16.vlgmr.msrb.gmra.mxu1 %v8364_v43  ;;  %4240 = vmatmul.bf16.vlgmr.msrb.gmra.mxu3 %v8440_v31  ;;  %v6151_v27 = vld [vmem:[%s8197_s5 + $0xa50] sm:$0xf0]  ;;  %v6554_v32 = vor.u32 %v7059_v14, %v6551_v15  ;;  %v7055_v41 = vld [vmem:[%s8197_s5 + $0xd44] sm:$0xf]  ;;  %v4957_v14 = vld [vmem:[%s8197_s5 + $0xe8] sm:$0xf] }
 0x2b6   : > { %4284 = vmatpush.bf16.msra.mxu3 %v6618_v20  ;;  %v6426_v20 = vor.u32 %v7027_v12, %v6423_v13  ;;  %v8698_v29 = vpop.f32.mrf.mxu2  ;;  %v6535_v44 = vld [vmem:[%s8197_s5 + $0xd50] sm:$0xf0]  ;;  %v6955_v50 = vld [vmem:[%s8197_s5 + $0xa24] sm:$0xf]  ;;  %v6662_v15 = vld [vmem:[%s8197_s5 + $0xf4] sm:$0xf0] }
 0x2b7   : > { %4246 = vmatpush.bf16.msra.mxu0 %v6218_v35  ;;  %v6279_v35 = vld [vmem:[%s8197_s5 + $0xb50] sm:$0xf0]  ;;  %v7019_v56 = vld [vmem:[%s8197_s5 + $0xc24] sm:$0xf] }
 0x2b8   : > { %4259 = vmatpush.bf16.msra.mxu1 %v6346_v36  ;;  %4272 = vmatpush.bf16.msra.mxu2 %v6474_v37  ;;  %v7023_v36 = vld [vmem:[%s8197_s5 + $0xc44] sm:$0xf]  ;;  %v6407_v37 = vld [vmem:[%s8197_s5 + $0xc50] sm:$0xf0]  ;;  %v3996_v47 = vpop.f32.mrf.mxu0  ;;  %v6282_v48 = vor.u32 %v6991_v28, %v6279_v35  ;;  %v5341_v35 = vld [vmem:[%s8197_s5 + $0x3e8] sm:$0xf] }
 0x2b9   : > { %v8703_v38 = vpop.f32.mrf.mxu3  ;;  %v6410_v49 = vor.u32 %v7023_v36, %v6407_v37  ;;  %v6135_v51 = vld [vmem:[%s8197_s5 + $0xa30] sm:$0xf0]  ;;  %v6951_v61 = vld [vmem:[%s8197_s5 + $0xa04] sm:$0xf]  ;;  %v6758_v36 = vld [vmem:[%s8197_s5 + $0x3f4] sm:$0xf0] }
 0x2ba   : > { %4285 = vmatpush.bf16.msra.mxu3 %v6602_v46  ;;  %v6154_v46 = vor.u32 %v6959_v24, %v6151_v27  ;;  %v6263_v55 = vld [vmem:[%s8197_s5 + $0xb30] sm:$0xf0]  ;;  %v6138_v60 = vor.u32 %v6955_v50, %v6135_v51  ;;  %v7015_v4 = vld [vmem:[%s8197_s5 + $0xc04] sm:$0xf]  ;;  %v5213_v24 = vld [vmem:[%s8197_s5 + $0x2e8] sm:$0xf]  ;;  %v5342_v50 = vor.u32 %v6758_v36, %v5341_v35 }
 0x2bb   : > { %4247 = vmatpush.bf16.msra.mxu0 %v6202_v52  ;;  %v6987_v52 = vld [vmem:[%s8197_s5 + $0xb24] sm:$0xf]  ;;  %v6391_v57 = vld [vmem:[%s8197_s5 + $0xc30] sm:$0xf0]  ;;  %v6726_v27 = vld [vmem:[%s8197_s5 + $0x2f4] sm:$0xf0] }
 0x2bc   : > { %4260 = vmatpush.bf16.msra.mxu1 %v6330_v53  ;;  %4273 = vmatpush.bf16.msra.mxu2 %v6458_v54  ;;  %v4009_v53 = vpop.f32.mrf.mxu1  ;;  %v6538_v54 = vor.u32 %v7055_v41, %v6535_v44  ;;  %v6519_v59 = vld [vmem:[%s8197_s5 + $0xd30] sm:$0xf0]  ;;  %v6266_v63 = vor.u32 %v6987_v52, %v6263_v55  ;;  %v7047_v11 = vld [vmem:[%s8197_s5 + $0xd04] sm:$0xf]  ;;  %v4958_v41 = vor.u32 %v6662_v15, %v4957_v14  ;;  %v4941_v47 = vld [vmem:[%s8197_s5 + $0xc8] sm:$0xf] }
 0x2bd   : > { %v6119_v62 = vld [vmem:[%s8197_s5 + $0xa10] sm:$0xf0]  ;;  %v6690_v51 = vld [vmem:[%s8197_s5 + $0x1d4] sm:$0xf0]  ;;  %v5197_v52 = vld [vmem:[%s8197_s5 + $0x2c8] sm:$0xf] }
 0x2be   : > { %4286 = vmatpush.bf16.msra.mxu3 %v6586_v58  ;;  %v7051_v58 = vld [vmem:[%s8197_s5 + $0xd24] sm:$0xf]  ;;  %v4022_v6 = vpop.f32.mrf.mxu2  ;;  %v6503_v12 = vld [vmem:[%s8197_s5 + $0xd10] sm:$0xf0]  ;;  %v6722_v53 = vld [vmem:[%s8197_s5 + $0x2d4] sm:$0xf0] }
 0x2bf   : > { %4248 = vmatpush.bf16.msra.mxu0 %v6186_v0  ;;  %v6394_v0 = vor.u32 %v7019_v56, %v6391_v57  ;;  %v6522_v8 = vor.u32 %v7051_v58, %v6519_v59  ;;  %v6506_v37 = vor.u32 %v7047_v11, %v6503_v12  ;;  %v6754_v55 = vld [vmem:[%s8197_s5 + $0x3d4] sm:$0xf0]  ;;  %v3956_v56 = vadd.f32 %v8625_v23, %v8623_v18  ;;  %v5181_v18 = vld [vmem:[%s8197_s5 + $0x2a8] sm:$0xf] }
 0x2c0   : > { %4261 = vmatpush.bf16.msra.mxu1 %v6314_v2  ;;  %4274 = vmatpush.bf16.msra.mxu2 %v6442_v3  ;;  %v6983_v2 = vld [vmem:[%s8197_s5 + $0xb04] sm:$0xf]  ;;  %v6247_v3 = vld [vmem:[%s8197_s5 + $0xb10] sm:$0xf0]  ;;  %v5198_v59 = vor.u32 %v6722_v53, %v5197_v52  ;;  %v6718_v23 = vld [vmem:[%s8197_s5 + $0x2b4] sm:$0xf0] }
 0x2c1   : > { %v4035_v13 = vpop.f32.mrf.mxu3  ;;  %v6250_v28 = vor.u32 %v6983_v2, %v6247_v3  ;;  %v5309_v2 = vld [vmem:[%s8197_s5 + $0x3a8] sm:$0xf]  ;;  %v6750_v3 = vld [vmem:[%s8197_s5 + $0x3b4] sm:$0xf0] }
 0x2c2   : > { %4287 = vmatpush.bf16.msra.mxu3 %v6570_v10  ;;  %v6375_v10 = vld [vmem:[%s8197_s5 + $0xc10] sm:$0xf0]  ;;  %v4909_v11 = vld [vmem:[%s8197_s5 + $0x88] sm:$0xf]  ;;  %v6650_v12 = vld [vmem:[%s8197_s5 + $0x94] sm:$0xf0]  ;;  %v5310_v14 = vor.u32 %v6750_v3, %v5309_v2 }
 0x2c3   : > { %4249 = vmatpush.bf16.msra.mxu0 %v6170_v16  ;;  %v5085_v16 = vld [vmem:[%s8197_s5 + $0x1e8] sm:$0xf]  ;;  %v6682_v15 = vld [vmem:[%s8197_s5 + $0x194] sm:$0xf0] }
 0x2c4   : > { %4262 = vmatpush.bf16.msra.mxu1 %v6298_v17  ;;  %4275 = vmatpush.bf16.msra.mxu2 %v6426_v20  ;;  %v6122_v17 = vor.u32 %v6951_v61, %v6119_v62  ;;  %v6694_v20 = vld [vmem:[%s8197_s5 + $0x1f4] sm:$0xf0]  ;;  %v5053_v62 = vld [vmem:[%s8197_s5 + $0x1a8] sm:$0xf] }
 0x2c5   : > { %v5086_v44 = vor.u32 %v6694_v20, %v5085_v16  ;;  %v6654_v61 = vld [vmem:[%s8197_s5 + $0xb4] sm:$0xf0]  ;;  %v5037_v13 = vld [vmem:[%s8197_s5 + $0x188] sm:$0xf] }
 0x2c6   : > { %4288 = vmatpush.bf16.msra.mxu3 %v6554_v32  ;;  %v6378_v32 = vor.u32 %v7015_v4, %v6375_v10  ;;  %v3969_v4 = vadd.f32 %v8630_v33, %v3956_v56  ;;  %v5182_v10 = vor.u32 %v6718_v23, %v5181_v18  ;;  %v5165_v33 = vld [vmem:[%s8197_s5 + $0x288] sm:$0xf]  ;;  %v6714_v16 = vld [vmem:[%s8197_s5 + $0x294] sm:$0xf0]  ;;  %v5038_v35 = vor.u32 %v6682_v15, %v5037_v13 }
 0x2c7   : > { %4250 = vmatpush.bf16.msra.mxu0 %v6154_v46  ;;  %v5214_v46 = vor.u32 %v6726_v27, %v5213_v24  ;;  %v5293_v20 = vld [vmem:[%s8197_s5 + $0x388] sm:$0xf]  ;;  %v6746_v24 = vld [vmem:[%s8197_s5 + $0x394] sm:$0xf0]  ;;  %v5166_v36 = vor.u32 %v6714_v16, %v5165_v33 }
 0x2c8   : > { %4263 = vmatpush.bf16.msra.mxu1 %v6282_v48  ;;  %4276 = vmatpush.bf16.msra.mxu2 %v6410_v49  ;;  %v6658_v48 = vld [vmem:[%s8197_s5 + $0xd4] sm:$0xf0]  ;;  %v5069_v49 = vld [vmem:[%s8197_s5 + $0x1c8] sm:$0xf]  ;;  %v3982_v27 = vadd.f32 %v8635_v40, %v3969_v4 }
 0x2c9   : > { %v4942_v57 = vor.u32 %v6658_v48, %v4941_v47  ;;  %v5070_v58 = vor.u32 %v6690_v51, %v5069_v49  ;;  %v6678_v47 = vld [vmem:[%s8197_s5 + $0x174] sm:$0xf0]  ;;  %v5149_v40 = vld [vmem:[%s8197_s5 + $0x268] sm:$0xf] }
 0x2ca   : > { %4289 = vmatpush.bf16.msra.mxu3 %v6538_v54  ;;  %v5325_v54 = vld [vmem:[%s8197_s5 + $0x3c8] sm:$0xf]  ;;  %v6710_v48 = vld [vmem:[%s8197_s5 + $0x274] sm:$0xf0]  ;;  %v3995_v51 = vadd.f32 %v8683_v1, %v3982_v27 }
 0x2cb   : > { %4251 = vmatpush.bf16.msra.mxu0 %v6138_v60  ;;  %v4925_v60 = vld [vmem:[%s8197_s5 + $0xa8] sm:$0xf]  ;;  %v6642_v56 = vld [vmem:[%s8197_s5 + $0x54] sm:$0xf0] }
 0x2cc   : > { %4264 = vmatpush.bf16.msra.mxu1 %v6266_v63  ;;  %4277 = vmatpush.bf16.msra.mxu2 %v6394_v0  ;;  %v5326_v63 = vor.u32 %v6754_v55, %v5325_v54  ;;  %v6686_v0 = vld [vmem:[%s8197_s5 + $0x1b4] sm:$0xf0]  ;;  %v4926_v6 = vor.u32 %v6654_v61, %v4925_v60  ;;  %v5277_v49 = vld [vmem:[%s8197_s5 + $0x368] sm:$0xf]  ;;  %v5150_v54 = vor.u32 %v6710_v48, %v5149_v40 }
 0x2cd   : > { %v4877_v55 = vld [vmem:[%s8197_s5 + $0x48] sm:$0xf]  ;;  %v6674_v60 = vld [vmem:[%s8197_s5 + $0x154] sm:$0xf0]  ;;  %v4008_v23 = vadd.f32 %v8688_v9, %v3995_v51 }
 0x2ce   : > { %4290 = vmatpush.bf16.msra.mxu3 %v6522_v8  ;;  %v5054_v8 = vor.u32 %v6686_v0, %v5053_v62  ;;  %v5133_v61 = vld [vmem:[%s8197_s5 + $0x248] sm:$0xf]  ;;  %v6706_v1 = vld [vmem:[%s8197_s5 + $0x254] sm:$0xf0]  ;;  %v4878_v2 = vor.u32 %v6642_v56, %v4877_v55 }
 0x2cf   : > { %4252 = vmatpush.bf16.msra.mxu0 %v6122_v17  ;;  %v6738_v0 = vld [vmem:[%s8197_s5 + $0x354] sm:$0xf0]  ;;  %v5117_v9 = vld [vmem:[%s8197_s5 + $0x228] sm:$0xf]  ;;  %v4021_v16 = vadd.f32 %v8698_v29, %v4008_v23 }
 0x2d0   : > { %4265 = vmatpush.bf16.msra.mxu1 %v6250_v28  ;;  %4278 = vmatpush.bf16.msra.mxu2 %v6378_v32  ;;  %v4910_v28 = vor.u32 %v6650_v12, %v4909_v11  ;;  %v4989_v11 = vld [vmem:[%s8197_s5 + $0x128] sm:$0xf]  ;;  %v6670_v13 = vld [vmem:[%s8197_s5 + $0x134] sm:$0xf0] }
 0x2d1   : > { %v5245_v15 = vld [vmem:[%s8197_s5 + $0x328] sm:$0xf]  ;;  %v6734_v33 = vld [vmem:[%s8197_s5 + $0x334] sm:$0xf0] }
 0x2d2   : > { %4291 = vmatpush.bf16.msra.mxu3 %v6506_v37  ;;  %4253 = vmatmul.bf16.vlgmr.msra.gmra.mxu0 %v8438_v30  ;;  %v8760_v17 = vpop.f32.mrf.mxu0  ;;  %v8765_v32 = vpop.f32.mrf.mxu1  ;;  %v4893_v37 = vld [vmem:[%s8197_s5 + $0x68] sm:$0xf]  ;;  %v6634_v27 = vld [vmem:[%s8197_s5 + $0x14] sm:$0xf0]  ;;  %v5246_v29 = vor.u32 %v6734_v33, %v5245_v15 }
 0x2d3   : > { %4297 = vmatpush.bf16.msrb.mxu0 %v4958_v41  ;;  %4279 = vmatmul.bf16.vlgmr.msra.gmra.mxu2 %v8510_v19  ;;  %v6646_v41 = vld [vmem:[%s8197_s5 + $0x74] sm:$0xf0]  ;;  %v5469_v48 = vld [vmem:[%s8197_s5 + $0x4e8] sm:$0xf] }
 0x2d4   : > { %4310 = vmatpush.bf16.msrb.mxu1 %v5086_v44  ;;  %4323 = vmatpush.bf16.msrb.mxu2 %v5214_v46  ;;  %v5021_v44 = vld [vmem:[%s8197_s5 + $0x168] sm:$0xf]  ;;  %v5294_v46 = vor.u32 %v6746_v24, %v5293_v20  ;;  %v4894_v52 = vor.u32 %v6646_v41, %v4893_v37  ;;  %v6666_v37 = vld [vmem:[%s8197_s5 + $0x114] sm:$0xf0] }
 0x2d5   : > { %4266 = vmatmul.bf16.vlgmr.msra.gmra.mxu1 %v8444_v34  ;;  %4292 = vmatmul.bf16.vlgmr.msra.gmra.mxu3 %v8515_v25  ;;  %v5022_v53 = vor.u32 %v6678_v47, %v5021_v44  ;;  %v4845_v24 = vld [vmem:[%s8197_s5 + $0x8] sm:$0xf]  ;;  %v6698_v44 = vld [vmem:[%s8197_s5 + $0x214] sm:$0xf0] }
 0x2d6   : > { %4336 = vmatpush.bf16.msrb.mxu3 %v5342_v50  ;;  %v6742_v50 = vld [vmem:[%s8197_s5 + $0x374] sm:$0xf0]  ;;  %v5101_v41 = vld [vmem:[%s8197_s5 + $0x208] sm:$0xf] }
 0x2d7   : > { %4298 = vmatpush.bf16.msrb.mxu0 %v4942_v57  ;;  %v5005_v57 = vld [vmem:[%s8197_s5 + $0x148] sm:$0xf]  ;;  %v6730_v47 = vld [vmem:[%s8197_s5 + $0x314] sm:$0xf0] }
 0x2d8   : > { %4311 = vmatpush.bf16.msrb.mxu1 %v5070_v58  ;;  %4324 = vmatpush.bf16.msrb.mxu2 %v5198_v59  ;;  %v5278_v58 = vor.u32 %v6742_v50, %v5277_v49  ;;  %v8779_v59 = vpop.f32.mrf.mxu2  ;;  %v5006_v4 = vor.u32 %v6674_v60, %v5005_v57  ;;  %v6790_v49 = vld [vmem:[%s8197_s5 + $0x4f4] sm:$0xf0]  ;;  %v5597_v50 = vld [vmem:[%s8197_s5 + $0x5e8] sm:$0xf] }
 0x2d9   : > { %v5725_v55 = vld [vmem:[%s8197_s5 + $0x6e8] sm:$0xf]  ;;  %v6854_v56 = vld [vmem:[%s8197_s5 + $0x6f4] sm:$0xf0] }
 0x2da   : > { %4337 = vmatpush.bf16.msrb.mxu3 %v5326_v63  ;;  %v8784_v62 = vpop.f32.mrf.mxu3  ;;  %v5261_v63 = vld [vmem:[%s8197_s5 + $0x348] sm:$0xf]  ;;  %v4048_v18 = vpop.f32.mrf.mxu0  ;;  %v6782_v33 = vld [vmem:[%s8197_s5 + $0x4b4] sm:$0xf0] }
 0x2db   : > { %4299 = vmatpush.bf16.msrb.mxu0 %v4926_v6  ;;  %v4061_v3 = vpop.f32.mrf.mxu1  ;;  %v5134_v6 = vor.u32 %v6706_v1, %v5133_v61  ;;  %v5262_v12 = vor.u32 %v6738_v0, %v5261_v63  ;;  %v5853_v60 = vld [vmem:[%s8197_s5 + $0x7e8] sm:$0xf]  ;;  %v6886_v61 = vld [vmem:[%s8197_s5 + $0x7f4] sm:$0xf0]  ;;  %v5470_v63 = vor.u32 %v6790_v49, %v5469_v48  ;;  %v5726_v18 = vor.u32 %v6854_v56, %v5725_v55  ;;  %v1185_v56 = vld [vmem:[#allocation2 + $0x10] sm:$0xff] }
 0x2dc   : > { %4312 = vmatpush.bf16.msrb.mxu1 %v5054_v8  ;;  %4325 = vmatpush.bf16.msrb.mxu2 %v5182_v10  ;;  %v4861_v8 = vld [vmem:[%s8197_s5 + $0x28] sm:$0xf]  ;;  %v6638_v10 = vld [vmem:[%s8197_s5 + $0x34] sm:$0xf0] }
 0x2dd   : > { %v4862_v20 = vor.u32 %v6638_v10, %v4861_v8  ;;  %v5453_v23 = vld [vmem:[%s8197_s5 + $0x4c8] sm:$0xf]  ;;  %v6850_v10 = vld [vmem:[%s8197_s5 + $0x6d4] sm:$0xf0] }
 0x2de   : > { %4338 = vmatpush.bf16.msrb.mxu3 %v5310_v14  ;;  %v6702_v14 = vld [vmem:[%s8197_s5 + $0x234] sm:$0xf0]  ;;  %v5581_v3 = vld [vmem:[%s8197_s5 + $0x5c8] sm:$0xf] }
 0x2df   : > { %4300 = vmatpush.bf16.msrb.mxu0 %v4910_v28  ;;  %v4990_v28 = vor.u32 %v6670_v13, %v4989_v11  ;;  %v5709_v8 = vld [vmem:[%s8197_s5 + $0x6c8] sm:$0xf]  ;;  %v6882_v11 = vld [vmem:[%s8197_s5 + $0x7d4] sm:$0xf0] }
 0x2e0   : > { %4313 = vmatpush.bf16.msrb.mxu1 %v5038_v35  ;;  %4326 = vmatpush.bf16.msrb.mxu2 %v5166_v36  ;;  %v5118_v35 = vor.u32 %v6702_v14, %v5117_v9  ;;  %v4973_v36 = vld [vmem:[%s8197_s5 + $0x108] sm:$0xf]  ;;  %v4074_v40 = vpop.f32.mrf.mxu2  ;;  %v5710_v14 = vor.u32 %v6850_v10, %v5709_v8  ;;  %v6810_v48 = vld [vmem:[%s8197_s5 + $0x594] sm:$0xf0] }
 0x2e1   : > { %v4974_v57 = vor.u32 %v6666_v37, %v4973_v36  ;;  %v5437_v15 = vld [vmem:[%s8197_s5 + $0x4a8] sm:$0xf]  ;;  %v6878_v36 = vld [vmem:[%s8197_s5 + $0x7b4] sm:$0xf0] }
 0x2e2   : > { %4339 = vmatpush.bf16.msrb.mxu3 %v5294_v46  ;;  %v5229_v46 = vld [vmem:[%s8197_s5 + $0x308] sm:$0xf]  ;;  %v4087_v51 = vpop.f32.mrf.mxu3 }
 0x2e3   : > { %4301 = vmatpush.bf16.msrb.mxu0 %v4894_v52  ;;  %v4034_v52 = vadd.f32 %v8703_v38, %v4021_v16  ;;  %v5230_v38 = vor.u32 %v6730_v47, %v5229_v46  ;;  %v5565_v16 = vld [vmem:[%s8197_s5 + $0x5a8] sm:$0xf] }
 0x2e4   : > { %4314 = vmatpush.bf16.msrb.mxu1 %v5022_v53  ;;  %4327 = vmatpush.bf16.msrb.mxu2 %v5150_v54  ;;  %v4846_v53 = vor.u32 %v6634_v27, %v4845_v24  ;;  %v6822_v54 = vld [vmem:[%s8197_s5 + $0x5f4] sm:$0xf0]  ;;  %v5549_v46 = vld [vmem:[%s8197_s5 + $0x588] sm:$0xf] }
 0x2e5   : > { %v4047_v1 = vadd.f32 %v8760_v17, %v4034_v52  ;;  %v5598_v0 = vor.u32 %v6822_v54, %v5597_v50  ;;  %v5837_v17 = vld [vmem:[%s8197_s5 + $0x7c8] sm:$0xf]  ;;  %v6814_v27 = vld [vmem:[%s8197_s5 + $0x5b4] sm:$0xf0] }
 0x2e6   : > { %4340 = vmatpush.bf16.msrb.mxu3 %v5278_v58  ;;  %v5102_v58 = vor.u32 %v6698_v44, %v5101_v41  ;;  %v5838_v24 = vor.u32 %v6882_v11, %v5837_v17  ;;  %v5566_v37 = vor.u32 %v6814_v27, %v5565_v16  ;;  %v6778_v44 = vld [vmem:[%s8197_s5 + $0x494] sm:$0xf0]  ;;  %v5677_v49 = vld [vmem:[%s8197_s5 + $0x688] sm:$0xf] }
 0x2e7   : > { %4302 = vmatpush.bf16.msrb.mxu0 %v4878_v2  ;;  %v6786_v2 = vld [vmem:[%s8197_s5 + $0x4d4] sm:$0xf0]  ;;  %v5805_v52 = vld [vmem:[%s8197_s5 + $0x788] sm:$0xf] }
 0x2e8   : > { %4315 = vmatpush.bf16.msrb.mxu1 %v5006_v4  ;;  %4328 = vmatpush.bf16.msrb.mxu2 %v5134_v6  ;;  %v5854_v4 = vor.u32 %v6886_v61, %v5853_v60  ;;  %v6818_v6 = vld [vmem:[%s8197_s5 + $0x5d4] sm:$0xf0]  ;;  %v5454_v13 = vor.u32 %v6786_v2, %v5453_v23  ;;  %v5405_v60 = vld [vmem:[%s8197_s5 + $0x468] sm:$0xf] }
 0x2e9   : > { %v5582_v9 = vor.u32 %v6818_v6, %v5581_v3  ;;  %v6842_v50 = vld [vmem:[%s8197_s5 + $0x694] sm:$0xf0]  ;;  %v5789_v2 = vld [vmem:[%s8197_s5 + $0x768] sm:$0xf] }
 0x2ea   : > { %4341 = vmatpush.bf16.msrb.mxu3 %v5262_v12  ;;  %v4060_v12 = vadd.f32 %v8765_v32, %v4047_v1  ;;  %v5693_v32 = vld [vmem:[%s8197_s5 + $0x6a8] sm:$0xf]  ;;  %v6774_v61 = vld [vmem:[%s8197_s5 + $0x474] sm:$0xf0] }
 0x2eb   : > { %4303 = vmatpush.bf16.msrb.mxu0 %v4862_v20  ;;  %v5533_v1 = vld [vmem:[%s8197_s5 + $0x568] sm:$0xf]  ;;  %v6838_v23 = vld [vmem:[%s8197_s5 + $0x674] sm:$0xf0]  ;;  %v5406_v6 = vor.u32 %v6774_v61, %v5405_v60 }
 0x2ec   : > { %4316 = vmatpush.bf16.msrb.mxu1 %v4990_v28  ;;  %4329 = vmatpush.bf16.msrb.mxu2 %v5118_v35  ;;  %v4073_v20 = vadd.f32 %v8779_v59, %v4060_v12  ;;  %v6846_v28 = vld [vmem:[%s8197_s5 + $0x6b4] sm:$0xf0]  ;;  %v5821_v35 = vld [vmem:[%s8197_s5 + $0x7a8] sm:$0xf]  ;;  %v5438_v59 = vor.u32 %v6782_v33, %v5437_v15 }
 0x2ed   : > { %v5694_v41 = vor.u32 %v6846_v28, %v5693_v32  ;;  %v5822_v40 = vor.u32 %v6878_v36, %v5821_v35  ;;  %v6870_v3 = vld [vmem:[%s8197_s5 + $0x774] sm:$0xf0]  ;;  %v5389_v8 = vld [vmem:[%s8197_s5 + $0x448] sm:$0xf] }
 0x2ee   : > { %4342 = vmatpush.bf16.msrb.mxu3 %v5246_v29  ;;  %v5421_v29 = vld [vmem:[%s8197_s5 + $0x488] sm:$0xf]  ;;  %v4086_v47 = vadd.f32 %v8784_v62, %v4073_v20  ;;  %v6770_v11 = vld [vmem:[%s8197_s5 + $0x454] sm:$0xf0] }
 0x2ef   : > { %4304 = vmatpush.bf16.msrb.mxu0 %v4846_v53  ;;  %v4098_v51 = vpop.f32.mrf.mxu0  ;;  %v6874_v53 = vld [vmem:[%s8197_s5 + $0x794] sm:$0xf0]  ;;  %v5422_v55 = vor.u32 %v6778_v44, %v5421_v29  ;;  %v5517_v12 = vld [vmem:[%s8197_s5 + $0x548] sm:$0xf]  ;;  %v5390_v32 = vor.u32 %v6770_v11, %v5389_v8 }
 0x2f0   : > { %4317 = vmatpush.bf16.msrb.mxu1 %v4974_v57  ;;  %4330 = vmatpush.bf16.msrb.mxu2 %v5102_v58  ;;  %v4099_v54 = vadd.f32 %v4098_v51, %v4086_v47  ;;  %v4111_v62 = vpop.f32.mrf.mxu1  ;;  %v5550_v57 = vor.u32 %v6810_v48, %v5549_v46  ;;  %v5678_v58 = vor.u32 %v6842_v50, %v5677_v49  ;;  %v6834_v15 = vld [vmem:[%s8197_s5 + $0x654] sm:$0xf0]  ;;  %v5773_v16 = vld [vmem:[%s8197_s5 + $0x748] sm:$0xf] }
 0x2f1   : > { %v6866_v20 = vld [vmem:[%s8197_s5 + $0x754] sm:$0xf0]  ;;  %v5501_v29 = vld [vmem:[%s8197_s5 + $0x528] sm:$0xf] }
 0x2f2   : > { %4343 = vmatpush.bf16.msrb.mxu3 %v5230_v38  ;;  %4305 = vmatmul.bf16.vlgmr.msrb.gmra.mxu0 %v8303_v21  ;;  %v5806_v38 = vor.u32 %v6874_v53, %v5805_v52  ;;  %v5774_v44 = vor.u32 %v6866_v20, %v5773_v16  ;;  %v6798_v46 = vld [vmem:[%s8197_s5 + $0x534] sm:$0xf0]  ;;  %v5629_v47 = vld [vmem:[%s8197_s5 + $0x628] sm:$0xf] }
 0x2f3   : > { %4349 = vmatpush.bf16.msra.mxu0 %v5470_v63  ;;  %4331 = vmatmul.bf16.vlgmr.msrb.gmra.mxu2 %v8289_v5  ;;  %v4112_v63 = vadd.f32 %v4111_v62, %v4099_v54  ;;  %v5757_v48 = vld [vmem:[%s8197_s5 + $0x728] sm:$0xf]  ;;  %v6862_v49 = vld [vmem:[%s8197_s5 + $0x734] sm:$0xf0]  ;;  %v5502_v53 = vor.u32 %v6798_v46, %v5501_v29 }
 0x2f4   : > { %4362 = vmatpush.bf16.msra.mxu1 %v5598_v0  ;;  %4375 = vmatpush.bf16.msra.mxu2 %v5726_v18  ;;  %v6806_v0 = vld [vmem:[%s8197_s5 + $0x574] sm:$0xf0]  ;;  %v5661_v18 = vld [vmem:[%s8197_s5 + $0x668] sm:$0xf] }
 0x2f5   : > { %4344 = vmatmul.bf16.vlgmr.msrb.gmra.mxu3 %v8292_v7  ;;  %4318 = vmatmul.bf16.vlgmr.msrb.gmra.mxu1 %v8306_v22  ;;  %v5534_v10 = vor.u32 %v6806_v0, %v5533_v1  ;;  %v5662_v17 = vor.u32 %v6838_v23, %v5661_v18  ;;  %v5357_v51 = vld [vmem:[%s8197_s5 + $0x408] sm:$0xf]  ;;  %v6762_v52 = vld [vmem:[%s8197_s5 + $0x414] sm:$0xf0] }
 0x2f6   : > { %4388 = vmatpush.bf16.msra.mxu3 %v5854_v4  ;;  %v4661_v4 = vadd.f32 %v4112_v63, %v1185_v56  ;;  %v6794_v56 = vld [vmem:[%s8197_s5 + $0x514] sm:$0xf0]  ;;  %v5613_v62 = vld [vmem:[%s8197_s5 + $0x608] sm:$0xf]  ;;  %v5358_v23 = vor.u32 %v6762_v52, %v5357_v51 }
 0x2f7   : > { %4350 = vmatpush.bf16.msra.mxu0 %v5454_v13  ;;  %v6802_v13 = vld [vmem:[%s8197_s5 + $0x554] sm:$0xf0]  ;;  %v4100_v27 = vpop.f32.mrf.mxu0  ;;  %v5741_v60 = vld [vmem:[%s8197_s5 + $0x708] sm:$0xf] }
 0x2f8   : > { %4363 = vmatpush.bf16.msra.mxu1 %v5582_v9  ;;  %4376 = vmatpush.bf16.msra.mxu2 %v5710_v14  ;;  %4665 = vst [vmem:[#allocation2 + $0x10] sm:$0xff] %v4661_v4  ;;  %v5790_v9 = vor.u32 %v6870_v3, %v5789_v2  ;;  %v5645_v14 = vld [vmem:[%s8197_s5 + $0x648] sm:$0xf]  ;;  %v4124_v33 = vpop.f32.mrf.mxu2  ;;  %v4113_v35 = vpop.f32.mrf.mxu1  ;;  %v5518_v36 = vor.u32 %v6802_v13, %v5517_v12  ;;  %v6858_v61 = vld [vmem:[%s8197_s5 + $0x714] sm:$0xf0] }
 0x2f9   : > { %v6918_v63 = vld [vmem:[%s8197_s5 + $0x8f4] sm:$0xf0]  ;;  %v6109_v0 = vld [vmem:[%s8197_s5 + $0x9e8] sm:$0xf]  ;;  %v5742_v11 = vor.u32 %v6858_v61, %v5741_v60 }
 0x2fa   : > { %4389 = vmatpush.bf16.msra.mxu3 %v5838_v24  ;;  %v4137_v24 = vpop.f32.mrf.mxu3  ;;  %v6950_v2 = vld [vmem:[%s8197_s5 + $0x9f4] sm:$0xf0]  ;;  %v6237_v3 = vld [vmem:[%s8197_s5 + $0xae8] sm:$0xf] }
 0x2fb   : > { %4351 = vmatpush.bf16.msra.mxu0 %v5438_v59  ;;  %v8863_v28 = vadd.f32 %v4137_v24, %v4124_v33  ;;  %v5646_v59 = vor.u32 %v6834_v15, %v5645_v14  ;;  %v6982_v4 = vld [vmem:[%s8197_s5 + $0xaf4] sm:$0xf0]  ;;  %v6110_v13 = vor.u32 %v6950_v2, %v6109_v0  ;;  %v5965_v14 = vld [vmem:[%s8197_s5 + $0x8c8] sm:$0xf] }
 0x2fc   : > { %4364 = vmatpush.bf16.msra.mxu1 %v5566_v37  ;;  %4377 = vmatpush.bf16.msra.mxu2 %v5694_v41  ;;  %v5373_v37 = vld [vmem:[%s8197_s5 + $0x428] sm:$0xf]  ;;  %v6766_v41 = vld [vmem:[%s8197_s5 + $0x434] sm:$0xf0] }
 0x2fd   : > { %v5374_v50 = vor.u32 %v6766_v41, %v5373_v37  ;;  %v6914_v15 = vld [vmem:[%s8197_s5 + $0x8d4] sm:$0xf0]  ;;  %v6093_v33 = vld [vmem:[%s8197_s5 + $0x9c8] sm:$0xf] }
 0x2fe   : > { %4390 = vmatpush.bf16.msra.mxu3 %v5822_v40  ;;  %v6830_v40 = vld [vmem:[%s8197_s5 + $0x634] sm:$0xf0]  ;;  %v6221_v24 = vld [vmem:[%s8197_s5 + $0xac8] sm:$0xf] }
 0x2ff   : > { %4352 = vmatpush.bf16.msra.mxu0 %v5422_v55  ;;  %v5630_v54 = vor.u32 %v6830_v40, %v5629_v47  ;;  %v5485_v55 = vld [vmem:[%s8197_s5 + $0x508] sm:$0xf]  ;;  %v6946_v20 = vld [vmem:[%s8197_s5 + $0x9d4] sm:$0xf0] }
 0x300   : > { %4365 = vmatpush.bf16.msra.mxu1 %v5550_v57  ;;  %4378 = vmatpush.bf16.msra.mxu2 %v5678_v58  ;;  %v5758_v57 = vor.u32 %v6862_v49, %v5757_v48  ;;  %v6826_v58 = vld [vmem:[%s8197_s5 + $0x614] sm:$0xf0]  ;;  %v4126_v1 = vpop.f32.mrf.mxu2  ;;  %v5949_v41 = vld [vmem:[%s8197_s5 + $0x8a8] sm:$0xf] }
 0x301   : > { %v5614_v8 = vor.u32 %v6826_v58, %v5613_v62  ;;  %v6978_v27 = vld [vmem:[%s8197_s5 + $0xad4] sm:$0xf0]  ;;  %v6205_v40 = vld [vmem:[%s8197_s5 + $0xaa8] sm:$0xf] }
 0x302   : > { %4391 = vmatpush.bf16.msra.mxu3 %v5806_v38  ;;  %v5981_v38 = vld [vmem:[%s8197_s5 + $0x8e8] sm:$0xf]  ;;  %v4139_v18 = vpop.f32.mrf.mxu3  ;;  %v7010_v35 = vld [vmem:[%s8197_s5 + $0xbd4] sm:$0xf0]  ;;  %v6222_v37 = vor.u32 %v6978_v27, %v6221_v24 }
 0x303   : > { %4353 = vmatpush.bf16.msra.mxu0 %v5406_v6  ;;  %v5486_v6 = vor.u32 %v6794_v56, %v5485_v55  ;;  %v5982_v12 = vor.u32 %v6918_v63, %v5981_v38  ;;  %v6910_v29 = vld [vmem:[%s8197_s5 + $0x8b4] sm:$0xf0]  ;;  %v6333_v49 = vld [vmem:[%s8197_s5 + $0xba8] sm:$0xf] }
 0x304   : > { %4366 = vmatpush.bf16.msra.mxu1 %v5534_v10  ;;  %4379 = vmatpush.bf16.msra.mxu2 %v5662_v17  ;;  %v6365_v10 = vld [vmem:[%s8197_s5 + $0xbe8] sm:$0xf]  ;;  %v7014_v17 = vld [vmem:[%s8197_s5 + $0xbf4] sm:$0xf0]  ;;  %v5950_v51 = vor.u32 %v6910_v29, %v5949_v41 }
 0x305   : > { %v6366_v16 = vor.u32 %v7014_v17, %v6365_v10  ;;  %v6942_v47 = vld [vmem:[%s8197_s5 + $0x9b4] sm:$0xf0]  ;;  %v6061_v56 = vld [vmem:[%s8197_s5 + $0x988] sm:$0xf] }
 0x306   : > { %4392 = vmatpush.bf16.msra.mxu3 %v5790_v9  ;;  %v6238_v9 = vor.u32 %v6982_v4, %v6237_v3  ;;  %v6974_v48 = vld [vmem:[%s8197_s5 + $0xab4] sm:$0xf0]  ;;  %v6189_v58 = vld [vmem:[%s8197_s5 + $0xa88] sm:$0xf] }
 0x307   : > { %4354 = vmatpush.bf16.msra.mxu0 %v5390_v32  ;;  %v6349_v32 = vld [vmem:[%s8197_s5 + $0xbc8] sm:$0xf]  ;;  %v6906_v55 = vld [vmem:[%s8197_s5 + $0x894] sm:$0xf0] }
 0x308   : > { %4367 = vmatpush.bf16.msra.mxu1 %v5518_v36  ;;  %4380 = vmatpush.bf16.msra.mxu2 %v5646_v59  ;;  %v5966_v36 = vor.u32 %v6914_v15, %v5965_v14  ;;  %v6094_v59 = vor.u32 %v6946_v20, %v6093_v33  ;;  %v6350_v46 = vor.u32 %v7010_v35, %v6349_v32  ;;  %v6970_v60 = vld [vmem:[%s8197_s5 + $0xa94] sm:$0xf0]  ;;  %v6317_v61 = vld [vmem:[%s8197_s5 + $0xb88] sm:$0xf] }
 0x309   : > { %v7002_v1 = vld [vmem:[%s8197_s5 + $0xb94] sm:$0xf0]  ;;  %v6190_v18 = vor.u32 %v6970_v60, %v6189_v58  ;;  %v6045_v3 = vld [vmem:[%s8197_s5 + $0x968] sm:$0xf] }
 0x30a   : > { %4393 = vmatpush.bf16.msra.mxu3 %v5774_v44  ;;  %v6077_v44 = vld [vmem:[%s8197_s5 + $0x9a8] sm:$0xf]  ;;  %v6902_v2 = vld [vmem:[%s8197_s5 + $0x874] sm:$0xf0] }
 0x30b   : > { %4355 = vmatpush.bf16.msra.mxu0 %v5374_v50  ;;  %v7006_v50 = vld [vmem:[%s8197_s5 + $0xbb4] sm:$0xf0]  ;;  %v6078_v52 = vor.u32 %v6942_v47, %v6077_v44  ;;  %v6173_v10 = vld [vmem:[%s8197_s5 + $0xa68] sm:$0xf] }
 0x30c   : > { %4368 = vmatpush.bf16.msra.mxu1 %v5502_v53  ;;  %4381 = vmatpush.bf16.msra.mxu2 %v5630_v54  ;;  %v6206_v53 = vor.u32 %v6974_v48, %v6205_v40  ;;  %v5933_v54 = vld [vmem:[%s8197_s5 + $0x888] sm:$0xf]  ;;  %v6334_v62 = vor.u32 %v7006_v50, %v6333_v49  ;;  %v6966_v17 = vld [vmem:[%s8197_s5 + $0xa74] sm:$0xf0] }
 0x30d   : > { %v5934_v38 = vor.u32 %v6906_v55, %v5933_v54  ;;  %v6174_v14 = vor.u32 %v6966_v17, %v6173_v10  ;;  %v5901_v15 = vld [vmem:[%s8197_s5 + $0x848] sm:$0xf]  ;;  %v6898_v33 = vld [vmem:[%s8197_s5 + $0x854] sm:$0xf0] }
 0x30e   : > { %4394 = vmatpush.bf16.msra.mxu3 %v5758_v57  ;;  %v6938_v57 = vld [vmem:[%s8197_s5 + $0x994] sm:$0xf0]  ;;  %v6157_v32 = vld [vmem:[%s8197_s5 + $0xa48] sm:$0xf]  ;;  %v5902_v41 = vor.u32 %v6898_v33, %v5901_v15  ;;  %v6692_v33 = vld [vmem:[%s8197_s5 + $0x1ec] sm:$0xf] }
 0x30f   : > { %4356 = vmatpush.bf16.msra.mxu0 %v5358_v23  ;;  %v8917_v63 = vpop.f32.mrf.mxu0  ;;  %v6062_v0 = vor.u32 %v6938_v57, %v6061_v56  ;;  %v5917_v23 = vld [vmem:[%s8197_s5 + $0x868] sm:$0xf]  ;;  %v6930_v27 = vld [vmem:[%s8197_s5 + $0x954] sm:$0xf0] }
 0x310   : > { %4369 = vmatpush.bf16.msra.mxu1 %v5486_v6  ;;  %4382 = vmatpush.bf16.msra.mxu2 %v5614_v8  ;;  %v6318_v6 = vor.u32 %v7002_v1, %v6317_v61  ;;  %v6934_v8 = vld [vmem:[%s8197_s5 + $0x974] sm:$0xf0]  ;;  %v5885_v47 = vld [vmem:[%s8197_s5 + $0x828] sm:$0xf] }
 0x311   : > { %v6962_v35 = vld [vmem:[%s8197_s5 + $0xa54] sm:$0xf0]  ;;  %v6013_v48 = vld [vmem:[%s8197_s5 + $0x928] sm:$0xf] }
 0x312   : > { %4395 = vmatpush.bf16.msra.mxu3 %v5742_v11  ;;  %4357 = vmatmul.bf16.vlgmr.msra.gmra.mxu0 %v8362_v42  ;;  %v8922_v4 = vpop.f32.mrf.mxu1  ;;  %v6301_v11 = vld [vmem:[%s8197_s5 + $0xb68] sm:$0xf]  ;;  %v6894_v40 = vld [vmem:[%s8197_s5 + $0x834] sm:$0xf0] }
 0x313   : > { %4401 = vmatpush.bf16.msrb.mxu0 %v5982_v12  ;;  %4383 = vmatmul.bf16.vlgmr.msra.gmra.mxu2 %v8358_v39  ;;  %v6998_v12 = vld [vmem:[%s8197_s5 + $0xb74] sm:$0xf0]  ;;  %v6269_v54 = vld [vmem:[%s8197_s5 + $0xb28] sm:$0xf]  ;;  %v5886_v56 = vor.u32 %v6894_v40, %v5885_v47  ;;  %v4943_v47 = vld [vmem:[%s8197_s5 + $0xd8] sm:$0xf0] }
 0x314   : > { %4414 = vmatpush.bf16.msrb.mxu1 %v6110_v13  ;;  %4427 = vmatpush.bf16.msrb.mxu2 %v6238_v9  ;;  %v5918_v13 = vor.u32 %v6902_v2, %v5917_v23  ;;  %v6046_v9 = vor.u32 %v6934_v8, %v6045_v3  ;;  %v6302_v24 = vor.u32 %v6998_v12, %v6301_v11  ;;  %v6990_v55 = vld [vmem:[%s8197_s5 + $0xb34] sm:$0xf0]  ;;  %v5997_v61 = vld [vmem:[%s8197_s5 + $0x908] sm:$0xf]  ;;  %v6688_v40 = vld [vmem:[%s8197_s5 + $0x1cc] sm:$0xf] }
 0x315   : > { %4396 = vmatmul.bf16.vlgmr.msra.gmra.mxu3 %v8364_v43  ;;  %4370 = vmatmul.bf16.vlgmr.msra.gmra.mxu1 %v8366_v45  ;;  %v6890_v57 = vld [vmem:[%s8197_s5 + $0x814] sm:$0xf0]  ;;  %v6253_v2 = vld [vmem:[%s8197_s5 + $0xb08] sm:$0xf] }
 0x316   : > { %4440 = vmatpush.bf16.msrb.mxu3 %v6366_v16  ;;  %v6029_v16 = vld [vmem:[%s8197_s5 + $0x948] sm:$0xf]  ;;  %v8932_v20 = vpop.f32.mrf.mxu2  ;;  %v6922_v1 = vld [vmem:[%s8197_s5 + $0x914] sm:$0xf0] }
 0x317   : > { %4402 = vmatpush.bf16.msrb.mxu0 %v5966_v36  ;;  %v4152_v29 = vpop.f32.mrf.mxu0  ;;  %v6030_v44 = vor.u32 %v6930_v27, %v6029_v16  ;;  %v6954_v23 = vld [vmem:[%s8197_s5 + $0xa14] sm:$0xf0]  ;;  %v6493_v8 = vld [vmem:[%s8197_s5 + $0xce8] sm:$0xf]  ;;  %v5087_v16 = vld [vmem:[%s8197_s5 + $0x1f8] sm:$0xf0] }
 0x318   : > { %4415 = vmatpush.bf16.msrb.mxu1 %v6094_v59  ;;  %4428 = vmatpush.bf16.msrb.mxu2 %v6222_v37  ;;  %v8937_v36 = vpop.f32.mrf.mxu3  ;;  %v6285_v59 = vld [vmem:[%s8197_s5 + $0xb48] sm:$0xf]  ;;  %v6994_v37 = vld [vmem:[%s8197_s5 + $0xb54] sm:$0xf0]  ;;  %v5090_v29 = vor.u32 %v6692_v33, %v5087_v16 }
 0x319   : > { %v6286_v50 = vor.u32 %v6994_v37, %v6285_v59  ;;  %v6986_v3 = vld [vmem:[%s8197_s5 + $0xb14] sm:$0xf0]  ;;  %v6621_v17 = vld [vmem:[%s8197_s5 + $0xde8] sm:$0xf] }
 0x31a   : > { %4441 = vmatpush.bf16.msrb.mxu3 %v6350_v46  ;;  %v6158_v46 = vor.u32 %v6962_v35, %v6157_v32  ;;  %v4165_v49 = vpop.f32.mrf.mxu1  ;;  %v7046_v10 = vld [vmem:[%s8197_s5 + $0xcf4] sm:$0xf0]  ;;  %v6477_v59 = vld [vmem:[%s8197_s5 + $0xcc8] sm:$0xf] }
 0x31b   : > { %4403 = vmatpush.bf16.msrb.mxu0 %v5950_v51  ;;  %v6926_v51 = vld [vmem:[%s8197_s5 + $0x934] sm:$0xf0]  ;;  %v6494_v27 = vor.u32 %v7046_v10, %v6493_v8  ;;  %v4911_v8 = vld [vmem:[%s8197_s5 + $0x98] sm:$0xf0]  ;;  %v6557_v16 = vld [vmem:[%s8197_s5 + $0xd68] sm:$0xf] }
 0x31c   : > { %4416 = vmatpush.bf16.msrb.mxu1 %v6078_v52  ;;  %4429 = vmatpush.bf16.msrb.mxu2 %v6206_v53  ;;  %v6141_v52 = vld [vmem:[%s8197_s5 + $0xa28] sm:$0xf]  ;;  %v6958_v53 = vld [vmem:[%s8197_s5 + $0xa34] sm:$0xf0]  ;;  %v6014_v58 = vor.u32 %v6926_v51, %v6013_v48  ;;  %v5071_v48 = vld [vmem:[%s8197_s5 + $0x1d8] sm:$0xf0] }
 0x31d   : > { %v6142_v60 = vor.u32 %v6958_v53, %v6141_v52  ;;  %v7078_v12 = vld [vmem:[%s8197_s5 + $0xdf4] sm:$0xf0]  ;;  %v6461_v52 = vld [vmem:[%s8197_s5 + $0xca8] sm:$0xf] }
 0x31e   : > { %4442 = vmatpush.bf16.msrb.mxu3 %v6334_v62  ;;  %v5869_v62 = vld [vmem:[%s8197_s5 + $0x808] sm:$0xf]  ;;  %v6622_v32 = vor.u32 %v7078_v12, %v6621_v17  ;;  %v7042_v37 = vld [vmem:[%s8197_s5 + $0xcd4] sm:$0xf0]  ;;  %v6680_v17 = vld [vmem:[%s8197_s5 + $0x18c] sm:$0xf] }
 0x31f   : > { %4404 = vmatpush.bf16.msrb.mxu0 %v5934_v38  ;;  %v6125_v38 = vld [vmem:[%s8197_s5 + $0xa08] sm:$0xf]  ;;  %v5870_v11 = vor.u32 %v6890_v57, %v5869_v62  ;;  %v6478_v49 = vor.u32 %v7042_v37, %v6477_v59  ;;  %v7038_v53 = vld [vmem:[%s8197_s5 + $0xcb4] sm:$0xf0]  ;;  %v6652_v62 = vld [vmem:[%s8197_s5 + $0xac] sm:$0xf] }
 0x320   : > { %4417 = vmatpush.bf16.msrb.mxu1 %v6062_v0  ;;  %4430 = vmatpush.bf16.msrb.mxu2 %v6190_v18  ;;  %v4178_v0 = vpop.f32.mrf.mxu2  ;;  %v6270_v18 = vor.u32 %v6990_v55, %v6269_v54  ;;  %v6126_v15 = vor.u32 %v6954_v23, %v6125_v38  ;;  %v6589_v54 = vld [vmem:[%s8197_s5 + $0xda8] sm:$0xf]  ;;  %v5074_v55 = vor.u32 %v6688_v40, %v5071_v48  ;;  %v4927_v57 = vld [vmem:[%s8197_s5 + $0xb8] sm:$0xf0]  ;;  %v7030_v33 = vld [vmem:[%s8197_s5 + $0xc74] sm:$0xf0] }
 0x321   : > { %v4930_v38 = vor.u32 %v6652_v62, %v4927_v57  ;;  %v6445_v0 = vld [vmem:[%s8197_s5 + $0xc88] sm:$0xf]  ;;  %v6676_v59 = vld [vmem:[%s8197_s5 + $0x16c] sm:$0xf]  ;;  %v5023_v37 = vld [vmem:[%s8197_s5 + $0x178] sm:$0xf0] }
 0x322   : > { %4443 = vmatpush.bf16.msrb.mxu3 %v6318_v6  ;;  %v4191_v6 = vpop.f32.mrf.mxu3  ;;  %v6573_v23 = vld [vmem:[%s8197_s5 + $0xd88] sm:$0xf]  ;;  %v7026_v40 = vld [vmem:[%s8197_s5 + $0xc54] sm:$0xf0] }
 0x323   : > { %4405 = vmatpush.bf16.msrb.mxu0 %v5918_v13  ;;  %v6660_v13 = vld [vmem:[%s8197_s5 + $0xec] sm:$0xf]  ;;  %v6541_v48 = vld [vmem:[%s8197_s5 + $0xd48] sm:$0xf] }
 0x324   : > { %4418 = vmatpush.bf16.msrb.mxu1 %v6046_v9  ;;  %4431 = vmatpush.bf16.msrb.mxu2 %v6174_v14  ;;  %v4959_v9 = vld [vmem:[%s8197_s5 + $0xf8] sm:$0xf0]  ;;  %v5998_v14 = vor.u32 %v6922_v1, %v5997_v61  ;;  %v6462_v61 = vor.u32 %v7038_v53, %v6461_v52  ;;  %v6648_v6 = vld [vmem:[%s8197_s5 + $0x8c] sm:$0xf] }
 0x325   : > { %v4962_v35 = vor.u32 %v6660_v13, %v4959_v9  ;;  %v6640_v52 = vld [vmem:[%s8197_s5 + $0x4c] sm:$0xf]  ;;  %v4879_v53 = vld [vmem:[%s8197_s5 + $0x58] sm:$0xf0] }
 0x326   : > { %4444 = vmatpush.bf16.msrb.mxu3 %v6302_v24  ;;  %v6254_v24 = vor.u32 %v6986_v3, %v6253_v2  ;;  %v7066_v3 = vld [vmem:[%s8197_s5 + $0xd94] sm:$0xf0] }
 0x327   : > { %4406 = vmatpush.bf16.msrb.mxu0 %v5902_v41  ;;  %v6605_v41 = vld [vmem:[%s8197_s5 + $0xdc8] sm:$0xf]  ;;  %v6574_v9 = vor.u32 %v7066_v3, %v6573_v23  ;;  %v6636_v23 = vld [vmem:[%s8197_s5 + $0x2c] sm:$0xf] }
 0x328   : > { %4419 = vmatpush.bf16.msrb.mxu1 %v6030_v44  ;;  %4432 = vmatpush.bf16.msrb.mxu2 %v6158_v46  ;;  %v7074_v44 = vld [vmem:[%s8197_s5 + $0xdd4] sm:$0xf0]  ;;  %v6656_v46 = vld [vmem:[%s8197_s5 + $0xcc] sm:$0xf] }
 0x329   : > { %v4946_v51 = vor.u32 %v6656_v46, %v4943_v47  ;;  %v6413_v47 = vld [vmem:[%s8197_s5 + $0xc48] sm:$0xf]  ;;  %v6668_v3 = vld [vmem:[%s8197_s5 + $0x12c] sm:$0xf] }
 0x32a   : > { %4445 = vmatpush.bf16.msrb.mxu3 %v6286_v50  ;;  %v6606_v50 = vor.u32 %v7074_v44, %v6605_v41 }
 0x32b   : > { %4407 = vmatpush.bf16.msrb.mxu0 %v5886_v56  ;;  %v7070_v56 = vld [vmem:[%s8197_s5 + $0xdb4] sm:$0xf0] }
 0x32c   : > { %4420 = vmatpush.bf16.msrb.mxu1 %v6014_v58  ;;  %4433 = vmatpush.bf16.msrb.mxu2 %v6142_v60  ;;  %v6684_v58 = vld [vmem:[%s8197_s5 + $0x1ac] sm:$0xf]  ;;  %v5055_v60 = vld [vmem:[%s8197_s5 + $0x1b8] sm:$0xf0]  ;;  %v6590_v1 = vor.u32 %v7070_v56, %v6589_v54  ;;  %v6414_v56 = vor.u32 %v7026_v40, %v6413_v47 }
 0x32d   : > { %v5058_v2 = vor.u32 %v6684_v58, %v5055_v60  ;;  %v4882_v60 = vor.u32 %v6640_v52, %v4879_v53  ;;  %v5471_v47 = vld [vmem:[%s8197_s5 + $0x4f8] sm:$0xf0] }
 0x32e   : > { %4446 = vmatpush.bf16.msrb.mxu3 %v6270_v18  ;;  %v7034_v18 = vld [vmem:[%s8197_s5 + $0xc94] sm:$0xf0]  ;;  %v5599_v52 = vld [vmem:[%s8197_s5 + $0x5f8] sm:$0xf0] }
 0x32f   : > { %4408 = vmatpush.bf16.msrb.mxu0 %v5870_v11  ;;  %v8991_v10 = vpop.f32.mrf.mxu0  ;;  %v5039_v11 = vld [vmem:[%s8197_s5 + $0x198] sm:$0xf0]  ;;  %v6446_v12 = vor.u32 %v7034_v18, %v6445_v0  ;;  %v7054_v18 = vld [vmem:[%s8197_s5 + $0xd34] sm:$0xf0] }
 0x330   : > { %4421 = vmatpush.bf16.msrb.mxu1 %v5998_v14  ;;  %4434 = vmatpush.bf16.msrb.mxu2 %v6126_v15  ;;  %v4914_v14 = vor.u32 %v6648_v6, %v4911_v8  ;;  %v6429_v15 = vld [vmem:[%s8197_s5 + $0xc68] sm:$0xf] }
 0x331   : > { %v6430_v41 = vor.u32 %v7030_v33, %v6429_v15  ;;  %v6381_v8 = vld [vmem:[%s8197_s5 + $0xc08] sm:$0xf]  ;;  %v7050_v15 = vld [vmem:[%s8197_s5 + $0xd14] sm:$0xf0]  ;;  %v6632_v33 = vld [vmem:[%s8197_s5 + $0xc] sm:$0xf] }
 0x332   : > { %4447 = vmatpush.bf16.msrb.mxu3 %v6254_v24  ;;  %4409 = vmatmul.bf16.vlgmr.msrb.gmra.mxu0 %v8433_v26  ;;  %v8995_v13 = vpop.f32.mrf.mxu1  ;;  %v5042_v24 = vor.u32 %v6680_v17, %v5039_v11  ;;  %v7018_v17 = vld [vmem:[%s8197_s5 + $0xc14] sm:$0xf0] }
 0x333   : > { %4453 = vmatpush.bf16.msra.mxu0 %v6494_v27  ;;  %4435 = vmatmul.bf16.vlgmr.msrb.gmra.mxu2 %v8438_v30  ;;  %v7062_v27 = vld [vmem:[%s8197_s5 + $0xd74] sm:$0xf0] }
 0x334   : > { %4466 = vmatpush.bf16.msra.mxu1 %v6622_v32  ;;  %4479 = vmatpush.bf16.msra.mxu2 %v4962_v35  ;;  %v6644_v32 = vld [vmem:[%s8197_s5 + $0x6c] sm:$0xf]  ;;  %v4895_v35 = vld [vmem:[%s8197_s5 + $0x78] sm:$0xf0]  ;;  %v6558_v44 = vor.u32 %v7062_v27, %v6557_v16 }
 0x335   : > { %4422 = vmatmul.bf16.vlgmr.msrb.gmra.mxu1 %v8440_v31  ;;  %4448 = vmatmul.bf16.vlgmr.msrb.gmra.mxu3 %v8444_v34  ;;  %v4898_v46 = vor.u32 %v6644_v32, %v4895_v35  ;;  %v6664_v27 = vld [vmem:[%s8197_s5 + $0x10c] sm:$0xf]  ;;  %v4975_v32 = vld [vmem:[%s8197_s5 + $0x118] sm:$0xf0] }
 0x336   : > { %4492 = vmatpush.bf16.msra.mxu3 %v5090_v29  ;;  %v4151_v29 = vadd.f32 %v8917_v63, %v8863_v28  ;;  %v6672_v28 = vld [vmem:[%s8197_s5 + $0x14c] sm:$0xf]  ;;  %v5007_v63 = vld [vmem:[%s8197_s5 + $0x158] sm:$0xf0]  ;;  %v4978_v53 = vor.u32 %v6664_v27, %v4975_v32 }
 0x337   : > { %4454 = vmatpush.bf16.msra.mxu0 %v6478_v49  ;;  %v5026_v49 = vor.u32 %v6676_v59, %v5023_v37  ;;  %v5010_v0 = vor.u32 %v6672_v28, %v5007_v63  ;;  %v5215_v59 = vld [vmem:[%s8197_s5 + $0x2f8] sm:$0xf0]  ;;  %v6756_v37 = vld [vmem:[%s8197_s5 + $0x3ec] sm:$0xf] }
 0x338   : > { %4467 = vmatpush.bf16.msra.mxu1 %v6606_v50  ;;  %4480 = vmatpush.bf16.msra.mxu2 %v4946_v51  ;;  %v9010_v50 = vpop.f32.mrf.mxu2  ;;  %v7058_v51 = vld [vmem:[%s8197_s5 + $0xd54] sm:$0xf0]  ;;  %v9015_v54 = vpop.f32.mrf.mxu3  ;;  %v4164_v57 = vadd.f32 %v8922_v4, %v4151_v29  ;;  %v4991_v4 = vld [vmem:[%s8197_s5 + $0x138] sm:$0xf0]  ;;  %v6382_v29 = vor.u32 %v7018_v17, %v6381_v8  ;;  %v6744_v27 = vld [vmem:[%s8197_s5 + $0x38c] sm:$0xf] }
 0x339   : > { %v6542_v58 = vor.u32 %v7058_v51, %v6541_v48  ;;  %v4994_v16 = vor.u32 %v6668_v3, %v4991_v4  ;;  %v6820_v51 = vld [vmem:[%s8197_s5 + $0x5ec] sm:$0xf]  ;;  %v5183_v4 = vld [vmem:[%s8197_s5 + $0x2b8] sm:$0xf0] }
 0x33a   : > { %4493 = vmatpush.bf16.msra.mxu3 %v5074_v55  ;;  %v4204_v55 = vpop.f32.mrf.mxu0  ;;  %v4217_v62 = vpop.f32.mrf.mxu1  ;;  %v4177_v11 = vadd.f32 %v8932_v20, %v4164_v57  ;;  %v6724_v20 = vld [vmem:[%s8197_s5 + $0x2ec] sm:$0xf]  ;;  %v5311_v17 = vld [vmem:[%s8197_s5 + $0x3b8] sm:$0xf0] }
 0x33b   : > { %4455 = vmatpush.bf16.msra.mxu0 %v6462_v61  ;;  %v6397_v61 = vld [vmem:[%s8197_s5 + $0xc28] sm:$0xf]  ;;  %v5218_v28 = vor.u32 %v6724_v20, %v5215_v59  ;;  %v6720_v62 = vld [vmem:[%s8197_s5 + $0x2cc] sm:$0xf] }
 0x33c   : > { %4468 = vmatpush.bf16.msra.mxu1 %v6590_v1  ;;  %4481 = vmatpush.bf16.msra.mxu2 %v4930_v38  ;;  %v7022_v1 = vld [vmem:[%s8197_s5 + $0xc34] sm:$0xf0]  ;;  %v6525_v38 = vld [vmem:[%s8197_s5 + $0xd28] sm:$0xf]  ;;  %v4190_v40 = vadd.f32 %v8937_v36, %v4177_v11  ;;  %v5199_v36 = vld [vmem:[%s8197_s5 + $0x2d8] sm:$0xf0] }
 0x33d   : > { %v6398_v6 = vor.u32 %v7022_v1, %v6397_v61  ;;  %v6752_v57 = vld [vmem:[%s8197_s5 + $0x3cc] sm:$0xf]  ;;  %v5455_v1 = vld [vmem:[%s8197_s5 + $0x4d8] sm:$0xf0] }
 0x33e   : > { %4494 = vmatpush.bf16.msra.mxu3 %v5058_v2  ;;  %v4863_v2 = vld [vmem:[%s8197_s5 + $0x38] sm:$0xf0]  ;;  %v4203_v63 = vadd.f32 %v8991_v10, %v4190_v40  ;;  %v6784_v61 = vld [vmem:[%s8197_s5 + $0x4cc] sm:$0xf]  ;;  %v5202_v10 = vor.u32 %v6720_v62, %v5199_v36 }
 0x33f   : > { %4456 = vmatpush.bf16.msra.mxu0 %v6446_v12  ;;  %v6526_v12 = vor.u32 %v7054_v18, %v6525_v38  ;;  %v6816_v38 = vld [vmem:[%s8197_s5 + $0x5cc] sm:$0xf] }
 0x340   : > { %4469 = vmatpush.bf16.msra.mxu1 %v6574_v9  ;;  %4482 = vmatpush.bf16.msra.mxu2 %v4914_v14  ;;  %v4866_v9 = vor.u32 %v6636_v23, %v4863_v2  ;;  %v6509_v14 = vld [vmem:[%s8197_s5 + $0xd08] sm:$0xf]  ;;  %v4230_v35 = vpop.f32.mrf.mxu2  ;;  %v4216_v18 = vadd.f32 %v8995_v13, %v4203_v63  ;;  %v5458_v2 = vor.u32 %v6784_v61, %v5455_v1  ;;  %v6716_v3 = vld [vmem:[%s8197_s5 + $0x2ac] sm:$0xf] }
 0x341   : > { %v6510_v48 = vor.u32 %v7050_v15, %v6509_v14  ;;  %v6780_v11 = vld [vmem:[%s8197_s5 + $0x4ac] sm:$0xf]  ;;  %v5567_v14 = vld [vmem:[%s8197_s5 + $0x5b8] sm:$0xf0]  ;;  %v5186_v15 = vor.u32 %v6716_v3, %v5183_v4 }
 0x342   : > { %4495 = vmatpush.bf16.msra.mxu3 %v5042_v24  ;;  %v4847_v24 = vld [vmem:[%s8197_s5 + $0x18] sm:$0xf0]  ;;  %v4229_v13 = vadd.f32 %v9010_v50, %v4216_v18  ;;  %v6712_v50 = vld [vmem:[%s8197_s5 + $0x28c] sm:$0xf] }
 0x343   : > { %4457 = vmatpush.bf16.msra.mxu0 %v6430_v41  ;;  %v4243_v41 = vpop.f32.mrf.mxu3  ;;  %v5295_v35 = vld [vmem:[%s8197_s5 + $0x398] sm:$0xf0]  ;;  %v6776_v20 = vld [vmem:[%s8197_s5 + $0x48c] sm:$0xf] }
 0x344   : > { %4470 = vmatpush.bf16.msra.mxu1 %v6558_v44  ;;  %4483 = vmatpush.bf16.msra.mxu2 %v4898_v46  ;;  %v5343_v44 = vld [vmem:[%s8197_s5 + $0x3f8] sm:$0xf0]  ;;  %v6788_v46 = vld [vmem:[%s8197_s5 + $0x4ec] sm:$0xf]  ;;  %v4242_v59 = vadd.f32 %v9015_v54, %v4229_v13 }
 0x345   : > { %v5346_v55 = vor.u32 %v6756_v37, %v5343_v44  ;;  %v5551_v41 = vld [vmem:[%s8197_s5 + $0x598] sm:$0xf0]  ;;  %v6740_v54 = vld [vmem:[%s8197_s5 + $0x36c] sm:$0xf] }
 0x346   : > { %4496 = vmatpush.bf16.msra.mxu3 %v5026_v49  ;;  %v4850_v49 = vor.u32 %v6632_v33, %v4847_v24  ;;  %v5167_v24 = vld [vmem:[%s8197_s5 + $0x298] sm:$0xf0]  ;;  %v6804_v63 = vld [vmem:[%s8197_s5 + $0x56c] sm:$0xf] }
 0x347   : > { %4458 = vmatpush.bf16.msra.mxu0 %v6414_v56  ;;  %v5474_v56 = vor.u32 %v6788_v46, %v5471_v47  ;;  %v5298_v47 = vor.u32 %v6744_v27, %v5295_v35  ;;  %v6736_v61 = vld [vmem:[%s8197_s5 + $0x34c] sm:$0xf]  ;;  %v5391_v18 = vld [vmem:[%s8197_s5 + $0x458] sm:$0xf0] }
 0x348   : > { %4471 = vmatpush.bf16.msra.mxu1 %v6542_v58  ;;  %4484 = vmatpush.bf16.msra.mxu2 %v4882_v60  ;;  %v5602_v58 = vor.u32 %v6820_v51, %v5599_v52  ;;  %v5327_v60 = vld [vmem:[%s8197_s5 + $0x3d8] sm:$0xf0]  ;;  %v6800_v3 = vld [vmem:[%s8197_s5 + $0x54c] sm:$0xf] }
 0x349   : > { %v5330_v23 = vor.u32 %v6752_v57, %v5327_v60  ;;  %v5279_v52 = vld [vmem:[%s8197_s5 + $0x378] sm:$0xf0]  ;;  %v6796_v35 = vld [vmem:[%s8197_s5 + $0x52c] sm:$0xf] }
 0x34a   : > { %4497 = vmatpush.bf16.msra.mxu3 %v5010_v0  ;;  %v5583_v0 = vld [vmem:[%s8197_s5 + $0x5d8] sm:$0xf0]  ;;  %v5282_v36 = vor.u32 %v6740_v54, %v5279_v52 }
 0x34b   : > { %4459 = vmatpush.bf16.msra.mxu0 %v6398_v6  ;;  %v6748_v6 = vld [vmem:[%s8197_s5 + $0x3ac] sm:$0xf]  ;;  %v5586_v8 = vor.u32 %v6816_v38, %v5583_v0  ;;  %v5135_v60 = vld [vmem:[%s8197_s5 + $0x258] sm:$0xf0] }
 0x34c   : > { %4472 = vmatpush.bf16.msra.mxu1 %v6526_v12  ;;  %4485 = vmatpush.bf16.msra.mxu2 %v4866_v9  ;;  %v5439_v12 = vld [vmem:[%s8197_s5 + $0x4b8] sm:$0xf0]  ;;  %v6812_v9 = vld [vmem:[%s8197_s5 + $0x5ac] sm:$0xf]  ;;  %v5314_v33 = vor.u32 %v6748_v6, %v5311_v17 }
 0x34d   : > { %v5570_v32 = vor.u32 %v6812_v9, %v5567_v14  ;;  %v5263_v0 = vld [vmem:[%s8197_s5 + $0x358] sm:$0xf0]  ;;  %v6700_v14 = vld [vmem:[%s8197_s5 + $0x22c] sm:$0xf] }
 0x34e   : > { %4498 = vmatpush.bf16.msra.mxu3 %v4994_v16  ;;  %v5442_v16 = vor.u32 %v6780_v11, %v5439_v12  ;;  %v5519_v4 = vld [vmem:[%s8197_s5 + $0x558] sm:$0xf0]  ;;  %v5266_v13 = vor.u32 %v6736_v61, %v5263_v0 }
 0x34f   : > { %4460 = vmatpush.bf16.msra.mxu0 %v6382_v29  ;;  %v4254_v37 = vpop.f32.mrf.mxu0  ;;  %v5170_v29 = vor.u32 %v6712_v50, %v5167_v24  ;;  %v5247_v50 = vld [vmem:[%s8197_s5 + $0x338] sm:$0xf0]  ;;  %v6764_v24 = vld [vmem:[%s8197_s5 + $0x42c] sm:$0xf] }
 0x350   : > { %4473 = vmatpush.bf16.msra.mxu1 %v6510_v48  ;;  %4486 = vmatpush.bf16.msra.mxu2 %v4850_v49  ;;  %v4255_v46 = vadd.f32 %v4254_v37, %v4242_v59  ;;  %v6708_v48 = vld [vmem:[%s8197_s5 + $0x26c] sm:$0xf]  ;;  %v5151_v49 = vld [vmem:[%s8197_s5 + $0x278] sm:$0xf0] }
 0x351   : > { %v5375_v27 = vld [vmem:[%s8197_s5 + $0x438] sm:$0xf0]  ;;  %v6696_v59 = vld [vmem:[%s8197_s5 + $0x20c] sm:$0xf] }
 0x352   : > { %4499 = vmatpush.bf16.msra.mxu3 %v4978_v53  ;;  %4461 = vmatmul.bf16.vlgmr.msra.gmra.mxu0 %v8510_v19  ;;  %v4267_v44 = vpop.f32.mrf.mxu1  ;;  %v6772_v53 = vld [vmem:[%s8197_s5 + $0x46c] sm:$0xf]  ;;  %v5103_v37 = vld [vmem:[%s8197_s5 + $0x218] sm:$0xf0] }
 0x353   : > { %4505 = vmatpush.bf16.msrb.mxu0 %v5218_v28  ;;  %4474 = vmatmul.bf16.vlgmr.msra.gmra.mxu1 %v8515_v25  ;;  %v5407_v28 = vld [vmem:[%s8197_s5 + $0x478] sm:$0xf0]  ;;  %v4268_v62 = vadd.f32 %v4267_v44, %v4255_v46  ;;  %v6760_v46 = vld [vmem:[%s8197_s5 + $0x40c] sm:$0xf] }
 0x354   : > { %4518 = vmatpush.bf16.msrb.mxu1 %v5346_v55  ;;  %4531 = vmatpush.bf16.msrb.mxu2 %v5474_v56  ;;  %v5535_v55 = vld [vmem:[%s8197_s5 + $0x578] sm:$0xf0]  ;;  %v5154_v56 = vor.u32 %v6708_v48, %v5151_v49  ;;  %v5410_v57 = vor.u32 %v6772_v53, %v5407_v28  ;;  %v6792_v48 = vld [vmem:[%s8197_s5 + $0x50c] sm:$0xf] }
 0x355   : > { %4487 = vmatmul.bf16.vlgmr.msra.gmra.mxu2 %v8303_v21  ;;  %4500 = vmatmul.bf16.vlgmr.msra.gmra.mxu3 %v8306_v22  ;;  %v5423_v21 = vld [vmem:[%s8197_s5 + $0x498] sm:$0xf0]  ;;  %v6808_v22 = vld [vmem:[%s8197_s5 + $0x58c] sm:$0xf]  ;;  %v5538_v1 = vor.u32 %v6804_v63, %v5535_v55  ;;  %v5106_v63 = vor.u32 %v6696_v59, %v5103_v37 }
 0x356   : > { %4544 = vmatpush.bf16.msrb.mxu3 %v5602_v58  ;;  %v5426_v40 = vor.u32 %v6776_v20, %v5423_v21  ;;  %v5554_v51 = vor.u32 %v6808_v22, %v5551_v41  ;;  %v6704_v58 = vld [vmem:[%s8197_s5 + $0x24c] sm:$0xf]  ;;  %v4280_v38 = vpop.f32.mrf.mxu2  ;;  %v5503_v20 = vld [vmem:[%s8197_s5 + $0x538] sm:$0xf0] }
 0x357   : > { %4506 = vmatpush.bf16.msrb.mxu0 %v5202_v10  ;;  %v6768_v10 = vld [vmem:[%s8197_s5 + $0x44c] sm:$0xf]  ;;  %v4256_v6 = vpop.f32.mrf.mxu0  ;;  %v5138_v17 = vor.u32 %v6704_v58, %v5135_v60  ;;  %v5231_v44 = vld [vmem:[%s8197_s5 + $0x318] sm:$0xf0] }
 0x358   : > { %4519 = vmatpush.bf16.msrb.mxu1 %v5330_v23  ;;  %4532 = vmatpush.bf16.msrb.mxu2 %v5458_v2  ;;  %v4281_v23 = vadd.f32 %v4280_v38, %v4268_v62  ;;  %v4293_v2 = vpop.f32.mrf.mxu3  ;;  %v5394_v9 = vor.u32 %v6768_v10, %v5391_v18  ;;  %v6728_v22 = vld [vmem:[%s8197_s5 + $0x30c] sm:$0xf]  ;;  %v5487_v49 = vld [vmem:[%s8197_s5 + $0x518] sm:$0xf0] }
 0x359   : > { %v5727_v52 = vld [vmem:[%s8197_s5 + $0x6f8] sm:$0xf0]  ;;  %v6884_v53 = vld [vmem:[%s8197_s5 + $0x7ec] sm:$0xf]  ;;  %v5490_v61 = vor.u32 %v6792_v48, %v5487_v49 }
 0x35a   : > { %4545 = vmatpush.bf16.msrb.mxu3 %v5586_v8  ;;  %v1186_v8 = vld [vmem:[#allocation2] sm:$0xff]  ;;  %v4269_v11 = vpop.f32.mrf.mxu1  ;;  %v4294_v12 = vadd.f32 %v4293_v2, %v4281_v23  ;;  %v5855_v55 = vld [vmem:[%s8197_s5 + $0x7f8] sm:$0xf0]  ;;  %v6948_v58 = vld [vmem:[%s8197_s5 + $0x9ec] sm:$0xf] }
 0x35b   : > { %4507 = vmatpush.bf16.msrb.mxu0 %v5186_v15  ;;  %v5119_v15 = vld [vmem:[%s8197_s5 + $0x238] sm:$0xf0]  ;;  %v5858_v38 = vor.u32 %v6884_v53, %v5855_v55  ;;  %v6848_v10 = vld [vmem:[%s8197_s5 + $0x6cc] sm:$0xf] }
 0x35c   : > { %4520 = vmatpush.bf16.msrb.mxu1 %v5314_v33  ;;  %4533 = vmatpush.bf16.msrb.mxu2 %v5442_v16  ;;  %v6732_v33 = vld [vmem:[%s8197_s5 + $0x32c] sm:$0xf]  ;;  %v5522_v16 = vor.u32 %v6800_v3, %v5519_v4  ;;  %v5122_v21 = vor.u32 %v6700_v14, %v5119_v15  ;;  %v5983_v62 = vld [vmem:[%s8197_s5 + $0x8f8] sm:$0xf0] }
 0x35d   : > { %v5250_v41 = vor.u32 %v6732_v33, %v5247_v50  ;;  %v6111_v60 = vld [vmem:[%s8197_s5 + $0x9f8] sm:$0xf0]  ;;  %v6880_v23 = vld [vmem:[%s8197_s5 + $0x7cc] sm:$0xf] }
 0x35e   : > { %4546 = vmatpush.bf16.msrb.mxu3 %v5570_v32  ;;  %v4662_v32 = vadd.f32 %v4294_v12, %v1186_v8  ;;  %v4282_v54 = vpop.f32.mrf.mxu2  ;;  %v5711_v18 = vld [vmem:[%s8197_s5 + $0x6d8] sm:$0xf0]  ;;  %v6114_v2 = vor.u32 %v6948_v58, %v6111_v60  ;;  %v6912_v4 = vld [vmem:[%s8197_s5 + $0x8cc] sm:$0xf] }
 0x35f   : > { %4508 = vmatpush.bf16.msrb.mxu0 %v5170_v29  ;;  %v5378_v29 = vor.u32 %v6764_v24, %v5375_v27  ;;  %v5839_v3 = vld [vmem:[%s8197_s5 + $0x7d8] sm:$0xf0]  ;;  %v6944_v8 = vld [vmem:[%s8197_s5 + $0x9cc] sm:$0xf]  ;;  %v5714_v11 = vor.u32 %v6848_v10, %v5711_v18 }
 0x360   : > { %4521 = vmatpush.bf16.msrb.mxu1 %v5298_v47  ;;  %4534 = vmatpush.bf16.msrb.mxu2 %v5426_v40  ;;  %4666 = vst [vmem:[#allocation2] sm:$0xff] %v4662_v32  ;;  %v5506_v47 = vor.u32 %v6796_v35, %v5503_v20  ;;  %v5359_v40 = vld [vmem:[%s8197_s5 + $0x418] sm:$0xf0]  ;;  %v4295_v28 = vpop.f32.mrf.mxu3  ;;  %v5842_v12 = vor.u32 %v6880_v23, %v5839_v3  ;;  %v6876_v15 = vld [vmem:[%s8197_s5 + $0x7ac] sm:$0xf] }
 0x361   : > { %v5967_v6 = vld [vmem:[%s8197_s5 + $0x8d8] sm:$0xf0]  ;;  %v6908_v50 = vld [vmem:[%s8197_s5 + $0x8ac] sm:$0xf] }
 0x362   : > { %4547 = vmatpush.bf16.msrb.mxu3 %v5554_v51  ;;  %v6852_v51 = vld [vmem:[%s8197_s5 + $0x6ec] sm:$0xf]  ;;  %v5695_v14 = vld [vmem:[%s8197_s5 + $0x6b8] sm:$0xf0] }
 0x363   : > { %4509 = vmatpush.bf16.msrb.mxu0 %v5154_v56  ;;  %v6916_v56 = vld [vmem:[%s8197_s5 + $0x8ec] sm:$0xf]  ;;  %v5951_v24 = vld [vmem:[%s8197_s5 + $0x8b8] sm:$0xf0] }
 0x364   : > { %4522 = vmatpush.bf16.msrb.mxu1 %v5282_v36  ;;  %4535 = vmatpush.bf16.msrb.mxu2 %v5410_v57  ;;  %v5234_v36 = vor.u32 %v6728_v22, %v5231_v44  ;;  %v5362_v57 = vor.u32 %v6760_v46, %v5359_v40  ;;  %v5986_v0 = vor.u32 %v6916_v56, %v5983_v62  ;;  %v6940_v27 = vld [vmem:[%s8197_s5 + $0x9ac] sm:$0xf]  ;;  %v6079_v32 = vld [vmem:[%s8197_s5 + $0x9b8] sm:$0xf0] }
 0x365   : > { %v5954_v20 = vor.u32 %v6908_v50, %v5951_v24  ;;  %v5679_v59 = vld [vmem:[%s8197_s5 + $0x698] sm:$0xf0]  ;;  %v6904_v22 = vld [vmem:[%s8197_s5 + $0x88c] sm:$0xf] }
 0x366   : > { %4548 = vmatpush.bf16.msrb.mxu3 %v5538_v1  ;;  %v5730_v1 = vor.u32 %v6852_v51, %v5727_v52  ;;  %v5807_v37 = vld [vmem:[%s8197_s5 + $0x798] sm:$0xf0]  ;;  %v6836_v48 = vld [vmem:[%s8197_s5 + $0x66c] sm:$0xf] }
 0x367   : > { %4510 = vmatpush.bf16.msrb.mxu0 %v5138_v17  ;;  %v6095_v17 = vld [vmem:[%s8197_s5 + $0x9d8] sm:$0xf0]  ;;  %v6868_v54 = vld [vmem:[%s8197_s5 + $0x76c] sm:$0xf] }
 0x368   : > { %4523 = vmatpush.bf16.msrb.mxu1 %v5266_v13  ;;  %4536 = vmatpush.bf16.msrb.mxu2 %v5394_v9  ;;  %v5970_v13 = vor.u32 %v6912_v4, %v5967_v6  ;;  %v6844_v9 = vld [vmem:[%s8197_s5 + $0x6ac] sm:$0xf]  ;;  %v6098_v33 = vor.u32 %v6944_v8, %v6095_v17  ;;  %v6063_v44 = vld [vmem:[%s8197_s5 + $0x998] sm:$0xf0] }
 0x369   : > { %v5698_v35 = vor.u32 %v6844_v9, %v5695_v14  ;;  %v5663_v49 = vld [vmem:[%s8197_s5 + $0x678] sm:$0xf0]  ;;  %v6900_v28 = vld [vmem:[%s8197_s5 + $0x86c] sm:$0xf] }
 0x36a   : > { %4549 = vmatpush.bf16.msrb.mxu3 %v5522_v16  ;;  %v5823_v16 = vld [vmem:[%s8197_s5 + $0x7b8] sm:$0xf0]  ;;  %v6932_v56 = vld [vmem:[%s8197_s5 + $0x96c] sm:$0xf] }
 0x36b   : > { %4511 = vmatpush.bf16.msrb.mxu0 %v5122_v21  ;;  %v6840_v21 = vld [vmem:[%s8197_s5 + $0x68c] sm:$0xf]  ;;  %v5791_v53 = vld [vmem:[%s8197_s5 + $0x778] sm:$0xf0] }
 0x36c   : > { %4524 = vmatpush.bf16.msrb.mxu1 %v5250_v41  ;;  %4537 = vmatpush.bf16.msrb.mxu2 %v5378_v29  ;;  %v5935_v41 = vld [vmem:[%s8197_s5 + $0x898] sm:$0xf0]  ;;  %v6936_v29 = vld [vmem:[%s8197_s5 + $0x98c] sm:$0xf] }
 0x36d   : > { %v5938_v40 = vor.u32 %v6904_v22, %v5935_v41  ;;  %v6066_v52 = vor.u32 %v6936_v29, %v6063_v44  ;;  %v6047_v62 = vld [vmem:[%s8197_s5 + $0x978] sm:$0xf0]  ;;  %v6832_v60 = vld [vmem:[%s8197_s5 + $0x64c] sm:$0xf] }
 0x36e   : > { %4550 = vmatpush.bf16.msrb.mxu3 %v5506_v47  ;;  %v5775_v10 = vld [vmem:[%s8197_s5 + $0x758] sm:$0xf0]  ;;  %v6896_v18 = vld [vmem:[%s8197_s5 + $0x84c] sm:$0xf] }
 0x36f   : > { %4512 = vmatpush.bf16.msrb.mxu0 %v5106_v63  ;;  %v4306_v46 = vpop.f32.mrf.mxu0  ;;  %v5919_v63 = vld [vmem:[%s8197_s5 + $0x878] sm:$0xf0]  ;;  %v6928_v4 = vld [vmem:[%s8197_s5 + $0x94c] sm:$0xf] }
 0x370   : > { %4525 = vmatpush.bf16.msrb.mxu1 %v5234_v36  ;;  %4538 = vmatpush.bf16.msrb.mxu2 %v5362_v57  ;;  %v5666_v36 = vor.u32 %v6836_v48, %v5663_v49  ;;  %v5794_v57 = vor.u32 %v6868_v54, %v5791_v53  ;;  %v5922_v58 = vor.u32 %v6900_v28, %v5919_v63  ;;  %v5903_v23 = vld [vmem:[%s8197_s5 + $0x858] sm:$0xf0]  ;;  %v6828_v9 = vld [vmem:[%s8197_s5 + $0x62c] sm:$0xf] }
 0x371   : > { %v6031_v6 = vld [vmem:[%s8197_s5 + $0x958] sm:$0xf0]  ;;  %v6892_v24 = vld [vmem:[%s8197_s5 + $0x82c] sm:$0xf] }
 0x372   : > { %4551 = vmatpush.bf16.msrb.mxu3 %v5490_v61  ;;  %4513 = vmatmul.bf16.vlgmr.msrb.gmra.mxu0 %v8289_v5  ;;  %v6872_v5 = vld [vmem:[%s8197_s5 + $0x78c] sm:$0xf]  ;;  %v4319_v51 = vpop.f32.mrf.mxu1  ;;  %v5647_v61 = vld [vmem:[%s8197_s5 + $0x658] sm:$0xf0] }
 0x373   : > { %4557 = vmatpush.bf16.msra.mxu0 %v5730_v1  ;;  %4539 = vmatmul.bf16.vlgmr.msrb.gmra.mxu2 %v8362_v42  ;;  %v5826_v42 = vor.u32 %v6876_v15, %v5823_v16  ;;  %v5810_v47 = vor.u32 %v6872_v5, %v5807_v37  ;;  %v4320_v55 = vadd.f32 %v4319_v51, %v4306_v46  ;;  %v6864_v1 = vld [vmem:[%s8197_s5 + $0x74c] sm:$0xf]  ;;  %v5631_v14 = vld [vmem:[%s8197_s5 + $0x638] sm:$0xf0] }
 0x374   : > { %4570 = vmatpush.bf16.msra.mxu1 %v5858_v38  ;;  %4583 = vmatpush.bf16.msra.mxu2 %v5986_v0  ;;  %v6050_v0 = vor.u32 %v6932_v56, %v6047_v62  ;;  %v5650_v8 = vor.u32 %v6832_v60, %v5647_v61  ;;  %v6860_v15 = vld [vmem:[%s8197_s5 + $0x72c] sm:$0xf]  ;;  %v6034_v16 = vor.u32 %v6928_v4, %v6031_v6  ;;  %v5759_v50 = vld [vmem:[%s8197_s5 + $0x738] sm:$0xf0] }
 0x375   : > { %4552 = vmatmul.bf16.vlgmr.msrb.gmra.mxu3 %v8366_v45  ;;  %4526 = vmatmul.bf16.vlgmr.msrb.gmra.mxu1 %v8292_v7  ;;  %v6082_v45 = vor.u32 %v6940_v27, %v6079_v32  ;;  %v5682_v7 = vor.u32 %v6840_v21, %v5679_v59  ;;  %v5887_v27 = vld [vmem:[%s8197_s5 + $0x838] sm:$0xf0]  ;;  %v6924_v32 = vld [vmem:[%s8197_s5 + $0x92c] sm:$0xf]  ;;  %v5762_v59 = vor.u32 %v6860_v15, %v5759_v50 }
 0x376   : > { %4596 = vmatpush.bf16.msra.mxu3 %v6114_v2  ;;  %v4332_v38 = vpop.f32.mrf.mxu2  ;;  %v5615_v21 = vld [vmem:[%s8197_s5 + $0x618] sm:$0xf0]  ;;  %v5890_v5 = vor.u32 %v6892_v24, %v5887_v27  ;;  %v6888_v22 = vld [vmem:[%s8197_s5 + $0x80c] sm:$0xf] }
 0x377   : > { %4558 = vmatpush.bf16.msra.mxu0 %v5714_v11  ;;  %v4333_v2 = vadd.f32 %v4332_v38, %v4320_v55  ;;  %v4308_v11 = vpop.f32.mrf.mxu0  ;;  %v5743_v37 = vld [vmem:[%s8197_s5 + $0x718] sm:$0xf0]  ;;  %v7012_v49 = vld [vmem:[%s8197_s5 + $0xbec] sm:$0xf] }
 0x378   : > { %4571 = vmatpush.bf16.msra.mxu1 %v5842_v12  ;;  %4584 = vmatpush.bf16.msra.mxu2 %v5970_v13  ;;  %v4345_v3 = vpop.f32.mrf.mxu3  ;;  %v5778_v12 = vor.u32 %v6864_v1, %v5775_v10  ;;  %v5906_v13 = vor.u32 %v6896_v18, %v5903_v23  ;;  %v5871_v44 = vld [vmem:[%s8197_s5 + $0x818] sm:$0xf0]  ;;  %v7076_v55 = vld [vmem:[%s8197_s5 + $0xdec] sm:$0xf] }
 0x379   : > { %v9162_v17 = vadd.f32 %v4345_v3, %v4333_v2  ;;  %v5999_v46 = vld [vmem:[%s8197_s5 + $0x918] sm:$0xf0]  ;;  %v5874_v63 = vor.u32 %v6888_v22, %v5871_v44  ;;  %v6976_v60 = vld [vmem:[%s8197_s5 + $0xacc] sm:$0xf] }
 0x37a   : > { %4597 = vmatpush.bf16.msra.mxu3 %v6098_v33  ;;  %v4321_v33 = vpop.f32.mrf.mxu1  ;;  %v6239_v48 = vld [vmem:[%s8197_s5 + $0xaf8] sm:$0xf0]  ;;  %v7008_v1 = vld [vmem:[%s8197_s5 + $0xbcc] sm:$0xf] }
 0x37b   : > { %4559 = vmatpush.bf16.msra.mxu0 %v5698_v35  ;;  %v6015_v35 = vld [vmem:[%s8197_s5 + $0x938] sm:$0xf0]  ;;  %v7040_v10 = vld [vmem:[%s8197_s5 + $0xccc] sm:$0xf] }
 0x37c   : > { %4572 = vmatpush.bf16.msra.mxu1 %v5826_v42  ;;  %4585 = vmatpush.bf16.msra.mxu2 %v5954_v20  ;;  %v5634_v42 = vor.u32 %v6828_v9, %v5631_v14  ;;  %v6824_v20 = vld [vmem:[%s8197_s5 + $0x60c] sm:$0xf]  ;;  %v6018_v29 = vor.u32 %v6924_v32, %v6015_v35  ;;  %v6367_v51 = vld [vmem:[%s8197_s5 + $0xbf8] sm:$0xf0] }
 0x37d   : > { %v5618_v54 = vor.u32 %v6824_v20, %v5615_v21  ;;  %v6495_v53 = vld [vmem:[%s8197_s5 + $0xcf8] sm:$0xf0]  ;;  %v7072_v23 = vld [vmem:[%s8197_s5 + $0xdcc] sm:$0xf] }
 0x37e   : > { %4598 = vmatpush.bf16.msra.mxu3 %v6082_v45  ;;  %v6856_v45 = vld [vmem:[%s8197_s5 + $0x70c] sm:$0xf]  ;;  %v4334_v41 = vpop.f32.mrf.mxu2  ;;  %v6623_v56 = vld [vmem:[%s8197_s5 + $0xdf8] sm:$0xf0] }
 0x37f   : > { %4560 = vmatpush.bf16.msra.mxu0 %v5682_v7  ;;  %v6920_v7 = vld [vmem:[%s8197_s5 + $0x90c] sm:$0xf]  ;;  %v5746_v28 = vor.u32 %v6856_v45, %v5743_v37  ;;  %v6223_v61 = vld [vmem:[%s8197_s5 + $0xad8] sm:$0xf0]  ;;  %v6626_v38 = vor.u32 %v7076_v55, %v6623_v56 }
 0x380   : > { %4573 = vmatpush.bf16.msra.mxu1 %v5810_v47  ;;  %4586 = vmatpush.bf16.msra.mxu2 %v5938_v40  ;;  %v4347_v47 = vpop.f32.mrf.mxu3  ;;  %v6980_v40 = vld [vmem:[%s8197_s5 + $0xaec] sm:$0xf]  ;;  %v6002_v62 = vor.u32 %v6920_v7, %v5999_v46  ;;  %v6479_v18 = vld [vmem:[%s8197_s5 + $0xcd8] sm:$0xf0]  ;;  %v6226_v3 = vor.u32 %v6976_v60, %v6223_v61 }
 0x381   : > { %v6607_v2 = vld [vmem:[%s8197_s5 + $0xdd8] sm:$0xf0]  ;;  %v6482_v6 = vor.u32 %v7040_v10, %v6479_v18  ;;  %v7036_v14 = vld [vmem:[%s8197_s5 + $0xcac] sm:$0xf] }
 0x382   : > { %4599 = vmatpush.bf16.msra.mxu3 %v6066_v52  ;;  %v7044_v52 = vld [vmem:[%s8197_s5 + $0xcec] sm:$0xf]  ;;  %v6207_v11 = vld [vmem:[%s8197_s5 + $0xab8] sm:$0xf0] }
 0x383   : > { %4561 = vmatpush.bf16.msra.mxu0 %v5666_v36  ;;  %v6242_v36 = vor.u32 %v6980_v40, %v6239_v48  ;;  %v6335_v9 = vld [vmem:[%s8197_s5 + $0xbb8] sm:$0xf0]  ;;  %v7068_v33 = vld [vmem:[%s8197_s5 + $0xdac] sm:$0xf] }
 0x384   : > { %4574 = vmatpush.bf16.msra.mxu1 %v5794_v57  ;;  %4587 = vmatpush.bf16.msra.mxu2 %v5922_v58  ;;  %v6370_v57 = vor.u32 %v7012_v49, %v6367_v51  ;;  %v6498_v58 = vor.u32 %v7044_v52, %v6495_v53  ;;  %v6463_v15 = vld [vmem:[%s8197_s5 + $0xcb8] sm:$0xf0]  ;;  %v6968_v27 = vld [vmem:[%s8197_s5 + $0xa8c] sm:$0xf] }
 0x385   : > { %v6466_v24 = vor.u32 %v7036_v14, %v6463_v15  ;;  %v6191_v32 = vld [vmem:[%s8197_s5 + $0xa98] sm:$0xf0]  ;;  %v6964_v22 = vld [vmem:[%s8197_s5 + $0xa6c] sm:$0xf] }
 0x386   : > { %4600 = vmatpush.bf16.msra.mxu3 %v6050_v0  ;;  %v6351_v0 = vld [vmem:[%s8197_s5 + $0xbd8] sm:$0xf0]  ;;  %v7028_v47 = vld [vmem:[%s8197_s5 + $0xc6c] sm:$0xf] }
 0x387   : > { %4562 = vmatpush.bf16.msra.mxu0 %v5650_v8  ;;  %v6354_v4 = vor.u32 %v7008_v1, %v6351_v0  ;;  %v6972_v8 = vld [vmem:[%s8197_s5 + $0xaac] sm:$0xf]  ;;  %v6319_v35 = vld [vmem:[%s8197_s5 + $0xb98] sm:$0xf0] }
 0x388   : > { %4575 = vmatpush.bf16.msra.mxu1 %v5778_v12  ;;  %4588 = vmatpush.bf16.msra.mxu2 %v5906_v13  ;;  %v7004_v12 = vld [vmem:[%s8197_s5 + $0xbac] sm:$0xf]  ;;  %v6610_v13 = vor.u32 %v7072_v23, %v6607_v2  ;;  %v6447_v20 = vld [vmem:[%s8197_s5 + $0xc98] sm:$0xf0] }
 0x389   : > { %v6338_v50 = vor.u32 %v7004_v12, %v6335_v9  ;;  %v6575_v21 = vld [vmem:[%s8197_s5 + $0xd98] sm:$0xf0]  ;;  %v7060_v48 = vld [vmem:[%s8197_s5 + $0xd6c] sm:$0xf] }
 0x38a   : > { %4601 = vmatpush.bf16.msra.mxu3 %v6034_v16  ;;  %v6591_v16 = vld [vmem:[%s8197_s5 + $0xdb8] sm:$0xf0]  ;;  %v6960_v53 = vld [vmem:[%s8197_s5 + $0xa4c] sm:$0xf] }
 0x38b   : > { %4563 = vmatpush.bf16.msra.mxu0 %v5634_v42  ;;  %v7032_v42 = vld [vmem:[%s8197_s5 + $0xc8c] sm:$0xf]  ;;  %v6175_v41 = vld [vmem:[%s8197_s5 + $0xa78] sm:$0xf0] }
 0x38c   : > { %4576 = vmatpush.bf16.msra.mxu1 %v5762_v59  ;;  %4589 = vmatpush.bf16.msra.mxu2 %v5890_v5  ;;  %v6194_v59 = vor.u32 %v6968_v27, %v6191_v32  ;;  %v6450_v37 = vor.u32 %v7032_v42, %v6447_v20  ;;  %v6303_v46 = vld [vmem:[%s8197_s5 + $0xb78] sm:$0xf0]  ;;  %v7056_v60 = vld [vmem:[%s8197_s5 + $0xd4c] sm:$0xf] }
 0x38d   : > { %v6431_v40 = vld [vmem:[%s8197_s5 + $0xc78] sm:$0xf0]  ;;  %v6956_v18 = vld [vmem:[%s8197_s5 + $0xa2c] sm:$0xf] }
 0x38e   : > { %4602 = vmatpush.bf16.msra.mxu3 %v6018_v29  ;;  %v6996_v29 = vld [vmem:[%s8197_s5 + $0xb6c] sm:$0xf]  ;;  %v6559_v49 = vld [vmem:[%s8197_s5 + $0xd78] sm:$0xf0]  ;;  %v6434_v52 = vor.u32 %v7028_v47, %v6431_v40 }
 0x38f   : > { %4564 = vmatpush.bf16.msra.mxu0 %v5618_v54  ;;  %v9216_v5 = vpop.f32.mrf.mxu0  ;;  %v6178_v54 = vor.u32 %v6964_v22, %v6175_v41  ;;  %v6306_v51 = vor.u32 %v6996_v29, %v6303_v46  ;;  %v6562_v56 = vor.u32 %v7060_v48, %v6559_v49  ;;  %v6543_v61 = vld [vmem:[%s8197_s5 + $0xd58] sm:$0xf0]  ;;  %v6988_v2 = vld [vmem:[%s8197_s5 + $0xb2c] sm:$0xf] }
 0x390   : > { %4577 = vmatpush.bf16.msra.mxu1 %v5746_v28  ;;  %4590 = vmatpush.bf16.msra.mxu2 %v5874_v63  ;;  %v6159_v28 = vld [vmem:[%s8197_s5 + $0xa58] sm:$0xf0]  ;;  %v6992_v63 = vld [vmem:[%s8197_s5 + $0xb4c] sm:$0xf]  ;;  %v4359_v22 = vadd.f32 %v9216_v5, %v9162_v17 }
 0x391   : > { %v6162_v1 = vor.u32 %v6960_v53, %v6159_v28  ;;  %v6143_v23 = vld [vmem:[%s8197_s5 + $0xa38] sm:$0xf0]  ;;  %v7052_v12 = vld [vmem:[%s8197_s5 + $0xd2c] sm:$0xf] }
 0x392   : > { %4603 = vmatpush.bf16.msra.mxu3 %v6002_v62  ;;  %4565 = vmatmul.bf16.vlgmr.msra.gmra.mxu0 %v8358_v39  ;;  %v6210_v39 = vor.u32 %v6972_v8, %v6207_v11  ;;  %v9221_v44 = vpop.f32.mrf.mxu1  ;;  %v6287_v62 = vld [vmem:[%s8197_s5 + $0xb58] sm:$0xf0]  ;;  %v7020_v8 = vld [vmem:[%s8197_s5 + $0xc2c] sm:$0xf]  ;;  %v6146_v9 = vor.u32 %v6956_v18, %v6143_v23 }
 0x393   : > { %4609 = vmatpush.bf16.msrb.mxu0 %v6242_v36  ;;  %4591 = vmatmul.bf16.vlgmr.msra.gmra.mxu2 %v8433_v26  ;;  %v7000_v26 = vld [vmem:[%s8197_s5 + $0xb8c] sm:$0xf]  ;;  %v6290_v0 = vor.u32 %v6992_v63, %v6287_v62  ;;  %v6399_v11 = vld [vmem:[%s8197_s5 + $0xc38] sm:$0xf0]  ;;  %v4372_v46 = vadd.f32 %v9221_v44, %v4359_v22 }
 0x394   : > { %4622 = vmatpush.bf16.msrb.mxu1 %v6370_v57  ;;  %4635 = vmatpush.bf16.msrb.mxu2 %v6498_v58  ;;  %v6322_v45 = vor.u32 %v7000_v26, %v6319_v35  ;;  %v7024_v36 = vld [vmem:[%s8197_s5 + $0xc4c] sm:$0xf]  ;;  %v6415_v57 = vld [vmem:[%s8197_s5 + $0xc58] sm:$0xf0]  ;;  %v6402_v15 = vor.u32 %v7020_v8, %v6399_v11 }
 0x395   : > { %4578 = vmatmul.bf16.vlgmr.msra.gmra.mxu1 %v8364_v43  ;;  %4604 = vmatmul.bf16.vlgmr.msra.gmra.mxu3 %v8440_v31  ;;  %v6594_v43 = vor.u32 %v7068_v33, %v6591_v16  ;;  %v7064_v31 = vld [vmem:[%s8197_s5 + $0xd8c] sm:$0xf]  ;;  %v6418_v10 = vor.u32 %v7024_v36, %v6415_v57  ;;  %v6127_v16 = vld [vmem:[%s8197_s5 + $0xa18] sm:$0xf0] }
 0x396   : > { %4648 = vmatpush.bf16.msrb.mxu3 %v6626_v38  ;;  %v6578_v7 = vor.u32 %v7064_v31, %v6575_v21  ;;  %v9231_v55 = vpop.f32.mrf.mxu2  ;;  %v6952_v33 = vld [vmem:[%s8197_s5 + $0xa0c] sm:$0xf]  ;;  %v6255_v27 = vld [vmem:[%s8197_s5 + $0xb18] sm:$0xf0] }
 0x397   : > { %4610 = vmatpush.bf16.msrb.mxu0 %v6226_v3  ;;  %v4360_v38 = vpop.f32.mrf.mxu0  ;;  %v7016_v32 = vld [vmem:[%s8197_s5 + $0xc0c] sm:$0xf]  ;;  %v6383_v26 = vld [vmem:[%s8197_s5 + $0xc18] sm:$0xf0]  ;;  %v6130_v20 = vor.u32 %v6952_v33, %v6127_v16  ;;  %v4385_v40 = vadd.f32 %v9231_v55, %v4372_v46 }
 0x398   : > { %4623 = vmatpush.bf16.msrb.mxu1 %v6354_v4  ;;  %4636 = vmatpush.bf16.msrb.mxu2 %v6482_v6  ;;  %v9236_v58 = vpop.f32.mrf.mxu3  ;;  %v6546_v4 = vor.u32 %v7056_v60, %v6543_v61  ;;  %v6271_v6 = vld [vmem:[%s8197_s5 + $0xb38] sm:$0xf0]  ;;  %v7048_v35 = vld [vmem:[%s8197_s5 + $0xd0c] sm:$0xf]  ;;  %v6386_v21 = vor.u32 %v7016_v32, %v6383_v26 }
 0x399   : > { %v6274_v14 = vor.u32 %v6988_v2, %v6271_v6  ;;  %v6511_v42 = vld [vmem:[%s8197_s5 + $0xd18] sm:$0xf0] }
 0x39a   : > { %4649 = vmatpush.bf16.msrb.mxu3 %v6610_v13  ;;  %v4373_v3 = vpop.f32.mrf.mxu1  ;;  %v6527_v13 = vld [vmem:[%s8197_s5 + $0xd38] sm:$0xf0] }
 0x39b   : > { %4611 = vmatpush.bf16.msrb.mxu0 %v6210_v39  ;;  %v6984_v39 = vld [vmem:[%s8197_s5 + $0xb0c] sm:$0xf]  ;;  %v1187_v17 = vld [vmem:[#allocation2 + $0x18] sm:$0xff] }
 0x39c   : > { %4624 = vmatpush.bf16.msrb.mxu1 %v6338_v50  ;;  %4637 = vmatpush.bf16.msrb.mxu2 %v6466_v24  ;;  %v6530_v24 = vor.u32 %v7052_v12, %v6527_v13  ;;  %v6258_v31 = vor.u32 %v6984_v39, %v6255_v27 }
 0x39e   : > { %4650 = vmatpush.bf16.msrb.mxu3 %v6594_v43  ;;  %v4386_v50 = vpop.f32.mrf.mxu2 }
 0x39f   : > { %4612 = vmatpush.bf16.msrb.mxu0 %v6194_v59  ;;  %v6514_v59 = vor.u32 %v7048_v35, %v6511_v42 }
 0x3a0   : > { %4625 = vmatpush.bf16.msrb.mxu1 %v6322_v45  ;;  %4638 = vmatpush.bf16.msrb.mxu2 %v6450_v37  ;;  %v4399_v43 = vpop.f32.mrf.mxu3 }
 0x3a2   : > { %4651 = vmatpush.bf16.msrb.mxu3 %v6578_v7 }
 0x3a3   : > { %4613 = vmatpush.bf16.msrb.mxu0 %v6178_v54 }
 0x3a4   : > { %4626 = vmatpush.bf16.msrb.mxu1 %v6306_v51  ;;  %4639 = vmatpush.bf16.msrb.mxu2 %v6434_v52 }
 0x3a6   : > { %4652 = vmatpush.bf16.msrb.mxu3 %v6562_v56 }
 0x3a7   : > { %4614 = vmatpush.bf16.msrb.mxu0 %v6162_v1 }
 0x3a8   : > { %4627 = vmatpush.bf16.msrb.mxu1 %v6290_v0  ;;  %4640 = vmatpush.bf16.msrb.mxu2 %v6418_v10 }
 0x3aa   : > { %4653 = vmatpush.bf16.msrb.mxu3 %v6546_v4 }
 0x3ab   : > { %4615 = vmatpush.bf16.msrb.mxu0 %v6146_v9 }
 0x3ac   : > { %4628 = vmatpush.bf16.msrb.mxu1 %v6274_v14  ;;  %4641 = vmatpush.bf16.msrb.mxu2 %v6402_v15 }
 0x3ae   : > { %4654 = vmatpush.bf16.msrb.mxu3 %v6530_v24 }
 0x3af   : > { %4616 = vmatpush.bf16.msrb.mxu0 %v6130_v20  ;;  %v4410_v45 = vpop.f32.mrf.mxu0 }
 0x3b0   : > { %4629 = vmatpush.bf16.msrb.mxu1 %v6258_v31  ;;  %4642 = vmatpush.bf16.msrb.mxu2 %v6386_v21  ;;  %v1188_v31 = vld [vmem:[#allocation2 + $0x8] sm:$0xff] }
 0x3b2   : > { %4655 = vmatpush.bf16.msrb.mxu3 %v6514_v59  ;;  %4617 = vmatmul.bf16.vlgmr.msrb.gmra.mxu0 %v8438_v30  ;;  %v4423_v37 = vpop.f32.mrf.mxu1 }
 0x3b3   : > { %4630 = vmatmul.bf16.vlgmr.msrb.gmra.mxu1 %v8444_v34  ;;  %4643 = vmatmul.bf16.vlgmr.msrb.gmra.mxu2 %v8510_v19  ;;  %v4398_v34 = vadd.f32 %v9236_v58, %v4385_v40 }
 0x3b5   : > { %4656 = vmatmul.bf16.vlgmr.msrb.gmra.mxu3 %v8515_v25  ;;  %v4411_v19 = vadd.f32 %v4410_v45, %v4398_v34 }
 0x3b6   : > { %v4436_v41 = vpop.f32.mrf.mxu2 }
 0x3b7   : > { %v4412_v7 = vpop.f32.mrf.mxu0  ;;  %v4424_v49 = vadd.f32 %v4423_v37, %v4411_v19 }
 0x3b8   : > { %v4449_v29 = vpop.f32.mrf.mxu3 }
 0x3b9   : > { %v4437_v25 = vadd.f32 %v4436_v41, %v4424_v49 }
 0x3ba   : > { %v4425_v47 = vpop.f32.mrf.mxu1 }
 0x3bb   : > { %v4450_v54 = vadd.f32 %v4449_v29, %v4437_v25 }
 0x3be   : > { %v4438_v30 = vpop.f32.mrf.mxu2 }
 0x3c0   : > { %v4451_v48 = vpop.f32.mrf.mxu3 }
 0x3cf   : > { %v4462_v51 = vpop.f32.mrf.mxu0 }
 0x3d0   : > { %v4463_v52 = vadd.f32 %v4462_v51, %v4450_v54  ;;  %v4475_v53 = vpop.f32.mrf.mxu1 }
 0x3d2   : > { %v4476_v5 = vadd.f32 %v4475_v53, %v4463_v52 }
 0x3d4   : > { %v4663_v28 = vadd.f32 %v4476_v5, %v1187_v17 }
 0x3d6   : > { %4667 = vst [vmem:[#allocation2 + $0x18] sm:$0xff] %v4663_v28 }
 0x3d7   : > { %v4464_v56 = vpop.f32.mrf.mxu0 }
 0x3d8   : > { %v4488_v63 = vpop.f32.mrf.mxu2  ;;  %v4501_v44 = vpop.f32.mrf.mxu3 }
 0x3d9   : > { %v4502_v62 = vadd.f32 %v4501_v44, %v4488_v63  ;;  %v4477_v55 = vpop.f32.mrf.mxu1 }
 0x3e0   : > { %v4490_v36 = vpop.f32.mrf.mxu2  ;;  %v4503_v57 = vpop.f32.mrf.mxu3 }
 0x3ef   : > { %v4514_v60 = vpop.f32.mrf.mxu0 }
 0x3f0   : > { %v4515_v3 = vadd.f32 %v4514_v60, %v4502_v62 }
 0x3f2   : > { %v4527_v58 = vpop.f32.mrf.mxu1 }
 0x3f3   : > { %v4528_v11 = vadd.f32 %v4527_v58, %v4515_v3 }
 0x3f6   : > { %v4540_v61 = vpop.f32.mrf.mxu2 }
 0x3f7   : > { %v4516_v38 = vpop.f32.mrf.mxu0  ;;  %v4541_v13 = vadd.f32 %v4540_v61, %v4528_v11 }
 0x3f8   : > { %v4553_v1 = vpop.f32.mrf.mxu3 }
 0x3f9   : > { %v4554_v15 = vadd.f32 %v4553_v1, %v4541_v13 }
 0x3fa   : > { %v4529_v0 = vpop.f32.mrf.mxu1 }
 0x3fe   : > { %v4542_v10 = vpop.f32.mrf.mxu2 }
 0x400   : > { %v4555_v18 = vpop.f32.mrf.mxu3 }
 0x40f   : > { %v4566_v23 = vpop.f32.mrf.mxu0 }
 0x410   : > { %v4567_v33 = vadd.f32 %v4566_v23, %v4554_v15 }
 0x412   : > { %v4579_v2 = vpop.f32.mrf.mxu1 }
 0x413   : > { %v4580_v16 = vadd.f32 %v4579_v2, %v4567_v33 }
 0x416   : > { %v4592_v4 = vpop.f32.mrf.mxu2 }
 0x417   : > { %v4568_v8 = vpop.f32.mrf.mxu0  ;;  %v4593_v39 = vadd.f32 %v4592_v4, %v4580_v16 }
 0x418   : > { %v4605_v6 = vpop.f32.mrf.mxu3 }
 0x419   : > { %v4606_v50 = vadd.f32 %v4605_v6, %v4593_v39 }
 0x41a   : > { %v4581_v12 = vpop.f32.mrf.mxu1 }
 0x41e   : > { %v4594_v9 = vpop.f32.mrf.mxu2 }
 0x420   : > { %v4607_v14 = vpop.f32.mrf.mxu3 }
 0x42f   : > { %v4618_v24 = vpop.f32.mrf.mxu0 }
 0x430   : > { %v4631_v27 = vpop.f32.mrf.mxu1  ;;  %v4619_v32 = vadd.f32 %v4618_v24, %v4606_v50 }
 0x432   : > { %v4632_v26 = vadd.f32 %v4631_v27, %v4619_v32 }
 0x436   : > { %v4644_v43 = vpop.f32.mrf.mxu2 }
 0x437   : > { %v4645_v35 = vadd.f32 %v4644_v43, %v4632_v26  ;;  %v4620_v20 = vpop.f32.mrf.mxu0 }
 0x438   : > { %v4657_v42 = vpop.f32.mrf.mxu3  ;;  %v4633_v21 = vpop.f32.mrf.mxu1 }
 0x439   : > { %v4658_v59 = vadd.f32 %v4657_v42, %v4645_v35 }
 0x43b   : > { %v4664_v45 = vadd.f32 %v4658_v59, %v1188_v31 }
 0x43c   : > { %4672 = sbr.rel (%p6627_p13) target bundleno = 1101 (0x44d), region = 63 }
 0x43d   : > { %4668 = vst [vmem:[#allocation2 + $0x8] sm:$0xff] %v4664_v45 }
 0x43e   : > { %v4646_v37 = vpop.f32.mrf.mxu2 }
 0x440   : > { %v4659_v22 = vpop.f32.mrf.mxu3 }
 0x441   : > { %v4673_v41 = vld [vmem:[#allocation2 + $0x10] sm:$0xff]  ;;  %v4674_v29 = vld [vmem:[#allocation2] sm:$0xff]  ;;  %v4675_v40 = vld [vmem:[#allocation2 + $0x18] sm:$0xff] }
 0x442   : > { %v4677_v7 = vld [vmem:[%s1165_s12] sm:$0xf] }
 0x443   : > { %v4679_v46 = vperm.slane %v4677_v7, 0  ;;  %v4680_v47 = vperm.slane %v4677_v7, 1  ;;  %v4681_v48 = vperm.slane %v4677_v7, 2  ;;  %v4682_v34 = vperm.slane %v4677_v7, 3 }
 0x444   : > { %v4676_v30 = vld [vmem:[#allocation2 + $0x8] sm:$0xff] }
 0x445   : > { %v4687_v19 = vadd.f32 %v4679_v46, %v4673_v41  ;;  %v4688_v49 = vadd.f32 %v4680_v47, %v4674_v29  ;;  %v4689_v25 = vadd.f32 %v4681_v48, %v4675_v40  ;;  %v4690_v54 = vadd.f32 %v4682_v34, %v4676_v30 }
 0x447   : > { %v4691_v51 = vmax.f32 %v4687_v19, 0.0  ;;  %v4692_v52 = vmax.f32 %v4688_v49, 0.0  ;;  %v4693_v53 = vmax.f32 %v4689_v25, 0.0  ;;  %v4694_v17 = vmax.f32 %v4690_v54, 0.0 }
 0x449   : > { %v4695_v5 = vpack.c.bf16 %v4692_v52, %v4691_v51  ;;  %v4696_v28 = vpack.c.bf16 %v4694_v17, %v4693_v53 }
 0x44b   : > { %4697 = vst [vmem:[%s8195_s4] sm:$0xff] %v4695_v5 }
 0x44c   : > { %4698 = vst [vmem:[%s8195_s4 + $0x8] sm:$0xff] %v4696_v28 }
 0x44d PF: > { %s13_s18 = sadd.s32 1, %s7192_s18   ;;  %s9298_s12 = smov %s7172_s13 }
 0x44e   : > { %p10_p0 = scmp.ge.s32.totalorder %s13_s18, 6   ;;  %s9299_s13 = smov %s7266_s25 }
 0x44f   : > { %s9300_s14 = smov %s7184_s16  ;;  %s9301_s15 = smov %s7188_s17 }
 0x450   : > { %s9302_s16 = smov %s9305_s19  ;;  %s9303_s17 = smov %s9309_s20 }
 0x451   :  { %12 = sbr.rel (!%p10_p0) target bundleno = 4 (0x4), region = 104 }

</bundles_post_ra>
